<compile_context>
chip_gen: v7x
topology: tpu7x:2x2x1
jax: 0.10.0
libtpu: 0.0.40
codegen_flags: <defaults>
</compile_context>

<pallas_src>
import functools
import numpy as np
import jax
import jax.numpy as jnp
from jax.experimental import pallas as pl
from jax.experimental.pallas import tpu as pltpu

TT_MAX = 128                      # max time rows per grid step (per tile)
VMEM_LIMIT = 64 * 1024 * 1024     # fits v7x's 64 MiB VMEM; plenty on v5e/v6e


# ---------------------------------------------------------------------------
# Tiling helpers (rows = leading dim)
# ---------------------------------------------------------------------------
def _pad_rows(x, multiple):
    """Zero-pad the leading (row) dim of 2-D x up to a multiple."""
    r = x.shape[0]
    extra = (-r) % multiple
    if extra:
        x = jnp.pad(x, ((0, extra), (0, 0)))
    return x


def _build_halos(x_rows, tile_rows, H):
    """For each row-tile, gather rows [-H, 0) and [tile_rows, tile_rows+H) around it.

    x_rows: (R, C) with R % tile_rows == 0.  Out-of-range rows are zeros (= conv zero pad).
    Returns (num_tiles, 2*H, C); tiny (2*H / tile_rows fraction of the tensor).
    """
    R, C = x_rows.shape
    nt = R // tile_rows
    offs = np.concatenate([np.arange(-H, 0), np.arange(tile_rows, tile_rows + H)])
    idx = np.arange(nt)[:, None] * tile_rows + offs[None, :]          # (nt, 2H)
    valid = (idx >= 0) & (idx < R)
    g = x_rows[np.clip(idx, 0, R - 1).reshape(-1)]                     # small gather
    g = jnp.where(jnp.asarray(valid.reshape(-1, 1)), g, jnp.zeros((), g.dtype))
    return g.reshape(nt, 2 * H, C)


# ---------------------------------------------------------------------------
# Fused ContextAndCorrelationLayer kernel (ConvTBC + Linear + LeakyReLU)
# ---------------------------------------------------------------------------
def _make_ccl_kernel(TT, B, K, Cc, Cl, additive, lrelu):
    pad = (K - 1) // 2
    HB = pad * B
    ROWS = TT * B

    def leaky(v):
        return jnp.where(v >= 0, v, 0.2 * v)

    def kernel(xc_ref, xh_ref, cw_ref, cb_ref, lw_ref, lb_ref, o_ref):
        xc = xc_ref[...]                                   # (ROWS, Cin) bf16
        left = xh_ref[:HB, :]                              # (pad*B, Cin)
        right = xh_ref[HB:, :]
        xw = jnp.concatenate([left, xc, right], axis=0)    # ((TT+2*pad)*B, Cin)

        # -- context branch: ConvTBC(k=K, pad) as K accumulated MXU dots (f32 accum)
        ctx = jnp.zeros((ROWS, Cc), jnp.float32)
        for k in range(K):
            ctx = ctx + jnp.dot(xw[k * B:(k + TT) * B, :], cw_ref[k],
                                preferred_element_type=jnp.float32)
        ctx = ctx + cb_ref[...]

        # -- correlation branch: Linear on the un-shifted window
        corr = jnp.dot(xc, lw_ref[...], preferred_element_type=jnp.float32)
        corr = corr + lb_ref[...]

        if additive:
            y = ctx + corr
            if lrelu:
                y = leaky(y)
            o_ref[...] = y
        else:
            if lrelu:
                ctx = leaky(ctx)
                corr = leaky(corr)
            # concat expressed as disjoint lane-range stores (no in-kernel concat)
            o_ref[:, :Cc] = ctx
            o_ref[:, Cc:] = corr

    return kernel


def ccl_apply(w_tbc, p, additive, lrelu):
    """Apply one ContextAndCorrelationLayer (+ optional LeakyReLU) to (T, B, Cin)."""
    T, B, Cin = w_tbc.shape
    cw = p["conv_w"]
    K, _, Cc = cw.shape
    lw = p["lin_w"]
    Cl = lw.shape[1]
    pad = (K - 1) // 2
    Cout = Cc if additive else Cc + Cl

    TT = T if T <= TT_MAX else TT_MAX
    x_rows = w_tbc.reshape(T * B, Cin).astype(jnp.bfloat16)   # bf16 at the MXU inputs
    x_rows = _pad_rows(x_rows, TT * B)
    Rp = x_rows.shape[0]
    nt = Rp // (TT * B)
    halos = _build_halos(x_rows, TT * B, pad * B)              # (nt, 2*pad*B, Cin)

    cw_b = cw.astype(jnp.bfloat16)
    lw_b = lw.astype(jnp.bfloat16)
    cb = p["conv_b"].reshape(1, Cc).astype(jnp.float32)
    lb = p["lin_b"].reshape(1, Cl).astype(jnp.float32)

    out = pl.pallas_call(
        _make_ccl_kernel(TT, B, K, Cc, Cl, additive, lrelu),
        out_shape=jax.ShapeDtypeStruct((Rp, Cout), jnp.float32),
        grid=(nt,),
        in_specs=[
            pl.BlockSpec((TT * B, Cin), lambda i: (i, 0)),          # center tile
            pl.BlockSpec((None, 2 * pad * B, Cin), lambda i: (i, 0, 0)),  # halo rows
            pl.BlockSpec((K, Cin, Cc), lambda i: (0, 0, 0)),        # resident weights
            pl.BlockSpec((1, Cc), lambda i: (0, 0)),
            pl.BlockSpec((Cin, Cl), lambda i: (0, 0)),
            pl.BlockSpec((1, Cl), lambda i: (0, 0)),
        ],
        out_specs=pl.BlockSpec((TT * B, Cout), lambda i: (i, 0)),
        compiler_params=pltpu.CompilerParams(
            dimension_semantics=("parallel",),
            vmem_limit_bytes=VMEM_LIMIT,
        ),
    )(x_rows, halos, cw_b, cb, lw_b, lb)

    return out[:T * B].reshape(T, B, Cout)


# ---------------------------------------------------------------------------
# Pool: AvgPool1d(kernel=5, stride=2, padding=2, count_include_pad) along time
# Banded kernel: out[j] = (x[2j-2]+x[2j-1]+x[2j]+x[2j+1]+x[2j+2]) / 5
# Input presented as (T//2, 2*B*C) so even/odd time live in disjoint lane halves.
# ---------------------------------------------------------------------------
def _make_pool_kernel(BC):
    def kernel(xc_ref, xh_ref, o_ref):
        xc = xc_ref[...]                                        # (TTo, 2*BC)
        prev = jnp.concatenate([xh_ref[0:1, :], xc[:-1, :]], axis=0)   # row j-1
        nxt = jnp.concatenate([xc[1:, :], xh_ref[1:2, :]], axis=0)     # row j+1
        xe, xo = xc[:, :BC], xc[:, BC:]
        xep, xop = prev[:, :BC], prev[:, BC:]
        xen = nxt[:, :BC]
        o_ref[...] = (xep + xop + xe + xo + xen) * (1.0 / 5.0)
    return kernel


def pool_apply(w_tbc):
    T, B, C = w_tbc.shape
    assert T % 2 == 0, "MaybePad guarantees even T at every pool"
    To = T // 2
    BC = B * C
    xr = w_tbc.reshape(To, 2 * BC)
    TTo = To if To <= TT_MAX else TT_MAX
    xr = _pad_rows(xr, TTo)
    Rp = xr.shape[0]
    nt = Rp // TTo
    halos = _build_halos(xr, TTo, 1)                            # (nt, 2, 2*BC)

    out = pl.pallas_call(
        _make_pool_kernel(BC),
        out_shape=jax.ShapeDtypeStruct((Rp, BC), jnp.float32),
        grid=(nt,),
        in_specs=[
            pl.BlockSpec((TTo, 2 * BC), lambda i: (i, 0)),
            pl.BlockSpec((None, 2, 2 * BC), lambda i: (i, 0, 0)),
        ],
        out_specs=pl.BlockSpec((TTo, BC), lambda i: (i, 0)),
        compiler_params=pltpu.CompilerParams(
            dimension_semantics=("parallel",), vmem_limit_bytes=VMEM_LIMIT),
    )(xr, halos)
    return out[:To].reshape(To, B, C)


# ---------------------------------------------------------------------------
# Unpool: linear interpolation doubling T (same convention as the reference:
# sample positions p_q = q*(T-1)/(2T-1)); skip-add fused in.
#   out[2m]   = (m/b)      * y[m-1] + (1 - m/b)   * y[m]
#   out[2m+1] = ((a+1+m)/b)* y[m]   + ((a-m)/b)   * y[m+1]      (a=T-1, b=2T-1)
# Output produced as (T, 2*B*C): even outputs in lanes [:BC], odd in [BC:].
# ---------------------------------------------------------------------------
def _make_unpool_kernel(TT, BC, T_total):
    a = float(T_total - 1)
    inv_b = 1.0 / float(2 * T_total - 1)

    def kernel(yc_ref, yh_ref, sk_ref, o_ref):
        i = pl.program_id(0)
        y = yc_ref[...]                                         # (TT, BC) f32
        y_prev = jnp.concatenate([yh_ref[0:1, :], y[:-1, :]], axis=0)
        y_next = jnp.concatenate([y[1:, :], yh_ref[1:2, :]], axis=0)

        base = (i * TT).astype(jnp.float32)
        m = jax.lax.broadcasted_iota(jnp.int32, (TT, 1), 0).astype(jnp.float32) + base
        wE_prev = m * inv_b
        wE_cur = 1.0 - wE_prev
        wO_cur = (a + 1.0 + m) * inv_b
        wO_next = (a - m) * inv_b

        sk = sk_ref[...]
        o_ref[:, :BC] = wE_prev * y_prev + wE_cur * y + sk[:, :BC]
        o_ref[:, BC:] = wO_cur * y + wO_next * y_next + sk[:, BC:]

    return kernel


def unpool_apply(y_tbc, skip_tbc):
    """Unpool (T -> 2T) with the U-Net skip-add fused into the kernel."""
    T, B, C = y_tbc.shape
    BC = B * C
    yr = y_tbc.reshape(T, BC)
    skr = skip_tbc.reshape(T, 2 * BC)          # (2T,B,C) rows interleave exactly as output
    TT = T if T <= TT_MAX else TT_MAX
    yr = _pad_rows(yr, TT)
    skr = _pad_rows(skr, TT)
    Rp = yr.shape[0]
    nt = Rp // TT
    halos = _build_halos(yr, TT, 1)            # (nt, 2, BC)

    out = pl.pallas_call(
        _make_unpool_kernel(TT, BC, T),
        out_shape=jax.ShapeDtypeStruct((Rp, 2 * BC), jnp.float32),
        grid=(nt,),
        in_specs=[
            pl.BlockSpec((TT, BC), lambda i: (i, 0)),
            pl.BlockSpec((None, 2, BC), lambda i: (i, 0, 0)),
            pl.BlockSpec((TT, 2 * BC), lambda i: (i, 0)),
        ],
        out_specs=pl.BlockSpec((TT, 2 * BC), lambda i: (i, 0)),
        compiler_params=pltpu.CompilerParams(
            dimension_semantics=("parallel",), vmem_limit_bytes=VMEM_LIMIT),
    )(yr, halos, skr)
    return out[:T].reshape(2 * T, B, C)


# ---------------------------------------------------------------------------
# Parameter init (deterministic, synthetic)
# ---------------------------------------------------------------------------
def init_ccl(key, c_in, c_out, additive, kernel_size=5):
    cc = c_out if additive else c_out // 2
    cl = c_out if additive else c_out // 2
    k1, k2, k3, k4 = jax.random.split(key, 4)
    bc = 1.0 / np.sqrt(kernel_size * c_in)
    bl = 1.0 / np.sqrt(c_in)
    return dict(
        conv_w=jax.random.uniform(k1, (kernel_size, c_in, cc), jnp.float32, -bc, bc),
        conv_b=jax.random.uniform(k2, (cc,), jnp.float32, -bc, bc),
        lin_w=jax.random.uniform(k3, (c_in, cl), jnp.float32, -bl, bl),
        lin_b=jax.random.uniform(k4, (cl,), jnp.float32, -bl, bl),
    )


def init_model(key, input_size, hidden_size, num_layers, output_size, n_layerwise):
    params = {"layers": [], "layerwise": []}
    mult = lambda n: 2 ** min(n, num_layers - n - 1)
    in_ch = input_size
    for n in range(num_layers):
        out_ch = hidden_size * mult(n)
        key, k1, k2 = jax.random.split(key, 3)
        params["layers"].append((
            init_ccl(k1, in_ch, out_ch, additive=False),
            init_ccl(k2, out_ch, out_ch, additive=False),
        ))
        in_ch = out_ch
    for _ in range(n_layerwise):
        key, k1, k2 = jax.random.split(key, 3)
        params["layerwise"].append((
            init_ccl(k1, hidden_size, hidden_size * 2, additive=True),
            init_ccl(k2, hidden_size * 2, output_size, additive=True),
        ))
    key, km, ks = jax.random.split(key, 3)
    params["input_mean"] = jax.random.normal(km, (input_size,), jnp.float32)
    params["input_std"] = jax.random.uniform(ks, (input_size,), jnp.float32, 0.5, 1.5)
    return params


# ---------------------------------------------------------------------------
# Forward pass (mirrors Audio2Latent2.forward)
# ---------------------------------------------------------------------------
def audio2latent2_forward(x, params, num_layers, n_outputs, n_layerwise):
    B, T, C = x.shape
    # Normalize
    w = (x - params["input_mean"]) / (params["input_std"] + 1e-8)
    # MaybePad(num_layers // 2): pad T to a multiple of 2 ** (num_layers // 2)
    half = num_layers // 2
    factor = 2 ** half
    pad_t = (-T) % factor
    if pad_t:
        w = jnp.pad(w, ((0, 0), (0, pad_t), (0, 0)))
    # SwapBatch: (B, T, C) -> (T, B, C)
    w = jnp.transpose(w, (1, 0, 2))

    skips = []
    for n, (ccl_a, ccl_b) in enumerate(params["layers"]):
        w = ccl_apply(w, ccl_a, additive=False, lrelu=True)
        w = ccl_apply(w, ccl_b, additive=False, lrelu=True)
        if n < half:
            skips.append(w)                      # see TODO(synk) at top of file
            w = pool_apply(w)                    # halve T (banded avg-pool kernel)
        else:
            w = unpool_apply(w, skips.pop())     # double T + fused skip-add

    w = w[:T]

    rep = n_outputs // n_layerwise
    outs = []
    for ccl1, ccl2 in params["layerwise"]:
        y = ccl_apply(w, ccl1, additive=True, lrelu=True)
        y = ccl_apply(y, ccl2, additive=True, lrelu=False)
        # UnsqueezeLayerwise(rep): (T, B, O) -> (T, B, rep, O) without a materialized repeat
        outs.append(jnp.broadcast_to(y[:, :, None, :],
                                     (y.shape[0], y.shape[1], rep, y.shape[2])))
    w_plus = jnp.concatenate(outs, axis=2)       # (T, B, n_outputs, O)
    # SwapBatch: (T, B, n_outputs, O) -> (B, T, n_outputs, O)
    return jnp.transpose(w_plus, (1, 0, 2, 3))


# ---------------------------------------------------------------------------
if __name__ == "__main__":
    B, T = 2, 16
    input_size, hidden_size, num_layers = 8, 32, 4
    n_outputs, output_size, n_layerwise = 4, 16, 2

    root = jax.random.PRNGKey(0)
    k_params, k_x = jax.random.split(root)
    params = init_model(k_params, input_size, hidden_size, num_layers,
                        output_size, n_layerwise)
    x = jax.random.normal(k_x, (B, T, input_size), jnp.float32)

    fwd = jax.jit(functools.partial(audio2latent2_forward,
                                    num_layers=num_layers,
                                    n_outputs=n_outputs,
                                    n_layerwise=n_layerwise))
    out = jax.block_until_ready(fwd(x, params))

    assert out.shape == (B, T, n_outputs, output_size), out.shape
    assert out.dtype == jnp.float32
    assert bool(jnp.all(jnp.isfinite(out)))
    print("KERNEL_OK")
</pallas_src>

<mosaic_0001>
module attributes {stable_mosaic.version = 11 : i64} {
  func.func @kernel(%arg0: i32, %arg1: memref<32x32xbf16, #tpu.memory_space<vmem>>, %arg2: memref<1x8x32xbf16, #tpu.memory_space<vmem>>, %arg3: memref<5x32x16xbf16, #tpu.memory_space<vmem>>, %arg4: memref<1x16xf32, #tpu.memory_space<vmem>>, %arg5: memref<32x16xbf16, #tpu.memory_space<vmem>>, %arg6: memref<1x16xf32, #tpu.memory_space<vmem>>, %arg7: memref<32x32xf32, #tpu.memory_space<vmem>>) attributes {dimension_semantics = [#tpu.dimension_semantics<parallel>], iteration_bounds = array<i64: 1>, scalar_prefetch = 0 : i64, scratch_operands = 0 : i64, tpu.core_type = #tpu.core_type<tc>, window_params = [{transform_indices = @transform_0, window_bounds = array<i64: 32, 32>}, {transform_indices = @transform_1, window_bounds = array<i64: 1, 8, 32>}, {pipeline_mode = #tpu.pipeline_mode<synchronous>, transform_indices = @transform_2, window_bounds = array<i64: 5, 32, 16>}, {pipeline_mode = #tpu.pipeline_mode<synchronous>, transform_indices = @transform_3, window_bounds = array<i64: 1, 16>}, {pipeline_mode = #tpu.pipeline_mode<synchronous>, transform_indices = @transform_4, window_bounds = array<i64: 32, 16>}, {pipeline_mode = #tpu.pipeline_mode<synchronous>, transform_indices = @transform_5, window_bounds = array<i64: 1, 16>}, {transform_indices = @transform_6, window_bounds = array<i64: 32, 32>}]} {
    %c0 = arith.constant 0 : index
    %c0_0 = arith.constant 0 : index
    %0 = vector.load %arg1[%c0, %c0_0] : memref<32x32xbf16, #tpu.memory_space<vmem>>, vector<32x32xbf16>
    %c0_1 = arith.constant 0 : index
    %c0_2 = arith.constant 0 : index
    %c0_3 = arith.constant 0 : index
    %1 = vector.load %arg2[%c0_1, %c0_2, %c0_3] : memref<1x8x32xbf16, #tpu.memory_space<vmem>>, vector<1x4x32xbf16>
    %2 = vector.shape_cast %1 : vector<1x4x32xbf16> to vector<4x32xbf16>
    %c0_4 = arith.constant 0 : index
    %c4 = arith.constant 4 : index
    %c0_5 = arith.constant 0 : index
    %3 = vector.load %arg2[%c0_4, %c4, %c0_5] : memref<1x8x32xbf16, #tpu.memory_space<vmem>>, vector<1x4x32xbf16>
    %4 = vector.shape_cast %3 : vector<1x4x32xbf16> to vector<4x32xbf16>
    %5 = tpu.concatenate %2, %0, %4 in 0 : vector<4x32xbf16>, vector<32x32xbf16>, vector<4x32xbf16> -> vector<40x32xbf16>
    %cst = arith.constant 0.000000e+00 : f32
    %6 = vector.broadcast %cst : f32 to vector<32x16xf32>
    %7 = vector.extract_strided_slice %5 {offsets = [0, 0], sizes = [32, 32], strides = [1, 1]} : vector<40x32xbf16> to vector<32x32xbf16>
    %c0_6 = arith.constant 0 : index
    %c0_7 = arith.constant 0 : index
    %c0_8 = arith.constant 0 : index
    %8 = vector.load %arg3[%c0_6, %c0_7, %c0_8] : memref<5x32x16xbf16, #tpu.memory_space<vmem>>, vector<1x32x16xbf16>
    %9 = vector.shape_cast %8 : vector<1x32x16xbf16> to vector<32x16xbf16>
    %cst_9 = arith.constant dense<0.000000e+00> : vector<32x16xf32>
    %10 = tpu.matmul %7, %9, %cst_9 {dimension_numbers = #tpu.dot_dimension_numbers<[1], [0], [0], [1], [0, 0, 1, 1], [], []>} : vector<32x32xbf16>, vector<32x16xbf16>, vector<32x16xf32> -> vector<32x16xf32>
    %11 = arith.addf %6, %10 : vector<32x16xf32>
    %12 = vector.extract_strided_slice %5 {offsets = [2, 0], sizes = [32, 32], strides = [1, 1]} : vector<40x32xbf16> to vector<32x32xbf16>
    %c1 = arith.constant 1 : index
    %c0_10 = arith.constant 0 : index
    %c0_11 = arith.constant 0 : index
    %13 = vector.load %arg3[%c1, %c0_10, %c0_11] : memref<5x32x16xbf16, #tpu.memory_space<vmem>>, vector<1x32x16xbf16>
    %14 = vector.shape_cast %13 : vector<1x32x16xbf16> to vector<32x16xbf16>
    %cst_12 = arith.constant dense<0.000000e+00> : vector<32x16xf32>
    %15 = tpu.matmul %12, %14, %cst_12 {dimension_numbers = #tpu.dot_dimension_numbers<[1], [0], [0], [1], [0, 0, 1, 1], [], []>} : vector<32x32xbf16>, vector<32x16xbf16>, vector<32x16xf32> -> vector<32x16xf32>
    %16 = arith.addf %11, %15 : vector<32x16xf32>
    %17 = vector.extract_strided_slice %5 {offsets = [4, 0], sizes = [32, 32], strides = [1, 1]} : vector<40x32xbf16> to vector<32x32xbf16>
    %c2 = arith.constant 2 : index
    %c0_13 = arith.constant 0 : index
    %c0_14 = arith.constant 0 : index
    %18 = vector.load %arg3[%c2, %c0_13, %c0_14] : memref<5x32x16xbf16, #tpu.memory_space<vmem>>, vector<1x32x16xbf16>
    %19 = vector.shape_cast %18 : vector<1x32x16xbf16> to vector<32x16xbf16>
    %cst_15 = arith.constant dense<0.000000e+00> : vector<32x16xf32>
    %20 = tpu.matmul %17, %19, %cst_15 {dimension_numbers = #tpu.dot_dimension_numbers<[1], [0], [0], [1], [0, 0, 1, 1], [], []>} : vector<32x32xbf16>, vector<32x16xbf16>, vector<32x16xf32> -> vector<32x16xf32>
    %21 = arith.addf %16, %20 : vector<32x16xf32>
    %22 = vector.extract_strided_slice %5 {offsets = [6, 0], sizes = [32, 32], strides = [1, 1]} : vector<40x32xbf16> to vector<32x32xbf16>
    %c3 = arith.constant 3 : index
    %c0_16 = arith.constant 0 : index
    %c0_17 = arith.constant 0 : index
    %23 = vector.load %arg3[%c3, %c0_16, %c0_17] : memref<5x32x16xbf16, #tpu.memory_space<vmem>>, vector<1x32x16xbf16>
    %24 = vector.shape_cast %23 : vector<1x32x16xbf16> to vector<32x16xbf16>
    %cst_18 = arith.constant dense<0.000000e+00> : vector<32x16xf32>
    %25 = tpu.matmul %22, %24, %cst_18 {dimension_numbers = #tpu.dot_dimension_numbers<[1], [0], [0], [1], [0, 0, 1, 1], [], []>} : vector<32x32xbf16>, vector<32x16xbf16>, vector<32x16xf32> -> vector<32x16xf32>
    %26 = arith.addf %21, %25 : vector<32x16xf32>
    %27 = vector.extract_strided_slice %5 {offsets = [8, 0], sizes = [32, 32], strides = [1, 1]} : vector<40x32xbf16> to vector<32x32xbf16>
    %c4_19 = arith.constant 4 : index
    %c0_20 = arith.constant 0 : index
    %c0_21 = arith.constant 0 : index
    %28 = vector.load %arg3[%c4_19, %c0_20, %c0_21] : memref<5x32x16xbf16, #tpu.memory_space<vmem>>, vector<1x32x16xbf16>
    %29 = vector.shape_cast %28 : vector<1x32x16xbf16> to vector<32x16xbf16>
    %cst_22 = arith.constant dense<0.000000e+00> : vector<32x16xf32>
    %30 = tpu.matmul %27, %29, %cst_22 {dimension_numbers = #tpu.dot_dimension_numbers<[1], [0], [0], [1], [0, 0, 1, 1], [], []>} : vector<32x32xbf16>, vector<32x16xbf16>, vector<32x16xf32> -> vector<32x16xf32>
    %31 = arith.addf %26, %30 : vector<32x16xf32>
    %c0_23 = arith.constant 0 : index
    %c0_24 = arith.constant 0 : index
    %32 = vector.load %arg4[%c0_23, %c0_24] : memref<1x16xf32, #tpu.memory_space<vmem>>, vector<1x16xf32>
    %33 = vector.broadcast %32 : vector<1x16xf32> to vector<32x16xf32>
    %34 = arith.addf %31, %33 : vector<32x16xf32>
    %c0_25 = arith.constant 0 : index
    %c0_26 = arith.constant 0 : index
    %35 = vector.load %arg5[%c0_25, %c0_26] : memref<32x16xbf16, #tpu.memory_space<vmem>>, vector<32x16xbf16>
    %cst_27 = arith.constant dense<0.000000e+00> : vector<32x16xf32>
    %36 = tpu.matmul %0, %35, %cst_27 {dimension_numbers = #tpu.dot_dimension_numbers<[1], [0], [0], [1], [0, 0, 1, 1], [], []>} : vector<32x32xbf16>, vector<32x16xbf16>, vector<32x16xf32> -> vector<32x16xf32>
    %c0_28 = arith.constant 0 : index
    %c0_29 = arith.constant 0 : index
    %37 = vector.load %arg6[%c0_28, %c0_29] : memref<1x16xf32, #tpu.memory_space<vmem>>, vector<1x16xf32>
    %38 = vector.broadcast %37 : vector<1x16xf32> to vector<32x16xf32>
    %39 = arith.addf %36, %38 : vector<32x16xf32>
    %cst_30 = arith.constant 0.000000e+00 : f32
    %40 = vector.broadcast %cst_30 : f32 to vector<32x16xf32>
    %41 = arith.cmpf oge, %34, %40 : vector<32x16xf32>
    %cst_31 = arith.constant 2.000000e-01 : f32
    %42 = vector.broadcast %cst_31 : f32 to vector<32x16xf32>
    %43 = arith.mulf %42, %34 : vector<32x16xf32>
    %44 = arith.select %41, %34, %43 : vector<32x16xi1>, vector<32x16xf32>
    %cst_32 = arith.constant 0.000000e+00 : f32
    %45 = vector.broadcast %cst_32 : f32 to vector<32x16xf32>
    %46 = arith.cmpf oge, %39, %45 : vector<32x16xf32>
    %cst_33 = arith.constant 2.000000e-01 : f32
    %47 = vector.broadcast %cst_33 : f32 to vector<32x16xf32>
    %48 = arith.mulf %47, %39 : vector<32x16xf32>
    %49 = arith.select %46, %39, %48 : vector<32x16xi1>, vector<32x16xf32>
    %c0_34 = arith.constant 0 : index
    %c0_35 = arith.constant 0 : index
    %50 = vector.load %arg7[%c0_34, %c0_35] : memref<32x32xf32, #tpu.memory_space<vmem>>, vector<32x16xf32>
    tpu.vector_store %arg7[%c0_34, %c0_35], %44 {strides = array<i32>} : memref<32x32xf32, #tpu.memory_space<vmem>>, vector<32x16xf32>,
    %c0_36 = arith.constant 0 : index
    %c16 = arith.constant 16 : index
    %51 = vector.load %arg7[%c0_36, %c16] : memref<32x32xf32, #tpu.memory_space<vmem>>, vector<32x16xf32>
    tpu.vector_store %arg7[%c0_36, %c16], %49 {strides = array<i32>} : memref<32x32xf32, #tpu.memory_space<vmem>>, vector<32x16xf32>,
    return
  }
  func.func @transform_0(%arg0: i32) -> (i32, i32) {
    %c0_i32 = arith.constant 0 : i32
    %c0_i32_0 = arith.constant 0 : i32
    return %arg0, %c0_i32 : i32, i32
  }
  func.func @transform_1(%arg0: i32) -> (i32, i32, i32) {
    %c0_i32 = arith.constant 0 : i32
    %c0_i32_0 = arith.constant 0 : i32
    %c0_i32_1 = arith.constant 0 : i32
    return %arg0, %c0_i32, %c0_i32_0 : i32, i32, i32
  }
  func.func @transform_2(%arg0: i32) -> (i32, i32, i32) {
    %c0_i32 = arith.constant 0 : i32
    %c0_i32_0 = arith.constant 0 : i32
    %c0_i32_1 = arith.constant 0 : i32
    %c0_i32_2 = arith.constant 0 : i32
    return %c0_i32, %c0_i32_0, %c0_i32_1 : i32, i32, i32
  }
  func.func @transform_3(%arg0: i32) -> (i32, i32) {
    %c0_i32 = arith.constant 0 : i32
    %c0_i32_0 = arith.constant 0 : i32
    %c0_i32_1 = arith.constant 0 : i32
    return %c0_i32, %c0_i32_0 : i32, i32
  }
  func.func @transform_4(%arg0: i32) -> (i32, i32) {
    %c0_i32 = arith.constant 0 : i32
    %c0_i32_0 = arith.constant 0 : i32
    %c0_i32_1 = arith.constant 0 : i32
    return %c0_i32, %c0_i32_0 : i32, i32
  }
  func.func @transform_5(%arg0: i32) -> (i32, i32) {
    %c0_i32 = arith.constant 0 : i32
    %c0_i32_0 = arith.constant 0 : i32
    %c0_i32_1 = arith.constant 0 : i32
    return %c0_i32, %c0_i32_0 : i32, i32
  }
  func.func @transform_6(%arg0: i32) -> (i32, i32) {
    %c0_i32 = arith.constant 0 : i32
    %c0_i32_0 = arith.constant 0 : i32
    return %arg0, %c0_i32 : i32, i32
  }
}

module attributes {stable_mosaic.version = 11 : i64} {
  func.func @kernel(%arg0: i32, %arg1: memref<32x8xbf16, #tpu.memory_space<vmem>>, %arg2: memref<1x8x8xbf16, #tpu.memory_space<vmem>>, %arg3: memref<5x8x16xbf16, #tpu.memory_space<vmem>>, %arg4: memref<1x16xf32, #tpu.memory_space<vmem>>, %arg5: memref<8x16xbf16, #tpu.memory_space<vmem>>, %arg6: memref<1x16xf32, #tpu.memory_space<vmem>>, %arg7: memref<32x32xf32, #tpu.memory_space<vmem>>) attributes {dimension_semantics = [#tpu.dimension_semantics<parallel>], iteration_bounds = array<i64: 1>, scalar_prefetch = 0 : i64, scratch_operands = 0 : i64, tpu.core_type = #tpu.core_type<tc>, window_params = [{transform_indices = @transform_0, window_bounds = array<i64: 32, 8>}, {transform_indices = @transform_1, window_bounds = array<i64: 1, 8, 8>}, {pipeline_mode = #tpu.pipeline_mode<synchronous>, transform_indices = @transform_2, window_bounds = array<i64: 5, 8, 16>}, {pipeline_mode = #tpu.pipeline_mode<synchronous>, transform_indices = @transform_3, window_bounds = array<i64: 1, 16>}, {pipeline_mode = #tpu.pipeline_mode<synchronous>, transform_indices = @transform_4, window_bounds = array<i64: 8, 16>}, {pipeline_mode = #tpu.pipeline_mode<synchronous>, transform_indices = @transform_5, window_bounds = array<i64: 1, 16>}, {transform_indices = @transform_6, window_bounds = array<i64: 32, 32>}]} {
    %c0 = arith.constant 0 : index
    %c0_0 = arith.constant 0 : index
    %0 = vector.load %arg1[%c0, %c0_0] : memref<32x8xbf16, #tpu.memory_space<vmem>>, vector<32x8xbf16>
    %c0_1 = arith.constant 0 : index
    %c0_2 = arith.constant 0 : index
    %c0_3 = arith.constant 0 : index
    %1 = vector.load %arg2[%c0_1, %c0_2, %c0_3] : memref<1x8x8xbf16, #tpu.memory_space<vmem>>, vector<1x4x8xbf16>
    %2 = vector.shape_cast %1 : vector<1x4x8xbf16> to vector<4x8xbf16>
    %c0_4 = arith.constant 0 : index
    %c4 = arith.constant 4 : index
    %c0_5 = arith.constant 0 : index
    %3 = vector.load %arg2[%c0_4, %c4, %c0_5] : memref<1x8x8xbf16, #tpu.memory_space<vmem>>, vector<1x4x8xbf16>
    %4 = vector.shape_cast %3 : vector<1x4x8xbf16> to vector<4x8xbf16>
    %5 = tpu.concatenate %2, %0, %4 in 0 : vector<4x8xbf16>, vector<32x8xbf16>, vector<4x8xbf16> -> vector<40x8xbf16>
    %cst = arith.constant 0.000000e+00 : f32
    %6 = vector.broadcast %cst : f32 to vector<32x16xf32>
    %7 = vector.extract_strided_slice %5 {offsets = [0, 0], sizes = [32, 8], strides = [1, 1]} : vector<40x8xbf16> to vector<32x8xbf16>
    %c0_6 = arith.constant 0 : index
    %c0_7 = arith.constant 0 : index
    %c0_8 = arith.constant 0 : index
    %8 = vector.load %arg3[%c0_6, %c0_7, %c0_8] : memref<5x8x16xbf16, #tpu.memory_space<vmem>>, vector<1x8x16xbf16>
    %9 = vector.shape_cast %8 : vector<1x8x16xbf16> to vector<8x16xbf16>
    %cst_9 = arith.constant dense<0.000000e+00> : vector<32x16xf32>
    %10 = tpu.matmul %7, %9, %cst_9 {dimension_numbers = #tpu.dot_dimension_numbers<[1], [0], [0], [1], [0, 0, 1, 1], [], []>} : vector<32x8xbf16>, vector<8x16xbf16>, vector<32x16xf32> -> vector<32x16xf32>
    %11 = arith.addf %6, %10 : vector<32x16xf32>
    %12 = vector.extract_strided_slice %5 {offsets = [2, 0], sizes = [32, 8], strides = [1, 1]} : vector<40x8xbf16> to vector<32x8xbf16>
    %c1 = arith.constant 1 : index
    %c0_10 = arith.constant 0 : index
    %c0_11 = arith.constant 0 : index
    %13 = vector.load %arg3[%c1, %c0_10, %c0_11] : memref<5x8x16xbf16, #tpu.memory_space<vmem>>, vector<1x8x16xbf16>
    %14 = vector.shape_cast %13 : vector<1x8x16xbf16> to vector<8x16xbf16>
    %cst_12 = arith.constant dense<0.000000e+00> : vector<32x16xf32>
    %15 = tpu.matmul %12, %14, %cst_12 {dimension_numbers = #tpu.dot_dimension_numbers<[1], [0], [0], [1], [0, 0, 1, 1], [], []>} : vector<32x8xbf16>, vector<8x16xbf16>, vector<32x16xf32> -> vector<32x16xf32>
    %16 = arith.addf %11, %15 : vector<32x16xf32>
    %17 = vector.extract_strided_slice %5 {offsets = [4, 0], sizes = [32, 8], strides = [1, 1]} : vector<40x8xbf16> to vector<32x8xbf16>
    %c2 = arith.constant 2 : index
    %c0_13 = arith.constant 0 : index
    %c0_14 = arith.constant 0 : index
    %18 = vector.load %arg3[%c2, %c0_13, %c0_14] : memref<5x8x16xbf16, #tpu.memory_space<vmem>>, vector<1x8x16xbf16>
    %19 = vector.shape_cast %18 : vector<1x8x16xbf16> to vector<8x16xbf16>
    %cst_15 = arith.constant dense<0.000000e+00> : vector<32x16xf32>
    %20 = tpu.matmul %17, %19, %cst_15 {dimension_numbers = #tpu.dot_dimension_numbers<[1], [0], [0], [1], [0, 0, 1, 1], [], []>} : vector<32x8xbf16>, vector<8x16xbf16>, vector<32x16xf32> -> vector<32x16xf32>
    %21 = arith.addf %16, %20 : vector<32x16xf32>
    %22 = vector.extract_strided_slice %5 {offsets = [6, 0], sizes = [32, 8], strides = [1, 1]} : vector<40x8xbf16> to vector<32x8xbf16>
    %c3 = arith.constant 3 : index
    %c0_16 = arith.constant 0 : index
    %c0_17 = arith.constant 0 : index
    %23 = vector.load %arg3[%c3, %c0_16, %c0_17] : memref<5x8x16xbf16, #tpu.memory_space<vmem>>, vector<1x8x16xbf16>
    %24 = vector.shape_cast %23 : vector<1x8x16xbf16> to vector<8x16xbf16>
    %cst_18 = arith.constant dense<0.000000e+00> : vector<32x16xf32>
    %25 = tpu.matmul %22, %24, %cst_18 {dimension_numbers = #tpu.dot_dimension_numbers<[1], [0], [0], [1], [0, 0, 1, 1], [], []>} : vector<32x8xbf16>, vector<8x16xbf16>, vector<32x16xf32> -> vector<32x16xf32>
    %26 = arith.addf %21, %25 : vector<32x16xf32>
    %27 = vector.extract_strided_slice %5 {offsets = [8, 0], sizes = [32, 8], strides = [1, 1]} : vector<40x8xbf16> to vector<32x8xbf16>
    %c4_19 = arith.constant 4 : index
    %c0_20 = arith.constant 0 : index
    %c0_21 = arith.constant 0 : index
    %28 = vector.load %arg3[%c4_19, %c0_20, %c0_21] : memref<5x8x16xbf16, #tpu.memory_space<vmem>>, vector<1x8x16xbf16>
    %29 = vector.shape_cast %28 : vector<1x8x16xbf16> to vector<8x16xbf16>
    %cst_22 = arith.constant dense<0.000000e+00> : vector<32x16xf32>
    %30 = tpu.matmul %27, %29, %cst_22 {dimension_numbers = #tpu.dot_dimension_numbers<[1], [0], [0], [1], [0, 0, 1, 1], [], []>} : vector<32x8xbf16>, vector<8x16xbf16>, vector<32x16xf32> -> vector<32x16xf32>
    %31 = arith.addf %26, %30 : vector<32x16xf32>
    %c0_23 = arith.constant 0 : index
    %c0_24 = arith.constant 0 : index
    %32 = vector.load %arg4[%c0_23, %c0_24] : memref<1x16xf32, #tpu.memory_space<vmem>>, vector<1x16xf32>
    %33 = vector.broadcast %32 : vector<1x16xf32> to vector<32x16xf32>
    %34 = arith.addf %31, %33 : vector<32x16xf32>
    %c0_25 = arith.constant 0 : index
    %c0_26 = arith.constant 0 : index
    %35 = vector.load %arg5[%c0_25, %c0_26] : memref<8x16xbf16, #tpu.memory_space<vmem>>, vector<8x16xbf16>
    %cst_27 = arith.constant dense<0.000000e+00> : vector<32x16xf32>
    %36 = tpu.matmul %0, %35, %cst_27 {dimension_numbers = #tpu.dot_dimension_numbers<[1], [0], [0], [1], [0, 0, 1, 1], [], []>} : vector<32x8xbf16>, vector<8x16xbf16>, vector<32x16xf32> -> vector<32x16xf32>
    %c0_28 = arith.constant 0 : index
    %c0_29 = arith.constant 0 : index
    %37 = vector.load %arg6[%c0_28, %c0_29] : memref<1x16xf32, #tpu.memory_space<vmem>>, vector<1x16xf32>
    %38 = vector.broadcast %37 : vector<1x16xf32> to vector<32x16xf32>
    %39 = arith.addf %36, %38 : vector<32x16xf32>
    %cst_30 = arith.constant 0.000000e+00 : f32
    %40 = vector.broadcast %cst_30 : f32 to vector<32x16xf32>
    %41 = arith.cmpf oge, %34, %40 : vector<32x16xf32>
    %cst_31 = arith.constant 2.000000e-01 : f32
    %42 = vector.broadcast %cst_31 : f32 to vector<32x16xf32>
    %43 = arith.mulf %42, %34 : vector<32x16xf32>
    %44 = arith.select %41, %34, %43 : vector<32x16xi1>, vector<32x16xf32>
    %cst_32 = arith.constant 0.000000e+00 : f32
    %45 = vector.broadcast %cst_32 : f32 to vector<32x16xf32>
    %46 = arith.cmpf oge, %39, %45 : vector<32x16xf32>
    %cst_33 = arith.constant 2.000000e-01 : f32
    %47 = vector.broadcast %cst_33 : f32 to vector<32x16xf32>
    %48 = arith.mulf %47, %39 : vector<32x16xf32>
    %49 = arith.select %46, %39, %48 : vector<32x16xi1>, vector<32x16xf32>
    %c0_34 = arith.constant 0 : index
    %c0_35 = arith.constant 0 : index
    %50 = vector.load %arg7[%c0_34, %c0_35] : memref<32x32xf32, #tpu.memory_space<vmem>>, vector<32x16xf32>
    tpu.vector_store %arg7[%c0_34, %c0_35], %44 {strides = array<i32>} : memref<32x32xf32, #tpu.memory_space<vmem>>, vector<32x16xf32>,
    %c0_36 = arith.constant 0 : index
    %c16 = arith.constant 16 : index
    %51 = vector.load %arg7[%c0_36, %c16] : memref<32x32xf32, #tpu.memory_space<vmem>>, vector<32x16xf32>
    tpu.vector_store %arg7[%c0_36, %c16], %49 {strides = array<i32>} : memref<32x32xf32, #tpu.memory_space<vmem>>, vector<32x16xf32>,
    return
  }
  func.func @transform_0(%arg0: i32) -> (i32, i32) {
    %c0_i32 = arith.constant 0 : i32
    %c0_i32_0 = arith.constant 0 : i32
    return %arg0, %c0_i32 : i32, i32
  }
  func.func @transform_1(%arg0: i32) -> (i32, i32, i32) {
    %c0_i32 = arith.constant 0 : i32
    %c0_i32_0 = arith.constant 0 : i32
    %c0_i32_1 = arith.constant 0 : i32
    return %arg0, %c0_i32, %c0_i32_0 : i32, i32, i32
  }
  func.func @transform_2(%arg0: i32) -> (i32, i32, i32) {
    %c0_i32 = arith.constant 0 : i32
    %c0_i32_0 = arith.constant 0 : i32
    %c0_i32_1 = arith.constant 0 : i32
    %c0_i32_2 = arith.constant 0 : i32
    return %c0_i32, %c0_i32_0, %c0_i32_1 : i32, i32, i32
  }
  func.func @transform_3(%arg0: i32) -> (i32, i32) {
    %c0_i32 = arith.constant 0 : i32
    %c0_i32_0 = arith.constant 0 : i32
    %c0_i32_1 = arith.constant 0 : i32
    return %c0_i32, %c0_i32_0 : i32, i32
  }
  func.func @transform_4(%arg0: i32) -> (i32, i32) {
    %c0_i32 = arith.constant 0 : i32
    %c0_i32_0 = arith.constant 0 : i32
    %c0_i32_1 = arith.constant 0 : i32
    return %c0_i32, %c0_i32_0 : i32, i32
  }
  func.func @transform_5(%arg0: i32) -> (i32, i32) {
    %c0_i32 = arith.constant 0 : i32
    %c0_i32_0 = arith.constant 0 : i32
    %c0_i32_1 = arith.constant 0 : i32
    return %c0_i32, %c0_i32_0 : i32, i32
  }
  func.func @transform_6(%arg0: i32) -> (i32, i32) {
    %c0_i32 = arith.constant 0 : i32
    %c0_i32_0 = arith.constant 0 : i32
    return %arg0, %c0_i32 : i32, i32
  }
}

module attributes {stable_mosaic.version = 11 : i64} {
  func.func @kernel(%arg0: i32, %arg1: memref<8x128xf32, #tpu.memory_space<vmem>>, %arg2: memref<1x2x128xf32, #tpu.memory_space<vmem>>, %arg3: memref<8x64xf32, #tpu.memory_space<vmem>>) attributes {dimension_semantics = [#tpu.dimension_semantics<parallel>], iteration_bounds = array<i64: 1>, scalar_prefetch = 0 : i64, scratch_operands = 0 : i64, tpu.core_type = #tpu.core_type<tc>, window_params = [{transform_indices = @transform_0, window_bounds = array<i64: 8, 128>}, {transform_indices = @transform_1, window_bounds = array<i64: 1, 2, 128>}, {transform_indices = @transform_2, window_bounds = array<i64: 8, 64>}]} {
    %c0 = arith.constant 0 : index
    %c0_0 = arith.constant 0 : index
    %0 = vector.load %arg1[%c0, %c0_0] : memref<8x128xf32, #tpu.memory_space<vmem>>, vector<8x128xf32>
    %c0_1 = arith.constant 0 : index
    %c0_2 = arith.constant 0 : index
    %c0_3 = arith.constant 0 : index
    %1 = vector.load %arg2[%c0_1, %c0_2, %c0_3] : memref<1x2x128xf32, #tpu.memory_space<vmem>>, vector<1x1x128xf32>
    %2 = vector.shape_cast %1 : vector<1x1x128xf32> to vector<1x128xf32>
    %3 = vector.extract_strided_slice %0 {offsets = [0, 0], sizes = [7, 128], strides = [1, 1]} : vector<8x128xf32> to vector<7x128xf32>
    %4 = tpu.concatenate %2, %3 in 0 : vector<1x128xf32>, vector<7x128xf32> -> vector<8x128xf32>
    %5 = vector.extract_strided_slice %0 {offsets = [1, 0], sizes = [7, 128], strides = [1, 1]} : vector<8x128xf32> to vector<7x128xf32>
    %c0_4 = arith.constant 0 : index
    %c1 = arith.constant 1 : index
    %c0_5 = arith.constant 0 : index
    %6 = vector.load %arg2[%c0_4, %c1, %c0_5] : memref<1x2x128xf32, #tpu.memory_space<vmem>>, vector<1x1x128xf32>
    %7 = vector.shape_cast %6 : vector<1x1x128xf32> to vector<1x128xf32>
    %8 = tpu.concatenate %5, %7 in 0 : vector<7x128xf32>, vector<1x128xf32> -> vector<8x128xf32>
    %9 = vector.extract_strided_slice %0 {offsets = [0, 0], sizes = [8, 64], strides = [1, 1]} : vector<8x128xf32> to vector<8x64xf32>
    %10 = vector.extract_strided_slice %0 {offsets = [0, 64], sizes = [8, 64], strides = [1, 1]} : vector<8x128xf32> to vector<8x64xf32>
    %11 = vector.extract_strided_slice %4 {offsets = [0, 0], sizes = [8, 64], strides = [1, 1]} : vector<8x128xf32> to vector<8x64xf32>
    %12 = vector.extract_strided_slice %4 {offsets = [0, 64], sizes = [8, 64], strides = [1, 1]} : vector<8x128xf32> to vector<8x64xf32>
    %13 = vector.extract_strided_slice %8 {offsets = [0, 0], sizes = [8, 64], strides = [1, 1]} : vector<8x128xf32> to vector<8x64xf32>
    %14 = arith.addf %11, %12 : vector<8x64xf32>
    %15 = arith.addf %14, %9 : vector<8x64xf32>
    %16 = arith.addf %15, %10 : vector<8x64xf32>
    %17 = arith.addf %16, %13 : vector<8x64xf32>
    %cst = arith.constant 2.000000e-01 : f32
    %18 = vector.broadcast %cst : f32 to vector<8x64xf32>
    %19 = arith.mulf %17, %18 : vector<8x64xf32>
    %c0_6 = arith.constant 0 : index
    %c0_7 = arith.constant 0 : index
    %20 = vector.load %arg3[%c0_6, %c0_7] : memref<8x64xf32, #tpu.memory_space<vmem>>, vector<8x64xf32>
    tpu.vector_store %arg3[%c0_6, %c0_7], %19 {strides = array<i32>} : memref<8x64xf32, #tpu.memory_space<vmem>>, vector<8x64xf32>,
    return
  }
  func.func @transform_0(%arg0: i32) -> (i32, i32) {
    %c0_i32 = arith.constant 0 : i32
    %c0_i32_0 = arith.constant 0 : i32
    return %arg0, %c0_i32 : i32, i32
  }
  func.func @transform_1(%arg0: i32) -> (i32, i32, i32) {
    %c0_i32 = arith.constant 0 : i32
    %c0_i32_0 = arith.constant 0 : i32
    %c0_i32_1 = arith.constant 0 : i32
    return %arg0, %c0_i32, %c0_i32_0 : i32, i32, i32
  }
  func.func @transform_2(%arg0: i32) -> (i32, i32) {
    %c0_i32 = arith.constant 0 : i32
    %c0_i32_0 = arith.constant 0 : i32
    return %arg0, %c0_i32 : i32, i32
  }
}

module attributes {stable_mosaic.version = 11 : i64} {
  func.func @kernel(%arg0: i32, %arg1: memref<16x32xbf16, #tpu.memory_space<vmem>>, %arg2: memref<1x8x32xbf16, #tpu.memory_space<vmem>>, %arg3: memref<5x32x32xbf16, #tpu.memory_space<vmem>>, %arg4: memref<1x32xf32, #tpu.memory_space<vmem>>, %arg5: memref<32x32xbf16, #tpu.memory_space<vmem>>, %arg6: memref<1x32xf32, #tpu.memory_space<vmem>>, %arg7: memref<16x64xf32, #tpu.memory_space<vmem>>) attributes {dimension_semantics = [#tpu.dimension_semantics<parallel>], iteration_bounds = array<i64: 1>, scalar_prefetch = 0 : i64, scratch_operands = 0 : i64, tpu.core_type = #tpu.core_type<tc>, window_params = [{transform_indices = @transform_0, window_bounds = array<i64: 16, 32>}, {transform_indices = @transform_1, window_bounds = array<i64: 1, 8, 32>}, {pipeline_mode = #tpu.pipeline_mode<synchronous>, transform_indices = @transform_2, window_bounds = array<i64: 5, 32, 32>}, {pipeline_mode = #tpu.pipeline_mode<synchronous>, transform_indices = @transform_3, window_bounds = array<i64: 1, 32>}, {pipeline_mode = #tpu.pipeline_mode<synchronous>, transform_indices = @transform_4, window_bounds = array<i64: 32, 32>}, {pipeline_mode = #tpu.pipeline_mode<synchronous>, transform_indices = @transform_5, window_bounds = array<i64: 1, 32>}, {transform_indices = @transform_6, window_bounds = array<i64: 16, 64>}]} {
    %c0 = arith.constant 0 : index
    %c0_0 = arith.constant 0 : index
    %0 = vector.load %arg1[%c0, %c0_0] : memref<16x32xbf16, #tpu.memory_space<vmem>>, vector<16x32xbf16>
    %c0_1 = arith.constant 0 : index
    %c0_2 = arith.constant 0 : index
    %c0_3 = arith.constant 0 : index
    %1 = vector.load %arg2[%c0_1, %c0_2, %c0_3] : memref<1x8x32xbf16, #tpu.memory_space<vmem>>, vector<1x4x32xbf16>
    %2 = vector.shape_cast %1 : vector<1x4x32xbf16> to vector<4x32xbf16>
    %c0_4 = arith.constant 0 : index
    %c4 = arith.constant 4 : index
    %c0_5 = arith.constant 0 : index
    %3 = vector.load %arg2[%c0_4, %c4, %c0_5] : memref<1x8x32xbf16, #tpu.memory_space<vmem>>, vector<1x4x32xbf16>
    %4 = vector.shape_cast %3 : vector<1x4x32xbf16> to vector<4x32xbf16>
    %5 = tpu.concatenate %2, %0, %4 in 0 : vector<4x32xbf16>, vector<16x32xbf16>, vector<4x32xbf16> -> vector<24x32xbf16>
    %cst = arith.constant 0.000000e+00 : f32
    %6 = vector.broadcast %cst : f32 to vector<16x32xf32>
    %7 = vector.extract_strided_slice %5 {offsets = [0, 0], sizes = [16, 32], strides = [1, 1]} : vector<24x32xbf16> to vector<16x32xbf16>
    %c0_6 = arith.constant 0 : index
    %c0_7 = arith.constant 0 : index
    %c0_8 = arith.constant 0 : index
    %8 = vector.load %arg3[%c0_6, %c0_7, %c0_8] : memref<5x32x32xbf16, #tpu.memory_space<vmem>>, vector<1x32x32xbf16>
    %9 = vector.shape_cast %8 : vector<1x32x32xbf16> to vector<32x32xbf16>
    %cst_9 = arith.constant dense<0.000000e+00> : vector<16x32xf32>
    %10 = tpu.matmul %7, %9, %cst_9 {dimension_numbers = #tpu.dot_dimension_numbers<[1], [0], [0], [1], [0, 0, 1, 1], [], []>} : vector<16x32xbf16>, vector<32x32xbf16>, vector<16x32xf32> -> vector<16x32xf32>
    %11 = arith.addf %6, %10 : vector<16x32xf32>
    %12 = vector.extract_strided_slice %5 {offsets = [2, 0], sizes = [16, 32], strides = [1, 1]} : vector<24x32xbf16> to vector<16x32xbf16>
    %c1 = arith.constant 1 : index
    %c0_10 = arith.constant 0 : index
    %c0_11 = arith.constant 0 : index
    %13 = vector.load %arg3[%c1, %c0_10, %c0_11] : memref<5x32x32xbf16, #tpu.memory_space<vmem>>, vector<1x32x32xbf16>
    %14 = vector.shape_cast %13 : vector<1x32x32xbf16> to vector<32x32xbf16>
    %cst_12 = arith.constant dense<0.000000e+00> : vector<16x32xf32>
    %15 = tpu.matmul %12, %14, %cst_12 {dimension_numbers = #tpu.dot_dimension_numbers<[1], [0], [0], [1], [0, 0, 1, 1], [], []>} : vector<16x32xbf16>, vector<32x32xbf16>, vector<16x32xf32> -> vector<16x32xf32>
    %16 = arith.addf %11, %15 : vector<16x32xf32>
    %17 = vector.extract_strided_slice %5 {offsets = [4, 0], sizes = [16, 32], strides = [1, 1]} : vector<24x32xbf16> to vector<16x32xbf16>
    %c2 = arith.constant 2 : index
    %c0_13 = arith.constant 0 : index
    %c0_14 = arith.constant 0 : index
    %18 = vector.load %arg3[%c2, %c0_13, %c0_14] : memref<5x32x32xbf16, #tpu.memory_space<vmem>>, vector<1x32x32xbf16>
    %19 = vector.shape_cast %18 : vector<1x32x32xbf16> to vector<32x32xbf16>
    %cst_15 = arith.constant dense<0.000000e+00> : vector<16x32xf32>
    %20 = tpu.matmul %17, %19, %cst_15 {dimension_numbers = #tpu.dot_dimension_numbers<[1], [0], [0], [1], [0, 0, 1, 1], [], []>} : vector<16x32xbf16>, vector<32x32xbf16>, vector<16x32xf32> -> vector<16x32xf32>
    %21 = arith.addf %16, %20 : vector<16x32xf32>
    %22 = vector.extract_strided_slice %5 {offsets = [6, 0], sizes = [16, 32], strides = [1, 1]} : vector<24x32xbf16> to vector<16x32xbf16>
    %c3 = arith.constant 3 : index
    %c0_16 = arith.constant 0 : index
    %c0_17 = arith.constant 0 : index
    %23 = vector.load %arg3[%c3, %c0_16, %c0_17] : memref<5x32x32xbf16, #tpu.memory_space<vmem>>, vector<1x32x32xbf16>
    %24 = vector.shape_cast %23 : vector<1x32x32xbf16> to vector<32x32xbf16>
    %cst_18 = arith.constant dense<0.000000e+00> : vector<16x32xf32>
    %25 = tpu.matmul %22, %24, %cst_18 {dimension_numbers = #tpu.dot_dimension_numbers<[1], [0], [0], [1], [0, 0, 1, 1], [], []>} : vector<16x32xbf16>, vector<32x32xbf16>, vector<16x32xf32> -> vector<16x32xf32>
    %26 = arith.addf %21, %25 : vector<16x32xf32>
    %27 = vector.extract_strided_slice %5 {offsets = [8, 0], sizes = [16, 32], strides = [1, 1]} : vector<24x32xbf16> to vector<16x32xbf16>
    %c4_19 = arith.constant 4 : index
    %c0_20 = arith.constant 0 : index
    %c0_21 = arith.constant 0 : index
    %28 = vector.load %arg3[%c4_19, %c0_20, %c0_21] : memref<5x32x32xbf16, #tpu.memory_space<vmem>>, vector<1x32x32xbf16>
    %29 = vector.shape_cast %28 : vector<1x32x32xbf16> to vector<32x32xbf16>
    %cst_22 = arith.constant dense<0.000000e+00> : vector<16x32xf32>
    %30 = tpu.matmul %27, %29, %cst_22 {dimension_numbers = #tpu.dot_dimension_numbers<[1], [0], [0], [1], [0, 0, 1, 1], [], []>} : vector<16x32xbf16>, vector<32x32xbf16>, vector<16x32xf32> -> vector<16x32xf32>
    %31 = arith.addf %26, %30 : vector<16x32xf32>
    %c0_23 = arith.constant 0 : index
    %c0_24 = arith.constant 0 : index
    %32 = vector.load %arg4[%c0_23, %c0_24] : memref<1x32xf32, #tpu.memory_space<vmem>>, vector<1x32xf32>
    %33 = vector.broadcast %32 : vector<1x32xf32> to vector<16x32xf32>
    %34 = arith.addf %31, %33 : vector<16x32xf32>
    %c0_25 = arith.constant 0 : index
    %c0_26 = arith.constant 0 : index
    %35 = vector.load %arg5[%c0_25, %c0_26] : memref<32x32xbf16, #tpu.memory_space<vmem>>, vector<32x32xbf16>
    %cst_27 = arith.constant dense<0.000000e+00> : vector<16x32xf32>
    %36 = tpu.matmul %0, %35, %cst_27 {dimension_numbers = #tpu.dot_dimension_numbers<[1], [0], [0], [1], [0, 0, 1, 1], [], []>} : vector<16x32xbf16>, vector<32x32xbf16>, vector<16x32xf32> -> vector<16x32xf32>
    %c0_28 = arith.constant 0 : index
    %c0_29 = arith.constant 0 : index
    %37 = vector.load %arg6[%c0_28, %c0_29] : memref<1x32xf32, #tpu.memory_space<vmem>>, vector<1x32xf32>
    %38 = vector.broadcast %37 : vector<1x32xf32> to vector<16x32xf32>
    %39 = arith.addf %36, %38 : vector<16x32xf32>
    %cst_30 = arith.constant 0.000000e+00 : f32
    %40 = vector.broadcast %cst_30 : f32 to vector<16x32xf32>
    %41 = arith.cmpf oge, %34, %40 : vector<16x32xf32>
    %cst_31 = arith.constant 2.000000e-01 : f32
    %42 = vector.broadcast %cst_31 : f32 to vector<16x32xf32>
    %43 = arith.mulf %42, %34 : vector<16x32xf32>
    %44 = arith.select %41, %34, %43 : vector<16x32xi1>, vector<16x32xf32>
    %cst_32 = arith.constant 0.000000e+00 : f32
    %45 = vector.broadcast %cst_32 : f32 to vector<16x32xf32>
    %46 = arith.cmpf oge, %39, %45 : vector<16x32xf32>
    %cst_33 = arith.constant 2.000000e-01 : f32
    %47 = vector.broadcast %cst_33 : f32 to vector<16x32xf32>
    %48 = arith.mulf %47, %39 : vector<16x32xf32>
    %49 = arith.select %46, %39, %48 : vector<16x32xi1>, vector<16x32xf32>
    %c0_34 = arith.constant 0 : index
    %c0_35 = arith.constant 0 : index
    %50 = vector.load %arg7[%c0_34, %c0_35] : memref<16x64xf32, #tpu.memory_space<vmem>>, vector<16x32xf32>
    tpu.vector_store %arg7[%c0_34, %c0_35], %44 {strides = array<i32>} : memref<16x64xf32, #tpu.memory_space<vmem>>, vector<16x32xf32>,
    %c0_36 = arith.constant 0 : index
    %c32 = arith.constant 32 : index
    %51 = vector.load %arg7[%c0_36, %c32] : memref<16x64xf32, #tpu.memory_space<vmem>>, vector<16x32xf32>
    tpu.vector_store %arg7[%c0_36, %c32], %49 {strides = array<i32>} : memref<16x64xf32, #tpu.memory_space<vmem>>, vector<16x32xf32>,
    return
  }
  func.func @transform_0(%arg0: i32) -> (i32, i32) {
    %c0_i32 = arith.constant 0 : i32
    %c0_i32_0 = arith.constant 0 : i32
    return %arg0, %c0_i32 : i32, i32
  }
  func.func @transform_1(%arg0: i32) -> (i32, i32, i32) {
    %c0_i32 = arith.constant 0 : i32
    %c0_i32_0 = arith.constant 0 : i32
    %c0_i32_1 = arith.constant 0 : i32
    return %arg0, %c0_i32, %c0_i32_0 : i32, i32, i32
  }
  func.func @transform_2(%arg0: i32) -> (i32, i32, i32) {
    %c0_i32 = arith.constant 0 : i32
    %c0_i32_0 = arith.constant 0 : i32
    %c0_i32_1 = arith.constant 0 : i32
    %c0_i32_2 = arith.constant 0 : i32
    return %c0_i32, %c0_i32_0, %c0_i32_1 : i32, i32, i32
  }
  func.func @transform_3(%arg0: i32) -> (i32, i32) {
    %c0_i32 = arith.constant 0 : i32
    %c0_i32_0 = arith.constant 0 : i32
    %c0_i32_1 = arith.constant 0 : i32
    return %c0_i32, %c0_i32_0 : i32, i32
  }
  func.func @transform_4(%arg0: i32) -> (i32, i32) {
    %c0_i32 = arith.constant 0 : i32
    %c0_i32_0 = arith.constant 0 : i32
    %c0_i32_1 = arith.constant 0 : i32
    return %c0_i32, %c0_i32_0 : i32, i32
  }
  func.func @transform_5(%arg0: i32) -> (i32, i32) {
    %c0_i32 = arith.constant 0 : i32
    %c0_i32_0 = arith.constant 0 : i32
    %c0_i32_1 = arith.constant 0 : i32
    return %c0_i32, %c0_i32_0 : i32, i32
  }
  func.func @transform_6(%arg0: i32) -> (i32, i32) {
    %c0_i32 = arith.constant 0 : i32
    %c0_i32_0 = arith.constant 0 : i32
    return %arg0, %c0_i32 : i32, i32
  }
}

module attributes {stable_mosaic.version = 11 : i64} {
  func.func @kernel(%arg0: i32, %arg1: memref<16x64xbf16, #tpu.memory_space<vmem>>, %arg2: memref<1x8x64xbf16, #tpu.memory_space<vmem>>, %arg3: memref<5x64x32xbf16, #tpu.memory_space<vmem>>, %arg4: memref<1x32xf32, #tpu.memory_space<vmem>>, %arg5: memref<64x32xbf16, #tpu.memory_space<vmem>>, %arg6: memref<1x32xf32, #tpu.memory_space<vmem>>, %arg7: memref<16x64xf32, #tpu.memory_space<vmem>>) attributes {dimension_semantics = [#tpu.dimension_semantics<parallel>], iteration_bounds = array<i64: 1>, scalar_prefetch = 0 : i64, scratch_operands = 0 : i64, tpu.core_type = #tpu.core_type<tc>, window_params = [{transform_indices = @transform_0, window_bounds = array<i64: 16, 64>}, {transform_indices = @transform_1, window_bounds = array<i64: 1, 8, 64>}, {pipeline_mode = #tpu.pipeline_mode<synchronous>, transform_indices = @transform_2, window_bounds = array<i64: 5, 64, 32>}, {pipeline_mode = #tpu.pipeline_mode<synchronous>, transform_indices = @transform_3, window_bounds = array<i64: 1, 32>}, {pipeline_mode = #tpu.pipeline_mode<synchronous>, transform_indices = @transform_4, window_bounds = array<i64: 64, 32>}, {pipeline_mode = #tpu.pipeline_mode<synchronous>, transform_indices = @transform_5, window_bounds = array<i64: 1, 32>}, {transform_indices = @transform_6, window_bounds = array<i64: 16, 64>}]} {
    %c0 = arith.constant 0 : index
    %c0_0 = arith.constant 0 : index
    %0 = vector.load %arg1[%c0, %c0_0] : memref<16x64xbf16, #tpu.memory_space<vmem>>, vector<16x64xbf16>
    %c0_1 = arith.constant 0 : index
    %c0_2 = arith.constant 0 : index
    %c0_3 = arith.constant 0 : index
    %1 = vector.load %arg2[%c0_1, %c0_2, %c0_3] : memref<1x8x64xbf16, #tpu.memory_space<vmem>>, vector<1x4x64xbf16>
    %2 = vector.shape_cast %1 : vector<1x4x64xbf16> to vector<4x64xbf16>
    %c0_4 = arith.constant 0 : index
    %c4 = arith.constant 4 : index
    %c0_5 = arith.constant 0 : index
    %3 = vector.load %arg2[%c0_4, %c4, %c0_5] : memref<1x8x64xbf16, #tpu.memory_space<vmem>>, vector<1x4x64xbf16>
    %4 = vector.shape_cast %3 : vector<1x4x64xbf16> to vector<4x64xbf16>
    %5 = tpu.concatenate %2, %0, %4 in 0 : vector<4x64xbf16>, vector<16x64xbf16>, vector<4x64xbf16> -> vector<24x64xbf16>
    %cst = arith.constant 0.000000e+00 : f32
    %6 = vector.broadcast %cst : f32 to vector<16x32xf32>
    %7 = vector.extract_strided_slice %5 {offsets = [0, 0], sizes = [16, 64], strides = [1, 1]} : vector<24x64xbf16> to vector<16x64xbf16>
    %c0_6 = arith.constant 0 : index
    %c0_7 = arith.constant 0 : index
    %c0_8 = arith.constant 0 : index
    %8 = vector.load %arg3[%c0_6, %c0_7, %c0_8] : memref<5x64x32xbf16, #tpu.memory_space<vmem>>, vector<1x64x32xbf16>
    %9 = vector.shape_cast %8 : vector<1x64x32xbf16> to vector<64x32xbf16>
    %cst_9 = arith.constant dense<0.000000e+00> : vector<16x32xf32>
    %10 = tpu.matmul %7, %9, %cst_9 {dimension_numbers = #tpu.dot_dimension_numbers<[1], [0], [0], [1], [0, 0, 1, 1], [], []>} : vector<16x64xbf16>, vector<64x32xbf16>, vector<16x32xf32> -> vector<16x32xf32>
    %11 = arith.addf %6, %10 : vector<16x32xf32>
    %12 = vector.extract_strided_slice %5 {offsets = [2, 0], sizes = [16, 64], strides = [1, 1]} : vector<24x64xbf16> to vector<16x64xbf16>
    %c1 = arith.constant 1 : index
    %c0_10 = arith.constant 0 : index
    %c0_11 = arith.constant 0 : index
    %13 = vector.load %arg3[%c1, %c0_10, %c0_11] : memref<5x64x32xbf16, #tpu.memory_space<vmem>>, vector<1x64x32xbf16>
    %14 = vector.shape_cast %13 : vector<1x64x32xbf16> to vector<64x32xbf16>
    %cst_12 = arith.constant dense<0.000000e+00> : vector<16x32xf32>
    %15 = tpu.matmul %12, %14, %cst_12 {dimension_numbers = #tpu.dot_dimension_numbers<[1], [0], [0], [1], [0, 0, 1, 1], [], []>} : vector<16x64xbf16>, vector<64x32xbf16>, vector<16x32xf32> -> vector<16x32xf32>
    %16 = arith.addf %11, %15 : vector<16x32xf32>
    %17 = vector.extract_strided_slice %5 {offsets = [4, 0], sizes = [16, 64], strides = [1, 1]} : vector<24x64xbf16> to vector<16x64xbf16>
    %c2 = arith.constant 2 : index
    %c0_13 = arith.constant 0 : index
    %c0_14 = arith.constant 0 : index
    %18 = vector.load %arg3[%c2, %c0_13, %c0_14] : memref<5x64x32xbf16, #tpu.memory_space<vmem>>, vector<1x64x32xbf16>
    %19 = vector.shape_cast %18 : vector<1x64x32xbf16> to vector<64x32xbf16>
    %cst_15 = arith.constant dense<0.000000e+00> : vector<16x32xf32>
    %20 = tpu.matmul %17, %19, %cst_15 {dimension_numbers = #tpu.dot_dimension_numbers<[1], [0], [0], [1], [0, 0, 1, 1], [], []>} : vector<16x64xbf16>, vector<64x32xbf16>, vector<16x32xf32> -> vector<16x32xf32>
    %21 = arith.addf %16, %20 : vector<16x32xf32>
    %22 = vector.extract_strided_slice %5 {offsets = [6, 0], sizes = [16, 64], strides = [1, 1]} : vector<24x64xbf16> to vector<16x64xbf16>
    %c3 = arith.constant 3 : index
    %c0_16 = arith.constant 0 : index
    %c0_17 = arith.constant 0 : index
    %23 = vector.load %arg3[%c3, %c0_16, %c0_17] : memref<5x64x32xbf16, #tpu.memory_space<vmem>>, vector<1x64x32xbf16>
    %24 = vector.shape_cast %23 : vector<1x64x32xbf16> to vector<64x32xbf16>
    %cst_18 = arith.constant dense<0.000000e+00> : vector<16x32xf32>
    %25 = tpu.matmul %22, %24, %cst_18 {dimension_numbers = #tpu.dot_dimension_numbers<[1], [0], [0], [1], [0, 0, 1, 1], [], []>} : vector<16x64xbf16>, vector<64x32xbf16>, vector<16x32xf32> -> vector<16x32xf32>
    %26 = arith.addf %21, %25 : vector<16x32xf32>
    %27 = vector.extract_strided_slice %5 {offsets = [8, 0], sizes = [16, 64], strides = [1, 1]} : vector<24x64xbf16> to vector<16x64xbf16>
    %c4_19 = arith.constant 4 : index
    %c0_20 = arith.constant 0 : index
    %c0_21 = arith.constant 0 : index
    %28 = vector.load %arg3[%c4_19, %c0_20, %c0_21] : memref<5x64x32xbf16, #tpu.memory_space<vmem>>, vector<1x64x32xbf16>
    %29 = vector.shape_cast %28 : vector<1x64x32xbf16> to vector<64x32xbf16>
    %cst_22 = arith.constant dense<0.000000e+00> : vector<16x32xf32>
    %30 = tpu.matmul %27, %29, %cst_22 {dimension_numbers = #tpu.dot_dimension_numbers<[1], [0], [0], [1], [0, 0, 1, 1], [], []>} : vector<16x64xbf16>, vector<64x32xbf16>, vector<16x32xf32> -> vector<16x32xf32>
    %31 = arith.addf %26, %30 : vector<16x32xf32>
    %c0_23 = arith.constant 0 : index
    %c0_24 = arith.constant 0 : index
    %32 = vector.load %arg4[%c0_23, %c0_24] : memref<1x32xf32, #tpu.memory_space<vmem>>, vector<1x32xf32>
    %33 = vector.broadcast %32 : vector<1x32xf32> to vector<16x32xf32>
    %34 = arith.addf %31, %33 : vector<16x32xf32>
    %c0_25 = arith.constant 0 : index
    %c0_26 = arith.constant 0 : index
    %35 = vector.load %arg5[%c0_25, %c0_26] : memref<64x32xbf16, #tpu.memory_space<vmem>>, vector<64x32xbf16>
    %cst_27 = arith.constant dense<0.000000e+00> : vector<16x32xf32>
    %36 = tpu.matmul %0, %35, %cst_27 {dimension_numbers = #tpu.dot_dimension_numbers<[1], [0], [0], [1], [0, 0, 1, 1], [], []>} : vector<16x64xbf16>, vector<64x32xbf16>, vector<16x32xf32> -> vector<16x32xf32>
    %c0_28 = arith.constant 0 : index
    %c0_29 = arith.constant 0 : index
    %37 = vector.load %arg6[%c0_28, %c0_29] : memref<1x32xf32, #tpu.memory_space<vmem>>, vector<1x32xf32>
    %38 = vector.broadcast %37 : vector<1x32xf32> to vector<16x32xf32>
    %39 = arith.addf %36, %38 : vector<16x32xf32>
    %cst_30 = arith.constant 0.000000e+00 : f32
    %40 = vector.broadcast %cst_30 : f32 to vector<16x32xf32>
    %41 = arith.cmpf oge, %34, %40 : vector<16x32xf32>
    %cst_31 = arith.constant 2.000000e-01 : f32
    %42 = vector.broadcast %cst_31 : f32 to vector<16x32xf32>
    %43 = arith.mulf %42, %34 : vector<16x32xf32>
    %44 = arith.select %41, %34, %43 : vector<16x32xi1>, vector<16x32xf32>
    %cst_32 = arith.constant 0.000000e+00 : f32
    %45 = vector.broadcast %cst_32 : f32 to vector<16x32xf32>
    %46 = arith.cmpf oge, %39, %45 : vector<16x32xf32>
    %cst_33 = arith.constant 2.000000e-01 : f32
    %47 = vector.broadcast %cst_33 : f32 to vector<16x32xf32>
    %48 = arith.mulf %47, %39 : vector<16x32xf32>
    %49 = arith.select %46, %39, %48 : vector<16x32xi1>, vector<16x32xf32>
    %c0_34 = arith.constant 0 : index
    %c0_35 = arith.constant 0 : index
    %50 = vector.load %arg7[%c0_34, %c0_35] : memref<16x64xf32, #tpu.memory_space<vmem>>, vector<16x32xf32>
    tpu.vector_store %arg7[%c0_34, %c0_35], %44 {strides = array<i32>} : memref<16x64xf32, #tpu.memory_space<vmem>>, vector<16x32xf32>,
    %c0_36 = arith.constant 0 : index
    %c32 = arith.constant 32 : index
    %51 = vector.load %arg7[%c0_36, %c32] : memref<16x64xf32, #tpu.memory_space<vmem>>, vector<16x32xf32>
    tpu.vector_store %arg7[%c0_36, %c32], %49 {strides = array<i32>} : memref<16x64xf32, #tpu.memory_space<vmem>>, vector<16x32xf32>,
    return
  }
  func.func @transform_0(%arg0: i32) -> (i32, i32) {
    %c0_i32 = arith.constant 0 : i32
    %c0_i32_0 = arith.constant 0 : i32
    return %arg0, %c0_i32 : i32, i32
  }
  func.func @transform_1(%arg0: i32) -> (i32, i32, i32) {
    %c0_i32 = arith.constant 0 : i32
    %c0_i32_0 = arith.constant 0 : i32
    %c0_i32_1 = arith.constant 0 : i32
    return %arg0, %c0_i32, %c0_i32_0 : i32, i32, i32
  }
  func.func @transform_2(%arg0: i32) -> (i32, i32, i32) {
    %c0_i32 = arith.constant 0 : i32
    %c0_i32_0 = arith.constant 0 : i32
    %c0_i32_1 = arith.constant 0 : i32
    %c0_i32_2 = arith.constant 0 : i32
    return %c0_i32, %c0_i32_0, %c0_i32_1 : i32, i32, i32
  }
  func.func @transform_3(%arg0: i32) -> (i32, i32) {
    %c0_i32 = arith.constant 0 : i32
    %c0_i32_0 = arith.constant 0 : i32
    %c0_i32_1 = arith.constant 0 : i32
    return %c0_i32, %c0_i32_0 : i32, i32
  }
  func.func @transform_4(%arg0: i32) -> (i32, i32) {
    %c0_i32 = arith.constant 0 : i32
    %c0_i32_0 = arith.constant 0 : i32
    %c0_i32_1 = arith.constant 0 : i32
    return %c0_i32, %c0_i32_0 : i32, i32
  }
  func.func @transform_5(%arg0: i32) -> (i32, i32) {
    %c0_i32 = arith.constant 0 : i32
    %c0_i32_0 = arith.constant 0 : i32
    %c0_i32_1 = arith.constant 0 : i32
    return %c0_i32, %c0_i32_0 : i32, i32
  }
  func.func @transform_6(%arg0: i32) -> (i32, i32) {
    %c0_i32 = arith.constant 0 : i32
    %c0_i32_0 = arith.constant 0 : i32
    return %arg0, %c0_i32 : i32, i32
  }
}

module attributes {stable_mosaic.version = 11 : i64} {
  func.func @kernel(%arg0: i32, %arg1: memref<4x256xf32, #tpu.memory_space<vmem>>, %arg2: memref<1x2x256xf32, #tpu.memory_space<vmem>>, %arg3: memref<4x128xf32, #tpu.memory_space<vmem>>) attributes {dimension_semantics = [#tpu.dimension_semantics<parallel>], iteration_bounds = array<i64: 1>, scalar_prefetch = 0 : i64, scratch_operands = 0 : i64, tpu.core_type = #tpu.core_type<tc>, window_params = [{transform_indices = @transform_0, window_bounds = array<i64: 4, 256>}, {transform_indices = @transform_1, window_bounds = array<i64: 1, 2, 256>}, {transform_indices = @transform_2, window_bounds = array<i64: 4, 128>}]} {
    %c0 = arith.constant 0 : index
    %c0_0 = arith.constant 0 : index
    %0 = vector.load %arg1[%c0, %c0_0] : memref<4x256xf32, #tpu.memory_space<vmem>>, vector<4x256xf32>
    %c0_1 = arith.constant 0 : index
    %c0_2 = arith.constant 0 : index
    %c0_3 = arith.constant 0 : index
    %1 = vector.load %arg2[%c0_1, %c0_2, %c0_3] : memref<1x2x256xf32, #tpu.memory_space<vmem>>, vector<1x1x256xf32>
    %2 = vector.shape_cast %1 : vector<1x1x256xf32> to vector<1x256xf32>
    %3 = vector.extract_strided_slice %0 {offsets = [0, 0], sizes = [3, 256], strides = [1, 1]} : vector<4x256xf32> to vector<3x256xf32>
    %4 = tpu.concatenate %2, %3 in 0 : vector<1x256xf32>, vector<3x256xf32> -> vector<4x256xf32>
    %5 = vector.extract_strided_slice %0 {offsets = [1, 0], sizes = [3, 256], strides = [1, 1]} : vector<4x256xf32> to vector<3x256xf32>
    %c0_4 = arith.constant 0 : index
    %c1 = arith.constant 1 : index
    %c0_5 = arith.constant 0 : index
    %6 = vector.load %arg2[%c0_4, %c1, %c0_5] : memref<1x2x256xf32, #tpu.memory_space<vmem>>, vector<1x1x256xf32>
    %7 = vector.shape_cast %6 : vector<1x1x256xf32> to vector<1x256xf32>
    %8 = tpu.concatenate %5, %7 in 0 : vector<3x256xf32>, vector<1x256xf32> -> vector<4x256xf32>
    %9 = vector.extract_strided_slice %0 {offsets = [0, 0], sizes = [4, 128], strides = [1, 1]} : vector<4x256xf32> to vector<4x128xf32>
    %10 = vector.extract_strided_slice %0 {offsets = [0, 128], sizes = [4, 128], strides = [1, 1]} : vector<4x256xf32> to vector<4x128xf32>
    %11 = vector.extract_strided_slice %4 {offsets = [0, 0], sizes = [4, 128], strides = [1, 1]} : vector<4x256xf32> to vector<4x128xf32>
    %12 = vector.extract_strided_slice %4 {offsets = [0, 128], sizes = [4, 128], strides = [1, 1]} : vector<4x256xf32> to vector<4x128xf32>
    %13 = vector.extract_strided_slice %8 {offsets = [0, 0], sizes = [4, 128], strides = [1, 1]} : vector<4x256xf32> to vector<4x128xf32>
    %14 = arith.addf %11, %12 : vector<4x128xf32>
    %15 = arith.addf %14, %9 : vector<4x128xf32>
    %16 = arith.addf %15, %10 : vector<4x128xf32>
    %17 = arith.addf %16, %13 : vector<4x128xf32>
    %cst = arith.constant 2.000000e-01 : f32
    %18 = vector.broadcast %cst : f32 to vector<4x128xf32>
    %19 = arith.mulf %17, %18 : vector<4x128xf32>
    %c0_6 = arith.constant 0 : index
    %c0_7 = arith.constant 0 : index
    %20 = vector.load %arg3[%c0_6, %c0_7] : memref<4x128xf32, #tpu.memory_space<vmem>>, vector<4x128xf32>
    tpu.vector_store %arg3[%c0_6, %c0_7], %19 {strides = array<i32>} : memref<4x128xf32, #tpu.memory_space<vmem>>, vector<4x128xf32>,
    return
  }
  func.func @transform_0(%arg0: i32) -> (i32, i32) {
    %c0_i32 = arith.constant 0 : i32
    %c0_i32_0 = arith.constant 0 : i32
    return %arg0, %c0_i32 : i32, i32
  }
  func.func @transform_1(%arg0: i32) -> (i32, i32, i32) {
    %c0_i32 = arith.constant 0 : i32
    %c0_i32_0 = arith.constant 0 : i32
    %c0_i32_1 = arith.constant 0 : i32
    return %arg0, %c0_i32, %c0_i32_0 : i32, i32, i32
  }
  func.func @transform_2(%arg0: i32) -> (i32, i32) {
    %c0_i32 = arith.constant 0 : i32
    %c0_i32_0 = arith.constant 0 : i32
    return %arg0, %c0_i32 : i32, i32
  }
}

module attributes {stable_mosaic.version = 11 : i64} {
  func.func @kernel(%arg0: i32, %arg1: memref<8x64xbf16, #tpu.memory_space<vmem>>, %arg2: memref<1x8x64xbf16, #tpu.memory_space<vmem>>, %arg3: memref<5x64x32xbf16, #tpu.memory_space<vmem>>, %arg4: memref<1x32xf32, #tpu.memory_space<vmem>>, %arg5: memref<64x32xbf16, #tpu.memory_space<vmem>>, %arg6: memref<1x32xf32, #tpu.memory_space<vmem>>, %arg7: memref<8x64xf32, #tpu.memory_space<vmem>>) attributes {dimension_semantics = [#tpu.dimension_semantics<parallel>], iteration_bounds = array<i64: 1>, scalar_prefetch = 0 : i64, scratch_operands = 0 : i64, tpu.core_type = #tpu.core_type<tc>, window_params = [{transform_indices = @transform_0, window_bounds = array<i64: 8, 64>}, {transform_indices = @transform_1, window_bounds = array<i64: 1, 8, 64>}, {pipeline_mode = #tpu.pipeline_mode<synchronous>, transform_indices = @transform_2, window_bounds = array<i64: 5, 64, 32>}, {pipeline_mode = #tpu.pipeline_mode<synchronous>, transform_indices = @transform_3, window_bounds = array<i64: 1, 32>}, {pipeline_mode = #tpu.pipeline_mode<synchronous>, transform_indices = @transform_4, window_bounds = array<i64: 64, 32>}, {pipeline_mode = #tpu.pipeline_mode<synchronous>, transform_indices = @transform_5, window_bounds = array<i64: 1, 32>}, {transform_indices = @transform_6, window_bounds = array<i64: 8, 64>}]} {
    %c0 = arith.constant 0 : index
    %c0_0 = arith.constant 0 : index
    %0 = vector.load %arg1[%c0, %c0_0] : memref<8x64xbf16, #tpu.memory_space<vmem>>, vector<8x64xbf16>
    %c0_1 = arith.constant 0 : index
    %c0_2 = arith.constant 0 : index
    %c0_3 = arith.constant 0 : index
    %1 = vector.load %arg2[%c0_1, %c0_2, %c0_3] : memref<1x8x64xbf16, #tpu.memory_space<vmem>>, vector<1x4x64xbf16>
    %2 = vector.shape_cast %1 : vector<1x4x64xbf16> to vector<4x64xbf16>
    %c0_4 = arith.constant 0 : index
    %c4 = arith.constant 4 : index
    %c0_5 = arith.constant 0 : index
    %3 = vector.load %arg2[%c0_4, %c4, %c0_5] : memref<1x8x64xbf16, #tpu.memory_space<vmem>>, vector<1x4x64xbf16>
    %4 = vector.shape_cast %3 : vector<1x4x64xbf16> to vector<4x64xbf16>
    %5 = tpu.concatenate %2, %0, %4 in 0 : vector<4x64xbf16>, vector<8x64xbf16>, vector<4x64xbf16> -> vector<16x64xbf16>
    %cst = arith.constant 0.000000e+00 : f32
    %6 = vector.broadcast %cst : f32 to vector<8x32xf32>
    %7 = vector.extract_strided_slice %5 {offsets = [0, 0], sizes = [8, 64], strides = [1, 1]} : vector<16x64xbf16> to vector<8x64xbf16>
    %c0_6 = arith.constant 0 : index
    %c0_7 = arith.constant 0 : index
    %c0_8 = arith.constant 0 : index
    %8 = vector.load %arg3[%c0_6, %c0_7, %c0_8] : memref<5x64x32xbf16, #tpu.memory_space<vmem>>, vector<1x64x32xbf16>
    %9 = vector.shape_cast %8 : vector<1x64x32xbf16> to vector<64x32xbf16>
    %cst_9 = arith.constant dense<0.000000e+00> : vector<8x32xf32>
    %10 = tpu.matmul %7, %9, %cst_9 {dimension_numbers = #tpu.dot_dimension_numbers<[1], [0], [0], [1], [0, 0, 1, 1], [], []>} : vector<8x64xbf16>, vector<64x32xbf16>, vector<8x32xf32> -> vector<8x32xf32>
    %11 = arith.addf %6, %10 : vector<8x32xf32>
    %12 = vector.extract_strided_slice %5 {offsets = [2, 0], sizes = [8, 64], strides = [1, 1]} : vector<16x64xbf16> to vector<8x64xbf16>
    %c1 = arith.constant 1 : index
    %c0_10 = arith.constant 0 : index
    %c0_11 = arith.constant 0 : index
    %13 = vector.load %arg3[%c1, %c0_10, %c0_11] : memref<5x64x32xbf16, #tpu.memory_space<vmem>>, vector<1x64x32xbf16>
    %14 = vector.shape_cast %13 : vector<1x64x32xbf16> to vector<64x32xbf16>
    %cst_12 = arith.constant dense<0.000000e+00> : vector<8x32xf32>
    %15 = tpu.matmul %12, %14, %cst_12 {dimension_numbers = #tpu.dot_dimension_numbers<[1], [0], [0], [1], [0, 0, 1, 1], [], []>} : vector<8x64xbf16>, vector<64x32xbf16>, vector<8x32xf32> -> vector<8x32xf32>
    %16 = arith.addf %11, %15 : vector<8x32xf32>
    %17 = vector.extract_strided_slice %5 {offsets = [4, 0], sizes = [8, 64], strides = [1, 1]} : vector<16x64xbf16> to vector<8x64xbf16>
    %c2 = arith.constant 2 : index
    %c0_13 = arith.constant 0 : index
    %c0_14 = arith.constant 0 : index
    %18 = vector.load %arg3[%c2, %c0_13, %c0_14] : memref<5x64x32xbf16, #tpu.memory_space<vmem>>, vector<1x64x32xbf16>
    %19 = vector.shape_cast %18 : vector<1x64x32xbf16> to vector<64x32xbf16>
    %cst_15 = arith.constant dense<0.000000e+00> : vector<8x32xf32>
    %20 = tpu.matmul %17, %19, %cst_15 {dimension_numbers = #tpu.dot_dimension_numbers<[1], [0], [0], [1], [0, 0, 1, 1], [], []>} : vector<8x64xbf16>, vector<64x32xbf16>, vector<8x32xf32> -> vector<8x32xf32>
    %21 = arith.addf %16, %20 : vector<8x32xf32>
    %22 = vector.extract_strided_slice %5 {offsets = [6, 0], sizes = [8, 64], strides = [1, 1]} : vector<16x64xbf16> to vector<8x64xbf16>
    %c3 = arith.constant 3 : index
    %c0_16 = arith.constant 0 : index
    %c0_17 = arith.constant 0 : index
    %23 = vector.load %arg3[%c3, %c0_16, %c0_17] : memref<5x64x32xbf16, #tpu.memory_space<vmem>>, vector<1x64x32xbf16>
    %24 = vector.shape_cast %23 : vector<1x64x32xbf16> to vector<64x32xbf16>
    %cst_18 = arith.constant dense<0.000000e+00> : vector<8x32xf32>
    %25 = tpu.matmul %22, %24, %cst_18 {dimension_numbers = #tpu.dot_dimension_numbers<[1], [0], [0], [1], [0, 0, 1, 1], [], []>} : vector<8x64xbf16>, vector<64x32xbf16>, vector<8x32xf32> -> vector<8x32xf32>
    %26 = arith.addf %21, %25 : vector<8x32xf32>
    %27 = vector.extract_strided_slice %5 {offsets = [8, 0], sizes = [8, 64], strides = [1, 1]} : vector<16x64xbf16> to vector<8x64xbf16>
    %c4_19 = arith.constant 4 : index
    %c0_20 = arith.constant 0 : index
    %c0_21 = arith.constant 0 : index
    %28 = vector.load %arg3[%c4_19, %c0_20, %c0_21] : memref<5x64x32xbf16, #tpu.memory_space<vmem>>, vector<1x64x32xbf16>
    %29 = vector.shape_cast %28 : vector<1x64x32xbf16> to vector<64x32xbf16>
    %cst_22 = arith.constant dense<0.000000e+00> : vector<8x32xf32>
    %30 = tpu.matmul %27, %29, %cst_22 {dimension_numbers = #tpu.dot_dimension_numbers<[1], [0], [0], [1], [0, 0, 1, 1], [], []>} : vector<8x64xbf16>, vector<64x32xbf16>, vector<8x32xf32> -> vector<8x32xf32>
    %31 = arith.addf %26, %30 : vector<8x32xf32>
    %c0_23 = arith.constant 0 : index
    %c0_24 = arith.constant 0 : index
    %32 = vector.load %arg4[%c0_23, %c0_24] : memref<1x32xf32, #tpu.memory_space<vmem>>, vector<1x32xf32>
    %33 = vector.broadcast %32 : vector<1x32xf32> to vector<8x32xf32>
    %34 = arith.addf %31, %33 : vector<8x32xf32>
    %c0_25 = arith.constant 0 : index
    %c0_26 = arith.constant 0 : index
    %35 = vector.load %arg5[%c0_25, %c0_26] : memref<64x32xbf16, #tpu.memory_space<vmem>>, vector<64x32xbf16>
    %cst_27 = arith.constant dense<0.000000e+00> : vector<8x32xf32>
    %36 = tpu.matmul %0, %35, %cst_27 {dimension_numbers = #tpu.dot_dimension_numbers<[1], [0], [0], [1], [0, 0, 1, 1], [], []>} : vector<8x64xbf16>, vector<64x32xbf16>, vector<8x32xf32> -> vector<8x32xf32>
    %c0_28 = arith.constant 0 : index
    %c0_29 = arith.constant 0 : index
    %37 = vector.load %arg6[%c0_28, %c0_29] : memref<1x32xf32, #tpu.memory_space<vmem>>, vector<1x32xf32>
    %38 = vector.broadcast %37 : vector<1x32xf32> to vector<8x32xf32>
    %39 = arith.addf %36, %38 : vector<8x32xf32>
    %cst_30 = arith.constant 0.000000e+00 : f32
    %40 = vector.broadcast %cst_30 : f32 to vector<8x32xf32>
    %41 = arith.cmpf oge, %34, %40 : vector<8x32xf32>
    %cst_31 = arith.constant 2.000000e-01 : f32
    %42 = vector.broadcast %cst_31 : f32 to vector<8x32xf32>
    %43 = arith.mulf %42, %34 : vector<8x32xf32>
    %44 = arith.select %41, %34, %43 : vector<8x32xi1>, vector<8x32xf32>
    %cst_32 = arith.constant 0.000000e+00 : f32
    %45 = vector.broadcast %cst_32 : f32 to vector<8x32xf32>
    %46 = arith.cmpf oge, %39, %45 : vector<8x32xf32>
    %cst_33 = arith.constant 2.000000e-01 : f32
    %47 = vector.broadcast %cst_33 : f32 to vector<8x32xf32>
    %48 = arith.mulf %47, %39 : vector<8x32xf32>
    %49 = arith.select %46, %39, %48 : vector<8x32xi1>, vector<8x32xf32>
    %c0_34 = arith.constant 0 : index
    %c0_35 = arith.constant 0 : index
    %50 = vector.load %arg7[%c0_34, %c0_35] : memref<8x64xf32, #tpu.memory_space<vmem>>, vector<8x32xf32>
    tpu.vector_store %arg7[%c0_34, %c0_35], %44 {strides = array<i32>} : memref<8x64xf32, #tpu.memory_space<vmem>>, vector<8x32xf32>,
    %c0_36 = arith.constant 0 : index
    %c32 = arith.constant 32 : index
    %51 = vector.load %arg7[%c0_36, %c32] : memref<8x64xf32, #tpu.memory_space<vmem>>, vector<8x32xf32>
    tpu.vector_store %arg7[%c0_36, %c32], %49 {strides = array<i32>} : memref<8x64xf32, #tpu.memory_space<vmem>>, vector<8x32xf32>,
    return
  }
  func.func @transform_0(%arg0: i32) -> (i32, i32) {
    %c0_i32 = arith.constant 0 : i32
    %c0_i32_0 = arith.constant 0 : i32
    return %arg0, %c0_i32 : i32, i32
  }
  func.func @transform_1(%arg0: i32) -> (i32, i32, i32) {
    %c0_i32 = arith.constant 0 : i32
    %c0_i32_0 = arith.constant 0 : i32
    %c0_i32_1 = arith.constant 0 : i32
    return %arg0, %c0_i32, %c0_i32_0 : i32, i32, i32
  }
  func.func @transform_2(%arg0: i32) -> (i32, i32, i32) {
    %c0_i32 = arith.constant 0 : i32
    %c0_i32_0 = arith.constant 0 : i32
    %c0_i32_1 = arith.constant 0 : i32
    %c0_i32_2 = arith.constant 0 : i32
    return %c0_i32, %c0_i32_0, %c0_i32_1 : i32, i32, i32
  }
  func.func @transform_3(%arg0: i32) -> (i32, i32) {
    %c0_i32 = arith.constant 0 : i32
    %c0_i32_0 = arith.constant 0 : i32
    %c0_i32_1 = arith.constant 0 : i32
    return %c0_i32, %c0_i32_0 : i32, i32
  }
  func.func @transform_4(%arg0: i32) -> (i32, i32) {
    %c0_i32 = arith.constant 0 : i32
    %c0_i32_0 = arith.constant 0 : i32
    %c0_i32_1 = arith.constant 0 : i32
    return %c0_i32, %c0_i32_0 : i32, i32
  }
  func.func @transform_5(%arg0: i32) -> (i32, i32) {
    %c0_i32 = arith.constant 0 : i32
    %c0_i32_0 = arith.constant 0 : i32
    %c0_i32_1 = arith.constant 0 : i32
    return %c0_i32, %c0_i32_0 : i32, i32
  }
  func.func @transform_6(%arg0: i32) -> (i32, i32) {
    %c0_i32 = arith.constant 0 : i32
    %c0_i32_0 = arith.constant 0 : i32
    return %arg0, %c0_i32 : i32, i32
  }
}

module attributes {stable_mosaic.version = 11 : i64} {
  func.func @kernel(%arg0: i32, %arg1: memref<4x128xf32, #tpu.memory_space<vmem>>, %arg2: memref<1x2x128xf32, #tpu.memory_space<vmem>>, %arg3: memref<4x256xf32, #tpu.memory_space<vmem>>, %arg4: memref<4x256xf32, #tpu.memory_space<vmem>>) attributes {dimension_semantics = [#tpu.dimension_semantics<parallel>], iteration_bounds = array<i64: 1>, scalar_prefetch = 0 : i64, scratch_operands = 0 : i64, tpu.core_type = #tpu.core_type<tc>, window_params = [{transform_indices = @transform_0, window_bounds = array<i64: 4, 128>}, {transform_indices = @transform_1, window_bounds = array<i64: 1, 2, 128>}, {transform_indices = @transform_2, window_bounds = array<i64: 4, 256>}, {transform_indices = @transform_3, window_bounds = array<i64: 4, 256>}]} {
    %c0 = arith.constant 0 : index
    %c0_0 = arith.constant 0 : index
    %0 = vector.load %arg1[%c0, %c0_0] : memref<4x128xf32, #tpu.memory_space<vmem>>, vector<4x128xf32>
    %c0_1 = arith.constant 0 : index
    %c0_2 = arith.constant 0 : index
    %c0_3 = arith.constant 0 : index
    %1 = vector.load %arg2[%c0_1, %c0_2, %c0_3] : memref<1x2x128xf32, #tpu.memory_space<vmem>>, vector<1x1x128xf32>
    %2 = vector.shape_cast %1 : vector<1x1x128xf32> to vector<1x128xf32>
    %3 = vector.extract_strided_slice %0 {offsets = [0, 0], sizes = [3, 128], strides = [1, 1]} : vector<4x128xf32> to vector<3x128xf32>
    %4 = tpu.concatenate %2, %3 in 0 : vector<1x128xf32>, vector<3x128xf32> -> vector<4x128xf32>
    %5 = vector.extract_strided_slice %0 {offsets = [1, 0], sizes = [3, 128], strides = [1, 1]} : vector<4x128xf32> to vector<3x128xf32>
    %c0_4 = arith.constant 0 : index
    %c1 = arith.constant 1 : index
    %c0_5 = arith.constant 0 : index
    %6 = vector.load %arg2[%c0_4, %c1, %c0_5] : memref<1x2x128xf32, #tpu.memory_space<vmem>>, vector<1x1x128xf32>
    %7 = vector.shape_cast %6 : vector<1x1x128xf32> to vector<1x128xf32>
    %8 = tpu.concatenate %5, %7 in 0 : vector<3x128xf32>, vector<1x128xf32> -> vector<4x128xf32>
    %c4_i32 = arith.constant 4 : i32
    %9 = arith.muli %arg0, %c4_i32 : i32
    %10 = arith.sitofp %9 : i32 to f32
    %11 = tpu.iota {dimensions = array<i32: 0>} : vector<4x1xi32>
    %12 = arith.sitofp %11 : vector<4x1xi32> to vector<4x1xf32>
    %13 = vector.broadcast %10 : f32 to vector<4x1xf32>
    %14 = arith.addf %12, %13 : vector<4x1xf32>
    %cst = arith.constant 0.142857149 : f32
    %15 = vector.broadcast %cst : f32 to vector<4x1xf32>
    %16 = arith.mulf %14, %15 : vector<4x1xf32>
    %cst_6 = arith.constant 1.000000e+00 : f32
    %17 = vector.broadcast %cst_6 : f32 to vector<4x1xf32>
    %18 = arith.subf %17, %16 : vector<4x1xf32>
    %cst_7 = arith.constant 4.000000e+00 : f32
    %19 = vector.broadcast %cst_7 : f32 to vector<4x1xf32>
    %20 = arith.addf %19, %14 : vector<4x1xf32>
    %cst_8 = arith.constant 0.142857149 : f32
    %21 = vector.broadcast %cst_8 : f32 to vector<4x1xf32>
    %22 = arith.mulf %20, %21 : vector<4x1xf32>
    %cst_9 = arith.constant 3.000000e+00 : f32
    %23 = vector.broadcast %cst_9 : f32 to vector<4x1xf32>
    %24 = arith.subf %23, %14 : vector<4x1xf32>
    %cst_10 = arith.constant 0.142857149 : f32
    %25 = vector.broadcast %cst_10 : f32 to vector<4x1xf32>
    %26 = arith.mulf %24, %25 : vector<4x1xf32>
    %c0_11 = arith.constant 0 : index
    %c0_12 = arith.constant 0 : index
    %27 = vector.load %arg3[%c0_11, %c0_12] : memref<4x256xf32, #tpu.memory_space<vmem>>, vector<4x256xf32>
    %28 = vector.broadcast %16 : vector<4x1xf32> to vector<4x128xf32>
    %29 = arith.mulf %28, %4 : vector<4x128xf32>
    %30 = vector.broadcast %18 : vector<4x1xf32> to vector<4x128xf32>
    %31 = arith.mulf %30, %0 : vector<4x128xf32>
    %32 = arith.addf %29, %31 : vector<4x128xf32>
    %33 = vector.extract_strided_slice %27 {offsets = [0, 0], sizes = [4, 128], strides = [1, 1]} : vector<4x256xf32> to vector<4x128xf32>
    %34 = arith.addf %32, %33 : vector<4x128xf32>
    %c0_13 = arith.constant 0 : index
    %c0_14 = arith.constant 0 : index
    %35 = vector.load %arg4[%c0_13, %c0_14] : memref<4x256xf32, #tpu.memory_space<vmem>>, vector<4x128xf32>
    tpu.vector_store %arg4[%c0_13, %c0_14], %34 {strides = array<i32>} : memref<4x256xf32, #tpu.memory_space<vmem>>, vector<4x128xf32>,
    %36 = vector.broadcast %22 : vector<4x1xf32> to vector<4x128xf32>
    %37 = arith.mulf %36, %0 : vector<4x128xf32>
    %38 = vector.broadcast %26 : vector<4x1xf32> to vector<4x128xf32>
    %39 = arith.mulf %38, %8 : vector<4x128xf32>
    %40 = arith.addf %37, %39 : vector<4x128xf32>
    %41 = vector.extract_strided_slice %27 {offsets = [0, 128], sizes = [4, 128], strides = [1, 1]} : vector<4x256xf32> to vector<4x128xf32>
    %42 = arith.addf %40, %41 : vector<4x128xf32>
    %c0_15 = arith.constant 0 : index
    %c128 = arith.constant 128 : index
    %43 = vector.load %arg4[%c0_15, %c128] : memref<4x256xf32, #tpu.memory_space<vmem>>, vector<4x128xf32>
    tpu.vector_store %arg4[%c0_15, %c128], %42 {strides = array<i32>} : memref<4x256xf32, #tpu.memory_space<vmem>>, vector<4x128xf32>,
    return
  }
  func.func @transform_0(%arg0: i32) -> (i32, i32) {
    %c0_i32 = arith.constant 0 : i32
    %c0_i32_0 = arith.constant 0 : i32
    return %arg0, %c0_i32 : i32, i32
  }
  func.func @transform_1(%arg0: i32) -> (i32, i32, i32) {
    %c0_i32 = arith.constant 0 : i32
    %c0_i32_0 = arith.constant 0 : i32
    %c0_i32_1 = arith.constant 0 : i32
    return %arg0, %c0_i32, %c0_i32_0 : i32, i32, i32
  }
  func.func @transform_2(%arg0: i32) -> (i32, i32) {
    %c0_i32 = arith.constant 0 : i32
    %c0_i32_0 = arith.constant 0 : i32
    return %arg0, %c0_i32 : i32, i32
  }
  func.func @transform_3(%arg0: i32) -> (i32, i32) {
    %c0_i32 = arith.constant 0 : i32
    %c0_i32_0 = arith.constant 0 : i32
    return %arg0, %c0_i32 : i32, i32
  }
}

module attributes {stable_mosaic.version = 11 : i64} {
  func.func @kernel(%arg0: i32, %arg1: memref<16x64xbf16, #tpu.memory_space<vmem>>, %arg2: memref<1x8x64xbf16, #tpu.memory_space<vmem>>, %arg3: memref<5x64x16xbf16, #tpu.memory_space<vmem>>, %arg4: memref<1x16xf32, #tpu.memory_space<vmem>>, %arg5: memref<64x16xbf16, #tpu.memory_space<vmem>>, %arg6: memref<1x16xf32, #tpu.memory_space<vmem>>, %arg7: memref<16x32xf32, #tpu.memory_space<vmem>>) attributes {dimension_semantics = [#tpu.dimension_semantics<parallel>], iteration_bounds = array<i64: 1>, scalar_prefetch = 0 : i64, scratch_operands = 0 : i64, tpu.core_type = #tpu.core_type<tc>, window_params = [{transform_indices = @transform_0, window_bounds = array<i64: 16, 64>}, {transform_indices = @transform_1, window_bounds = array<i64: 1, 8, 64>}, {pipeline_mode = #tpu.pipeline_mode<synchronous>, transform_indices = @transform_2, window_bounds = array<i64: 5, 64, 16>}, {pipeline_mode = #tpu.pipeline_mode<synchronous>, transform_indices = @transform_3, window_bounds = array<i64: 1, 16>}, {pipeline_mode = #tpu.pipeline_mode<synchronous>, transform_indices = @transform_4, window_bounds = array<i64: 64, 16>}, {pipeline_mode = #tpu.pipeline_mode<synchronous>, transform_indices = @transform_5, window_bounds = array<i64: 1, 16>}, {transform_indices = @transform_6, window_bounds = array<i64: 16, 32>}]} {
    %c0 = arith.constant 0 : index
    %c0_0 = arith.constant 0 : index
    %0 = vector.load %arg1[%c0, %c0_0] : memref<16x64xbf16, #tpu.memory_space<vmem>>, vector<16x64xbf16>
    %c0_1 = arith.constant 0 : index
    %c0_2 = arith.constant 0 : index
    %c0_3 = arith.constant 0 : index
    %1 = vector.load %arg2[%c0_1, %c0_2, %c0_3] : memref<1x8x64xbf16, #tpu.memory_space<vmem>>, vector<1x4x64xbf16>
    %2 = vector.shape_cast %1 : vector<1x4x64xbf16> to vector<4x64xbf16>
    %c0_4 = arith.constant 0 : index
    %c4 = arith.constant 4 : index
    %c0_5 = arith.constant 0 : index
    %3 = vector.load %arg2[%c0_4, %c4, %c0_5] : memref<1x8x64xbf16, #tpu.memory_space<vmem>>, vector<1x4x64xbf16>
    %4 = vector.shape_cast %3 : vector<1x4x64xbf16> to vector<4x64xbf16>
    %5 = tpu.concatenate %2, %0, %4 in 0 : vector<4x64xbf16>, vector<16x64xbf16>, vector<4x64xbf16> -> vector<24x64xbf16>
    %cst = arith.constant 0.000000e+00 : f32
    %6 = vector.broadcast %cst : f32 to vector<16x16xf32>
    %7 = vector.extract_strided_slice %5 {offsets = [0, 0], sizes = [16, 64], strides = [1, 1]} : vector<24x64xbf16> to vector<16x64xbf16>
    %c0_6 = arith.constant 0 : index
    %c0_7 = arith.constant 0 : index
    %c0_8 = arith.constant 0 : index
    %8 = vector.load %arg3[%c0_6, %c0_7, %c0_8] : memref<5x64x16xbf16, #tpu.memory_space<vmem>>, vector<1x64x16xbf16>
    %9 = vector.shape_cast %8 : vector<1x64x16xbf16> to vector<64x16xbf16>
    %cst_9 = arith.constant dense<0.000000e+00> : vector<16x16xf32>
    %10 = tpu.matmul %7, %9, %cst_9 {dimension_numbers = #tpu.dot_dimension_numbers<[1], [0], [0], [1], [0, 0, 1, 1], [], []>} : vector<16x64xbf16>, vector<64x16xbf16>, vector<16x16xf32> -> vector<16x16xf32>
    %11 = arith.addf %6, %10 : vector<16x16xf32>
    %12 = vector.extract_strided_slice %5 {offsets = [2, 0], sizes = [16, 64], strides = [1, 1]} : vector<24x64xbf16> to vector<16x64xbf16>
    %c1 = arith.constant 1 : index
    %c0_10 = arith.constant 0 : index
    %c0_11 = arith.constant 0 : index
    %13 = vector.load %arg3[%c1, %c0_10, %c0_11] : memref<5x64x16xbf16, #tpu.memory_space<vmem>>, vector<1x64x16xbf16>
    %14 = vector.shape_cast %13 : vector<1x64x16xbf16> to vector<64x16xbf16>
    %cst_12 = arith.constant dense<0.000000e+00> : vector<16x16xf32>
    %15 = tpu.matmul %12, %14, %cst_12 {dimension_numbers = #tpu.dot_dimension_numbers<[1], [0], [0], [1], [0, 0, 1, 1], [], []>} : vector<16x64xbf16>, vector<64x16xbf16>, vector<16x16xf32> -> vector<16x16xf32>
    %16 = arith.addf %11, %15 : vector<16x16xf32>
    %17 = vector.extract_strided_slice %5 {offsets = [4, 0], sizes = [16, 64], strides = [1, 1]} : vector<24x64xbf16> to vector<16x64xbf16>
    %c2 = arith.constant 2 : index
    %c0_13 = arith.constant 0 : index
    %c0_14 = arith.constant 0 : index
    %18 = vector.load %arg3[%c2, %c0_13, %c0_14] : memref<5x64x16xbf16, #tpu.memory_space<vmem>>, vector<1x64x16xbf16>
    %19 = vector.shape_cast %18 : vector<1x64x16xbf16> to vector<64x16xbf16>
    %cst_15 = arith.constant dense<0.000000e+00> : vector<16x16xf32>
    %20 = tpu.matmul %17, %19, %cst_15 {dimension_numbers = #tpu.dot_dimension_numbers<[1], [0], [0], [1], [0, 0, 1, 1], [], []>} : vector<16x64xbf16>, vector<64x16xbf16>, vector<16x16xf32> -> vector<16x16xf32>
    %21 = arith.addf %16, %20 : vector<16x16xf32>
    %22 = vector.extract_strided_slice %5 {offsets = [6, 0], sizes = [16, 64], strides = [1, 1]} : vector<24x64xbf16> to vector<16x64xbf16>
    %c3 = arith.constant 3 : index
    %c0_16 = arith.constant 0 : index
    %c0_17 = arith.constant 0 : index
    %23 = vector.load %arg3[%c3, %c0_16, %c0_17] : memref<5x64x16xbf16, #tpu.memory_space<vmem>>, vector<1x64x16xbf16>
    %24 = vector.shape_cast %23 : vector<1x64x16xbf16> to vector<64x16xbf16>
    %cst_18 = arith.constant dense<0.000000e+00> : vector<16x16xf32>
    %25 = tpu.matmul %22, %24, %cst_18 {dimension_numbers = #tpu.dot_dimension_numbers<[1], [0], [0], [1], [0, 0, 1, 1], [], []>} : vector<16x64xbf16>, vector<64x16xbf16>, vector<16x16xf32> -> vector<16x16xf32>
    %26 = arith.addf %21, %25 : vector<16x16xf32>
    %27 = vector.extract_strided_slice %5 {offsets = [8, 0], sizes = [16, 64], strides = [1, 1]} : vector<24x64xbf16> to vector<16x64xbf16>
    %c4_19 = arith.constant 4 : index
    %c0_20 = arith.constant 0 : index
    %c0_21 = arith.constant 0 : index
    %28 = vector.load %arg3[%c4_19, %c0_20, %c0_21] : memref<5x64x16xbf16, #tpu.memory_space<vmem>>, vector<1x64x16xbf16>
    %29 = vector.shape_cast %28 : vector<1x64x16xbf16> to vector<64x16xbf16>
    %cst_22 = arith.constant dense<0.000000e+00> : vector<16x16xf32>
    %30 = tpu.matmul %27, %29, %cst_22 {dimension_numbers = #tpu.dot_dimension_numbers<[1], [0], [0], [1], [0, 0, 1, 1], [], []>} : vector<16x64xbf16>, vector<64x16xbf16>, vector<16x16xf32> -> vector<16x16xf32>
    %31 = arith.addf %26, %30 : vector<16x16xf32>
    %c0_23 = arith.constant 0 : index
    %c0_24 = arith.constant 0 : index
    %32 = vector.load %arg4[%c0_23, %c0_24] : memref<1x16xf32, #tpu.memory_space<vmem>>, vector<1x16xf32>
    %33 = vector.broadcast %32 : vector<1x16xf32> to vector<16x16xf32>
    %34 = arith.addf %31, %33 : vector<16x16xf32>
    %c0_25 = arith.constant 0 : index
    %c0_26 = arith.constant 0 : index
    %35 = vector.load %arg5[%c0_25, %c0_26] : memref<64x16xbf16, #tpu.memory_space<vmem>>, vector<64x16xbf16>
    %cst_27 = arith.constant dense<0.000000e+00> : vector<16x16xf32>
    %36 = tpu.matmul %0, %35, %cst_27 {dimension_numbers = #tpu.dot_dimension_numbers<[1], [0], [0], [1], [0, 0, 1, 1], [], []>} : vector<16x64xbf16>, vector<64x16xbf16>, vector<16x16xf32> -> vector<16x16xf32>
    %c0_28 = arith.constant 0 : index
    %c0_29 = arith.constant 0 : index
    %37 = vector.load %arg6[%c0_28, %c0_29] : memref<1x16xf32, #tpu.memory_space<vmem>>, vector<1x16xf32>
    %38 = vector.broadcast %37 : vector<1x16xf32> to vector<16x16xf32>
    %39 = arith.addf %36, %38 : vector<16x16xf32>
    %cst_30 = arith.constant 0.000000e+00 : f32
    %40 = vector.broadcast %cst_30 : f32 to vector<16x16xf32>
    %41 = arith.cmpf oge, %34, %40 : vector<16x16xf32>
    %cst_31 = arith.constant 2.000000e-01 : f32
    %42 = vector.broadcast %cst_31 : f32 to vector<16x16xf32>
    %43 = arith.mulf %42, %34 : vector<16x16xf32>
    %44 = arith.select %41, %34, %43 : vector<16x16xi1>, vector<16x16xf32>
    %cst_32 = arith.constant 0.000000e+00 : f32
    %45 = vector.broadcast %cst_32 : f32 to vector<16x16xf32>
    %46 = arith.cmpf oge, %39, %45 : vector<16x16xf32>
    %cst_33 = arith.constant 2.000000e-01 : f32
    %47 = vector.broadcast %cst_33 : f32 to vector<16x16xf32>
    %48 = arith.mulf %47, %39 : vector<16x16xf32>
    %49 = arith.select %46, %39, %48 : vector<16x16xi1>, vector<16x16xf32>
    %c0_34 = arith.constant 0 : index
    %c0_35 = arith.constant 0 : index
    %50 = vector.load %arg7[%c0_34, %c0_35] : memref<16x32xf32, #tpu.memory_space<vmem>>, vector<16x16xf32>
    tpu.vector_store %arg7[%c0_34, %c0_35], %44 {strides = array<i32>} : memref<16x32xf32, #tpu.memory_space<vmem>>, vector<16x16xf32>,
    %c0_36 = arith.constant 0 : index
    %c16 = arith.constant 16 : index
    %51 = vector.load %arg7[%c0_36, %c16] : memref<16x32xf32, #tpu.memory_space<vmem>>, vector<16x16xf32>
    tpu.vector_store %arg7[%c0_36, %c16], %49 {strides = array<i32>} : memref<16x32xf32, #tpu.memory_space<vmem>>, vector<16x16xf32>,
    return
  }
  func.func @transform_0(%arg0: i32) -> (i32, i32) {
    %c0_i32 = arith.constant 0 : i32
    %c0_i32_0 = arith.constant 0 : i32
    return %arg0, %c0_i32 : i32, i32
  }
  func.func @transform_1(%arg0: i32) -> (i32, i32, i32) {
    %c0_i32 = arith.constant 0 : i32
    %c0_i32_0 = arith.constant 0 : i32
    %c0_i32_1 = arith.constant 0 : i32
    return %arg0, %c0_i32, %c0_i32_0 : i32, i32, i32
  }
  func.func @transform_2(%arg0: i32) -> (i32, i32, i32) {
    %c0_i32 = arith.constant 0 : i32
    %c0_i32_0 = arith.constant 0 : i32
    %c0_i32_1 = arith.constant 0 : i32
    %c0_i32_2 = arith.constant 0 : i32
    return %c0_i32, %c0_i32_0, %c0_i32_1 : i32, i32, i32
  }
  func.func @transform_3(%arg0: i32) -> (i32, i32) {
    %c0_i32 = arith.constant 0 : i32
    %c0_i32_0 = arith.constant 0 : i32
    %c0_i32_1 = arith.constant 0 : i32
    return %c0_i32, %c0_i32_0 : i32, i32
  }
  func.func @transform_4(%arg0: i32) -> (i32, i32) {
    %c0_i32 = arith.constant 0 : i32
    %c0_i32_0 = arith.constant 0 : i32
    %c0_i32_1 = arith.constant 0 : i32
    return %c0_i32, %c0_i32_0 : i32, i32
  }
  func.func @transform_5(%arg0: i32) -> (i32, i32) {
    %c0_i32 = arith.constant 0 : i32
    %c0_i32_0 = arith.constant 0 : i32
    %c0_i32_1 = arith.constant 0 : i32
    return %c0_i32, %c0_i32_0 : i32, i32
  }
  func.func @transform_6(%arg0: i32) -> (i32, i32) {
    %c0_i32 = arith.constant 0 : i32
    %c0_i32_0 = arith.constant 0 : i32
    return %arg0, %c0_i32 : i32, i32
  }
}

module attributes {stable_mosaic.version = 11 : i64} {
  func.func @kernel(%arg0: i32, %arg1: memref<16x32xbf16, #tpu.memory_space<vmem>>, %arg2: memref<1x8x32xbf16, #tpu.memory_space<vmem>>, %arg3: memref<5x32x16xbf16, #tpu.memory_space<vmem>>, %arg4: memref<1x16xf32, #tpu.memory_space<vmem>>, %arg5: memref<32x16xbf16, #tpu.memory_space<vmem>>, %arg6: memref<1x16xf32, #tpu.memory_space<vmem>>, %arg7: memref<16x32xf32, #tpu.memory_space<vmem>>) attributes {dimension_semantics = [#tpu.dimension_semantics<parallel>], iteration_bounds = array<i64: 1>, scalar_prefetch = 0 : i64, scratch_operands = 0 : i64, tpu.core_type = #tpu.core_type<tc>, window_params = [{transform_indices = @transform_0, window_bounds = array<i64: 16, 32>}, {transform_indices = @transform_1, window_bounds = array<i64: 1, 8, 32>}, {pipeline_mode = #tpu.pipeline_mode<synchronous>, transform_indices = @transform_2, window_bounds = array<i64: 5, 32, 16>}, {pipeline_mode = #tpu.pipeline_mode<synchronous>, transform_indices = @transform_3, window_bounds = array<i64: 1, 16>}, {pipeline_mode = #tpu.pipeline_mode<synchronous>, transform_indices = @transform_4, window_bounds = array<i64: 32, 16>}, {pipeline_mode = #tpu.pipeline_mode<synchronous>, transform_indices = @transform_5, window_bounds = array<i64: 1, 16>}, {transform_indices = @transform_6, window_bounds = array<i64: 16, 32>}]} {
    %c0 = arith.constant 0 : index
    %c0_0 = arith.constant 0 : index
    %0 = vector.load %arg1[%c0, %c0_0] : memref<16x32xbf16, #tpu.memory_space<vmem>>, vector<16x32xbf16>
    %c0_1 = arith.constant 0 : index
    %c0_2 = arith.constant 0 : index
    %c0_3 = arith.constant 0 : index
    %1 = vector.load %arg2[%c0_1, %c0_2, %c0_3] : memref<1x8x32xbf16, #tpu.memory_space<vmem>>, vector<1x4x32xbf16>
    %2 = vector.shape_cast %1 : vector<1x4x32xbf16> to vector<4x32xbf16>
    %c0_4 = arith.constant 0 : index
    %c4 = arith.constant 4 : index
    %c0_5 = arith.constant 0 : index
    %3 = vector.load %arg2[%c0_4, %c4, %c0_5] : memref<1x8x32xbf16, #tpu.memory_space<vmem>>, vector<1x4x32xbf16>
    %4 = vector.shape_cast %3 : vector<1x4x32xbf16> to vector<4x32xbf16>
    %5 = tpu.concatenate %2, %0, %4 in 0 : vector<4x32xbf16>, vector<16x32xbf16>, vector<4x32xbf16> -> vector<24x32xbf16>
    %cst = arith.constant 0.000000e+00 : f32
    %6 = vector.broadcast %cst : f32 to vector<16x16xf32>
    %7 = vector.extract_strided_slice %5 {offsets = [0, 0], sizes = [16, 32], strides = [1, 1]} : vector<24x32xbf16> to vector<16x32xbf16>
    %c0_6 = arith.constant 0 : index
    %c0_7 = arith.constant 0 : index
    %c0_8 = arith.constant 0 : index
    %8 = vector.load %arg3[%c0_6, %c0_7, %c0_8] : memref<5x32x16xbf16, #tpu.memory_space<vmem>>, vector<1x32x16xbf16>
    %9 = vector.shape_cast %8 : vector<1x32x16xbf16> to vector<32x16xbf16>
    %cst_9 = arith.constant dense<0.000000e+00> : vector<16x16xf32>
    %10 = tpu.matmul %7, %9, %cst_9 {dimension_numbers = #tpu.dot_dimension_numbers<[1], [0], [0], [1], [0, 0, 1, 1], [], []>} : vector<16x32xbf16>, vector<32x16xbf16>, vector<16x16xf32> -> vector<16x16xf32>
    %11 = arith.addf %6, %10 : vector<16x16xf32>
    %12 = vector.extract_strided_slice %5 {offsets = [2, 0], sizes = [16, 32], strides = [1, 1]} : vector<24x32xbf16> to vector<16x32xbf16>
    %c1 = arith.constant 1 : index
    %c0_10 = arith.constant 0 : index
    %c0_11 = arith.constant 0 : index
    %13 = vector.load %arg3[%c1, %c0_10, %c0_11] : memref<5x32x16xbf16, #tpu.memory_space<vmem>>, vector<1x32x16xbf16>
    %14 = vector.shape_cast %13 : vector<1x32x16xbf16> to vector<32x16xbf16>
    %cst_12 = arith.constant dense<0.000000e+00> : vector<16x16xf32>
    %15 = tpu.matmul %12, %14, %cst_12 {dimension_numbers = #tpu.dot_dimension_numbers<[1], [0], [0], [1], [0, 0, 1, 1], [], []>} : vector<16x32xbf16>, vector<32x16xbf16>, vector<16x16xf32> -> vector<16x16xf32>
    %16 = arith.addf %11, %15 : vector<16x16xf32>
    %17 = vector.extract_strided_slice %5 {offsets = [4, 0], sizes = [16, 32], strides = [1, 1]} : vector<24x32xbf16> to vector<16x32xbf16>
    %c2 = arith.constant 2 : index
    %c0_13 = arith.constant 0 : index
    %c0_14 = arith.constant 0 : index
    %18 = vector.load %arg3[%c2, %c0_13, %c0_14] : memref<5x32x16xbf16, #tpu.memory_space<vmem>>, vector<1x32x16xbf16>
    %19 = vector.shape_cast %18 : vector<1x32x16xbf16> to vector<32x16xbf16>
    %cst_15 = arith.constant dense<0.000000e+00> : vector<16x16xf32>
    %20 = tpu.matmul %17, %19, %cst_15 {dimension_numbers = #tpu.dot_dimension_numbers<[1], [0], [0], [1], [0, 0, 1, 1], [], []>} : vector<16x32xbf16>, vector<32x16xbf16>, vector<16x16xf32> -> vector<16x16xf32>
    %21 = arith.addf %16, %20 : vector<16x16xf32>
    %22 = vector.extract_strided_slice %5 {offsets = [6, 0], sizes = [16, 32], strides = [1, 1]} : vector<24x32xbf16> to vector<16x32xbf16>
    %c3 = arith.constant 3 : index
    %c0_16 = arith.constant 0 : index
    %c0_17 = arith.constant 0 : index
    %23 = vector.load %arg3[%c3, %c0_16, %c0_17] : memref<5x32x16xbf16, #tpu.memory_space<vmem>>, vector<1x32x16xbf16>
    %24 = vector.shape_cast %23 : vector<1x32x16xbf16> to vector<32x16xbf16>
    %cst_18 = arith.constant dense<0.000000e+00> : vector<16x16xf32>
    %25 = tpu.matmul %22, %24, %cst_18 {dimension_numbers = #tpu.dot_dimension_numbers<[1], [0], [0], [1], [0, 0, 1, 1], [], []>} : vector<16x32xbf16>, vector<32x16xbf16>, vector<16x16xf32> -> vector<16x16xf32>
    %26 = arith.addf %21, %25 : vector<16x16xf32>
    %27 = vector.extract_strided_slice %5 {offsets = [8, 0], sizes = [16, 32], strides = [1, 1]} : vector<24x32xbf16> to vector<16x32xbf16>
    %c4_19 = arith.constant 4 : index
    %c0_20 = arith.constant 0 : index
    %c0_21 = arith.constant 0 : index
    %28 = vector.load %arg3[%c4_19, %c0_20, %c0_21] : memref<5x32x16xbf16, #tpu.memory_space<vmem>>, vector<1x32x16xbf16>
    %29 = vector.shape_cast %28 : vector<1x32x16xbf16> to vector<32x16xbf16>
    %cst_22 = arith.constant dense<0.000000e+00> : vector<16x16xf32>
    %30 = tpu.matmul %27, %29, %cst_22 {dimension_numbers = #tpu.dot_dimension_numbers<[1], [0], [0], [1], [0, 0, 1, 1], [], []>} : vector<16x32xbf16>, vector<32x16xbf16>, vector<16x16xf32> -> vector<16x16xf32>
    %31 = arith.addf %26, %30 : vector<16x16xf32>
    %c0_23 = arith.constant 0 : index
    %c0_24 = arith.constant 0 : index
    %32 = vector.load %arg4[%c0_23, %c0_24] : memref<1x16xf32, #tpu.memory_space<vmem>>, vector<1x16xf32>
    %33 = vector.broadcast %32 : vector<1x16xf32> to vector<16x16xf32>
    %34 = arith.addf %31, %33 : vector<16x16xf32>
    %c0_25 = arith.constant 0 : index
    %c0_26 = arith.constant 0 : index
    %35 = vector.load %arg5[%c0_25, %c0_26] : memref<32x16xbf16, #tpu.memory_space<vmem>>, vector<32x16xbf16>
    %cst_27 = arith.constant dense<0.000000e+00> : vector<16x16xf32>
    %36 = tpu.matmul %0, %35, %cst_27 {dimension_numbers = #tpu.dot_dimension_numbers<[1], [0], [0], [1], [0, 0, 1, 1], [], []>} : vector<16x32xbf16>, vector<32x16xbf16>, vector<16x16xf32> -> vector<16x16xf32>
    %c0_28 = arith.constant 0 : index
    %c0_29 = arith.constant 0 : index
    %37 = vector.load %arg6[%c0_28, %c0_29] : memref<1x16xf32, #tpu.memory_space<vmem>>, vector<1x16xf32>
    %38 = vector.broadcast %37 : vector<1x16xf32> to vector<16x16xf32>
    %39 = arith.addf %36, %38 : vector<16x16xf32>
    %cst_30 = arith.constant 0.000000e+00 : f32
    %40 = vector.broadcast %cst_30 : f32 to vector<16x16xf32>
    %41 = arith.cmpf oge, %34, %40 : vector<16x16xf32>
    %cst_31 = arith.constant 2.000000e-01 : f32
    %42 = vector.broadcast %cst_31 : f32 to vector<16x16xf32>
    %43 = arith.mulf %42, %34 : vector<16x16xf32>
    %44 = arith.select %41, %34, %43 : vector<16x16xi1>, vector<16x16xf32>
    %cst_32 = arith.constant 0.000000e+00 : f32
    %45 = vector.broadcast %cst_32 : f32 to vector<16x16xf32>
    %46 = arith.cmpf oge, %39, %45 : vector<16x16xf32>
    %cst_33 = arith.constant 2.000000e-01 : f32
    %47 = vector.broadcast %cst_33 : f32 to vector<16x16xf32>
    %48 = arith.mulf %47, %39 : vector<16x16xf32>
    %49 = arith.select %46, %39, %48 : vector<16x16xi1>, vector<16x16xf32>
    %c0_34 = arith.constant 0 : index
    %c0_35 = arith.constant 0 : index
    %50 = vector.load %arg7[%c0_34, %c0_35] : memref<16x32xf32, #tpu.memory_space<vmem>>, vector<16x16xf32>
    tpu.vector_store %arg7[%c0_34, %c0_35], %44 {strides = array<i32>} : memref<16x32xf32, #tpu.memory_space<vmem>>, vector<16x16xf32>,
    %c0_36 = arith.constant 0 : index
    %c16 = arith.constant 16 : index
    %51 = vector.load %arg7[%c0_36, %c16] : memref<16x32xf32, #tpu.memory_space<vmem>>, vector<16x16xf32>
    tpu.vector_store %arg7[%c0_36, %c16], %49 {strides = array<i32>} : memref<16x32xf32, #tpu.memory_space<vmem>>, vector<16x16xf32>,
    return
  }
  func.func @transform_0(%arg0: i32) -> (i32, i32) {
    %c0_i32 = arith.constant 0 : i32
    %c0_i32_0 = arith.constant 0 : i32
    return %arg0, %c0_i32 : i32, i32
  }
  func.func @transform_1(%arg0: i32) -> (i32, i32, i32) {
    %c0_i32 = arith.constant 0 : i32
    %c0_i32_0 = arith.constant 0 : i32
    %c0_i32_1 = arith.constant 0 : i32
    return %arg0, %c0_i32, %c0_i32_0 : i32, i32, i32
  }
  func.func @transform_2(%arg0: i32) -> (i32, i32, i32) {
    %c0_i32 = arith.constant 0 : i32
    %c0_i32_0 = arith.constant 0 : i32
    %c0_i32_1 = arith.constant 0 : i32
    %c0_i32_2 = arith.constant 0 : i32
    return %c0_i32, %c0_i32_0, %c0_i32_1 : i32, i32, i32
  }
  func.func @transform_3(%arg0: i32) -> (i32, i32) {
    %c0_i32 = arith.constant 0 : i32
    %c0_i32_0 = arith.constant 0 : i32
    %c0_i32_1 = arith.constant 0 : i32
    return %c0_i32, %c0_i32_0 : i32, i32
  }
  func.func @transform_4(%arg0: i32) -> (i32, i32) {
    %c0_i32 = arith.constant 0 : i32
    %c0_i32_0 = arith.constant 0 : i32
    %c0_i32_1 = arith.constant 0 : i32
    return %c0_i32, %c0_i32_0 : i32, i32
  }
  func.func @transform_5(%arg0: i32) -> (i32, i32) {
    %c0_i32 = arith.constant 0 : i32
    %c0_i32_0 = arith.constant 0 : i32
    %c0_i32_1 = arith.constant 0 : i32
    return %c0_i32, %c0_i32_0 : i32, i32
  }
  func.func @transform_6(%arg0: i32) -> (i32, i32) {
    %c0_i32 = arith.constant 0 : i32
    %c0_i32_0 = arith.constant 0 : i32
    return %arg0, %c0_i32 : i32, i32
  }
}

module attributes {stable_mosaic.version = 11 : i64} {
  func.func @kernel(%arg0: i32, %arg1: memref<8x64xf32, #tpu.memory_space<vmem>>, %arg2: memref<1x2x64xf32, #tpu.memory_space<vmem>>, %arg3: memref<8x128xf32, #tpu.memory_space<vmem>>, %arg4: memref<8x128xf32, #tpu.memory_space<vmem>>) attributes {dimension_semantics = [#tpu.dimension_semantics<parallel>], iteration_bounds = array<i64: 1>, scalar_prefetch = 0 : i64, scratch_operands = 0 : i64, tpu.core_type = #tpu.core_type<tc>, window_params = [{transform_indices = @transform_0, window_bounds = array<i64: 8, 64>}, {transform_indices = @transform_1, window_bounds = array<i64: 1, 2, 64>}, {transform_indices = @transform_2, window_bounds = array<i64: 8, 128>}, {transform_indices = @transform_3, window_bounds = array<i64: 8, 128>}]} {
    %c0 = arith.constant 0 : index
    %c0_0 = arith.constant 0 : index
    %0 = vector.load %arg1[%c0, %c0_0] : memref<8x64xf32, #tpu.memory_space<vmem>>, vector<8x64xf32>
    %c0_1 = arith.constant 0 : index
    %c0_2 = arith.constant 0 : index
    %c0_3 = arith.constant 0 : index
    %1 = vector.load %arg2[%c0_1, %c0_2, %c0_3] : memref<1x2x64xf32, #tpu.memory_space<vmem>>, vector<1x1x64xf32>
    %2 = vector.shape_cast %1 : vector<1x1x64xf32> to vector<1x64xf32>
    %3 = vector.extract_strided_slice %0 {offsets = [0, 0], sizes = [7, 64], strides = [1, 1]} : vector<8x64xf32> to vector<7x64xf32>
    %4 = tpu.concatenate %2, %3 in 0 : vector<1x64xf32>, vector<7x64xf32> -> vector<8x64xf32>
    %5 = vector.extract_strided_slice %0 {offsets = [1, 0], sizes = [7, 64], strides = [1, 1]} : vector<8x64xf32> to vector<7x64xf32>
    %c0_4 = arith.constant 0 : index
    %c1 = arith.constant 1 : index
    %c0_5 = arith.constant 0 : index
    %6 = vector.load %arg2[%c0_4, %c1, %c0_5] : memref<1x2x64xf32, #tpu.memory_space<vmem>>, vector<1x1x64xf32>
    %7 = vector.shape_cast %6 : vector<1x1x64xf32> to vector<1x64xf32>
    %8 = tpu.concatenate %5, %7 in 0 : vector<7x64xf32>, vector<1x64xf32> -> vector<8x64xf32>
    %c8_i32 = arith.constant 8 : i32
    %9 = arith.muli %arg0, %c8_i32 : i32
    %10 = arith.sitofp %9 : i32 to f32
    %11 = tpu.iota {dimensions = array<i32: 0>} : vector<8x1xi32>
    %12 = arith.sitofp %11 : vector<8x1xi32> to vector<8x1xf32>
    %13 = vector.broadcast %10 : f32 to vector<8x1xf32>
    %14 = arith.addf %12, %13 : vector<8x1xf32>
    %cst = arith.constant 0.0666666701 : f32
    %15 = vector.broadcast %cst : f32 to vector<8x1xf32>
    %16 = arith.mulf %14, %15 : vector<8x1xf32>
    %cst_6 = arith.constant 1.000000e+00 : f32
    %17 = vector.broadcast %cst_6 : f32 to vector<8x1xf32>
    %18 = arith.subf %17, %16 : vector<8x1xf32>
    %cst_7 = arith.constant 8.000000e+00 : f32
    %19 = vector.broadcast %cst_7 : f32 to vector<8x1xf32>
    %20 = arith.addf %19, %14 : vector<8x1xf32>
    %cst_8 = arith.constant 0.0666666701 : f32
    %21 = vector.broadcast %cst_8 : f32 to vector<8x1xf32>
    %22 = arith.mulf %20, %21 : vector<8x1xf32>
    %cst_9 = arith.constant 7.000000e+00 : f32
    %23 = vector.broadcast %cst_9 : f32 to vector<8x1xf32>
    %24 = arith.subf %23, %14 : vector<8x1xf32>
    %cst_10 = arith.constant 0.0666666701 : f32
    %25 = vector.broadcast %cst_10 : f32 to vector<8x1xf32>
    %26 = arith.mulf %24, %25 : vector<8x1xf32>
    %c0_11 = arith.constant 0 : index
    %c0_12 = arith.constant 0 : index
    %27 = vector.load %arg3[%c0_11, %c0_12] : memref<8x128xf32, #tpu.memory_space<vmem>>, vector<8x128xf32>
    %28 = vector.broadcast %16 : vector<8x1xf32> to vector<8x64xf32>
    %29 = arith.mulf %28, %4 : vector<8x64xf32>
    %30 = vector.broadcast %18 : vector<8x1xf32> to vector<8x64xf32>
    %31 = arith.mulf %30, %0 : vector<8x64xf32>
    %32 = arith.addf %29, %31 : vector<8x64xf32>
    %33 = vector.extract_strided_slice %27 {offsets = [0, 0], sizes = [8, 64], strides = [1, 1]} : vector<8x128xf32> to vector<8x64xf32>
    %34 = arith.addf %32, %33 : vector<8x64xf32>
    %c0_13 = arith.constant 0 : index
    %c0_14 = arith.constant 0 : index
    %35 = vector.load %arg4[%c0_13, %c0_14] : memref<8x128xf32, #tpu.memory_space<vmem>>, vector<8x64xf32>
    tpu.vector_store %arg4[%c0_13, %c0_14], %34 {strides = array<i32>} : memref<8x128xf32, #tpu.memory_space<vmem>>, vector<8x64xf32>,
    %36 = vector.broadcast %22 : vector<8x1xf32> to vector<8x64xf32>
    %37 = arith.mulf %36, %0 : vector<8x64xf32>
    %38 = vector.broadcast %26 : vector<8x1xf32> to vector<8x64xf32>
    %39 = arith.mulf %38, %8 : vector<8x64xf32>
    %40 = arith.addf %37, %39 : vector<8x64xf32>
    %41 = vector.extract_strided_slice %27 {offsets = [0, 64], sizes = [8, 64], strides = [1, 1]} : vector<8x128xf32> to vector<8x64xf32>
    %42 = arith.addf %40, %41 : vector<8x64xf32>
    %c0_15 = arith.constant 0 : index
    %c64 = arith.constant 64 : index
    %43 = vector.load %arg4[%c0_15, %c64] : memref<8x128xf32, #tpu.memory_space<vmem>>, vector<8x64xf32>
    tpu.vector_store %arg4[%c0_15, %c64], %42 {strides = array<i32>} : memref<8x128xf32, #tpu.memory_space<vmem>>, vector<8x64xf32>,
    return
  }
  func.func @transform_0(%arg0: i32) -> (i32, i32) {
    %c0_i32 = arith.constant 0 : i32
    %c0_i32_0 = arith.constant 0 : i32
    return %arg0, %c0_i32 : i32, i32
  }
  func.func @transform_1(%arg0: i32) -> (i32, i32, i32) {
    %c0_i32 = arith.constant 0 : i32
    %c0_i32_0 = arith.constant 0 : i32
    %c0_i32_1 = arith.constant 0 : i32
    return %arg0, %c0_i32, %c0_i32_0 : i32, i32, i32
  }
  func.func @transform_2(%arg0: i32) -> (i32, i32) {
    %c0_i32 = arith.constant 0 : i32
    %c0_i32_0 = arith.constant 0 : i32
    return %arg0, %c0_i32 : i32, i32
  }
  func.func @transform_3(%arg0: i32) -> (i32, i32) {
    %c0_i32 = arith.constant 0 : i32
    %c0_i32_0 = arith.constant 0 : i32
    return %arg0, %c0_i32 : i32, i32
  }
}

module attributes {stable_mosaic.version = 11 : i64} {
  func.func @kernel(%arg0: i32, %arg1: memref<32x32xbf16, #tpu.memory_space<vmem>>, %arg2: memref<1x8x32xbf16, #tpu.memory_space<vmem>>, %arg3: memref<5x32x64xbf16, #tpu.memory_space<vmem>>, %arg4: memref<1x64xf32, #tpu.memory_space<vmem>>, %arg5: memref<32x64xbf16, #tpu.memory_space<vmem>>, %arg6: memref<1x64xf32, #tpu.memory_space<vmem>>, %arg7: memref<32x64xf32, #tpu.memory_space<vmem>>) attributes {dimension_semantics = [#tpu.dimension_semantics<parallel>], iteration_bounds = array<i64: 1>, scalar_prefetch = 0 : i64, scratch_operands = 0 : i64, tpu.core_type = #tpu.core_type<tc>, window_params = [{transform_indices = @transform_0, window_bounds = array<i64: 32, 32>}, {transform_indices = @transform_1, window_bounds = array<i64: 1, 8, 32>}, {pipeline_mode = #tpu.pipeline_mode<synchronous>, transform_indices = @transform_2, window_bounds = array<i64: 5, 32, 64>}, {pipeline_mode = #tpu.pipeline_mode<synchronous>, transform_indices = @transform_3, window_bounds = array<i64: 1, 64>}, {pipeline_mode = #tpu.pipeline_mode<synchronous>, transform_indices = @transform_4, window_bounds = array<i64: 32, 64>}, {pipeline_mode = #tpu.pipeline_mode<synchronous>, transform_indices = @transform_5, window_bounds = array<i64: 1, 64>}, {transform_indices = @transform_6, window_bounds = array<i64: 32, 64>}]} {
    %c0 = arith.constant 0 : index
    %c0_0 = arith.constant 0 : index
    %0 = vector.load %arg1[%c0, %c0_0] : memref<32x32xbf16, #tpu.memory_space<vmem>>, vector<32x32xbf16>
    %c0_1 = arith.constant 0 : index
    %c0_2 = arith.constant 0 : index
    %c0_3 = arith.constant 0 : index
    %1 = vector.load %arg2[%c0_1, %c0_2, %c0_3] : memref<1x8x32xbf16, #tpu.memory_space<vmem>>, vector<1x4x32xbf16>
    %2 = vector.shape_cast %1 : vector<1x4x32xbf16> to vector<4x32xbf16>
    %c0_4 = arith.constant 0 : index
    %c4 = arith.constant 4 : index
    %c0_5 = arith.constant 0 : index
    %3 = vector.load %arg2[%c0_4, %c4, %c0_5] : memref<1x8x32xbf16, #tpu.memory_space<vmem>>, vector<1x4x32xbf16>
    %4 = vector.shape_cast %3 : vector<1x4x32xbf16> to vector<4x32xbf16>
    %5 = tpu.concatenate %2, %0, %4 in 0 : vector<4x32xbf16>, vector<32x32xbf16>, vector<4x32xbf16> -> vector<40x32xbf16>
    %cst = arith.constant 0.000000e+00 : f32
    %6 = vector.broadcast %cst : f32 to vector<32x64xf32>
    %7 = vector.extract_strided_slice %5 {offsets = [0, 0], sizes = [32, 32], strides = [1, 1]} : vector<40x32xbf16> to vector<32x32xbf16>
    %c0_6 = arith.constant 0 : index
    %c0_7 = arith.constant 0 : index
    %c0_8 = arith.constant 0 : index
    %8 = vector.load %arg3[%c0_6, %c0_7, %c0_8] : memref<5x32x64xbf16, #tpu.memory_space<vmem>>, vector<1x32x64xbf16>
    %9 = vector.shape_cast %8 : vector<1x32x64xbf16> to vector<32x64xbf16>
    %cst_9 = arith.constant dense<0.000000e+00> : vector<32x64xf32>
    %10 = tpu.matmul %7, %9, %cst_9 {dimension_numbers = #tpu.dot_dimension_numbers<[1], [0], [0], [1], [0, 0, 1, 1], [], []>} : vector<32x32xbf16>, vector<32x64xbf16>, vector<32x64xf32> -> vector<32x64xf32>
    %11 = arith.addf %6, %10 : vector<32x64xf32>
    %12 = vector.extract_strided_slice %5 {offsets = [2, 0], sizes = [32, 32], strides = [1, 1]} : vector<40x32xbf16> to vector<32x32xbf16>
    %c1 = arith.constant 1 : index
    %c0_10 = arith.constant 0 : index
    %c0_11 = arith.constant 0 : index
    %13 = vector.load %arg3[%c1, %c0_10, %c0_11] : memref<5x32x64xbf16, #tpu.memory_space<vmem>>, vector<1x32x64xbf16>
    %14 = vector.shape_cast %13 : vector<1x32x64xbf16> to vector<32x64xbf16>
    %cst_12 = arith.constant dense<0.000000e+00> : vector<32x64xf32>
    %15 = tpu.matmul %12, %14, %cst_12 {dimension_numbers = #tpu.dot_dimension_numbers<[1], [0], [0], [1], [0, 0, 1, 1], [], []>} : vector<32x32xbf16>, vector<32x64xbf16>, vector<32x64xf32> -> vector<32x64xf32>
    %16 = arith.addf %11, %15 : vector<32x64xf32>
    %17 = vector.extract_strided_slice %5 {offsets = [4, 0], sizes = [32, 32], strides = [1, 1]} : vector<40x32xbf16> to vector<32x32xbf16>
    %c2 = arith.constant 2 : index
    %c0_13 = arith.constant 0 : index
    %c0_14 = arith.constant 0 : index
    %18 = vector.load %arg3[%c2, %c0_13, %c0_14] : memref<5x32x64xbf16, #tpu.memory_space<vmem>>, vector<1x32x64xbf16>
    %19 = vector.shape_cast %18 : vector<1x32x64xbf16> to vector<32x64xbf16>
    %cst_15 = arith.constant dense<0.000000e+00> : vector<32x64xf32>
    %20 = tpu.matmul %17, %19, %cst_15 {dimension_numbers = #tpu.dot_dimension_numbers<[1], [0], [0], [1], [0, 0, 1, 1], [], []>} : vector<32x32xbf16>, vector<32x64xbf16>, vector<32x64xf32> -> vector<32x64xf32>
    %21 = arith.addf %16, %20 : vector<32x64xf32>
    %22 = vector.extract_strided_slice %5 {offsets = [6, 0], sizes = [32, 32], strides = [1, 1]} : vector<40x32xbf16> to vector<32x32xbf16>
    %c3 = arith.constant 3 : index
    %c0_16 = arith.constant 0 : index
    %c0_17 = arith.constant 0 : index
    %23 = vector.load %arg3[%c3, %c0_16, %c0_17] : memref<5x32x64xbf16, #tpu.memory_space<vmem>>, vector<1x32x64xbf16>
    %24 = vector.shape_cast %23 : vector<1x32x64xbf16> to vector<32x64xbf16>
    %cst_18 = arith.constant dense<0.000000e+00> : vector<32x64xf32>
    %25 = tpu.matmul %22, %24, %cst_18 {dimension_numbers = #tpu.dot_dimension_numbers<[1], [0], [0], [1], [0, 0, 1, 1], [], []>} : vector<32x32xbf16>, vector<32x64xbf16>, vector<32x64xf32> -> vector<32x64xf32>
    %26 = arith.addf %21, %25 : vector<32x64xf32>
    %27 = vector.extract_strided_slice %5 {offsets = [8, 0], sizes = [32, 32], strides = [1, 1]} : vector<40x32xbf16> to vector<32x32xbf16>
    %c4_19 = arith.constant 4 : index
    %c0_20 = arith.constant 0 : index
    %c0_21 = arith.constant 0 : index
    %28 = vector.load %arg3[%c4_19, %c0_20, %c0_21] : memref<5x32x64xbf16, #tpu.memory_space<vmem>>, vector<1x32x64xbf16>
    %29 = vector.shape_cast %28 : vector<1x32x64xbf16> to vector<32x64xbf16>
    %cst_22 = arith.constant dense<0.000000e+00> : vector<32x64xf32>
    %30 = tpu.matmul %27, %29, %cst_22 {dimension_numbers = #tpu.dot_dimension_numbers<[1], [0], [0], [1], [0, 0, 1, 1], [], []>} : vector<32x32xbf16>, vector<32x64xbf16>, vector<32x64xf32> -> vector<32x64xf32>
    %31 = arith.addf %26, %30 : vector<32x64xf32>
    %c0_23 = arith.constant 0 : index
    %c0_24 = arith.constant 0 : index
    %32 = vector.load %arg4[%c0_23, %c0_24] : memref<1x64xf32, #tpu.memory_space<vmem>>, vector<1x64xf32>
    %33 = vector.broadcast %32 : vector<1x64xf32> to vector<32x64xf32>
    %34 = arith.addf %31, %33 : vector<32x64xf32>
    %c0_25 = arith.constant 0 : index
    %c0_26 = arith.constant 0 : index
    %35 = vector.load %arg5[%c0_25, %c0_26] : memref<32x64xbf16, #tpu.memory_space<vmem>>, vector<32x64xbf16>
    %cst_27 = arith.constant dense<0.000000e+00> : vector<32x64xf32>
    %36 = tpu.matmul %0, %35, %cst_27 {dimension_numbers = #tpu.dot_dimension_numbers<[1], [0], [0], [1], [0, 0, 1, 1], [], []>} : vector<32x32xbf16>, vector<32x64xbf16>, vector<32x64xf32> -> vector<32x64xf32>
    %c0_28 = arith.constant 0 : index
    %c0_29 = arith.constant 0 : index
    %37 = vector.load %arg6[%c0_28, %c0_29] : memref<1x64xf32, #tpu.memory_space<vmem>>, vector<1x64xf32>
    %38 = vector.broadcast %37 : vector<1x64xf32> to vector<32x64xf32>
    %39 = arith.addf %36, %38 : vector<32x64xf32>
    %40 = arith.addf %34, %39 : vector<32x64xf32>
    %cst_30 = arith.constant 0.000000e+00 : f32
    %41 = vector.broadcast %cst_30 : f32 to vector<32x64xf32>
    %42 = arith.cmpf oge, %40, %41 : vector<32x64xf32>
    %cst_31 = arith.constant 2.000000e-01 : f32
    %43 = vector.broadcast %cst_31 : f32 to vector<32x64xf32>
    %44 = arith.mulf %43, %40 : vector<32x64xf32>
    %45 = arith.select %42, %40, %44 : vector<32x64xi1>, vector<32x64xf32>
    %c0_32 = arith.constant 0 : index
    %c0_33 = arith.constant 0 : index
    %46 = vector.load %arg7[%c0_32, %c0_33] : memref<32x64xf32, #tpu.memory_space<vmem>>, vector<32x64xf32>
    tpu.vector_store %arg7[%c0_32, %c0_33], %45 {strides = array<i32>} : memref<32x64xf32, #tpu.memory_space<vmem>>, vector<32x64xf32>,
    return
  }
  func.func @transform_0(%arg0: i32) -> (i32, i32) {
    %c0_i32 = arith.constant 0 : i32
    %c0_i32_0 = arith.constant 0 : i32
    return %arg0, %c0_i32 : i32, i32
  }
  func.func @transform_1(%arg0: i32) -> (i32, i32, i32) {
    %c0_i32 = arith.constant 0 : i32
    %c0_i32_0 = arith.constant 0 : i32
    %c0_i32_1 = arith.constant 0 : i32
    return %arg0, %c0_i32, %c0_i32_0 : i32, i32, i32
  }
  func.func @transform_2(%arg0: i32) -> (i32, i32, i32) {
    %c0_i32 = arith.constant 0 : i32
    %c0_i32_0 = arith.constant 0 : i32
    %c0_i32_1 = arith.constant 0 : i32
    %c0_i32_2 = arith.constant 0 : i32
    return %c0_i32, %c0_i32_0, %c0_i32_1 : i32, i32, i32
  }
  func.func @transform_3(%arg0: i32) -> (i32, i32) {
    %c0_i32 = arith.constant 0 : i32
    %c0_i32_0 = arith.constant 0 : i32
    %c0_i32_1 = arith.constant 0 : i32
    return %c0_i32, %c0_i32_0 : i32, i32
  }
  func.func @transform_4(%arg0: i32) -> (i32, i32) {
    %c0_i32 = arith.constant 0 : i32
    %c0_i32_0 = arith.constant 0 : i32
    %c0_i32_1 = arith.constant 0 : i32
    return %c0_i32, %c0_i32_0 : i32, i32
  }
  func.func @transform_5(%arg0: i32) -> (i32, i32) {
    %c0_i32 = arith.constant 0 : i32
    %c0_i32_0 = arith.constant 0 : i32
    %c0_i32_1 = arith.constant 0 : i32
    return %c0_i32, %c0_i32_0 : i32, i32
  }
  func.func @transform_6(%arg0: i32) -> (i32, i32) {
    %c0_i32 = arith.constant 0 : i32
    %c0_i32_0 = arith.constant 0 : i32
    return %arg0, %c0_i32 : i32, i32
  }
}

module attributes {stable_mosaic.version = 11 : i64} {
  func.func @kernel(%arg0: i32, %arg1: memref<32x64xbf16, #tpu.memory_space<vmem>>, %arg2: memref<1x8x64xbf16, #tpu.memory_space<vmem>>, %arg3: memref<5x64x16xbf16, #tpu.memory_space<vmem>>, %arg4: memref<1x16xf32, #tpu.memory_space<vmem>>, %arg5: memref<64x16xbf16, #tpu.memory_space<vmem>>, %arg6: memref<1x16xf32, #tpu.memory_space<vmem>>, %arg7: memref<32x16xf32, #tpu.memory_space<vmem>>) attributes {dimension_semantics = [#tpu.dimension_semantics<parallel>], iteration_bounds = array<i64: 1>, scalar_prefetch = 0 : i64, scratch_operands = 0 : i64, tpu.core_type = #tpu.core_type<tc>, window_params = [{transform_indices = @transform_0, window_bounds = array<i64: 32, 64>}, {transform_indices = @transform_1, window_bounds = array<i64: 1, 8, 64>}, {pipeline_mode = #tpu.pipeline_mode<synchronous>, transform_indices = @transform_2, window_bounds = array<i64: 5, 64, 16>}, {pipeline_mode = #tpu.pipeline_mode<synchronous>, transform_indices = @transform_3, window_bounds = array<i64: 1, 16>}, {pipeline_mode = #tpu.pipeline_mode<synchronous>, transform_indices = @transform_4, window_bounds = array<i64: 64, 16>}, {pipeline_mode = #tpu.pipeline_mode<synchronous>, transform_indices = @transform_5, window_bounds = array<i64: 1, 16>}, {transform_indices = @transform_6, window_bounds = array<i64: 32, 16>}]} {
    %c0 = arith.constant 0 : index
    %c0_0 = arith.constant 0 : index
    %0 = vector.load %arg1[%c0, %c0_0] : memref<32x64xbf16, #tpu.memory_space<vmem>>, vector<32x64xbf16>
    %c0_1 = arith.constant 0 : index
    %c0_2 = arith.constant 0 : index
    %c0_3 = arith.constant 0 : index
    %1 = vector.load %arg2[%c0_1, %c0_2, %c0_3] : memref<1x8x64xbf16, #tpu.memory_space<vmem>>, vector<1x4x64xbf16>
    %2 = vector.shape_cast %1 : vector<1x4x64xbf16> to vector<4x64xbf16>
    %c0_4 = arith.constant 0 : index
    %c4 = arith.constant 4 : index
    %c0_5 = arith.constant 0 : index
    %3 = vector.load %arg2[%c0_4, %c4, %c0_5] : memref<1x8x64xbf16, #tpu.memory_space<vmem>>, vector<1x4x64xbf16>
    %4 = vector.shape_cast %3 : vector<1x4x64xbf16> to vector<4x64xbf16>
    %5 = tpu.concatenate %2, %0, %4 in 0 : vector<4x64xbf16>, vector<32x64xbf16>, vector<4x64xbf16> -> vector<40x64xbf16>
    %cst = arith.constant 0.000000e+00 : f32
    %6 = vector.broadcast %cst : f32 to vector<32x16xf32>
    %7 = vector.extract_strided_slice %5 {offsets = [0, 0], sizes = [32, 64], strides = [1, 1]} : vector<40x64xbf16> to vector<32x64xbf16>
    %c0_6 = arith.constant 0 : index
    %c0_7 = arith.constant 0 : index
    %c0_8 = arith.constant 0 : index
    %8 = vector.load %arg3[%c0_6, %c0_7, %c0_8] : memref<5x64x16xbf16, #tpu.memory_space<vmem>>, vector<1x64x16xbf16>
    %9 = vector.shape_cast %8 : vector<1x64x16xbf16> to vector<64x16xbf16>
    %cst_9 = arith.constant dense<0.000000e+00> : vector<32x16xf32>
    %10 = tpu.matmul %7, %9, %cst_9 {dimension_numbers = #tpu.dot_dimension_numbers<[1], [0], [0], [1], [0, 0, 1, 1], [], []>} : vector<32x64xbf16>, vector<64x16xbf16>, vector<32x16xf32> -> vector<32x16xf32>
    %11 = arith.addf %6, %10 : vector<32x16xf32>
    %12 = vector.extract_strided_slice %5 {offsets = [2, 0], sizes = [32, 64], strides = [1, 1]} : vector<40x64xbf16> to vector<32x64xbf16>
    %c1 = arith.constant 1 : index
    %c0_10 = arith.constant 0 : index
    %c0_11 = arith.constant 0 : index
    %13 = vector.load %arg3[%c1, %c0_10, %c0_11] : memref<5x64x16xbf16, #tpu.memory_space<vmem>>, vector<1x64x16xbf16>
    %14 = vector.shape_cast %13 : vector<1x64x16xbf16> to vector<64x16xbf16>
    %cst_12 = arith.constant dense<0.000000e+00> : vector<32x16xf32>
    %15 = tpu.matmul %12, %14, %cst_12 {dimension_numbers = #tpu.dot_dimension_numbers<[1], [0], [0], [1], [0, 0, 1, 1], [], []>} : vector<32x64xbf16>, vector<64x16xbf16>, vector<32x16xf32> -> vector<32x16xf32>
    %16 = arith.addf %11, %15 : vector<32x16xf32>
    %17 = vector.extract_strided_slice %5 {offsets = [4, 0], sizes = [32, 64], strides = [1, 1]} : vector<40x64xbf16> to vector<32x64xbf16>
    %c2 = arith.constant 2 : index
    %c0_13 = arith.constant 0 : index
    %c0_14 = arith.constant 0 : index
    %18 = vector.load %arg3[%c2, %c0_13, %c0_14] : memref<5x64x16xbf16, #tpu.memory_space<vmem>>, vector<1x64x16xbf16>
    %19 = vector.shape_cast %18 : vector<1x64x16xbf16> to vector<64x16xbf16>
    %cst_15 = arith.constant dense<0.000000e+00> : vector<32x16xf32>
    %20 = tpu.matmul %17, %19, %cst_15 {dimension_numbers = #tpu.dot_dimension_numbers<[1], [0], [0], [1], [0, 0, 1, 1], [], []>} : vector<32x64xbf16>, vector<64x16xbf16>, vector<32x16xf32> -> vector<32x16xf32>
    %21 = arith.addf %16, %20 : vector<32x16xf32>
    %22 = vector.extract_strided_slice %5 {offsets = [6, 0], sizes = [32, 64], strides = [1, 1]} : vector<40x64xbf16> to vector<32x64xbf16>
    %c3 = arith.constant 3 : index
    %c0_16 = arith.constant 0 : index
    %c0_17 = arith.constant 0 : index
    %23 = vector.load %arg3[%c3, %c0_16, %c0_17] : memref<5x64x16xbf16, #tpu.memory_space<vmem>>, vector<1x64x16xbf16>
    %24 = vector.shape_cast %23 : vector<1x64x16xbf16> to vector<64x16xbf16>
    %cst_18 = arith.constant dense<0.000000e+00> : vector<32x16xf32>
    %25 = tpu.matmul %22, %24, %cst_18 {dimension_numbers = #tpu.dot_dimension_numbers<[1], [0], [0], [1], [0, 0, 1, 1], [], []>} : vector<32x64xbf16>, vector<64x16xbf16>, vector<32x16xf32> -> vector<32x16xf32>
    %26 = arith.addf %21, %25 : vector<32x16xf32>
    %27 = vector.extract_strided_slice %5 {offsets = [8, 0], sizes = [32, 64], strides = [1, 1]} : vector<40x64xbf16> to vector<32x64xbf16>
    %c4_19 = arith.constant 4 : index
    %c0_20 = arith.constant 0 : index
    %c0_21 = arith.constant 0 : index
    %28 = vector.load %arg3[%c4_19, %c0_20, %c0_21] : memref<5x64x16xbf16, #tpu.memory_space<vmem>>, vector<1x64x16xbf16>
    %29 = vector.shape_cast %28 : vector<1x64x16xbf16> to vector<64x16xbf16>
    %cst_22 = arith.constant dense<0.000000e+00> : vector<32x16xf32>
    %30 = tpu.matmul %27, %29, %cst_22 {dimension_numbers = #tpu.dot_dimension_numbers<[1], [0], [0], [1], [0, 0, 1, 1], [], []>} : vector<32x64xbf16>, vector<64x16xbf16>, vector<32x16xf32> -> vector<32x16xf32>
    %31 = arith.addf %26, %30 : vector<32x16xf32>
    %c0_23 = arith.constant 0 : index
    %c0_24 = arith.constant 0 : index
    %32 = vector.load %arg4[%c0_23, %c0_24] : memref<1x16xf32, #tpu.memory_space<vmem>>, vector<1x16xf32>
    %33 = vector.broadcast %32 : vector<1x16xf32> to vector<32x16xf32>
    %34 = arith.addf %31, %33 : vector<32x16xf32>
    %c0_25 = arith.constant 0 : index
    %c0_26 = arith.constant 0 : index
    %35 = vector.load %arg5[%c0_25, %c0_26] : memref<64x16xbf16, #tpu.memory_space<vmem>>, vector<64x16xbf16>
    %cst_27 = arith.constant dense<0.000000e+00> : vector<32x16xf32>
    %36 = tpu.matmul %0, %35, %cst_27 {dimension_numbers = #tpu.dot_dimension_numbers<[1], [0], [0], [1], [0, 0, 1, 1], [], []>} : vector<32x64xbf16>, vector<64x16xbf16>, vector<32x16xf32> -> vector<32x16xf32>
    %c0_28 = arith.constant 0 : index
    %c0_29 = arith.constant 0 : index
    %37 = vector.load %arg6[%c0_28, %c0_29] : memref<1x16xf32, #tpu.memory_space<vmem>>, vector<1x16xf32>
    %38 = vector.broadcast %37 : vector<1x16xf32> to vector<32x16xf32>
    %39 = arith.addf %36, %38 : vector<32x16xf32>
    %40 = arith.addf %34, %39 : vector<32x16xf32>
    %c0_30 = arith.constant 0 : index
    %c0_31 = arith.constant 0 : index
    %41 = vector.load %arg7[%c0_30, %c0_31] : memref<32x16xf32, #tpu.memory_space<vmem>>, vector<32x16xf32>
    tpu.vector_store %arg7[%c0_30, %c0_31], %40 {strides = array<i32>} : memref<32x16xf32, #tpu.memory_space<vmem>>, vector<32x16xf32>,
    return
  }
  func.func @transform_0(%arg0: i32) -> (i32, i32) {
    %c0_i32 = arith.constant 0 : i32
    %c0_i32_0 = arith.constant 0 : i32
    return %arg0, %c0_i32 : i32, i32
  }
  func.func @transform_1(%arg0: i32) -> (i32, i32, i32) {
    %c0_i32 = arith.constant 0 : i32
    %c0_i32_0 = arith.constant 0 : i32
    %c0_i32_1 = arith.constant 0 : i32
    return %arg0, %c0_i32, %c0_i32_0 : i32, i32, i32
  }
  func.func @transform_2(%arg0: i32) -> (i32, i32, i32) {
    %c0_i32 = arith.constant 0 : i32
    %c0_i32_0 = arith.constant 0 : i32
    %c0_i32_1 = arith.constant 0 : i32
    %c0_i32_2 = arith.constant 0 : i32
    return %c0_i32, %c0_i32_0, %c0_i32_1 : i32, i32, i32
  }
  func.func @transform_3(%arg0: i32) -> (i32, i32) {
    %c0_i32 = arith.constant 0 : i32
    %c0_i32_0 = arith.constant 0 : i32
    %c0_i32_1 = arith.constant 0 : i32
    return %c0_i32, %c0_i32_0 : i32, i32
  }
  func.func @transform_4(%arg0: i32) -> (i32, i32) {
    %c0_i32 = arith.constant 0 : i32
    %c0_i32_0 = arith.constant 0 : i32
    %c0_i32_1 = arith.constant 0 : i32
    return %c0_i32, %c0_i32_0 : i32, i32
  }
  func.func @transform_5(%arg0: i32) -> (i32, i32) {
    %c0_i32 = arith.constant 0 : i32
    %c0_i32_0 = arith.constant 0 : i32
    %c0_i32_1 = arith.constant 0 : i32
    return %c0_i32, %c0_i32_0 : i32, i32
  }
  func.func @transform_6(%arg0: i32) -> (i32, i32) {
    %c0_i32 = arith.constant 0 : i32
    %c0_i32_0 = arith.constant 0 : i32
    return %arg0, %c0_i32 : i32, i32
  }
}

</mosaic_0001>

<bundles_post_ra>
// kernel: audio2latent2_forward.18
= control target key start
LH: loop header
LB: loop body
LE: loop exit
PB: predicated region body
PF: predicated region fallthrough
CT: control target
= control target key end

     0   :  { %7 = vsyncpa [#allocation3], 0  ;;  %s212_s0 = inlined_call_operand.hbm [shape: f32[8,128], index: 0, kind: input, shape index: {}]   ;;  %s213_s1 = inlined_call_operand.hbm [shape: f32[1,2,128], index: 1, kind: input, shape index: {}]   ;;  %s214_s2 = inlined_call_operand.hbm [shape: f32[8,64], index: 2, kind: output, shape index: {}]  }
   0x1   :  { %8 = vsyncpa [#allocation6], 0 }
   0x2   :  { %9 = vsyncpa [#allocation4], 0  ;;  %s157_s9 = smov [#allocation2]   ;;  %s158_s11 = smov [#allocation5]  }
   0x3   :  { %s16_s10 = sshll.u32 %s157_s9, 4  ;;  %s26_s12 = sshll.u32 %s158_s11, 4  ;;  %s17_s10 = int_to_ptr.vmem [resolvable:$true] %s16_s10  ;;  %s27_s12 = int_to_ptr.vmem [resolvable:$true] %s26_s12 }
   0x4   :  { %s85_s15 = scalar_lea.hbm %s212_s0, 128 }
   0x5   :  { %p86_p0 = scmp.ne.s32.totalorder %s212_s0, %s85_s15  ;;  %p89_p1 = scmp.lt.u32.totalorder %s85_s15, %s212_s0 }
   0x7   :  { %p91_p2 = pnand %p89_p1, %p86_p0 }
   0x9   :  { %94 = shalt.err (!%p91_p2)
}
   0xa   :  { %s95_s20 = scalar_lea.vmem %s17_s10, 128  ;;  %p100_p4 = scmp.lt.s32.totalorder %s17_s10, %s17_s10 }
   0xb   :  { %p96_p3 = scmp.ne.s32.totalorder %s17_s10, %s95_s20  ;;  %p101_p5 = scmp.lt.s32.totalorder %s95_s20, %s95_s20 }
   0xd   :  { %p102_p6 = por %p101_p5, %p100_p4 }
   0xf   :  { %p103_p7 = pnand %p102_p6, %p96_p3 }
  0x11   :  { %106 = shalt.err (!%p103_p7)
}
  0x12   :  { %19 = dma.hbm_to_vmem [thread:$0]  %s212_s0, 128, %s17_s10, [#allocation3]  }
  0x13   :  { %s107_s25 = scalar_lea.hbm %s213_s1, 32 }
  0x14   :  { %p108_p8 = scmp.ne.s32.totalorder %s213_s1, %s107_s25  ;;  %p111_p9 = scmp.lt.u32.totalorder %s107_s25, %s213_s1 }
  0x16   :  { %p113_p10 = pnand %p111_p9, %p108_p8 }
  0x18   :  { %116 = shalt.err (!%p113_p10)
}
  0x19   :  { %s117_s30 = scalar_lea.vmem %s27_s12, 32  ;;  %p122_p12 = scmp.lt.s32.totalorder %s27_s12, %s27_s12 }
  0x1a   :  { %p118_p11 = scmp.ne.s32.totalorder %s27_s12, %s117_s30  ;;  %p123_p13 = scmp.lt.s32.totalorder %s117_s30, %s117_s30 }
  0x1c   :  { %p124_p0 = por %p123_p13, %p122_p12 }
  0x1e   :  { %p125_p1 = pnand %p124_p0, %p118_p11 }
  0x20   :  { %128 = shalt.err (!%p125_p1)
}
  0x21   :  { %29 = dma.hbm_to_vmem [thread:$0]  %s213_s1, 32, %s27_s12, [#allocation6]  }
  0x22   :  { %151 = dma.done.wait [#allocation3], 128  }
  0x23   :  { %152 = vsyncadd [#allocation3], 4294967168 }
  0x24   :  { %153 = dma.done.wait [#allocation6], 32  }
  0x25   :  { %154 = vsyncadd [#allocation6], 4294967264  ;;  %v36_v0 = vld [vmem:[#allocation2] sm:$0xff]  ;;  %v37_v1 = vld [vmem:[#allocation5] sm:$0x1]  ;;  %vm41_vm0 = vcmask 1040384  }
  0x26   :  { %v39_v2 = vrot.slane %v36_v0, 7  ;;  %s159_s4 = smov 64   ;;  %v43_v4 = vld [vmem:[#allocation5 + $0x1] sm:$0x1]  ;;  %v44_v6 = vrot.slane %v36_v0, 1  ;;  %vm49_vm1 = vcmask 1046528  }
  0x27   :  { %v47_v7 = vrot.slane %v43_v4, 1  ;;  %s160_s1 = smov [#allocation7]   ;;  %vm63_vm2 = vcmask 523264  }
  0x28   :  { %v42_v3 = vsel %vm41_vm0, %v37_v1, %v39_v2  ;;  %s71_s5 = sshll.u32 %s160_s1, 4  ;;  %s72_s5 = int_to_ptr.vmem [resolvable:$true] %s71_s5 }
  0x29   :  { %52 = vrot.lane.b32.xlu0 %v42_v3, %s159_s4  ;;  %v50_v10 = vsel %vm49_vm1, %v44_v6, %v47_v7  ;;  %s129_s6 = scalar_lea.vmem %s72_s5, 128  ;;  %p134_p3 = scmp.lt.s32.totalorder %s72_s5, %s72_s5 }
  0x2a   :  { %p130_p2 = scmp.ne.s32.totalorder %s72_s5, %s129_s6  ;;  %p135_p4 = scmp.lt.s32.totalorder %s129_s6, %s129_s6 }
  0x2c   :  { %p136_p5 = por %p135_p4, %p134_p3 }
  0x2d   :  { %57 = vrot.lane.b32.xlu0 %v36_v0, %s159_s4 }
  0x2e   :  { %p137_p6 = pnand %p136_p5, %p130_p2 }
  0x9b   :  { %v53_v5 = vpop.permute.xlu0 %52 }
  0x9c   :  { %v55_v8 = vadd.f32 %v53_v5, %v42_v3 }
  0x9e   :  { %v56_v9 = vadd.f32 %v55_v8, %v36_v0 }
  0x9f   :  { %v58_v11 = vpop.permute.xlu0 %57 }
  0xa0   :  { %v60_v12 = vadd.f32 %v58_v11, %v56_v9 }
  0xa2   :  { %v61_v13 = vadd.f32 %v60_v12, %v50_v10 }
  0xa4   :  { %v62_v14 = vmul.f32 0.2, %v61_v13 }
  0xa6   :  { %64 = vst.msk [vmem:[#allocation7] sm:$0xff] %vm63_vm2, %v62_v14 }
  0xa7   :  { %140 = shalt.err (!%p137_p6)
}
  0xa8   :  { %s141_s9 = scalar_lea.hbm %s214_s2, 128 }
  0xa9   :  { %p142_p7 = scmp.ne.s32.totalorder %s214_s2, %s141_s9  ;;  %p145_p8 = scmp.lt.u32.totalorder %s141_s9, %s214_s2 }
  0xab   :  { %p147_p9 = pnand %p145_p8, %p142_p7 }
  0xad   :  { %150 = shalt.err (!%p147_p9)
}
  0xae   :  { %74 = dma.vmem_to_hbm [thread:$0]  %s72_s5, 128, %s214_s2, [#allocation4]  }
  0xaf   :  { %155 = dma.done.wait [#allocation4], 128  }
  0xb0   :  { %156 = vsyncadd [#allocation4], 4294967168 }
  0xb1   :  { %78 = vsyncpa [#allocation3], 1 }
  0xb2   :  { %79 = vsyncpa [#allocation6], 1 }
  0xb3   :  { %80 = vsyncpa [#allocation4], 1 }

// kernel: audio2latent2_forward.16
= control target key start
LH: loop header
LB: loop body
LE: loop exit
PB: predicated region body
PF: predicated region fallthrough
CT: control target
= control target key end

     0   :  { %11 = vsyncpa [#allocation3], 0  ;;  %s1051_s0 = inlined_call_operand.hbm [shape: bf16[32,8], index: 0, kind: input, shape index: {}]   ;;  %s1052_s1 = inlined_call_operand.hbm [shape: bf16[1,8,8], index: 1, kind: input, shape index: {}]   ;;  %s1053_s2 = inlined_call_operand.hbm [shape: bf16[5,8,16], index: 2, kind: input, shape index: {}]   ;;  %s1054_s3 = inlined_call_operand.hbm [shape: f32[1,16], index: 3, kind: input, shape index: {}]   ;;  %s1055_s4 = inlined_call_operand.hbm [shape: bf16[8,16], index: 4, kind: input, shape index: {}]   ;;  %s1056_s5 = inlined_call_operand.hbm [shape: f32[1,16], index: 5, kind: input, shape index: {}]   ;;  %s1057_s6 = inlined_call_operand.hbm [shape: f32[32,32], index: 6, kind: output, shape index: {}]  }
   0x1   :  { %12 = vsyncpa [#allocation6], 0 }
   0x2   :  { %13 = vsyncpa [#allocation9], 0 }
   0x3   :  { %14 = vsyncpa [#allocation12], 0 }
   0x4   :  { %15 = vsyncpa [#allocation4], 0  ;;  %s881_s21 = smov [#allocation5]   ;;  %s882_s23 = smov [#allocation8]  }
   0x5   :  { %s34_s22 = sshll.u32 %s881_s21, 4  ;;  %s56_s24 = sshll.u32 %s882_s23, 4  ;;  %s35_s22 = int_to_ptr.vmem [resolvable:$true] %s34_s22  ;;  %s57_s24 = int_to_ptr.vmem [resolvable:$true] %s56_s24 }
   0x6   :  { %s717_s27 = scalar_lea.hbm %s1052_s1, 64 }
   0x7   :  { %p718_p0 = scmp.ne.s32.totalorder %s1052_s1, %s717_s27  ;;  %p721_p1 = scmp.lt.u32.totalorder %s717_s27, %s1052_s1 }
   0x9   :  { %p723_p2 = pnand %p721_p1, %p718_p0 }
   0xb   :  { %726 = shalt.err (!%p723_p2)
}
   0xc   :  { %s727_s8 = scalar_lea.vmem %s35_s22, 64  ;;  %p732_p4 = scmp.lt.s32.totalorder %s35_s22, %s35_s22 }
   0xd   :  { %p728_p3 = scmp.ne.s32.totalorder %s35_s22, %s727_s8  ;;  %p733_p5 = scmp.lt.s32.totalorder %s727_s8, %s727_s8 }
   0xf   :  { %p734_p6 = por %p733_p5, %p732_p4 }
  0x11   :  { %p735_p7 = pnand %p734_p6, %p728_p3 }
  0x13   :  { %738 = shalt.err (!%p735_p7)
}
  0x14   :  { %37 = dma.hbm_to_vmem [thread:$0]  %s1052_s1, 64, %s35_s22, [#allocation6]  }
  0x15   :  { %s739_s13 = scalar_lea.hbm %s1054_s3, 16 }
  0x16   :  { %p740_p8 = scmp.ne.s32.totalorder %s1054_s3, %s739_s13  ;;  %p743_p9 = scmp.lt.u32.totalorder %s739_s13, %s1054_s3 }
  0x18   :  { %p745_p10 = pnand %p743_p9, %p740_p8 }
  0x1a   :  { %748 = shalt.err (!%p745_p10)
}
  0x1b   :  { %s749_s18 = scalar_lea.vmem %s57_s24, 16  ;;  %s753_s19 = scalar_lea.vmem %s57_s24, 32 }
  0x1c   :  { %p750_p11 = scmp.ne.s32.totalorder %s57_s24, %s749_s18  ;;  %p754_p12 = scmp.lt.s32.totalorder %s57_s24, %s57_s24 }
  0x1d   :  { %p755_p13 = scmp.lt.s32.totalorder %s753_s19, %s749_s18 }
  0x1f   :  { %p756_p0 = por %p755_p13, %p754_p12 }
  0x21   :  { %p757_p1 = pnand %p756_p0, %p750_p11 }
  0x23   :  { %760 = shalt.err (!%p757_p1)
}
  0x24   :  { %59 = dma.hbm_to_vmem [thread:$0]  %s1054_s3, 16, %s57_s24, [#allocation9]  }
  0x25   :  { %s883_s21 = smov [#allocation2]   ;;  %s761_s26 = scalar_lea.hbm %s1051_s0, 256 }
  0x26   :  { %s21_s22 = sshll.u32 %s883_s21, 4  ;;  %p762_p2 = scmp.ne.s32.totalorder %s1051_s0, %s761_s26  ;;  %s22_s22 = int_to_ptr.vmem [resolvable:$true] %s21_s22 }
  0x27   :  { %p765_p3 = scmp.lt.u32.totalorder %s761_s26, %s1051_s0 }
  0x29   :  { %p767_p4 = pnand %p765_p3, %p762_p2 }
  0x2b   :  { %770 = shalt.err (!%p767_p4)
}
  0x2c   :  { %s771_s7 = scalar_lea.vmem %s22_s22, 256  ;;  %p776_p6 = scmp.lt.s32.totalorder %s22_s22, %s22_s22 }
  0x2d   :  { %p772_p5 = scmp.ne.s32.totalorder %s22_s22, %s771_s7  ;;  %p777_p7 = scmp.lt.s32.totalorder %s771_s7, %s771_s7 }
  0x2f   :  { %p778_p8 = por %p777_p7, %p776_p6 }
  0x31   :  { %p779_p9 = pnand %p778_p8, %p772_p5 }
  0x33   :  { %782 = shalt.err (!%p779_p9)
}
  0x34   :  { %s884_s3 = smov 64   ;;  %s885_s24 = smov 4  }
  0x35   :  { %27 = dma.hbm_to_vmem [thread:$0]  %s1051_s0, 256, %s22_s22, [#allocation3], %s884_s3, %s884_s3, %s885_s24  }
  0x36   :  { %s886_s10 = smov [#allocation7]   ;;  %s887_s12 = smov [#allocation10]  }
  0x37   :  { %s43_s11 = sshll.u32 %s886_s10, 4  ;;  %s66_s13 = sshll.u32 %s887_s12, 4  ;;  %s44_s11 = int_to_ptr.vmem [resolvable:$true] %s43_s11  ;;  %s67_s13 = int_to_ptr.vmem [resolvable:$true] %s66_s13 }
  0x38   :  { %s783_s16 = scalar_lea.hbm %s1053_s2, 320 }
  0x39   :  { %p784_p10 = scmp.ne.s32.totalorder %s1053_s2, %s783_s16  ;;  %p787_p11 = scmp.lt.u32.totalorder %s783_s16, %s1053_s2 }
  0x3b   :  { %p789_p12 = pnand %p787_p11, %p784_p10 }
  0x3d   :  { %792 = shalt.err (!%p789_p12)
}
  0x3e   :  { %s793_s0 = scalar_lea.vmem %s44_s11, 320  ;;  %p798_p0 = scmp.lt.s32.totalorder %s44_s11, %s44_s11 }
  0x3f   :  { %p794_p13 = scmp.ne.s32.totalorder %s44_s11, %s793_s0  ;;  %p799_p1 = scmp.lt.s32.totalorder %s793_s0, %s793_s0 }
  0x41   :  { %p800_p2 = por %p799_p1, %p798_p0 }
  0x43   :  { %p801_p3 = pnand %p800_p2, %p794_p13 }
  0x45   :  { %804 = shalt.err (!%p801_p3)
}
  0x46   :  { %49 = dma.hbm_to_vmem [thread:$0]  %s1053_s2, 320, %s44_s11, [#allocation6], %s884_s3, %s884_s3, %s885_s24  }
  0x47   :  { %s805_s25 = scalar_lea.hbm %s1055_s4, 64 }
  0x48   :  { %p806_p4 = scmp.ne.s32.totalorder %s1055_s4, %s805_s25  ;;  %p809_p5 = scmp.lt.u32.totalorder %s805_s25, %s1055_s4 }
  0x4a   :  { %p811_p6 = pnand %p809_p5, %p806_p4 }
  0x4c   :  { %814 = shalt.err (!%p811_p6)
}
  0x4d   :  { %s815_s30 = scalar_lea.vmem %s67_s13, 64  ;;  %p820_p8 = scmp.lt.s32.totalorder %s67_s13, %s67_s13 }
  0x4e   :  { %p816_p7 = scmp.ne.s32.totalorder %s67_s13, %s815_s30  ;;  %p821_p9 = scmp.lt.s32.totalorder %s815_s30, %s815_s30 }
  0x50   :  { %p822_p10 = por %p821_p9, %p820_p8 }
  0x52   :  { %p823_p11 = pnand %p822_p10, %p816_p7 }
  0x54   :  { %826 = shalt.err (!%p823_p11)
}
  0x55   :  { %69 = dma.hbm_to_vmem [thread:$0]  %s1055_s4, 64, %s67_s13, [#allocation9]  }
  0x56   :  { %s888_s3 = smov [#allocation11]   ;;  %s827_s10 = scalar_lea.hbm %s1056_s5, 16 }
  0x57   :  { %s76_s24 = sshll.u32 %s888_s3, 4  ;;  %p828_p12 = scmp.ne.s32.totalorder %s1056_s5, %s827_s10  ;;  %s77_s24 = int_to_ptr.vmem [resolvable:$true] %s76_s24 }
  0x58   :  { %p831_p13 = scmp.lt.u32.totalorder %s827_s10, %s1056_s5 }
  0x5a   :  { %p833_p0 = pnand %p831_p13, %p828_p12 }
  0x5c   :  { %836 = shalt.err (!%p833_p0)
}
  0x5d   :  { %s837_s16 = scalar_lea.vmem %s77_s24, 16  ;;  %s841_s4 = scalar_lea.vmem %s77_s24, 32 }
  0x5e   :  { %p838_p1 = scmp.ne.s32.totalorder %s77_s24, %s837_s16  ;;  %p842_p2 = scmp.lt.s32.totalorder %s77_s24, %s77_s24 }
  0x5f   :  { %p843_p3 = scmp.lt.s32.totalorder %s841_s4, %s837_s16 }
  0x61   :  { %p844_p4 = por %p843_p3, %p842_p2 }
  0x63   :  { %p845_p5 = pnand %p844_p4, %p838_p1 }
  0x65   :  { %848 = shalt.err (!%p845_p5)
}
  0x66   :  { %79 = dma.hbm_to_vmem [thread:$0]  %s1056_s5, 16, %s77_s24, [#allocation12]  }
  0x67   :  { %871 = dma.done.wait [#allocation3], 256  }
  0x68   :  { %872 = vsyncadd [#allocation3], 4294967040 }
  0x69   :  { %873 = dma.done.wait [#allocation6], 384  }
  0x6a   :  { %874 = vsyncadd [#allocation6], 4294966912 }
  0x6b   :  { %875 = dma.done.wait [#allocation9], 80  }
  0x6c   :  { %876 = vsyncadd [#allocation9], 4294967216 }
  0x6d   :  { %877 = dma.done.wait [#allocation12], 16  }
  0x6e   :  { %878 = vsyncadd [#allocation12], 4294967280  ;;  %vm144_vm0 = vcmask 1043456   ;;  %v128_v0 = vld [vmem:[#allocation7 + $0x4] sm:$0xf]  ;;  %v715_v4 = vld [vmem:[#allocation2] sm:$0xff]  }
  0x6f   :  { %v255_v1 = vld [vmem:[#allocation7 + $0x8] sm:$0xf]  ;;  %697 = vmatprep.subr.msk.bf16.mxu1 %vm144_vm0, %v128_v0  ;;  %v146_v2 = vsel %vm144_vm0, %v128_v0, 0  ;;  %v103_v5 = vld [vmem:[#allocation5] sm:$0x3]  ;;  %v716_v6 = vld [vmem:[#allocation2 + $0x8] sm:$0xff]  }
  0x70   :  { %699 = vmatprep.subr.msk.bf16.mxu0 %vm144_vm0, %v255_v1  ;;  %v269_v3 = vsel %vm144_vm0, %v255_v1, 0  ;;  %646 = vmatpush3.bf16.msra.mxu1 %v146_v2  ;;  %vm115_vm1 = vcmask 1041408   ;;  %v126_v7 = vld [vmem:[#allocation7] sm:$0xf]  ;;  %v116_v8 = vrot.slane %v715_v4, 6  ;;  %v117_v11 = vrot.slane %v716_v6, 6 }
  0x71   :  { %658 = vmatpush3.bf16.msra.mxu0 %v269_v3  ;;  %698 = vmatprep.subr.msk.bf16.mxu1 %vm144_vm0, %v126_v7  ;;  %v104_v9 = vld [vmem:[#allocation5] sm:$0xc]  ;;  %v325_v10 = vld [vmem:[#allocation7 + $0xc] sm:$0xf]  ;;  %vm131_vm2 = vcmask 1046528   ;;  %vm137_vm3 = vcmask 64512  }
  0x72   :  { %700 = vmatprep.subr.msk.bf16.mxu0 %vm144_vm0, %v325_v10  ;;  %v122_v12 = vsel %vm115_vm1, %v103_v5, %v116_v8  ;;  %vm256_vm4 = vcmask 1045504   ;;  %vm326_vm5 = vcmask 1044480   ;;  %v118_v13 = vsel %vm115_vm1, %v116_v8, %v117_v11  ;;  %v475_v30 = vld [vmem:[#allocation10] sm:$0xf]  ;;  %v395_v31 = vld [vmem:[#allocation7 + $0x10] sm:$0xf] }
  0x73   :  { %v132_v14 = vrot.slane %v122_v12, 1  ;;  %v257_v15 = vrot.slane %v122_v12, 2  ;;  %v125_v16 = vsel %vm115_vm1, %v117_v11, %v104_v9  ;;  %v133_v17 = vrot.slane %v118_v13, 1  ;;  %v624_v45 = vld [vmem:[#allocation11] ss:$0 sm:$0xff]  ;;  %s889_s5 = smov 16  }
  0x74   :  { %v258_v18 = vrot.slane %v118_v13, 2  ;;  %v135_v19 = vrot.slane %v125_v16, 1  ;;  %v260_v20 = vrot.slane %v125_v16, 2  ;;  %v203_v21 = vsel %vm144_vm0, %v126_v7, 0  ;;  %v623_v56 = vld [vmem:[#allocation8] ss:$0 sm:$0xff] }
  0x75   :  { %v339_v22 = vsel %vm144_vm0, %v325_v10, 0  ;;  %v327_v23 = vrot.slane %v122_v12, 3  ;;  %v328_v24 = vrot.slane %v118_v13, 3  ;;  %v134_v25 = vsel %vm131_vm2, %v132_v14, %v133_v17  ;;  %s890_s18 = smov [#allocation13]  }
  0x76   :  { %v259_v26 = vsel %vm256_vm4, %v257_v15, %v258_v18  ;;  %v136_v27 = vsel %vm131_vm2, %v133_v17, %v135_v19  ;;  %v261_v28 = vsel %vm256_vm4, %v258_v18, %v260_v20  ;;  %647 = vmatprep.mubr.msk.bf16.mxu1 %vm137_vm3, %v134_v25  ;;  %v330_v32 = vrot.slane %v125_v16, 3  ;;  %s596_s19 = sshll.u32 %s890_s18, 4  ;;  %s597_s19 = int_to_ptr.vmem [resolvable:$true] %s596_s19 }
  0x77   :  { %659 = vmatprep.mubr.msk.bf16.mxu0 %vm137_vm3, %v259_v26  ;;  %v329_v29 = vsel %vm326_vm5, %v327_v23, %v328_v24  ;;  %648 = vmatmul.mubr.msk.bf16.vlgmr.msra.gmra.mrb[0].mxu1 %vm137_vm3, %v136_v27  ;;  %v397_v33 = vrot.slane %v122_v12, 4  ;;  %v398_v34 = vrot.slane %v118_v13, 4  ;;  %v490_v36 = vsel %vm144_vm0, %v475_v30, 0  ;;  %s849_s1 = scalar_lea.vmem %s597_s19, 512  ;;  %p854_p7 = scmp.lt.s32.totalorder %s597_s19, %s597_s19 }
  0x78   :  { %660 = vmatmul.mubr.msk.bf16.vlgmr.msra.gmra.mrb[0].mxu0 %vm137_vm3, %v261_v28  ;;  %652 = vmatpush3.bf16.msra.mxu1 %v203_v21  ;;  %v331_v35 = vsel %vm326_vm5, %v328_v24, %v330_v32  ;;  %v409_v37 = vsel %vm144_vm0, %v395_v31, 0  ;;  %v400_v39 = vrot.slane %v125_v16, 4  ;;  %vm565_vm10 = vcmask 130048   ;;  %p850_p6 = scmp.ne.s32.totalorder %s597_s19, %s849_s1  ;;  %p855_p8 = scmp.lt.s32.totalorder %s849_s1, %s849_s1 }
  0x79   :  { %664 = vmatpush3.bf16.msra.mxu0 %v339_v22  ;;  %653 = vmatprep.mubr.msk.bf16.mxu1 %vm137_vm3, %v122_v12  ;;  %v399_v38 = vsel %vm144_vm0, %v397_v33, %v398_v34  ;;  %vm586_vm15 = vcmask 261248  }
  0x7a   :  { %665 = vmatprep.mubr.msk.bf16.mxu0 %vm137_vm3, %v329_v29  ;;  %702 = vmatprep.subr.msk.bf16.mxu1 %vm144_vm0, %v475_v30  ;;  %v401_v40 = vsel %vm144_vm0, %v398_v34, %v400_v39  ;;  %p856_p9 = por %p855_p8, %p854_p7 }
  0x7b   :  { %701 = vmatprep.subr.msk.bf16.mxu0 %vm144_vm0, %v395_v31 }
  0x7c   :  { %p857_p10 = pnand %p856_p9, %p850_p6 }
  0x83   :  { %654 = vmatmul.mubr.msk.bf16.vlgmr.msra.gmra.mrb[0].mxu1 %vm137_vm3, %v118_v13 }
  0x84   :  { %666 = vmatmul.mubr.msk.bf16.vlgmr.msra.gmra.mrb[0].mxu0 %vm137_vm3, %v331_v35  ;;  %676 = vmatpush3.bf16.msra.mxu1 %v490_v36 }
  0x85   :  { %677 = vmatprep.mubr.msk.bf16.mxu1 %vm137_vm3, %v715_v4  ;;  %670 = vmatpush3.bf16.msra.mxu0 %v409_v37 }
  0x86   :  { %671 = vmatprep.mubr.msk.bf16.mxu0 %vm137_vm3, %v399_v38 }
  0x8b   :  { %678 = vmatmul.mubr.msk.bf16.vlgmr.msra.gmra.mrb[4].mxu1 %vm137_vm3, %v716_v6 }
  0x90   :  { %672 = vmatmul.mubr.msk.bf16.vlgmr.msra.gmra.mrb[0].mxu0 %vm137_vm3, %v401_v40 }
 0x156   :  { %v655_v41 = vpop.f32.mrb[0].mxu1 }
 0x157   :  { %v239_v42 = vpop.f32.mrb[1].mxu1 }
 0x158   :  { %v656_v43 = vpop.f32.mrb[2].mxu1 }
 0x159   :  { %v242_v44 = vpop.f32.mrb[3].mxu1 }
 0x15e   :  { %v679_v46 = vpop.f32.mrb[4].mxu1 }
 0x15f   :  { %v535_v47 = vadd.f32 %v679_v46, %v624_v45  ;;  %v526_v48 = vpop.f32.mrb[5].mxu1 }
 0x160   :  { %v527_v49 = vadd.f32 %v624_v45, %v526_v48  ;;  %v680_v50 = vpop.f32.mrb[6].mxu1 }
 0x161   :  { %v538_v51 = vadd.f32 %v680_v50, %v624_v45  ;;  %v529_v52 = vpop.f32.mrb[7].mxu1  ;;  %vm555_vm6 = vcmp.ge.f32.partialorder %v535_v47, 0.0  ;;  %v559_v53 = vmul.f32 0.2, %v535_v47 }
 0x162   :  { %v530_v54 = vadd.f32 %v624_v45, %v529_v52  ;;  %vm553_vm7 = vcmp.ge.f32.partialorder %v527_v49, 0.0  ;;  %v557_v57 = vmul.f32 0.2, %v527_v49 }
 0x163   :  { %v673_v55 = vpop.f32.mrb[0].mxu0  ;;  %v560_v58 = vmul.f32 0.2, %v538_v51  ;;  %v563_v61 = vsel %vm555_vm6, %v535_v47, %v559_v53  ;;  %vm556_vm8 = vcmp.ge.f32.partialorder %v538_v51, 0.0 }
 0x164   :  { %v681_v59 = vadd.f32 %v673_v55, %v655_v41  ;;  %v445_v60 = vpop.f32.mrb[1].mxu0  ;;  %v558_v62 = vmul.f32 0.2, %v530_v54  ;;  %578 = vrot.lane.b32.xlu1 %v563_v61, %s889_s5  ;;  %v561_v1 = vsel %vm553_vm7, %v527_v49, %v557_v57  ;;  %vm554_vm9 = vcmp.ge.f32.partialorder %v530_v54, 0.0 }
 0x165   :  { %v682_v63 = vadd.f32 %v445_v60, %v239_v42  ;;  %v674_v0 = vpop.f32.mrb[2].mxu0  ;;  %574 = vrot.lane.b32.xlu0 %v561_v1, %s889_s5  ;;  %v564_v9 = vsel %vm556_vm8, %v538_v51, %v560_v58 }
 0x166   :  { %v473_v2 = vadd.f32 %v681_v59, %v623_v56  ;;  %v683_v3 = vadd.f32 %v674_v0, %v656_v43  ;;  %v448_v4 = vpop.f32.mrb[3].mxu0  ;;  %v562_v12 = vsel %vm554_vm9, %v530_v54, %v558_v62 }
 0x167   :  { %v471_v5 = vadd.f32 %v682_v63, %v623_v56  ;;  %v684_v6 = vadd.f32 %v448_v4, %v242_v44 }
 0x168   :  { %vm543_vm11 = vcmp.ge.f32.partialorder %v473_v2, 0.0  ;;  %v547_v7 = vmul.f32 0.2, %v473_v2  ;;  %v474_v8 = vadd.f32 %v683_v3, %v623_v56  ;;  %580 = vrot.lane.b32.xlu1 %v564_v9, %s889_s5 }
 0x169   :  { %vm541_vm12 = vcmp.ge.f32.partialorder %v471_v5, 0.0  ;;  %v545_v10 = vmul.f32 0.2, %v471_v5  ;;  %v472_v11 = vadd.f32 %v684_v6, %v623_v56  ;;  %576 = vrot.lane.b32.xlu0 %v562_v12, %s889_s5 }
 0x16a   :  { %v551_v13 = vsel %vm543_vm11, %v473_v2, %v547_v7  ;;  %vm544_vm13 = vcmp.ge.f32.partialorder %v474_v8, 0.0  ;;  %v548_v14 = vmul.f32 0.2, %v474_v8 }
 0x16b   :  { %v549_v15 = vsel %vm541_vm12, %v471_v5, %v545_v10  ;;  %vm542_vm14 = vcmp.ge.f32.partialorder %v472_v11, 0.0  ;;  %v546_v16 = vmul.f32 0.2, %v472_v11  ;;  %568 = vst.msk [vmem:[#allocation13 + $0x10] sm:$0xff] %vm565_vm10, %v551_v13 }
 0x16c   :  { %v552_v17 = vsel %vm544_vm13, %v474_v8, %v548_v14  ;;  %566 = vst.msk [vmem:[#allocation13] sm:$0xff] %vm565_vm10, %v549_v15 }
 0x16d   :  { %v550_v18 = vsel %vm542_vm14, %v472_v11, %v546_v16  ;;  %569 = vst.msk [vmem:[#allocation13 + $0x18] sm:$0xff] %vm565_vm10, %v552_v17 }
 0x16e   :  { %567 = vst.msk [vmem:[#allocation13 + $0x8] sm:$0xff] %vm565_vm10, %v550_v18 }
 0x1d6   :  { %v579_v19 = vpop.permute.xlu1 %578 }
 0x1d7   :  { %589 = vst.msk [vmem:[#allocation13 + $0x10] sm:$0xff] %vm586_vm15, %v579_v19  ;;  %v575_v20 = vpop.permute.xlu0 %574 }
 0x1d8   :  { %587 = vst.msk [vmem:[#allocation13] sm:$0xff] %vm586_vm15, %v575_v20 }
 0x1da   :  { %v581_v21 = vpop.permute.xlu1 %580 }
 0x1db   :  { %590 = vst.msk [vmem:[#allocation13 + $0x18] sm:$0xff] %vm586_vm15, %v581_v21  ;;  %v577_v22 = vpop.permute.xlu0 %576 }
 0x1dc   :  { %588 = vst.msk [vmem:[#allocation13 + $0x8] sm:$0xff] %vm586_vm15, %v577_v22 }
 0x1dd   :  { %860 = shalt.err (!%p857_p10)
}
 0x1de   :  { %s861_s21 = scalar_lea.hbm %s1057_s6, 512 }
 0x1df   :  { %p862_p11 = scmp.ne.s32.totalorder %s1057_s6, %s861_s21  ;;  %p865_p12 = scmp.lt.u32.totalorder %s861_s21, %s1057_s6 }
 0x1e1   :  { %p867_p13 = pnand %p865_p12, %p862_p11 }
 0x1e3   :  { %870 = shalt.err (!%p867_p13)
}
 0x1e4   :  { %s891_s27 = smov 128   ;;  %s892_s28 = smov 8  }
 0x1e5   :  { %602 = dma.vmem_to_hbm [thread:$0]  %s597_s19, 512, %s1057_s6, [#allocation4], %s891_s27, %s891_s27, %s892_s28  }
 0x1e6   :  { %879 = dma.done.wait [#allocation4], 512  }
 0x1e7   :  { %880 = vsyncadd [#allocation4], 4294966784 }
 0x1e8   :  { %606 = vsyncpa [#allocation3], 1 }
 0x1e9   :  { %607 = vsyncpa [#allocation6], 1 }
 0x1ea   :  { %608 = vsyncpa [#allocation9], 1 }
 0x1eb   :  { %609 = vsyncpa [#allocation12], 1 }
 0x1ec   :  { %610 = vsyncpa [#allocation4], 1 }

// kernel: audio2latent2_forward.17
= control target key start
LH: loop header
LB: loop body
LE: loop exit
PB: predicated region body
PF: predicated region fallthrough
CT: control target
= control target key end

     0   :  { %11 = vsyncpa [#allocation3], 0  ;;  %s1161_s0 = inlined_call_operand.hbm [shape: bf16[32,32], index: 0, kind: input, shape index: {}]   ;;  %s1162_s1 = inlined_call_operand.hbm [shape: bf16[1,8,32], index: 1, kind: input, shape index: {}]   ;;  %s1163_s2 = inlined_call_operand.hbm [shape: bf16[5,32,16], index: 2, kind: input, shape index: {}]   ;;  %s1164_s3 = inlined_call_operand.hbm [shape: f32[1,16], index: 3, kind: input, shape index: {}]   ;;  %s1165_s4 = inlined_call_operand.hbm [shape: bf16[32,16], index: 4, kind: input, shape index: {}]   ;;  %s1166_s5 = inlined_call_operand.hbm [shape: f32[1,16], index: 5, kind: input, shape index: {}]   ;;  %s1167_s6 = inlined_call_operand.hbm [shape: f32[32,32], index: 6, kind: output, shape index: {}]  }
   0x1   :  { %12 = vsyncpa [#allocation6], 0 }
   0x2   :  { %13 = vsyncpa [#allocation9], 0 }
   0x3   :  { %14 = vsyncpa [#allocation12], 0 }
   0x4   :  { %15 = vsyncpa [#allocation4], 0  ;;  %s990_s21 = smov [#allocation5]   ;;  %s991_s23 = smov [#allocation8]  }
   0x5   :  { %s34_s22 = sshll.u32 %s990_s21, 4  ;;  %s56_s24 = sshll.u32 %s991_s23, 4  ;;  %s35_s22 = int_to_ptr.vmem [resolvable:$true] %s34_s22  ;;  %s57_s24 = int_to_ptr.vmem [resolvable:$true] %s56_s24 }
   0x6   :  { %s826_s27 = scalar_lea.hbm %s1162_s1, 64 }
   0x7   :  { %p827_p0 = scmp.ne.s32.totalorder %s1162_s1, %s826_s27  ;;  %p830_p1 = scmp.lt.u32.totalorder %s826_s27, %s1162_s1 }
   0x9   :  { %p832_p2 = pnand %p830_p1, %p827_p0 }
   0xb   :  { %835 = shalt.err (!%p832_p2)
}
   0xc   :  { %s836_s8 = scalar_lea.vmem %s35_s22, 64  ;;  %p841_p4 = scmp.lt.s32.totalorder %s35_s22, %s35_s22 }
   0xd   :  { %p837_p3 = scmp.ne.s32.totalorder %s35_s22, %s836_s8  ;;  %p842_p5 = scmp.lt.s32.totalorder %s836_s8, %s836_s8 }
   0xf   :  { %p843_p6 = por %p842_p5, %p841_p4 }
  0x11   :  { %p844_p7 = pnand %p843_p6, %p837_p3 }
  0x13   :  { %847 = shalt.err (!%p844_p7)
}
  0x14   :  { %37 = dma.hbm_to_vmem [thread:$0]  %s1162_s1, 64, %s35_s22, [#allocation6]  }
  0x15   :  { %s848_s13 = scalar_lea.hbm %s1164_s3, 16 }
  0x16   :  { %p849_p8 = scmp.ne.s32.totalorder %s1164_s3, %s848_s13  ;;  %p852_p9 = scmp.lt.u32.totalorder %s848_s13, %s1164_s3 }
  0x18   :  { %p854_p10 = pnand %p852_p9, %p849_p8 }
  0x1a   :  { %857 = shalt.err (!%p854_p10)
}
  0x1b   :  { %s858_s18 = scalar_lea.vmem %s57_s24, 16  ;;  %s862_s19 = scalar_lea.vmem %s57_s24, 32 }
  0x1c   :  { %p859_p11 = scmp.ne.s32.totalorder %s57_s24, %s858_s18  ;;  %p863_p12 = scmp.lt.s32.totalorder %s57_s24, %s57_s24 }
  0x1d   :  { %p864_p13 = scmp.lt.s32.totalorder %s862_s19, %s858_s18 }
  0x1f   :  { %p865_p0 = por %p864_p13, %p863_p12 }
  0x21   :  { %p866_p1 = pnand %p865_p0, %p859_p11 }
  0x23   :  { %869 = shalt.err (!%p866_p1)
}
  0x24   :  { %59 = dma.hbm_to_vmem [thread:$0]  %s1164_s3, 16, %s57_s24, [#allocation9]  }
  0x25   :  { %s992_s21 = smov [#allocation2]   ;;  %s870_s26 = scalar_lea.hbm %s1161_s0, 256 }
  0x26   :  { %s21_s22 = sshll.u32 %s992_s21, 4  ;;  %p871_p2 = scmp.ne.s32.totalorder %s1161_s0, %s870_s26  ;;  %s22_s22 = int_to_ptr.vmem [resolvable:$true] %s21_s22 }
  0x27   :  { %p874_p3 = scmp.lt.u32.totalorder %s870_s26, %s1161_s0 }
  0x29   :  { %p876_p4 = pnand %p874_p3, %p871_p2 }
  0x2b   :  { %879 = shalt.err (!%p876_p4)
}
  0x2c   :  { %s880_s7 = scalar_lea.vmem %s22_s22, 256  ;;  %p885_p6 = scmp.lt.s32.totalorder %s22_s22, %s22_s22 }
  0x2d   :  { %p881_p5 = scmp.ne.s32.totalorder %s22_s22, %s880_s7  ;;  %p886_p7 = scmp.lt.s32.totalorder %s880_s7, %s880_s7 }
  0x2f   :  { %p887_p8 = por %p886_p7, %p885_p6 }
  0x31   :  { %p888_p9 = pnand %p887_p8, %p881_p5 }
  0x33   :  { %891 = shalt.err (!%p888_p9)
}
  0x34   :  { %s993_s3 = smov 64   ;;  %s994_s24 = smov 4  }
  0x35   :  { %27 = dma.hbm_to_vmem [thread:$0]  %s1161_s0, 256, %s22_s22, [#allocation3], %s993_s3, %s993_s3, %s994_s24  }
  0x36   :  { %s995_s10 = smov [#allocation7]   ;;  %s996_s12 = smov [#allocation10]  }
  0x37   :  { %s43_s11 = sshll.u32 %s995_s10, 4  ;;  %s65_s13 = sshll.u32 %s996_s12, 4  ;;  %s44_s11 = int_to_ptr.vmem [resolvable:$true] %s43_s11  ;;  %s66_s13 = int_to_ptr.vmem [resolvable:$true] %s65_s13 }
  0x38   :  { %s892_s16 = scalar_lea.hbm %s1163_s2, 1280 }
  0x39   :  { %p893_p10 = scmp.ne.s32.totalorder %s1163_s2, %s892_s16  ;;  %p896_p11 = scmp.lt.u32.totalorder %s892_s16, %s1163_s2 }
  0x3b   :  { %p898_p12 = pnand %p896_p11, %p893_p10 }
  0x3d   :  { %901 = shalt.err (!%p898_p12)
}
  0x3e   :  { %s902_s0 = scalar_lea.vmem %s44_s11, 1280  ;;  %p907_p0 = scmp.lt.s32.totalorder %s44_s11, %s44_s11 }
  0x3f   :  { %p903_p13 = scmp.ne.s32.totalorder %s44_s11, %s902_s0  ;;  %p908_p1 = scmp.lt.s32.totalorder %s902_s0, %s902_s0 }
  0x41   :  { %p909_p2 = por %p908_p1, %p907_p0 }
  0x43   :  { %p910_p3 = pnand %p909_p2, %p903_p13 }
  0x45   :  { %913 = shalt.err (!%p910_p3)
}
  0x46   :  { %49 = dma.hbm_to_vmem [thread:$0]  %s1163_s2, 1280, %s44_s11, [#allocation6], %s993_s3, %s993_s3, %s994_s24  }
  0x47   :  { %s914_s25 = scalar_lea.hbm %s1165_s4, 256 }
  0x48   :  { %p915_p4 = scmp.ne.s32.totalorder %s1165_s4, %s914_s25  ;;  %p918_p5 = scmp.lt.u32.totalorder %s914_s25, %s1165_s4 }
  0x4a   :  { %p920_p6 = pnand %p918_p5, %p915_p4 }
  0x4c   :  { %923 = shalt.err (!%p920_p6)
}
  0x4d   :  { %s924_s30 = scalar_lea.vmem %s66_s13, 256  ;;  %p929_p8 = scmp.lt.s32.totalorder %s66_s13, %s66_s13 }
  0x4e   :  { %p925_p7 = scmp.ne.s32.totalorder %s66_s13, %s924_s30  ;;  %p930_p9 = scmp.lt.s32.totalorder %s924_s30, %s924_s30 }
  0x50   :  { %p931_p10 = por %p930_p9, %p929_p8 }
  0x52   :  { %p932_p11 = pnand %p931_p10, %p925_p7 }
  0x54   :  { %935 = shalt.err (!%p932_p11)
}
  0x55   :  { %71 = dma.hbm_to_vmem [thread:$0]  %s1165_s4, 256, %s66_s13, [#allocation9], %s993_s3, %s993_s3, %s994_s24  }
  0x56   :  { %s997_s8 = smov [#allocation11]   ;;  %s936_s12 = scalar_lea.hbm %s1166_s5, 16 }
  0x57   :  { %s78_s9 = sshll.u32 %s997_s8, 4  ;;  %p937_p12 = scmp.ne.s32.totalorder %s1166_s5, %s936_s12  ;;  %s79_s9 = int_to_ptr.vmem [resolvable:$true] %s78_s9 }
  0x58   :  { %p940_p13 = scmp.lt.u32.totalorder %s936_s12, %s1166_s5 }
  0x5a   :  { %p942_p0 = pnand %p940_p13, %p937_p12 }
  0x5c   :  { %945 = shalt.err (!%p942_p0)
}
  0x5d   :  { %s946_s18 = scalar_lea.vmem %s79_s9, 16  ;;  %s950_s4 = scalar_lea.vmem %s79_s9, 32 }
  0x5e   :  { %p947_p1 = scmp.ne.s32.totalorder %s79_s9, %s946_s18  ;;  %p951_p2 = scmp.lt.s32.totalorder %s79_s9, %s79_s9 }
  0x5f   :  { %p952_p3 = scmp.lt.s32.totalorder %s950_s4, %s946_s18 }
  0x61   :  { %p953_p4 = por %p952_p3, %p951_p2 }
  0x63   :  { %p954_p5 = pnand %p953_p4, %p947_p1 }
  0x65   :  { %957 = shalt.err (!%p954_p5)
}
  0x66   :  { %81 = dma.hbm_to_vmem [thread:$0]  %s1166_s5, 16, %s79_s9, [#allocation12]  }
  0x67   :  { %980 = dma.done.wait [#allocation3], 256  }
  0x68   :  { %981 = vsyncadd [#allocation3], 4294967040 }
  0x69   :  { %982 = dma.done.wait [#allocation6], 1344  }
  0x6a   :  { %983 = vsyncadd [#allocation6], 4294965952 }
  0x6b   :  { %984 = dma.done.wait [#allocation9], 272  }
  0x6c   :  { %985 = vsyncadd [#allocation9], 4294967024 }
  0x6d   :  { %986 = dma.done.wait [#allocation12], 16  }
  0x6e   :  { %987 = vsyncadd [#allocation12], 4294967280  ;;  %v812_v0 = vld [vmem:[#allocation7 + $0x10] sm:$0xff]   ;;  %v813_v1 = vld [vmem:[#allocation7 + $0x20] sm:$0xff]   ;;  %vm117_vm0 = vcmask 1041408   ;;  %vm139_vm1 = vcmask 1046528  }
  0x6f   :  { %736 = vmatprep.subr.bf16.mxu1 %v812_v0  ;;  %v814_v2 = vld [vmem:[#allocation7 + $0x18] sm:$0xff]   ;;  %752 = vmatprep.subr.bf16.mxu0 %v813_v1  ;;  %v815_v3 = vld [vmem:[#allocation7 + $0x28] sm:$0xff]   ;;  %vm157_vm2 = vcmask 261120   ;;  %v818_v9 = vld [vmem:[#allocation7] sm:$0xff]   ;;  %vm284_vm3 = vcmask 1045504   ;;  %vm366_vm4 = vcmask 1044480  }
  0x70   :  { %737 = vmatpush3.bf16.msra.mxu1 %v812_v0  ;;  %753 = vmatpush3.bf16.msra.mxu0 %v813_v1  ;;  %v105_v4 = vld [vmem:[#allocation5] sm:$0x3]  ;;  %v816_v5 = vld [vmem:[#allocation2] sm:$0xff]   ;;  %v1118_v6 = vld [vmem:[#allocation2 + $0x8] sm:$0xff]   ;;  %vm448_vm5 = vcmask 1043456   ;;  %s998_s5 = smov 16  }
  0x71   :  { %738 = vmatprep.subr.bf16.mxu1 %v814_v2  ;;  %754 = vmatprep.subr.bf16.mxu0 %v815_v3  ;;  %v106_v7 = vld [vmem:[#allocation5] sm:$0xc]  ;;  %v118_v8 = vrot.slane %v816_v5, 6  ;;  %v119_v10 = vrot.slane %v1118_v6, 6  ;;  %v819_v11 = vld [vmem:[#allocation7 + $0x30] sm:$0xff]   ;;  %v820_v21 = vld [vmem:[#allocation7 + $0x8] sm:$0xff]  }
  0x72   :  { %v821_v22 = vld [vmem:[#allocation7 + $0x38] sm:$0xff]   ;;  %v823_v31 = vld [vmem:[#allocation7 + $0x40] sm:$0xff]   ;;  %v825_v37 = vld [vmem:[#allocation7 + $0x48] sm:$0xff]   ;;  %vm638_vm10 = vcmask 130048   ;;  %vm659_vm15 = vcmask 261248   ;;  %s999_s13 = smov [#allocation13]  }
  0x73   :  { %v124_v12 = vsel %vm117_vm0, %v105_v4, %v118_v8  ;;  %v120_v13 = vsel %vm117_vm0, %v118_v8, %v119_v10  ;;  %v127_v16 = vsel %vm117_vm0, %v119_v10, %v106_v7  ;;  %v822_v30 = vld [vmem:[#allocation10] sm:$0xff]   ;;  %v824_v36 = vld [vmem:[#allocation10 + $0x8] sm:$0xff]   ;;  %v707_v45 = vld [vmem:[#allocation11] ss:$0 sm:$0xff]  ;;  %s669_s19 = sshll.u32 %s999_s13, 4  ;;  %s670_s19 = int_to_ptr.vmem [resolvable:$true] %s669_s19 }
  0x74   :  { %739 = vmatpush3.bf16.msra.mxu1 %v814_v2  ;;  %755 = vmatpush3.bf16.msra.mxu0 %v815_v3  ;;  %v140_v14 = vrot.slane %v124_v12, 1  ;;  %v285_v15 = vrot.slane %v124_v12, 2  ;;  %v141_v17 = vrot.slane %v120_v13, 1  ;;  %v286_v18 = vrot.slane %v120_v13, 2  ;;  %v706_v56 = vld [vmem:[#allocation8] ss:$0 sm:$0xff]  ;;  %p963_p7 = scmp.lt.s32.totalorder %s670_s19, %s670_s19 }
  0x75   :  { %744 = vmatprep.subr.bf16.mxu1 %v818_v9  ;;  %760 = vmatprep.subr.bf16.mxu0 %v819_v11  ;;  %v143_v19 = vrot.slane %v127_v16, 1  ;;  %v288_v20 = vrot.slane %v127_v16, 2  ;;  %v367_v23 = vrot.slane %v124_v12, 3  ;;  %v368_v24 = vrot.slane %v120_v13, 3  ;;  %s958_s1 = scalar_lea.vmem %s670_s19, 512 }
  0x76   :  { %v142_v25 = vsel %vm139_vm1, %v140_v14, %v141_v17  ;;  %v287_v26 = vsel %vm284_vm3, %v285_v15, %v286_v18  ;;  %v370_v32 = vrot.slane %v127_v16, 3  ;;  %v449_v33 = vrot.slane %v124_v12, 4  ;;  %p959_p6 = scmp.ne.s32.totalorder %s670_s19, %s958_s1  ;;  %p964_p8 = scmp.lt.s32.totalorder %s958_s1, %s958_s1 }
  0x77   :  { %v144_v27 = vsel %vm139_vm1, %v141_v17, %v143_v19  ;;  %v289_v28 = vsel %vm284_vm3, %v286_v18, %v288_v20  ;;  %740 = vmatprep.mubr.msk.bf16.mxu1 %vm157_vm2, %v142_v25  ;;  %756 = vmatprep.mubr.msk.bf16.mxu0 %vm157_vm2, %v287_v26  ;;  %v369_v29 = vsel %vm366_vm4, %v367_v23, %v368_v24  ;;  %v450_v34 = vrot.slane %v120_v13, 4 }
  0x78   :  { %741 = vmatmul.mubr.msk.bf16.vlgmr.msra.gmra.mrb[0].mxu1 %vm157_vm2, %v144_v27  ;;  %757 = vmatmul.mubr.msk.bf16.vlgmr.msra.gmra.mrb[0].mxu0 %vm157_vm2, %v289_v28  ;;  %v371_v35 = vsel %vm366_vm4, %v368_v24, %v370_v32  ;;  %v452_v39 = vrot.slane %v127_v16, 4  ;;  %p965_p9 = por %p964_p8, %p963_p7 }
  0x79   :  { %745 = vmatpush3.bf16.msra.mxu1 %v818_v9  ;;  %761 = vmatpush3.bf16.msra.mxu0 %v819_v11  ;;  %v451_v38 = vsel %vm448_vm5, %v449_v33, %v450_v34 }
  0x7a   :  { %746 = vmatprep.subr.bf16.mxu1 %v820_v21  ;;  %762 = vmatprep.subr.bf16.mxu0 %v821_v22  ;;  %v453_v40 = vsel %vm448_vm5, %v450_v34, %v452_v39  ;;  %p966_p10 = pnand %p965_p9, %p959_p6 }
  0x7b   :  { %748 = vmatprep.mubr.msk.bf16.mxu1 %vm157_vm2, %v124_v12  ;;  %764 = vmatprep.mubr.msk.bf16.mxu0 %vm157_vm2, %v369_v29 }
  0x7d   :  { %747 = vmatpush3.bf16.msra.mxu1 %v820_v21  ;;  %763 = vmatpush3.bf16.msra.mxu0 %v821_v22 }
  0x7e   :  { %776 = vmatprep.subr.bf16.mxu1 %v822_v30  ;;  %768 = vmatprep.subr.bf16.mxu0 %v823_v31 }
  0x84   :  { %749 = vmatmul.mubr.msk.bf16.vlgmr.msra.gmra.mrb[0].mxu1 %vm157_vm2, %v120_v13  ;;  %765 = vmatmul.mubr.msk.bf16.vlgmr.msra.gmra.mrb[0].mxu0 %vm157_vm2, %v371_v35 }
  0x85   :  { %777 = vmatpush3.bf16.msra.mxu1 %v822_v30  ;;  %769 = vmatpush3.bf16.msra.mxu0 %v823_v31 }
  0x86   :  { %778 = vmatprep.subr.bf16.mxu1 %v824_v36  ;;  %780 = vmatprep.mubr.msk.bf16.mxu1 %vm157_vm2, %v816_v5 }
  0x87   :  { %770 = vmatprep.subr.bf16.mxu0 %v825_v37  ;;  %772 = vmatprep.mubr.msk.bf16.mxu0 %vm157_vm2, %v451_v38 }
  0x89   :  { %779 = vmatpush3.bf16.msra.mxu1 %v824_v36  ;;  %771 = vmatpush3.bf16.msra.mxu0 %v825_v37 }
  0x8c   :  { %781 = vmatmul.mubr.msk.bf16.vlgmr.msra.gmra.mrb[4].mxu1 %vm157_vm2, %v1118_v6 }
  0x90   :  { %773 = vmatmul.mubr.msk.bf16.vlgmr.msra.gmra.mrb[0].mxu0 %vm157_vm2, %v453_v40 }
 0x157   :  { %v750_v41 = vpop.f32.mrb[0].mxu1 }
 0x158   :  { %v264_v42 = vpop.f32.mrb[1].mxu1 }
 0x159   :  { %v751_v43 = vpop.f32.mrb[2].mxu1 }
 0x15a   :  { %v267_v44 = vpop.f32.mrb[3].mxu1 }
 0x15f   :  { %v782_v46 = vpop.f32.mrb[4].mxu1 }
 0x160   :  { %v608_v47 = vadd.f32 %v782_v46, %v707_v45  ;;  %v599_v48 = vpop.f32.mrb[5].mxu1 }
 0x161   :  { %v600_v49 = vadd.f32 %v707_v45, %v599_v48  ;;  %v783_v50 = vpop.f32.mrb[6].mxu1 }
 0x162   :  { %v611_v51 = vadd.f32 %v783_v50, %v707_v45  ;;  %v602_v52 = vpop.f32.mrb[7].mxu1  ;;  %vm628_vm6 = vcmp.ge.f32.partialorder %v608_v47, 0.0  ;;  %v632_v53 = vmul.f32 0.2, %v608_v47 }
 0x163   :  { %v603_v54 = vadd.f32 %v707_v45, %v602_v52  ;;  %v774_v55 = vpop.f32.mrb[0].mxu0  ;;  %vm626_vm7 = vcmp.ge.f32.partialorder %v600_v49, 0.0  ;;  %v630_v57 = vmul.f32 0.2, %v600_v49 }
 0x164   :  { %v633_v58 = vmul.f32 0.2, %v611_v51  ;;  %v784_v59 = vadd.f32 %v774_v55, %v750_v41  ;;  %v506_v60 = vpop.f32.mrb[1].mxu0  ;;  %v636_v61 = vsel %vm628_vm6, %v608_v47, %v632_v53  ;;  %vm629_vm8 = vcmp.ge.f32.partialorder %v611_v51, 0.0 }
 0x165   :  { %v631_v62 = vmul.f32 0.2, %v603_v54  ;;  %v785_v63 = vadd.f32 %v506_v60, %v264_v42  ;;  %v775_v0 = vpop.f32.mrb[2].mxu0  ;;  %651 = vrot.lane.b32.xlu1 %v636_v61, %s998_s5  ;;  %v634_v1 = vsel %vm626_vm7, %v600_v49, %v630_v57  ;;  %vm627_vm9 = vcmp.ge.f32.partialorder %v603_v54, 0.0 }
 0x166   :  { %v534_v2 = vadd.f32 %v784_v59, %v706_v56  ;;  %v786_v3 = vadd.f32 %v775_v0, %v751_v43  ;;  %v509_v4 = vpop.f32.mrb[3].mxu0  ;;  %647 = vrot.lane.b32.xlu0 %v634_v1, %s998_s5  ;;  %v637_v9 = vsel %vm629_vm8, %v611_v51, %v633_v58 }
 0x167   :  { %v532_v5 = vadd.f32 %v785_v63, %v706_v56  ;;  %v787_v6 = vadd.f32 %v509_v4, %v267_v44  ;;  %v635_v12 = vsel %vm627_vm9, %v603_v54, %v631_v62 }
 0x168   :  { %vm616_vm11 = vcmp.ge.f32.partialorder %v534_v2, 0.0  ;;  %v620_v7 = vmul.f32 0.2, %v534_v2  ;;  %v535_v8 = vadd.f32 %v786_v3, %v706_v56 }
 0x169   :  { %vm614_vm12 = vcmp.ge.f32.partialorder %v532_v5, 0.0  ;;  %v618_v10 = vmul.f32 0.2, %v532_v5  ;;  %v533_v11 = vadd.f32 %v787_v6, %v706_v56  ;;  %653 = vrot.lane.b32.xlu1 %v637_v9, %s998_s5 }
 0x16a   :  { %v624_v13 = vsel %vm616_vm11, %v534_v2, %v620_v7  ;;  %vm617_vm13 = vcmp.ge.f32.partialorder %v535_v8, 0.0  ;;  %v621_v14 = vmul.f32 0.2, %v535_v8  ;;  %649 = vrot.lane.b32.xlu0 %v635_v12, %s998_s5 }
 0x16b   :  { %v622_v15 = vsel %vm614_vm12, %v532_v5, %v618_v10  ;;  %vm615_vm14 = vcmp.ge.f32.partialorder %v533_v11, 0.0  ;;  %v619_v16 = vmul.f32 0.2, %v533_v11  ;;  %641 = vst.msk [vmem:[#allocation13 + $0x10] sm:$0xff] %vm638_vm10, %v624_v13 }
 0x16c   :  { %v625_v17 = vsel %vm617_vm13, %v535_v8, %v621_v14  ;;  %639 = vst.msk [vmem:[#allocation13] sm:$0xff] %vm638_vm10, %v622_v15 }
 0x16d   :  { %v623_v18 = vsel %vm615_vm14, %v533_v11, %v619_v16  ;;  %642 = vst.msk [vmem:[#allocation13 + $0x18] sm:$0xff] %vm638_vm10, %v625_v17 }
 0x16e   :  { %640 = vst.msk [vmem:[#allocation13 + $0x8] sm:$0xff] %vm638_vm10, %v623_v18 }
 0x1d7   :  { %v652_v19 = vpop.permute.xlu1 %651 }
 0x1d8   :  { %662 = vst.msk [vmem:[#allocation13 + $0x10] sm:$0xff] %vm659_vm15, %v652_v19  ;;  %v648_v20 = vpop.permute.xlu0 %647 }
 0x1d9   :  { %660 = vst.msk [vmem:[#allocation13] sm:$0xff] %vm659_vm15, %v648_v20 }
 0x1db   :  { %v654_v21 = vpop.permute.xlu1 %653 }
 0x1dc   :  { %663 = vst.msk [vmem:[#allocation13 + $0x18] sm:$0xff] %vm659_vm15, %v654_v21  ;;  %v650_v22 = vpop.permute.xlu0 %649 }
 0x1dd   :  { %661 = vst.msk [vmem:[#allocation13 + $0x8] sm:$0xff] %vm659_vm15, %v650_v22 }
 0x1de   :  { %969 = shalt.err (!%p966_p10)
}
 0x1df   :  { %s970_s21 = scalar_lea.hbm %s1167_s6, 512 }
 0x1e0   :  { %p971_p11 = scmp.ne.s32.totalorder %s1167_s6, %s970_s21  ;;  %p974_p12 = scmp.lt.u32.totalorder %s970_s21, %s1167_s6 }
 0x1e2   :  { %p976_p13 = pnand %p974_p12, %p971_p11 }
 0x1e4   :  { %979 = shalt.err (!%p976_p13)
}
 0x1e5   :  { %s1000_s27 = smov 128   ;;  %s1001_s28 = smov 8  }
 0x1e6   :  { %675 = dma.vmem_to_hbm [thread:$0]  %s670_s19, 512, %s1167_s6, [#allocation4], %s1000_s27, %s1000_s27, %s1001_s28  }
 0x1e7   :  { %988 = dma.done.wait [#allocation4], 512  }
 0x1e8   :  { %989 = vsyncadd [#allocation4], 4294966784 }
 0x1e9   :  { %679 = vsyncpa [#allocation3], 1 }
 0x1ea   :  { %680 = vsyncpa [#allocation6], 1 }
 0x1eb   :  { %681 = vsyncpa [#allocation9], 1 }
 0x1ec   :  { %682 = vsyncpa [#allocation12], 1 }
 0x1ed   :  { %683 = vsyncpa [#allocation4], 1 }

// kernel: audio2latent2_forward.19
= control target key start
LH: loop header
LB: loop body
LE: loop exit
PB: predicated region body
PF: predicated region fallthrough
CT: control target
= control target key end

     0   :  { %11 = vsyncpa [#allocation3], 0  ;;  %s1018_s0 = inlined_call_operand.hbm [shape: bf16[16,32], index: 0, kind: input, shape index: {}]   ;;  %s1019_s1 = inlined_call_operand.hbm [shape: bf16[1,8,32], index: 1, kind: input, shape index: {}]   ;;  %s1020_s2 = inlined_call_operand.hbm [shape: bf16[5,32,32], index: 2, kind: input, shape index: {}]   ;;  %s1021_s3 = inlined_call_operand.hbm [shape: f32[1,32], index: 3, kind: input, shape index: {}]   ;;  %s1022_s4 = inlined_call_operand.hbm [shape: bf16[32,32], index: 4, kind: input, shape index: {}]   ;;  %s1023_s5 = inlined_call_operand.hbm [shape: f32[1,32], index: 5, kind: input, shape index: {}]   ;;  %s1024_s6 = inlined_call_operand.hbm [shape: f32[16,64], index: 6, kind: output, shape index: {}]  }
   0x1   :  { %12 = vsyncpa [#allocation6], 0 }
   0x2   :  { %13 = vsyncpa [#allocation9], 0 }
   0x3   :  { %14 = vsyncpa [#allocation12], 0 }
   0x4   :  { %15 = vsyncpa [#allocation4], 0  ;;  %s844_s21 = smov [#allocation5]   ;;  %s845_s23 = smov [#allocation8]  }
   0x5   :  { %s34_s22 = sshll.u32 %s844_s21, 4  ;;  %s56_s24 = sshll.u32 %s845_s23, 4  ;;  %s35_s22 = int_to_ptr.vmem [resolvable:$true] %s34_s22  ;;  %s57_s24 = int_to_ptr.vmem [resolvable:$true] %s56_s24 }
   0x6   :  { %s680_s27 = scalar_lea.hbm %s1019_s1, 64 }
   0x7   :  { %p681_p0 = scmp.ne.s32.totalorder %s1019_s1, %s680_s27  ;;  %p684_p1 = scmp.lt.u32.totalorder %s680_s27, %s1019_s1 }
   0x9   :  { %p686_p2 = pnand %p684_p1, %p681_p0 }
   0xb   :  { %689 = shalt.err (!%p686_p2)
}
   0xc   :  { %s690_s8 = scalar_lea.vmem %s35_s22, 64  ;;  %p695_p4 = scmp.lt.s32.totalorder %s35_s22, %s35_s22 }
   0xd   :  { %p691_p3 = scmp.ne.s32.totalorder %s35_s22, %s690_s8  ;;  %p696_p5 = scmp.lt.s32.totalorder %s690_s8, %s690_s8 }
   0xf   :  { %p697_p6 = por %p696_p5, %p695_p4 }
  0x11   :  { %p698_p7 = pnand %p697_p6, %p691_p3 }
  0x13   :  { %701 = shalt.err (!%p698_p7)
}
  0x14   :  { %37 = dma.hbm_to_vmem [thread:$0]  %s1019_s1, 64, %s35_s22, [#allocation6]  }
  0x15   :  { %s702_s13 = scalar_lea.hbm %s1021_s3, 16 }
  0x16   :  { %p703_p8 = scmp.ne.s32.totalorder %s1021_s3, %s702_s13  ;;  %p706_p9 = scmp.lt.u32.totalorder %s702_s13, %s1021_s3 }
  0x18   :  { %p708_p10 = pnand %p706_p9, %p703_p8 }
  0x1a   :  { %711 = shalt.err (!%p708_p10)
}
  0x1b   :  { %s712_s18 = scalar_lea.vmem %s57_s24, 16  ;;  %s716_s19 = scalar_lea.vmem %s57_s24, 32 }
  0x1c   :  { %p713_p11 = scmp.ne.s32.totalorder %s57_s24, %s712_s18  ;;  %p717_p12 = scmp.lt.s32.totalorder %s57_s24, %s57_s24 }
  0x1d   :  { %p718_p13 = scmp.lt.s32.totalorder %s716_s19, %s712_s18 }
  0x1f   :  { %p719_p0 = por %p718_p13, %p717_p12 }
  0x21   :  { %p720_p1 = pnand %p719_p0, %p713_p11 }
  0x23   :  { %723 = shalt.err (!%p720_p1)
}
  0x24   :  { %59 = dma.hbm_to_vmem [thread:$0]  %s1021_s3, 16, %s57_s24, [#allocation9]  }
  0x25   :  { %s846_s21 = smov [#allocation2]   ;;  %s724_s26 = scalar_lea.hbm %s1018_s0, 128 }
  0x26   :  { %s21_s22 = sshll.u32 %s846_s21, 4  ;;  %p725_p2 = scmp.ne.s32.totalorder %s1018_s0, %s724_s26  ;;  %s22_s22 = int_to_ptr.vmem [resolvable:$true] %s21_s22 }
  0x27   :  { %p728_p3 = scmp.lt.u32.totalorder %s724_s26, %s1018_s0 }
  0x29   :  { %p730_p4 = pnand %p728_p3, %p725_p2 }
  0x2b   :  { %733 = shalt.err (!%p730_p4)
}
  0x2c   :  { %s734_s7 = scalar_lea.vmem %s22_s22, 128  ;;  %p739_p6 = scmp.lt.s32.totalorder %s22_s22, %s22_s22 }
  0x2d   :  { %p735_p5 = scmp.ne.s32.totalorder %s22_s22, %s734_s7  ;;  %p740_p7 = scmp.lt.s32.totalorder %s734_s7, %s734_s7 }
  0x2f   :  { %p741_p8 = por %p740_p7, %p739_p6 }
  0x31   :  { %p742_p9 = pnand %p741_p8, %p735_p5 }
  0x33   :  { %745 = shalt.err (!%p742_p9)
}
  0x34   :  { %s847_s3 = smov 64   ;;  %s848_s24 = smov 4  }
  0x35   :  { %27 = dma.hbm_to_vmem [thread:$0]  %s1018_s0, 128, %s22_s22, [#allocation3], %s847_s3, %s847_s3, %s848_s24  }
  0x36   :  { %s849_s10 = smov [#allocation7]   ;;  %s850_s12 = smov [#allocation10]  }
  0x37   :  { %s43_s11 = sshll.u32 %s849_s10, 4  ;;  %s65_s13 = sshll.u32 %s850_s12, 4  ;;  %s44_s11 = int_to_ptr.vmem [resolvable:$true] %s43_s11  ;;  %s66_s13 = int_to_ptr.vmem [resolvable:$true] %s65_s13 }
  0x38   :  { %s746_s16 = scalar_lea.hbm %s1020_s2, 1280 }
  0x39   :  { %p747_p10 = scmp.ne.s32.totalorder %s1020_s2, %s746_s16  ;;  %p750_p11 = scmp.lt.u32.totalorder %s746_s16, %s1020_s2 }
  0x3b   :  { %p752_p12 = pnand %p750_p11, %p747_p10 }
  0x3d   :  { %755 = shalt.err (!%p752_p12)
}
  0x3e   :  { %s756_s0 = scalar_lea.vmem %s44_s11, 1280  ;;  %p761_p0 = scmp.lt.s32.totalorder %s44_s11, %s44_s11 }
  0x3f   :  { %p757_p13 = scmp.ne.s32.totalorder %s44_s11, %s756_s0  ;;  %p762_p1 = scmp.lt.s32.totalorder %s756_s0, %s756_s0 }
  0x41   :  { %p763_p2 = por %p762_p1, %p761_p0 }
  0x43   :  { %p764_p3 = pnand %p763_p2, %p757_p13 }
  0x45   :  { %767 = shalt.err (!%p764_p3)
}
  0x46   :  { %49 = dma.hbm_to_vmem [thread:$0]  %s1020_s2, 1280, %s44_s11, [#allocation6], %s847_s3, %s847_s3, %s848_s24  }
  0x47   :  { %s768_s25 = scalar_lea.hbm %s1022_s4, 256 }
  0x48   :  { %p769_p4 = scmp.ne.s32.totalorder %s1022_s4, %s768_s25  ;;  %p772_p5 = scmp.lt.u32.totalorder %s768_s25, %s1022_s4 }
  0x4a   :  { %p774_p6 = pnand %p772_p5, %p769_p4 }
  0x4c   :  { %777 = shalt.err (!%p774_p6)
}
  0x4d   :  { %s778_s30 = scalar_lea.vmem %s66_s13, 256  ;;  %p783_p8 = scmp.lt.s32.totalorder %s66_s13, %s66_s13 }
  0x4e   :  { %p779_p7 = scmp.ne.s32.totalorder %s66_s13, %s778_s30  ;;  %p784_p9 = scmp.lt.s32.totalorder %s778_s30, %s778_s30 }
  0x50   :  { %p785_p10 = por %p784_p9, %p783_p8 }
  0x52   :  { %p786_p11 = pnand %p785_p10, %p779_p7 }
  0x54   :  { %789 = shalt.err (!%p786_p11)
}
  0x55   :  { %71 = dma.hbm_to_vmem [thread:$0]  %s1022_s4, 256, %s66_s13, [#allocation9], %s847_s3, %s847_s3, %s848_s24  }
  0x56   :  { %s851_s8 = smov [#allocation11]   ;;  %s790_s12 = scalar_lea.hbm %s1023_s5, 16 }
  0x57   :  { %s78_s9 = sshll.u32 %s851_s8, 4  ;;  %p791_p12 = scmp.ne.s32.totalorder %s1023_s5, %s790_s12  ;;  %s79_s9 = int_to_ptr.vmem [resolvable:$true] %s78_s9 }
  0x58   :  { %p794_p13 = scmp.lt.u32.totalorder %s790_s12, %s1023_s5 }
  0x5a   :  { %p796_p0 = pnand %p794_p13, %p791_p12 }
  0x5c   :  { %799 = shalt.err (!%p796_p0)
}
  0x5d   :  { %s800_s18 = scalar_lea.vmem %s79_s9, 16  ;;  %s804_s4 = scalar_lea.vmem %s79_s9, 32 }
  0x5e   :  { %p801_p1 = scmp.ne.s32.totalorder %s79_s9, %s800_s18  ;;  %p805_p2 = scmp.lt.s32.totalorder %s79_s9, %s79_s9 }
  0x5f   :  { %p806_p3 = scmp.lt.s32.totalorder %s804_s4, %s800_s18 }
  0x61   :  { %p807_p4 = por %p806_p3, %p805_p2 }
  0x63   :  { %p808_p5 = pnand %p807_p4, %p801_p1 }
  0x65   :  { %811 = shalt.err (!%p808_p5)
}
  0x66   :  { %81 = dma.hbm_to_vmem [thread:$0]  %s1023_s5, 16, %s79_s9, [#allocation12]  }
  0x67   :  { %834 = dma.done.wait [#allocation3], 128  }
  0x68   :  { %835 = vsyncadd [#allocation3], 4294967168 }
  0x69   :  { %836 = dma.done.wait [#allocation6], 1344  }
  0x6a   :  { %837 = vsyncadd [#allocation6], 4294965952 }
  0x6b   :  { %838 = dma.done.wait [#allocation9], 272  }
  0x6c   :  { %839 = vsyncadd [#allocation9], 4294967024 }
  0x6d   :  { %840 = dma.done.wait [#allocation12], 16  }
  0x6e   :  { %841 = vsyncadd [#allocation12], 4294967280  ;;  %v852_v0 = vmov 0.0   ;;  %vm853_vm0 = vmmov 0   ;;  %v667_v1 = vld [vmem:[#allocation7 + $0x10] sm:$0xff]   ;;  %v668_v2 = vld [vmem:[#allocation7] sm:$0xff]  }
  0x6f   :  { %605 = vmatprep.subr.bf16.mxu0 %v852_v0  ;;  %613 = vmatprep.subr.bf16.mxu1 %v852_v0  ;;  %v669_v3 = vld [vmem:[#allocation7 + $0x18] sm:$0xff]   ;;  %v670_v4 = vld [vmem:[#allocation7 + $0x8] sm:$0xff]   ;;  %vm111_vm1 = vcmask 1041408   ;;  %vm144_vm2 = vcmask 261120   ;;  %v673_v9 = vld [vmem:[#allocation7 + $0x30] sm:$0xff]   ;;  %vm128_vm3 = vcmask 1046528  }
  0x70   :  { %609 = vmatprep.mubr.msk.bf16.mxu0 %vm853_vm0, %v852_v0  ;;  %617 = vmatprep.mubr.msk.bf16.mxu1 %vm853_vm0, %v852_v0  ;;  %v103_v5 = vld [vmem:[#allocation5] sm:$0x3]  ;;  %v671_v6 = vld [vmem:[#allocation2] sm:$0xff]   ;;  %v104_v7 = vld [vmem:[#allocation5] sm:$0xc]  ;;  %vm316_vm4 = vcmask 1044480  }
  0x71   :  { %606 = vmatpush3.bf16.msra.mxu0 %v667_v1  ;;  %614 = vmatpush3.bf16.msra.mxu1 %v668_v2  ;;  %v110_v8 = vrot.slane %v671_v6, 6  ;;  %v672_v14 = vld [vmem:[#allocation7 + $0x20] sm:$0xff]   ;;  %v675_v15 = vld [vmem:[#allocation7 + $0x38] sm:$0xff]   ;;  %v674_v19 = vld [vmem:[#allocation7 + $0x28] sm:$0xff]   ;;  %vm249_vm5 = vcmask 1045504   ;;  %vm383_vm6 = vcmask 1043456  }
  0x72   :  { %607 = vmatprep.subr.bf16.mxu0 %v852_v0  ;;  %615 = vmatprep.subr.bf16.mxu1 %v852_v0  ;;  %v677_v23 = vld [vmem:[#allocation10] sm:$0xff]   ;;  %v676_v25 = vld [vmem:[#allocation7 + $0x40] sm:$0xff]   ;;  %v678_v27 = vld [vmem:[#allocation7 + $0x48] sm:$0xff]   ;;  %s854_s5 = smov 32   ;;  %vm543_vm11 = vcmask 523520   ;;  %s855_s13 = smov [#allocation13]  }
  0x73   :  { %v114_v10 = vsel %vm111_vm1, %v103_v5, %v110_v8  ;;  %v116_v11 = vsel %vm111_vm1, %v110_v8, %v104_v7  ;;  %v679_v26 = vld [vmem:[#allocation10 + $0x8] sm:$0xff]   ;;  %v583_v52 = vld [vmem:[#allocation11] ss:$0 sm:$0xff]  ;;  %v582_v57 = vld [vmem:[#allocation8] ss:$0 sm:$0xff]  ;;  %s551_s19 = sshll.u32 %s855_s13, 4  ;;  %s552_s19 = int_to_ptr.vmem [resolvable:$true] %s551_s19 }
  0x74   :  { %v129_v12 = vrot.slane %v114_v10, 1  ;;  %v130_v13 = vrot.slane %v116_v11, 1  ;;  %v317_v16 = vrot.slane %v114_v10, 3  ;;  %v318_v17 = vrot.slane %v116_v11, 3  ;;  %s812_s1 = scalar_lea.vmem %s552_s19, 256  ;;  %p817_p7 = scmp.lt.s32.totalorder %s552_s19, %s552_s19 }
  0x75   :  { %608 = vmatpush3.bf16.msra.mxu0 %v669_v3  ;;  %616 = vmatpush3.bf16.msra.mxu1 %v670_v4  ;;  %v250_v20 = vrot.slane %v114_v10, 2  ;;  %v251_v21 = vrot.slane %v116_v11, 2  ;;  %v384_v28 = vrot.slane %v114_v10, 4  ;;  %v385_v29 = vrot.slane %v116_v11, 4  ;;  %p813_p6 = scmp.ne.s32.totalorder %s552_s19, %s812_s1  ;;  %p818_p8 = scmp.lt.s32.totalorder %s812_s1, %s812_s1 }
  0x76   :  { %621 = vmatprep.subr.bf16.mxu0 %v852_v0  ;;  %629 = vmatprep.subr.bf16.mxu1 %v852_v0  ;;  %v131_v18 = vsel %vm128_vm3, %v129_v12, %v130_v13  ;;  %v319_v22 = vsel %vm316_vm4, %v317_v16, %v318_v17 }
  0x77   :  { %v252_v24 = vsel %vm249_vm5, %v250_v20, %v251_v21  ;;  %v386_v30 = vsel %vm383_vm6, %v384_v28, %v385_v29  ;;  %p819_p9 = por %p818_p8, %p817_p7 }
  0x78   :  { %618 = vmatmul.mubr.msk.bf16.vlgmr.msra.gmra.mrb[0].mxu1 %vm144_vm2, %v114_v10  ;;  %610 = vmatmul.mubr.msk.bf16.vlgmr.msra.gmra.mrb[0].mxu0 %vm144_vm2, %v131_v18 }
  0x79   :  { %630 = vmatpush3.bf16.msra.mxu1 %v673_v9  ;;  %633 = vmatprep.mubr.msk.bf16.mxu1 %vm853_vm0, %v852_v0  ;;  %p820_p10 = pnand %p819_p9, %p813_p6 }
  0x7a   :  { %631 = vmatprep.subr.bf16.mxu1 %v852_v0  ;;  %622 = vmatpush3.bf16.msra.mxu0 %v672_v14 }
  0x7b   :  { %625 = vmatprep.mubr.msk.bf16.mxu0 %vm853_vm0, %v852_v0  ;;  %623 = vmatprep.subr.bf16.mxu0 %v852_v0 }
  0x7d   :  { %632 = vmatpush3.bf16.msra.mxu1 %v675_v15 }
  0x7e   :  { %645 = vmatprep.subr.bf16.mxu1 %v852_v0  ;;  %624 = vmatpush3.bf16.msra.mxu0 %v674_v19 }
  0x7f   :  { %637 = vmatprep.subr.bf16.mxu0 %v852_v0 }
  0x80   :  { %634 = vmatmul.mubr.msk.bf16.vlgmr.msra.gmra.mrb[4].mxu1 %vm144_vm2, %v319_v22 }
  0x81   :  { %646 = vmatpush3.bf16.msra.mxu1 %v677_v23  ;;  %649 = vmatprep.mubr.msk.bf16.mxu1 %vm853_vm0, %v852_v0 }
  0x82   :  { %647 = vmatprep.subr.bf16.mxu1 %v852_v0  ;;  %626 = vmatmul.mubr.msk.bf16.vlgmr.msra.gmra.mrb[4].mxu0 %vm144_vm2, %v252_v24 }
  0x83   :  { %638 = vmatpush3.bf16.msra.mxu0 %v676_v25  ;;  %641 = vmatprep.mubr.msk.bf16.mxu0 %vm853_vm0, %v852_v0 }
  0x84   :  { %639 = vmatprep.subr.bf16.mxu0 %v852_v0 }
  0x85   :  { %648 = vmatpush3.bf16.msra.mxu1 %v679_v26 }
  0x87   :  { %640 = vmatpush3.bf16.msra.mxu0 %v678_v27 }
  0x88   :  { %650 = vmatmul.mubr.msk.bf16.vlgmr.msra.gmra.mrb[8].mxu1 %vm144_vm2, %v671_v6 }
  0x8a   :  { %642 = vmatmul.mubr.msk.bf16.vlgmr.msra.gmra.mrb[8].mxu0 %vm144_vm2, %v386_v30 }
 0x14b   :  { %v237_v31 = vpop.f32.mrb[0].mxu1  ;;  %v182_v34 = vpop.f32.mrb[0].mxu0 }
 0x14c   :  { %v619_v32 = vpop.f32.mrb[1].mxu1  ;;  %v238_v36 = vadd.f32 %v237_v31, %v182_v34  ;;  %v611_v37 = vpop.f32.mrb[1].mxu0 }
 0x14d   :  { %v240_v33 = vpop.f32.mrb[2].mxu1  ;;  %v185_v38 = vpop.f32.mrb[2].mxu0 }
 0x14e   :  { %v620_v35 = vpop.f32.mrb[3].mxu1  ;;  %v241_v39 = vadd.f32 %v240_v33, %v185_v38  ;;  %v612_v40 = vpop.f32.mrb[3].mxu0 }
 0x153   :  { %v369_v41 = vpop.f32.mrb[4].mxu1 }
 0x154   :  { %v635_v42 = vpop.f32.mrb[5].mxu1 }
 0x155   :  { %v372_v43 = vpop.f32.mrb[6].mxu1  ;;  %v302_v44 = vpop.f32.mrb[4].mxu0 }
 0x156   :  { %v636_v45 = vpop.f32.mrb[7].mxu1  ;;  %v309_v46 = vadd.f32 %v302_v44, %v238_v36  ;;  %v627_v47 = vpop.f32.mrb[5].mxu0 }
 0x157   :  { %v305_v48 = vpop.f32.mrb[6].mxu0 }
 0x158   :  { %v376_v49 = vadd.f32 %v369_v41, %v309_v46  ;;  %v310_v50 = vadd.f32 %v305_v48, %v241_v39  ;;  %v628_v51 = vpop.f32.mrb[7].mxu0 }
 0x15a   :  { %v377_v53 = vadd.f32 %v372_v43, %v310_v50 }
 0x15b   :  { %v514_v54 = vpop.f32.mrb[8].mxu1 }
 0x15c   :  { %v515_v55 = vadd.f32 %v583_v52, %v514_v54  ;;  %v651_v56 = vpop.f32.mrb[9].mxu1 }
 0x15d   :  { %v517_v58 = vpop.f32.mrb[10].mxu1  ;;  %v436_v59 = vpop.f32.mrb[8].mxu0 }
 0x15e   :  { %v518_v60 = vadd.f32 %v583_v52, %v517_v58  ;;  %v652_v61 = vpop.f32.mrb[11].mxu1  ;;  %vm527_vm7 = vcmp.ge.f32.partialorder %v515_v55, 0.0  ;;  %v529_v62 = vmul.f32 0.2, %v515_v55  ;;  %v443_v63 = vadd.f32 %v436_v59, %v376_v49  ;;  %v643_v0 = vpop.f32.mrb[9].mxu0 }
 0x15f   :  { %v439_v1 = vpop.f32.mrb[10].mxu0 }
 0x160   :  { %v530_v2 = vmul.f32 0.2, %v518_v60  ;;  %v531_v3 = vsel %vm527_vm7, %v515_v55, %v529_v62  ;;  %v452_v4 = vadd.f32 %v582_v57, %v443_v63  ;;  %v444_v5 = vadd.f32 %v439_v1, %v377_v53  ;;  %v644_v6 = vpop.f32.mrb[11].mxu0 }
 0x161   :  { %537 = vrot.lane.b32.xlu0 %v531_v3, %s854_s5  ;;  %vm528_vm8 = vcmp.ge.f32.partialorder %v518_v60, 0.0 }
 0x162   :  { %vm521_vm9 = vcmp.ge.f32.partialorder %v452_v4, 0.0  ;;  %v523_v7 = vmul.f32 0.2, %v452_v4  ;;  %v453_v8 = vadd.f32 %v582_v57, %v444_v5  ;;  %v532_v9 = vsel %vm528_vm8, %v518_v60, %v530_v2 }
 0x164   :  { %v525_v10 = vsel %vm521_vm9, %v452_v4, %v523_v7  ;;  %vm522_vm10 = vcmp.ge.f32.partialorder %v453_v8, 0.0  ;;  %v524_v11 = vmul.f32 0.2, %v453_v8 }
 0x165   :  { %539 = vrot.lane.b32.xlu0 %v532_v9, %s854_s5  ;;  %533 = vst.msk [vmem:[#allocation13] sm:$0xff] %vm144_vm2, %v525_v10 }
 0x166   :  { %v526_v12 = vsel %vm522_vm10, %v453_v8, %v524_v11 }
 0x167   :  { %534 = vst.msk [vmem:[#allocation13 + $0x8] sm:$0xff] %vm144_vm2, %v526_v12 }
 0x1d3   :  { %v538_v13 = vpop.permute.xlu0 %537 }
 0x1d4   :  { %544 = vst.msk [vmem:[#allocation13] sm:$0xff] %vm543_vm11, %v538_v13 }
 0x1d7   :  { %v540_v14 = vpop.permute.xlu0 %539 }
 0x1d8   :  { %545 = vst.msk [vmem:[#allocation13 + $0x8] sm:$0xff] %vm543_vm11, %v540_v14 }
 0x1d9   :  { %823 = shalt.err (!%p820_p10)
}
 0x1da   :  { %s824_s21 = scalar_lea.hbm %s1024_s6, 256 }
 0x1db   :  { %p825_p11 = scmp.ne.s32.totalorder %s1024_s6, %s824_s21  ;;  %p828_p12 = scmp.lt.u32.totalorder %s824_s21, %s1024_s6 }
 0x1dd   :  { %p830_p13 = pnand %p828_p12, %p825_p11 }
 0x1df   :  { %833 = shalt.err (!%p830_p13)
}
 0x1e0   :  { %s856_s27 = smov 128   ;;  %s857_s28 = smov 8  }
 0x1e1   :  { %557 = dma.vmem_to_hbm [thread:$0]  %s552_s19, 256, %s1024_s6, [#allocation4], %s856_s27, %s856_s27, %s857_s28  }
 0x1e2   :  { %842 = dma.done.wait [#allocation4], 256  }
 0x1e3   :  { %843 = vsyncadd [#allocation4], 4294967040 }
 0x1e4   :  { %561 = vsyncpa [#allocation3], 1 }
 0x1e5   :  { %562 = vsyncpa [#allocation6], 1 }
 0x1e6   :  { %563 = vsyncpa [#allocation9], 1 }
 0x1e7   :  { %564 = vsyncpa [#allocation12], 1 }
 0x1e8   :  { %565 = vsyncpa [#allocation4], 1 }

// kernel: audio2latent2_forward.21
= control target key start
LH: loop header
LB: loop body
LE: loop exit
PB: predicated region body
PF: predicated region fallthrough
CT: control target
= control target key end

     0   :  { %7 = vsyncpa [#allocation3], 0  ;;  %s223_s0 = inlined_call_operand.hbm [shape: f32[4,256], index: 0, kind: input, shape index: {}]   ;;  %s224_s1 = inlined_call_operand.hbm [shape: f32[1,2,256], index: 1, kind: input, shape index: {}]   ;;  %s225_s2 = inlined_call_operand.hbm [shape: f32[4,128], index: 2, kind: output, shape index: {}]  }
   0x1   :  { %8 = vsyncpa [#allocation6], 0 }
   0x2   :  { %9 = vsyncpa [#allocation4], 0  ;;  %s169_s9 = smov [#allocation2]   ;;  %s170_s11 = smov [#allocation5]  }
   0x3   :  { %s16_s10 = sshll.u32 %s169_s9, 4  ;;  %s26_s12 = sshll.u32 %s170_s11, 4  ;;  %s17_s10 = int_to_ptr.vmem [resolvable:$true] %s16_s10  ;;  %s27_s12 = int_to_ptr.vmem [resolvable:$true] %s26_s12 }
   0x4   :  { %s97_s15 = scalar_lea.hbm %s223_s0, 128 }
   0x5   :  { %p98_p0 = scmp.ne.s32.totalorder %s223_s0, %s97_s15  ;;  %p101_p1 = scmp.lt.u32.totalorder %s97_s15, %s223_s0 }
   0x7   :  { %p103_p2 = pnand %p101_p1, %p98_p0 }
   0x9   :  { %106 = shalt.err (!%p103_p2)
}
   0xa   :  { %s107_s20 = scalar_lea.vmem %s17_s10, 128  ;;  %p112_p4 = scmp.lt.s32.totalorder %s17_s10, %s17_s10 }
   0xb   :  { %p108_p3 = scmp.ne.s32.totalorder %s17_s10, %s107_s20  ;;  %p113_p5 = scmp.lt.s32.totalorder %s107_s20, %s107_s20 }
   0xd   :  { %p114_p6 = por %p113_p5, %p112_p4 }
   0xf   :  { %p115_p7 = pnand %p114_p6, %p108_p3 }
  0x11   :  { %118 = shalt.err (!%p115_p7)
}
  0x12   :  { %19 = dma.hbm_to_vmem [thread:$0]  %s223_s0, 128, %s17_s10, [#allocation3]  }
  0x13   :  { %s119_s25 = scalar_lea.hbm %s224_s1, 64 }
  0x14   :  { %p120_p8 = scmp.ne.s32.totalorder %s224_s1, %s119_s25  ;;  %p123_p9 = scmp.lt.u32.totalorder %s119_s25, %s224_s1 }
  0x16   :  { %p125_p10 = pnand %p123_p9, %p120_p8 }
  0x18   :  { %128 = shalt.err (!%p125_p10)
}
  0x19   :  { %s129_s30 = scalar_lea.vmem %s27_s12, 64  ;;  %p134_p12 = scmp.lt.s32.totalorder %s27_s12, %s27_s12 }
  0x1a   :  { %p130_p11 = scmp.ne.s32.totalorder %s27_s12, %s129_s30  ;;  %p135_p13 = scmp.lt.s32.totalorder %s129_s30, %s129_s30 }
  0x1c   :  { %p136_p0 = por %p135_p13, %p134_p12 }
  0x1e   :  { %p137_p1 = pnand %p136_p0, %p130_p11 }
  0x20   :  { %140 = shalt.err (!%p137_p1)
}
  0x21   :  { %29 = dma.hbm_to_vmem [thread:$0]  %s224_s1, 64, %s27_s12, [#allocation6]  }
  0x22   :  { %163 = dma.done.wait [#allocation3], 128  }
  0x23   :  { %164 = vsyncadd [#allocation3], 4294967168 }
  0x24   :  { %165 = dma.done.wait [#allocation6], 64  }
  0x25   :  { %166 = vsyncadd [#allocation6], 4294967232  ;;  %v39_v0 = vlaneseq  ;;  %v36_v4 = vld [vmem:[#allocation2] sm:$0xff]  ;;  %v37_v5 = vld [vmem:[#allocation5] ss:$2 sm:$0x3] }
  0x26   :  { %vm55_vm0 = vcmask 1040384   ;;  %v50_v8 = vcombine.high %v36_v4, %v36_v4  ;;  %v51_v9 = vrot.slane %v36_v4, 7  ;;  %v59_v10 = vld [vmem:[#allocation5 + $0x1] ss:$2 sm:$0x3]  ;;  %v60_v14 = vrot.slane %v36_v4, 1 }
  0x27   :  { %v40_v1 = vshrl.u32 %v39_v0, 7  ;;  %vm68_vm1 = vcmask 1042432   ;;  %s171_s1 = smov [#allocation7]  }
  0x28   :  { %v52_v11 = vrot.slane %v50_v8, 7  ;;  %s83_s4 = sshll.u32 %s171_s1, 4  ;;  %s84_s4 = int_to_ptr.vmem [resolvable:$true] %s83_s4 }
  0x29   :  { %v41_v2 = vsub.s32 0, %v40_v1  ;;  %v45_v3 = vsub.s32 1, %v40_v1  ;;  %s141_s5 = scalar_lea.vmem %s84_s4, 64  ;;  %p146_p3 = scmp.lt.s32.totalorder %s84_s4, %s84_s4 }
  0x2a   :  { %p142_p2 = scmp.ne.s32.totalorder %s84_s4, %s141_s5  ;;  %p147_p4 = scmp.lt.s32.totalorder %s141_s5, %s141_s5 }
  0x2b   :  { %v42_v6 = vrot.slane %v37_v5, %v41_v2  ;;  %v46_v7 = vrot.slane %v37_v5, %v45_v3  ;;  %v66_v15 = vrot.slane %v59_v10, %v41_v2 }
  0x2c   :  { %p148_p5 = por %p147_p4, %p146_p3 }
  0x2d   :  { %v56_v12 = vsel %vm55_vm0, %v42_v6, %v51_v9  ;;  %v57_v13 = vsel %vm55_vm0, %v46_v7, %v52_v11  ;;  %v69_v18 = vsel %vm68_vm1, %v60_v14, %v66_v15 }
  0x2e   :  { %v70_v16 = vadd.f32 %v57_v13, %v56_v12  ;;  %p149_p6 = pnand %p148_p5, %p142_p2 }
  0x30   :  { %v71_v17 = vadd.f32 %v70_v16, %v36_v4 }
  0x32   :  { %v73_v19 = vadd.f32 %v71_v17, %v50_v8 }
  0x34   :  { %v74_v20 = vadd.f32 %v73_v19, %v69_v18 }
  0x36   :  { %v75_v21 = vmul.f32 0.2, %v74_v20 }
  0x38   :  { %76 = vst [vmem:[#allocation7] sm:$0xf] %v75_v21 }
  0x39   :  { %152 = shalt.err (!%p149_p6)
}
  0x3a   :  { %s153_s8 = scalar_lea.hbm %s225_s2, 64 }
  0x3b   :  { %p154_p7 = scmp.ne.s32.totalorder %s225_s2, %s153_s8  ;;  %p157_p8 = scmp.lt.u32.totalorder %s153_s8, %s225_s2 }
  0x3d   :  { %p159_p9 = pnand %p157_p8, %p154_p7 }
  0x3f   :  { %162 = shalt.err (!%p159_p9)
}
  0x40   :  { %86 = dma.vmem_to_hbm [thread:$0]  %s84_s4, 64, %s225_s2, [#allocation4]  }
  0x41   :  { %167 = dma.done.wait [#allocation4], 64  }
  0x42   :  { %168 = vsyncadd [#allocation4], 4294967232 }
  0x43   :  { %90 = vsyncpa [#allocation3], 1 }
  0x44   :  { %91 = vsyncpa [#allocation6], 1 }
  0x45   :  { %92 = vsyncpa [#allocation4], 1 }

// kernel: audio2latent2_forward.20
= control target key start
LH: loop header
LB: loop body
LE: loop exit
PB: predicated region body
PF: predicated region fallthrough
CT: control target
= control target key end

     0   :  { %11 = vsyncpa [#allocation3], 0  ;;  %s1202_s0 = inlined_call_operand.hbm [shape: bf16[16,64], index: 0, kind: input, shape index: {}]   ;;  %s1203_s1 = inlined_call_operand.hbm [shape: bf16[1,8,64], index: 1, kind: input, shape index: {}]   ;;  %s1204_s2 = inlined_call_operand.hbm [shape: bf16[5,64,32], index: 2, kind: input, shape index: {}]   ;;  %s1205_s3 = inlined_call_operand.hbm [shape: f32[1,32], index: 3, kind: input, shape index: {}]   ;;  %s1206_s4 = inlined_call_operand.hbm [shape: bf16[64,32], index: 4, kind: input, shape index: {}]   ;;  %s1207_s5 = inlined_call_operand.hbm [shape: f32[1,32], index: 5, kind: input, shape index: {}]   ;;  %s1208_s6 = inlined_call_operand.hbm [shape: f32[16,64], index: 6, kind: output, shape index: {}]  }
   0x1   :  { %12 = vsyncpa [#allocation6], 0 }
   0x2   :  { %13 = vsyncpa [#allocation9], 0 }
   0x3   :  { %14 = vsyncpa [#allocation12], 0 }
   0x4   :  { %15 = vsyncpa [#allocation4], 0  ;;  %s1001_s21 = smov [#allocation5]   ;;  %s1002_s23 = smov [#allocation8]  }
   0x5   :  { %s34_s22 = sshll.u32 %s1001_s21, 4  ;;  %s56_s24 = sshll.u32 %s1002_s23, 4  ;;  %s35_s22 = int_to_ptr.vmem [resolvable:$true] %s34_s22  ;;  %s57_s24 = int_to_ptr.vmem [resolvable:$true] %s56_s24 }
   0x6   :  { %s837_s27 = scalar_lea.hbm %s1203_s1, 64 }
   0x7   :  { %p838_p0 = scmp.ne.s32.totalorder %s1203_s1, %s837_s27  ;;  %p841_p1 = scmp.lt.u32.totalorder %s837_s27, %s1203_s1 }
   0x9   :  { %p843_p2 = pnand %p841_p1, %p838_p0 }
   0xb   :  { %846 = shalt.err (!%p843_p2)
}
   0xc   :  { %s847_s8 = scalar_lea.vmem %s35_s22, 64  ;;  %p852_p4 = scmp.lt.s32.totalorder %s35_s22, %s35_s22 }
   0xd   :  { %p848_p3 = scmp.ne.s32.totalorder %s35_s22, %s847_s8  ;;  %p853_p5 = scmp.lt.s32.totalorder %s847_s8, %s847_s8 }
   0xf   :  { %p854_p6 = por %p853_p5, %p852_p4 }
  0x11   :  { %p855_p7 = pnand %p854_p6, %p848_p3 }
  0x13   :  { %858 = shalt.err (!%p855_p7)
}
  0x14   :  { %37 = dma.hbm_to_vmem [thread:$0]  %s1203_s1, 64, %s35_s22, [#allocation6]  }
  0x15   :  { %s859_s13 = scalar_lea.hbm %s1205_s3, 16 }
  0x16   :  { %p860_p8 = scmp.ne.s32.totalorder %s1205_s3, %s859_s13  ;;  %p863_p9 = scmp.lt.u32.totalorder %s859_s13, %s1205_s3 }
  0x18   :  { %p865_p10 = pnand %p863_p9, %p860_p8 }
  0x1a   :  { %868 = shalt.err (!%p865_p10)
}
  0x1b   :  { %s869_s18 = scalar_lea.vmem %s57_s24, 16  ;;  %s873_s19 = scalar_lea.vmem %s57_s24, 32 }
  0x1c   :  { %p870_p11 = scmp.ne.s32.totalorder %s57_s24, %s869_s18  ;;  %p874_p12 = scmp.lt.s32.totalorder %s57_s24, %s57_s24 }
  0x1d   :  { %p875_p13 = scmp.lt.s32.totalorder %s873_s19, %s869_s18 }
  0x1f   :  { %p876_p0 = por %p875_p13, %p874_p12 }
  0x21   :  { %p877_p1 = pnand %p876_p0, %p870_p11 }
  0x23   :  { %880 = shalt.err (!%p877_p1)
}
  0x24   :  { %59 = dma.hbm_to_vmem [thread:$0]  %s1205_s3, 16, %s57_s24, [#allocation9]  }
  0x25   :  { %s1003_s21 = smov [#allocation2]   ;;  %s881_s26 = scalar_lea.hbm %s1202_s0, 128 }
  0x26   :  { %s21_s22 = sshll.u32 %s1003_s21, 4  ;;  %p882_p2 = scmp.ne.s32.totalorder %s1202_s0, %s881_s26  ;;  %s22_s22 = int_to_ptr.vmem [resolvable:$true] %s21_s22 }
  0x27   :  { %p885_p3 = scmp.lt.u32.totalorder %s881_s26, %s1202_s0 }
  0x29   :  { %p887_p4 = pnand %p885_p3, %p882_p2 }
  0x2b   :  { %890 = shalt.err (!%p887_p4)
}
  0x2c   :  { %s891_s7 = scalar_lea.vmem %s22_s22, 128  ;;  %p896_p6 = scmp.lt.s32.totalorder %s22_s22, %s22_s22 }
  0x2d   :  { %p892_p5 = scmp.ne.s32.totalorder %s22_s22, %s891_s7  ;;  %p897_p7 = scmp.lt.s32.totalorder %s891_s7, %s891_s7 }
  0x2f   :  { %p898_p8 = por %p897_p7, %p896_p6 }
  0x31   :  { %p899_p9 = pnand %p898_p8, %p892_p5 }
  0x33   :  { %902 = shalt.err (!%p899_p9)
}
  0x34   :  { %s1004_s3 = smov 64   ;;  %s1005_s24 = smov 4  }
  0x35   :  { %27 = dma.hbm_to_vmem [thread:$0]  %s1202_s0, 128, %s22_s22, [#allocation3], %s1004_s3, %s1004_s3, %s1005_s24  }
  0x36   :  { %s1006_s10 = smov [#allocation7]   ;;  %s1007_s12 = smov [#allocation10]  }
  0x37   :  { %s43_s11 = sshll.u32 %s1006_s10, 4  ;;  %s65_s13 = sshll.u32 %s1007_s12, 4  ;;  %s44_s11 = int_to_ptr.vmem [resolvable:$true] %s43_s11  ;;  %s66_s13 = int_to_ptr.vmem [resolvable:$true] %s65_s13 }
  0x38   :  { %s903_s16 = scalar_lea.hbm %s1204_s2, 2560 }
  0x39   :  { %p904_p10 = scmp.ne.s32.totalorder %s1204_s2, %s903_s16  ;;  %p907_p11 = scmp.lt.u32.totalorder %s903_s16, %s1204_s2 }
  0x3b   :  { %p909_p12 = pnand %p907_p11, %p904_p10 }
  0x3d   :  { %912 = shalt.err (!%p909_p12)
}
  0x3e   :  { %s913_s0 = scalar_lea.vmem %s44_s11, 2560  ;;  %p918_p0 = scmp.lt.s32.totalorder %s44_s11, %s44_s11 }
  0x3f   :  { %p914_p13 = scmp.ne.s32.totalorder %s44_s11, %s913_s0  ;;  %p919_p1 = scmp.lt.s32.totalorder %s913_s0, %s913_s0 }
  0x41   :  { %p920_p2 = por %p919_p1, %p918_p0 }
  0x43   :  { %p921_p3 = pnand %p920_p2, %p914_p13 }
  0x45   :  { %924 = shalt.err (!%p921_p3)
}
  0x46   :  { %49 = dma.hbm_to_vmem [thread:$0]  %s1204_s2, 2560, %s44_s11, [#allocation6], %s1004_s3, %s1004_s3, %s1005_s24  }
  0x47   :  { %s925_s25 = scalar_lea.hbm %s1206_s4, 512 }
  0x48   :  { %p926_p4 = scmp.ne.s32.totalorder %s1206_s4, %s925_s25  ;;  %p929_p5 = scmp.lt.u32.totalorder %s925_s25, %s1206_s4 }
  0x4a   :  { %p931_p6 = pnand %p929_p5, %p926_p4 }
  0x4c   :  { %934 = shalt.err (!%p931_p6)
}
  0x4d   :  { %s935_s30 = scalar_lea.vmem %s66_s13, 512  ;;  %p940_p8 = scmp.lt.s32.totalorder %s66_s13, %s66_s13 }
  0x4e   :  { %p936_p7 = scmp.ne.s32.totalorder %s66_s13, %s935_s30  ;;  %p941_p9 = scmp.lt.s32.totalorder %s935_s30, %s935_s30 }
  0x50   :  { %p942_p10 = por %p941_p9, %p940_p8 }
  0x52   :  { %p943_p11 = pnand %p942_p10, %p936_p7 }
  0x54   :  { %946 = shalt.err (!%p943_p11)
}
  0x55   :  { %71 = dma.hbm_to_vmem [thread:$0]  %s1206_s4, 512, %s66_s13, [#allocation9], %s1004_s3, %s1004_s3, %s1005_s24  }
  0x56   :  { %s1008_s8 = smov [#allocation11]   ;;  %s947_s12 = scalar_lea.hbm %s1207_s5, 16 }
  0x57   :  { %s78_s9 = sshll.u32 %s1008_s8, 4  ;;  %p948_p12 = scmp.ne.s32.totalorder %s1207_s5, %s947_s12  ;;  %s79_s9 = int_to_ptr.vmem [resolvable:$true] %s78_s9 }
  0x58   :  { %p951_p13 = scmp.lt.u32.totalorder %s947_s12, %s1207_s5 }
  0x5a   :  { %p953_p0 = pnand %p951_p13, %p948_p12 }
  0x5c   :  { %956 = shalt.err (!%p953_p0)
}
  0x5d   :  { %s957_s18 = scalar_lea.vmem %s79_s9, 16  ;;  %s961_s4 = scalar_lea.vmem %s79_s9, 32 }
  0x5e   :  { %p958_p1 = scmp.ne.s32.totalorder %s79_s9, %s957_s18  ;;  %p962_p2 = scmp.lt.s32.totalorder %s79_s9, %s79_s9 }
  0x5f   :  { %p963_p3 = scmp.lt.s32.totalorder %s961_s4, %s957_s18 }
  0x61   :  { %p964_p4 = por %p963_p3, %p962_p2 }
  0x63   :  { %p965_p5 = pnand %p964_p4, %p958_p1 }
  0x65   :  { %968 = shalt.err (!%p965_p5)
}
  0x66   :  { %81 = dma.hbm_to_vmem [thread:$0]  %s1207_s5, 16, %s79_s9, [#allocation12]  }
  0x67   :  { %991 = dma.done.wait [#allocation3], 128  }
  0x68   :  { %992 = vsyncadd [#allocation3], 4294967168 }
  0x69   :  { %993 = dma.done.wait [#allocation6], 2624  }
  0x6a   :  { %994 = vsyncadd [#allocation6], 4294964672 }
  0x6b   :  { %995 = dma.done.wait [#allocation9], 528  }
  0x6c   :  { %996 = vsyncadd [#allocation9], 4294966768 }
  0x6d   :  { %997 = dma.done.wait [#allocation12], 16  }
  0x6e   :  { %998 = vsyncadd [#allocation12], 4294967280  ;;  %v1009_v0 = vmov 0.0   ;;  %vm1010_vm0 = vmmov 0   ;;  %v812_v1 = vld [vmem:[#allocation7 + $0x20] sm:$0xff]   ;;  %v814_v3 = vld [vmem:[#allocation7 + $0x28] sm:$0xff]  }
  0x6f   :  { %726 = vmatprep.subr.bf16.mxu0 %v1009_v0  ;;  %738 = vmatprep.subr.bf16.mxu1 %v1009_v0  ;;  %v813_v2 = vld [vmem:[#allocation7] sm:$0xff]   ;;  %v815_v4 = vld [vmem:[#allocation7 + $0x8] sm:$0xff]   ;;  %v816_v5 = vld [vmem:[#allocation7 + $0x30] sm:$0xff]   ;;  %vm111_vm1 = vcmask 1041408   ;;  %vm136_vm2 = vcmask 1046528   ;;  %vm164_vm3 = vcmask 523264  }
  0x70   :  { %734 = vmatprep.mubr.msk.bf16.mxu0 %vm1010_vm0, %v1009_v0  ;;  %746 = vmatprep.mubr.msk.bf16.mxu1 %vm1010_vm0, %v1009_v0  ;;  %v817_v6 = vld [vmem:[#allocation7 + $0x10] sm:$0xff]   ;;  %v818_v7 = vld [vmem:[#allocation7 + $0x38] sm:$0xff]   ;;  %v821_v17 = vld [vmem:[#allocation7 + $0x40] sm:$0xff]   ;;  %vm285_vm4 = vcmask 1045504   ;;  %vm368_vm5 = vcmask 1044480   ;;  %vm451_vm6 = vcmask 1043456  }
  0x71   :  { %727 = vmatpush3.bf16.msra.mxu0 %v812_v1  ;;  %739 = vmatpush3.bf16.msra.mxu1 %v813_v2  ;;  %v103_v8 = vld [vmem:[#allocation5] sm:$0x3]  ;;  %v1141_v9 = vld [vmem:[#allocation2] sm:$0xff]   ;;  %v104_v10 = vld [vmem:[#allocation5] sm:$0xc]  ;;  %vm629_vm9 = vcmask 261120  }
  0x72   :  { %728 = vmatprep.subr.bf16.mxu0 %v1009_v0  ;;  %740 = vmatprep.subr.bf16.mxu1 %v1009_v0  ;;  %v819_v11 = vld [vmem:[#allocation7 + $0x18] sm:$0xff]   ;;  %v110_v12 = vrot.slane %v1141_v9, 6  ;;  %v822_v18 = vld [vmem:[#allocation7 + $0x60] sm:$0xff]   ;;  %v823_v20 = vld [vmem:[#allocation7 + $0x48] sm:$0xff]   ;;  %s1011_s5 = smov 32   ;;  %vm640_vm12 = vcmask 523520  }
  0x73   :  { %v824_v21 = vld [vmem:[#allocation7 + $0x68] sm:$0xff]   ;;  %v825_v22 = vld [vmem:[#allocation7 + $0x50] sm:$0xff]   ;;  %v827_v24 = vld [vmem:[#allocation7 + $0x58] sm:$0xff]   ;;  %s1012_s13 = smov [#allocation13]  }
  0x74   :  { %v1146_v13 = vsel %vm111_vm1, %v103_v8, %v110_v12  ;;  %v1148_v14 = vsel %vm111_vm1, %v110_v12, %v104_v10  ;;  %v826_v23 = vld [vmem:[#allocation7 + $0x70] sm:$0xff]   ;;  %v828_v27 = vld [vmem:[#allocation7 + $0x78] sm:$0xff]   ;;  %v829_v31 = vld [vmem:[#allocation7 + $0x80] sm:$0xff]   ;;  %s648_s19 = sshll.u32 %s1012_s13, 4  ;;  %s649_s19 = int_to_ptr.vmem [resolvable:$true] %s648_s19 }
  0x75   :  { %729 = vmatpush3.bf16.msra.mxu0 %v814_v3  ;;  %741 = vmatpush3.bf16.msra.mxu1 %v815_v4  ;;  %v137_v15 = vrot.slane %v1146_v13, 1  ;;  %v138_v16 = vrot.slane %v1148_v14, 1  ;;  %v286_v25 = vrot.slane %v1146_v13, 2  ;;  %v287_v26 = vrot.slane %v1148_v14, 2  ;;  %v830_v33 = vld [vmem:[#allocation10] sm:$0xff]   ;;  %v832_v35 = vld [vmem:[#allocation10 + $0x8] sm:$0xff]   ;;  %p974_p7 = scmp.lt.s32.totalorder %s649_s19, %s649_s19 }
  0x76   :  { %730 = vmatprep.subr.bf16.mxu0 %v1009_v0  ;;  %742 = vmatprep.subr.bf16.mxu1 %v1009_v0  ;;  %v369_v28 = vrot.slane %v1146_v13, 3  ;;  %v370_v29 = vrot.slane %v1148_v14, 3  ;;  %v831_v34 = vld [vmem:[#allocation7 + $0x88] sm:$0xff]   ;;  %v833_v36 = vld [vmem:[#allocation7 + $0x90] sm:$0xff]   ;;  %v835_v38 = vld [vmem:[#allocation7 + $0x98] sm:$0xff]   ;;  %v452_v39 = vrot.slane %v1146_v13, 4 }
  0x77   :  { %v139_v19 = vsel %vm136_vm2, %v137_v15, %v138_v16  ;;  %v288_v30 = vsel %vm285_vm4, %v286_v25, %v287_v26  ;;  %v834_v37 = vld [vmem:[#allocation10 + $0x10] sm:$0xff]   ;;  %v453_v40 = vrot.slane %v1148_v14, 4  ;;  %v836_v41 = vld [vmem:[#allocation10 + $0x18] sm:$0xff]   ;;  %v690_v1 = vld [vmem:[#allocation11] ss:$0 sm:$0xff]  ;;  %s969_s1 = scalar_lea.vmem %s649_s19, 256 }
  0x78   :  { %v371_v32 = vsel %vm368_vm5, %v369_v28, %v370_v29  ;;  %v689_v3 = vld [vmem:[#allocation8] ss:$0 sm:$0xff]  ;;  %p970_p6 = scmp.ne.s32.totalorder %s649_s19, %s969_s1  ;;  %p975_p8 = scmp.lt.s32.totalorder %s969_s1, %s969_s1 }
  0x79   :  { %731 = vmatpush3.bf16.msra.mxu0 %v816_v5  ;;  %743 = vmatpush3.bf16.msra.mxu1 %v817_v6  ;;  %v454_v42 = vsel %vm451_vm6, %v452_v39, %v453_v40 }
  0x7a   :  { %732 = vmatprep.subr.bf16.mxu0 %v1009_v0  ;;  %744 = vmatprep.subr.bf16.mxu1 %v1009_v0  ;;  %p976_p9 = por %p975_p8, %p974_p7 }
  0x7c   :  { %p977_p10 = pnand %p976_p9, %p970_p6 }
  0x7d   :  { %733 = vmatpush3.bf16.msra.mxu0 %v818_v7  ;;  %745 = vmatpush3.bf16.msra.mxu1 %v819_v11 }
  0x7e   :  { %750 = vmatprep.subr.bf16.mxu0 %v1009_v0  ;;  %762 = vmatprep.subr.bf16.mxu1 %v1009_v0 }
  0x80   :  { %735 = vmatmul.mubr.msk.bf16.vlgmr.msra.gmra.mrb[0].mxu0 %vm164_vm3, %v139_v19  ;;  %747 = vmatmul.mubr.msk.bf16.vlgmr.msra.gmra.mrb[0].mxu1 %vm164_vm3, %v1146_v13 }
  0x81   :  { %751 = vmatpush3.bf16.msra.mxu0 %v821_v17  ;;  %763 = vmatpush3.bf16.msra.mxu1 %v822_v18 }
  0x82   :  { %752 = vmatprep.subr.bf16.mxu0 %v1009_v0  ;;  %764 = vmatprep.subr.bf16.mxu1 %v1009_v0 }
  0x83   :  { %758 = vmatprep.mubr.msk.bf16.mxu0 %vm1010_vm0, %v1009_v0  ;;  %770 = vmatprep.mubr.msk.bf16.mxu1 %vm1010_vm0, %v1009_v0 }
  0x85   :  { %753 = vmatpush3.bf16.msra.mxu0 %v823_v20  ;;  %765 = vmatpush3.bf16.msra.mxu1 %v824_v21 }
  0x86   :  { %754 = vmatprep.subr.bf16.mxu0 %v1009_v0  ;;  %766 = vmatprep.subr.bf16.mxu1 %v1009_v0 }
  0x89   :  { %755 = vmatpush3.bf16.msra.mxu0 %v825_v22  ;;  %767 = vmatpush3.bf16.msra.mxu1 %v826_v23 }
  0x8a   :  { %756 = vmatprep.subr.bf16.mxu0 %v1009_v0  ;;  %768 = vmatprep.subr.bf16.mxu1 %v1009_v0 }
  0x8d   :  { %757 = vmatpush3.bf16.msra.mxu0 %v827_v24  ;;  %769 = vmatpush3.bf16.msra.mxu1 %v828_v27 }
  0x8e   :  { %774 = vmatprep.subr.bf16.mxu0 %v1009_v0  ;;  %786 = vmatprep.subr.bf16.mxu1 %v1009_v0 }
  0x90   :  { %759 = vmatmul.mubr.msk.bf16.vlgmr.msra.gmra.mrb[4].mxu0 %vm164_vm3, %v288_v30  ;;  %771 = vmatmul.mubr.msk.bf16.vlgmr.msra.gmra.mrb[4].mxu1 %vm164_vm3, %v371_v32 }
  0x91   :  { %775 = vmatpush3.bf16.msra.mxu0 %v829_v31  ;;  %787 = vmatpush3.bf16.msra.mxu1 %v830_v33 }
  0x92   :  { %776 = vmatprep.subr.bf16.mxu0 %v1009_v0  ;;  %788 = vmatprep.subr.bf16.mxu1 %v1009_v0 }
  0x93   :  { %782 = vmatprep.mubr.msk.bf16.mxu0 %vm1010_vm0, %v1009_v0  ;;  %794 = vmatprep.mubr.msk.bf16.mxu1 %vm1010_vm0, %v1009_v0 }
  0x95   :  { %777 = vmatpush3.bf16.msra.mxu0 %v831_v34  ;;  %789 = vmatpush3.bf16.msra.mxu1 %v832_v35 }
  0x96   :  { %778 = vmatprep.subr.bf16.mxu0 %v1009_v0  ;;  %790 = vmatprep.subr.bf16.mxu1 %v1009_v0 }
  0x99   :  { %779 = vmatpush3.bf16.msra.mxu0 %v833_v36  ;;  %791 = vmatpush3.bf16.msra.mxu1 %v834_v37 }
  0x9a   :  { %780 = vmatprep.subr.bf16.mxu0 %v1009_v0  ;;  %792 = vmatprep.subr.bf16.mxu1 %v1009_v0 }
  0x9d   :  { %781 = vmatpush3.bf16.msra.mxu0 %v835_v38  ;;  %793 = vmatpush3.bf16.msra.mxu1 %v836_v41 }
  0xa0   :  { %783 = vmatmul.mubr.msk.bf16.vlgmr.msra.gmra.mrb[8].mxu0 %vm164_vm3, %v454_v42  ;;  %795 = vmatmul.mubr.msk.bf16.vlgmr.msra.gmra.mrb[8].mxu1 %vm164_vm3, %v1141_v9 }
 0x153   :  { %v202_v43 = vpop.f32.mrb[0].mxu0  ;;  %v269_v44 = vpop.f32.mrb[0].mxu1 }
 0x154   :  { %v736_v45 = vpop.f32.mrb[1].mxu0  ;;  %v270_v46 = vadd.f32 %v269_v44, %v202_v43  ;;  %v748_v47 = vpop.f32.mrb[1].mxu1 }
 0x155   :  { %v205_v48 = vpop.f32.mrb[2].mxu0  ;;  %v272_v49 = vpop.f32.mrb[2].mxu1 }
 0x156   :  { %v737_v50 = vpop.f32.mrb[3].mxu0  ;;  %v273_v51 = vadd.f32 %v272_v49, %v205_v48  ;;  %v749_v52 = vpop.f32.mrb[3].mxu1 }
 0x163   :  { %v350_v53 = vpop.f32.mrb[4].mxu0  ;;  %v433_v55 = vpop.f32.mrb[4].mxu1 }
 0x164   :  { %v357_v54 = vadd.f32 %v350_v53, %v270_v46  ;;  %v760_v56 = vpop.f32.mrb[5].mxu0  ;;  %v772_v57 = vpop.f32.mrb[5].mxu1 }
 0x165   :  { %v353_v58 = vpop.f32.mrb[6].mxu0  ;;  %v436_v61 = vpop.f32.mrb[6].mxu1 }
 0x166   :  { %v440_v59 = vadd.f32 %v433_v55, %v357_v54  ;;  %v358_v60 = vadd.f32 %v353_v58, %v273_v51  ;;  %v761_v62 = vpop.f32.mrb[7].mxu0  ;;  %v773_v63 = vpop.f32.mrb[7].mxu1 }
 0x168   :  { %v441_v0 = vadd.f32 %v436_v61, %v358_v60 }
 0x173   :  { %v516_v2 = vpop.f32.mrb[8].mxu0  ;;  %v610_v5 = vpop.f32.mrb[8].mxu1 }
 0x174   :  { %v523_v4 = vadd.f32 %v516_v2, %v440_v59  ;;  %v784_v6 = vpop.f32.mrb[9].mxu0  ;;  %v611_v7 = vadd.f32 %v690_v1, %v610_v5  ;;  %v796_v8 = vpop.f32.mrb[9].mxu1 }
 0x175   :  { %v519_v9 = vpop.f32.mrb[10].mxu0  ;;  %v613_v12 = vpop.f32.mrb[10].mxu1 }
 0x176   :  { %v532_v10 = vadd.f32 %v689_v3, %v523_v4  ;;  %v524_v11 = vadd.f32 %v519_v9, %v441_v0  ;;  %v785_v13 = vpop.f32.mrb[11].mxu0  ;;  %v614_v14 = vadd.f32 %v690_v1, %v613_v12  ;;  %v797_v15 = vpop.f32.mrb[11].mxu1  ;;  %vm623_vm7 = vcmp.ge.f32.partialorder %v611_v7, 0.0 }
 0x177   :  { %v625_v16 = vmul.f32 0.2, %v611_v7 }
 0x178   :  { %vm617_vm8 = vcmp.ge.f32.partialorder %v532_v10, 0.0  ;;  %v619_v17 = vmul.f32 0.2, %v532_v10  ;;  %v533_v18 = vadd.f32 %v689_v3, %v524_v11  ;;  %v626_v19 = vmul.f32 0.2, %v614_v14 }
 0x179   :  { %v627_v20 = vsel %vm623_vm7, %v611_v7, %v625_v16  ;;  %vm624_vm11 = vcmp.ge.f32.partialorder %v614_v14, 0.0 }
 0x17a   :  { %v621_v21 = vsel %vm617_vm8, %v532_v10, %v619_v17  ;;  %vm618_vm10 = vcmp.ge.f32.partialorder %v533_v18, 0.0  ;;  %v620_v22 = vmul.f32 0.2, %v533_v18  ;;  %634 = vrot.lane.b32.xlu0 %v627_v20, %s1011_s5  ;;  %v628_v24 = vsel %vm624_vm11, %v614_v14, %v626_v19 }
 0x17b   :  { %630 = vst.msk [vmem:[#allocation13] sm:$0xff] %vm629_vm9, %v621_v21 }
 0x17c   :  { %v622_v23 = vsel %vm618_vm10, %v533_v18, %v620_v22 }
 0x17d   :  { %631 = vst.msk [vmem:[#allocation13 + $0x8] sm:$0xff] %vm629_vm9, %v622_v23 }
 0x17e   :  { %636 = vrot.lane.b32.xlu0 %v628_v24, %s1011_s5 }
 0x1ec   :  { %v635_v25 = vpop.permute.xlu0 %634 }
 0x1ed   :  { %641 = vst.msk [vmem:[#allocation13] sm:$0xff] %vm640_vm12, %v635_v25 }
 0x1f0   :  { %v637_v26 = vpop.permute.xlu0 %636 }
 0x1f1   :  { %642 = vst.msk [vmem:[#allocation13 + $0x8] sm:$0xff] %vm640_vm12, %v637_v26 }
 0x1f2   :  { %980 = shalt.err (!%p977_p10)
}
 0x1f3   :  { %s981_s21 = scalar_lea.hbm %s1208_s6, 256 }
 0x1f4   :  { %p982_p11 = scmp.ne.s32.totalorder %s1208_s6, %s981_s21  ;;  %p985_p12 = scmp.lt.u32.totalorder %s981_s21, %s1208_s6 }
 0x1f6   :  { %p987_p13 = pnand %p985_p12, %p982_p11 }
 0x1f8   :  { %990 = shalt.err (!%p987_p13)
}
 0x1f9   :  { %s1013_s27 = smov 128   ;;  %s1014_s28 = smov 8  }
 0x1fa   :  { %654 = dma.vmem_to_hbm [thread:$0]  %s649_s19, 256, %s1208_s6, [#allocation4], %s1013_s27, %s1013_s27, %s1014_s28  }
 0x1fb   :  { %999 = dma.done.wait [#allocation4], 256  }
 0x1fc   :  { %1000 = vsyncadd [#allocation4], 4294967040 }
 0x1fd   :  { %658 = vsyncpa [#allocation3], 1 }
 0x1fe   :  { %659 = vsyncpa [#allocation6], 1 }
 0x1ff   :  { %660 = vsyncpa [#allocation9], 1 }
 0x200   :  { %661 = vsyncpa [#allocation12], 1 }
 0x201   :  { %662 = vsyncpa [#allocation4], 1 }

// kernel: audio2latent2_forward.22
= control target key start
LH: loop header
LB: loop body
LE: loop exit
PB: predicated region body
PF: predicated region fallthrough
CT: control target
= control target key end

     0   :  { %11 = vsyncpa [#allocation3], 0  ;;  %s1156_s0 = inlined_call_operand.hbm [shape: bf16[8,64], index: 0, kind: input, shape index: {}]   ;;  %s1157_s1 = inlined_call_operand.hbm [shape: bf16[1,8,64], index: 1, kind: input, shape index: {}]   ;;  %s1158_s2 = inlined_call_operand.hbm [shape: bf16[5,64,32], index: 2, kind: input, shape index: {}]   ;;  %s1159_s3 = inlined_call_operand.hbm [shape: f32[1,32], index: 3, kind: input, shape index: {}]   ;;  %s1160_s4 = inlined_call_operand.hbm [shape: bf16[64,32], index: 4, kind: input, shape index: {}]   ;;  %s1161_s5 = inlined_call_operand.hbm [shape: f32[1,32], index: 5, kind: input, shape index: {}]   ;;  %s1162_s6 = inlined_call_operand.hbm [shape: f32[8,64], index: 6, kind: output, shape index: {}]  }
   0x1   :  { %12 = vsyncpa [#allocation6], 0 }
   0x2   :  { %13 = vsyncpa [#allocation9], 0 }
   0x3   :  { %14 = vsyncpa [#allocation12], 0 }
   0x4   :  { %15 = vsyncpa [#allocation4], 0  ;;  %s963_s21 = smov [#allocation5]   ;;  %s964_s23 = smov [#allocation8]  }
   0x5   :  { %s32_s22 = sshll.u32 %s963_s21, 4  ;;  %s54_s24 = sshll.u32 %s964_s23, 4  ;;  %s33_s22 = int_to_ptr.vmem [resolvable:$true] %s32_s22  ;;  %s55_s24 = int_to_ptr.vmem [resolvable:$true] %s54_s24 }
   0x6   :  { %s799_s27 = scalar_lea.hbm %s1157_s1, 64 }
   0x7   :  { %p800_p0 = scmp.ne.s32.totalorder %s1157_s1, %s799_s27  ;;  %p803_p1 = scmp.lt.u32.totalorder %s799_s27, %s1157_s1 }
   0x9   :  { %p805_p2 = pnand %p803_p1, %p800_p0 }
   0xb   :  { %808 = shalt.err (!%p805_p2)
}
   0xc   :  { %s809_s8 = scalar_lea.vmem %s33_s22, 64  ;;  %p814_p4 = scmp.lt.s32.totalorder %s33_s22, %s33_s22 }
   0xd   :  { %p810_p3 = scmp.ne.s32.totalorder %s33_s22, %s809_s8  ;;  %p815_p5 = scmp.lt.s32.totalorder %s809_s8, %s809_s8 }
   0xf   :  { %p816_p6 = por %p815_p5, %p814_p4 }
  0x11   :  { %p817_p7 = pnand %p816_p6, %p810_p3 }
  0x13   :  { %820 = shalt.err (!%p817_p7)
}
  0x14   :  { %35 = dma.hbm_to_vmem [thread:$0]  %s1157_s1, 64, %s33_s22, [#allocation6]  }
  0x15   :  { %s821_s13 = scalar_lea.hbm %s1159_s3, 16 }
  0x16   :  { %p822_p8 = scmp.ne.s32.totalorder %s1159_s3, %s821_s13  ;;  %p825_p9 = scmp.lt.u32.totalorder %s821_s13, %s1159_s3 }
  0x18   :  { %p827_p10 = pnand %p825_p9, %p822_p8 }
  0x1a   :  { %830 = shalt.err (!%p827_p10)
}
  0x1b   :  { %s831_s18 = scalar_lea.vmem %s55_s24, 16  ;;  %s835_s19 = scalar_lea.vmem %s55_s24, 32 }
  0x1c   :  { %p832_p11 = scmp.ne.s32.totalorder %s55_s24, %s831_s18  ;;  %p836_p12 = scmp.lt.s32.totalorder %s55_s24, %s55_s24 }
  0x1d   :  { %p837_p13 = scmp.lt.s32.totalorder %s835_s19, %s831_s18 }
  0x1f   :  { %p838_p0 = por %p837_p13, %p836_p12 }
  0x21   :  { %p839_p1 = pnand %p838_p0, %p832_p11 }
  0x23   :  { %842 = shalt.err (!%p839_p1)
}
  0x24   :  { %57 = dma.hbm_to_vmem [thread:$0]  %s1159_s3, 16, %s55_s24, [#allocation9]  }
  0x25   :  { %s965_s21 = smov [#allocation2]   ;;  %s966_s23 = smov [#allocation7]  }
  0x26   :  { %s22_s22 = sshll.u32 %s965_s21, 4  ;;  %s41_s25 = sshll.u32 %s966_s23, 4  ;;  %s23_s22 = int_to_ptr.vmem [resolvable:$true] %s22_s22  ;;  %s1034_s25 = int_to_ptr.vmem [resolvable:$true] %s41_s25 }
  0x27   :  { %s843_s28 = scalar_lea.hbm %s1156_s0, 64 }
  0x28   :  { %p844_p2 = scmp.ne.s32.totalorder %s1156_s0, %s843_s28  ;;  %p847_p3 = scmp.lt.u32.totalorder %s843_s28, %s1156_s0 }
  0x2a   :  { %p849_p4 = pnand %p847_p3, %p844_p2 }
  0x2c   :  { %852 = shalt.err (!%p849_p4)
}
  0x2d   :  { %s853_s3 = scalar_lea.vmem %s23_s22, 64  ;;  %p858_p6 = scmp.lt.s32.totalorder %s23_s22, %s23_s22 }
  0x2e   :  { %p854_p5 = scmp.ne.s32.totalorder %s23_s22, %s853_s3  ;;  %p859_p7 = scmp.lt.s32.totalorder %s853_s3, %s853_s3 }
  0x30   :  { %p860_p8 = por %p859_p7, %p858_p6 }
  0x32   :  { %p861_p9 = pnand %p860_p8, %p854_p5 }
  0x34   :  { %864 = shalt.err (!%p861_p9)
}
  0x35   :  { %25 = dma.hbm_to_vmem [thread:$0]  %s1156_s0, 64, %s23_s22, [#allocation3]  }
  0x36   :  { %s865_s12 = scalar_lea.hbm %s1158_s2, 2560 }
  0x37   :  { %p866_p10 = scmp.ne.s32.totalorder %s1158_s2, %s865_s12  ;;  %p869_p11 = scmp.lt.u32.totalorder %s865_s12, %s1158_s2 }
  0x39   :  { %p871_p12 = pnand %p869_p11, %p866_p10 }
  0x3b   :  { %874 = shalt.err (!%p871_p12)
}
  0x3c   :  { %s875_s17 = scalar_lea.vmem %s1034_s25, 2560  ;;  %p880_p0 = scmp.lt.s32.totalorder %s1034_s25, %s1034_s25 }
  0x3d   :  { %p876_p13 = scmp.ne.s32.totalorder %s1034_s25, %s875_s17  ;;  %p881_p1 = scmp.lt.s32.totalorder %s875_s17, %s875_s17 }
  0x3f   :  { %p882_p2 = por %p881_p1, %p880_p0 }
  0x41   :  { %p883_p3 = pnand %p882_p2, %p876_p13 }
  0x43   :  { %886 = shalt.err (!%p883_p3)
}
  0x44   :  { %s967_s0 = smov 64   ;;  %s968_s18 = smov 4  }
  0x45   :  { %47 = dma.hbm_to_vmem [thread:$0]  %s1158_s2, 2560, %s1034_s25, [#allocation6], %s967_s0, %s967_s0, %s968_s18  }
  0x46   :  { %s969_s20 = smov [#allocation10]   ;;  %s970_s22 = smov [#allocation11]  }
  0x47   :  { %s63_s21 = sshll.u32 %s969_s20, 4  ;;  %s76_s23 = sshll.u32 %s970_s22, 4  ;;  %s64_s21 = int_to_ptr.vmem [resolvable:$true] %s63_s21  ;;  %s77_s23 = int_to_ptr.vmem [resolvable:$true] %s76_s23 }
  0x48   :  { %s887_s28 = scalar_lea.hbm %s1160_s4, 512 }
  0x49   :  { %p888_p4 = scmp.ne.s32.totalorder %s1160_s4, %s887_s28  ;;  %p891_p5 = scmp.lt.u32.totalorder %s887_s28, %s1160_s4 }
  0x4b   :  { %p893_p6 = pnand %p891_p5, %p888_p4 }
  0x4d   :  { %896 = shalt.err (!%p893_p6)
}
  0x4e   :  { %s897_s2 = scalar_lea.vmem %s64_s21, 512  ;;  %p902_p8 = scmp.lt.s32.totalorder %s64_s21, %s64_s21 }
  0x4f   :  { %p898_p7 = scmp.ne.s32.totalorder %s64_s21, %s897_s2  ;;  %p903_p9 = scmp.lt.s32.totalorder %s897_s2, %s897_s2 }
  0x51   :  { %p904_p10 = por %p903_p9, %p902_p8 }
  0x53   :  { %p905_p11 = pnand %p904_p10, %p898_p7 }
  0x55   :  { %908 = shalt.err (!%p905_p11)
}
  0x56   :  { %69 = dma.hbm_to_vmem [thread:$0]  %s1160_s4, 512, %s64_s21, [#allocation9], %s967_s0, %s967_s0, %s968_s18  }
  0x57   :  { %s909_s10 = scalar_lea.hbm %s1161_s5, 16 }
  0x58   :  { %p910_p12 = scmp.ne.s32.totalorder %s1161_s5, %s909_s10  ;;  %p913_p13 = scmp.lt.u32.totalorder %s909_s10, %s1161_s5 }
  0x5a   :  { %p915_p0 = pnand %p913_p13, %p910_p12 }
  0x5c   :  { %918 = shalt.err (!%p915_p0)
}
  0x5d   :  { %s919_s15 = scalar_lea.vmem %s77_s23, 16  ;;  %s923_s16 = scalar_lea.vmem %s77_s23, 32 }
  0x5e   :  { %p920_p1 = scmp.ne.s32.totalorder %s77_s23, %s919_s15  ;;  %p924_p2 = scmp.lt.s32.totalorder %s77_s23, %s77_s23 }
  0x5f   :  { %p925_p3 = scmp.lt.s32.totalorder %s923_s16, %s919_s15 }
  0x61   :  { %p926_p4 = por %p925_p3, %p924_p2 }
  0x63   :  { %p927_p5 = pnand %p926_p4, %p920_p1 }
  0x65   :  { %930 = shalt.err (!%p927_p5)
}
  0x66   :  { %79 = dma.hbm_to_vmem [thread:$0]  %s1161_s5, 16, %s77_s23, [#allocation12]  }
  0x67   :  { %953 = dma.done.wait [#allocation3], 64  }
  0x68   :  { %954 = vsyncadd [#allocation3], 4294967232 }
  0x69   :  { %955 = dma.done.wait [#allocation6], 2624  }
  0x6a   :  { %956 = vsyncadd [#allocation6], 4294964672 }
  0x6b   :  { %957 = dma.done.wait [#allocation9], 528  }
  0x6c   :  { %958 = vsyncadd [#allocation9], 4294966768 }
  0x6d   :  { %959 = dma.done.wait [#allocation12], 16  }
  0x6e   :  { %960 = vsyncadd [#allocation12], 4294967280  ;;  %v971_v0 = vmov 0.0   ;;  %vm972_vm0 = vmmov 0   ;;  %v773_v1 = vld [vmem:[#allocation7 + $0x20] sm:$0xff]   ;;  %v775_v3 = vld [vmem:[#allocation7 + $0x28] sm:$0xff]  }
  0x6f   :  { %689 = vmatprep.subr.bf16.mxu0 %v971_v0  ;;  %701 = vmatprep.subr.bf16.mxu1 %v971_v0  ;;  %v774_v2 = vld [vmem:[#allocation7] sm:$0xff]   ;;  %v776_v4 = vld [vmem:[#allocation7 + $0x8] sm:$0xff]   ;;  %v777_v5 = vld [vmem:[#allocation7 + $0x30] sm:$0xff]   ;;  %vm109_vm1 = vcmask 1041408   ;;  %vm113_vm2 = vcmask 1045504   ;;  %vm159_vm3 = vcmask 523264  }
  0x70   :  { %709 = vmatprep.mubr.msk.bf16.mxu1 %vm972_vm0, %v971_v0  ;;  %697 = vmatprep.mubr.msk.bf16.mxu0 %vm972_vm0, %v971_v0  ;;  %v778_v6 = vld [vmem:[#allocation7 + $0x10] sm:$0xff]   ;;  %v1099_v7 = vld [vmem:[#allocation2] sm:$0xf]  ;;  %v100_v8 = vld [vmem:[#allocation5] sm:$0x3]  ;;  %vm599_vm6 = vcmask 261120  }
  0x71   :  { %690 = vmatpush3.bf16.msra.mxu0 %v773_v1  ;;  %702 = vmatpush3.bf16.msra.mxu1 %v774_v2  ;;  %v779_v9 = vld [vmem:[#allocation7 + $0x38] sm:$0xff]   ;;  %v625_v10 = vcombine.low %v1099_v7, %v1099_v7  ;;  %v783_v16 = vld [vmem:[#allocation7 + $0x40] sm:$0xff]   ;;  %v785_v19 = vld [vmem:[#allocation7 + $0x48] sm:$0xff]   ;;  %s973_s5 = smov 32   ;;  %s974_s0 = smov [#allocation13]   ;;  %vm605_vm7 = vcmask 523520  }
  0x72   :  { %691 = vmatprep.subr.bf16.mxu0 %v971_v0  ;;  %703 = vmatprep.subr.bf16.mxu1 %v971_v0  ;;  %v782_v11 = vld [vmem:[#allocation5] ss:$0 sps:$4 sm:$0xcc]   ;;  %v784_v18 = vld [vmem:[#allocation7 + $0x60] sm:$0xff]   ;;  %v786_v20 = vld [vmem:[#allocation7 + $0x68] sm:$0xff]   ;;  %s613_s18 = sshll.u32 %s974_s0, 4  ;;  %s614_s18 = int_to_ptr.vmem [resolvable:$true] %s613_s18 }
  0x73   :  { %v780_v12 = vld [vmem:[#allocation7 + $0x18] sm:$0xff]   ;;  %v105_v13 = vrot.slane %v625_v10, 6  ;;  %v787_v21 = vld [vmem:[#allocation7 + $0x50] sm:$0xff]   ;;  %v791_v27 = vld [vmem:[#allocation7 + $0x80] sm:$0xff]   ;;  %s931_s19 = scalar_lea.vmem %s614_s18, 128  ;;  %p936_p7 = scmp.lt.s32.totalorder %s614_s18, %s614_s18 }
  0x74   :  { %v788_v22 = vld [vmem:[#allocation7 + $0x70] sm:$0xff]   ;;  %v789_v23 = vld [vmem:[#allocation7 + $0x58] sm:$0xff]   ;;  %v792_v28 = vld [vmem:[#allocation10] sm:$0xff]   ;;  %p932_p6 = scmp.ne.s32.totalorder %s614_s18, %s931_s19  ;;  %p937_p8 = scmp.lt.s32.totalorder %s931_s19, %s931_s19 }
  0x75   :  { %692 = vmatpush3.bf16.msra.mxu0 %v775_v3  ;;  %704 = vmatpush3.bf16.msra.mxu1 %v776_v4  ;;  %v112_v14 = vsel %vm109_vm1, %v100_v8, %v105_v13  ;;  %v790_v24 = vld [vmem:[#allocation7 + $0x78] sm:$0xff]   ;;  %v793_v29 = vld [vmem:[#allocation7 + $0x88] sm:$0xff]   ;;  %v795_v31 = vld [vmem:[#allocation7 + $0x90] sm:$0xff]  }
  0x76   :  { %693 = vmatprep.subr.bf16.mxu0 %v971_v0  ;;  %705 = vmatprep.subr.bf16.mxu1 %v971_v0  ;;  %v1106_v15 = vsel %vm113_vm2, %v112_v14, %v782_v11  ;;  %v794_v30 = vld [vmem:[#allocation10 + $0x8] sm:$0xff]   ;;  %v796_v32 = vld [vmem:[#allocation10 + $0x10] sm:$0xff]   ;;  %v798_v34 = vld [vmem:[#allocation10 + $0x18] sm:$0xff]   ;;  %p938_p9 = por %p937_p8, %p936_p7 }
  0x77   :  { %v134_v17 = vrot.slane %v1106_v15, 1  ;;  %v278_v25 = vrot.slane %v1106_v15, 2  ;;  %v356_v26 = vrot.slane %v1106_v15, 3  ;;  %v797_v33 = vld [vmem:[#allocation7 + $0x98] sm:$0xff]   ;;  %v434_v35 = vrot.slane %v1106_v15, 4 }
  0x78   :  { %v653_v55 = vld [vmem:[#allocation11] ss:$0 sm:$0xff]  ;;  %v652_v57 = vld [vmem:[#allocation8] ss:$0 sm:$0xff]  ;;  %p939_p10 = pnand %p938_p9, %p932_p6 }
  0x79   :  { %694 = vmatpush3.bf16.msra.mxu0 %v777_v5  ;;  %706 = vmatpush3.bf16.msra.mxu1 %v778_v6 }
  0x7a   :  { %695 = vmatprep.subr.bf16.mxu0 %v971_v0  ;;  %707 = vmatprep.subr.bf16.mxu1 %v971_v0 }
  0x7d   :  { %696 = vmatpush3.bf16.msra.mxu0 %v779_v9  ;;  %708 = vmatpush3.bf16.msra.mxu1 %v780_v12 }
  0x7e   :  { %713 = vmatprep.subr.bf16.mxu0 %v971_v0  ;;  %725 = vmatprep.subr.bf16.mxu1 %v971_v0 }
  0x80   :  { %698 = vmatmul.mubr.msk.bf16.vlgmr.msra.gmra.mrb[0].mxu0 %vm159_vm3, %v134_v17  ;;  %710 = vmatmul.mubr.msk.bf16.vlgmr.msra.gmra.mrb[0].mxu1 %vm159_vm3, %v1106_v15 }
  0x81   :  { %714 = vmatpush3.bf16.msra.mxu0 %v783_v16  ;;  %726 = vmatpush3.bf16.msra.mxu1 %v784_v18 }
  0x82   :  { %715 = vmatprep.subr.bf16.mxu0 %v971_v0  ;;  %727 = vmatprep.subr.bf16.mxu1 %v971_v0 }
  0x83   :  { %721 = vmatprep.mubr.msk.bf16.mxu0 %vm972_vm0, %v971_v0  ;;  %733 = vmatprep.mubr.msk.bf16.mxu1 %vm972_vm0, %v971_v0 }
  0x85   :  { %716 = vmatpush3.bf16.msra.mxu0 %v785_v19  ;;  %728 = vmatpush3.bf16.msra.mxu1 %v786_v20 }
  0x86   :  { %717 = vmatprep.subr.bf16.mxu0 %v971_v0  ;;  %729 = vmatprep.subr.bf16.mxu1 %v971_v0 }
  0x89   :  { %718 = vmatpush3.bf16.msra.mxu0 %v787_v21  ;;  %730 = vmatpush3.bf16.msra.mxu1 %v788_v22 }
  0x8a   :  { %719 = vmatprep.subr.bf16.mxu0 %v971_v0  ;;  %731 = vmatprep.subr.bf16.mxu1 %v971_v0 }
  0x8d   :  { %720 = vmatpush3.bf16.msra.mxu0 %v789_v23  ;;  %732 = vmatpush3.bf16.msra.mxu1 %v790_v24 }
  0x8e   :  { %737 = vmatprep.subr.bf16.mxu0 %v971_v0  ;;  %749 = vmatprep.subr.bf16.mxu1 %v971_v0 }
  0x90   :  { %722 = vmatmul.mubr.msk.bf16.vlgmr.msra.gmra.mrb[4].mxu0 %vm159_vm3, %v278_v25  ;;  %734 = vmatmul.mubr.msk.bf16.vlgmr.msra.gmra.mrb[4].mxu1 %vm159_vm3, %v356_v26 }
  0x91   :  { %738 = vmatpush3.bf16.msra.mxu0 %v791_v27  ;;  %750 = vmatpush3.bf16.msra.mxu1 %v792_v28 }
  0x92   :  { %739 = vmatprep.subr.bf16.mxu0 %v971_v0  ;;  %751 = vmatprep.subr.bf16.mxu1 %v971_v0 }
  0x93   :  { %745 = vmatprep.mubr.msk.bf16.mxu0 %vm972_vm0, %v971_v0  ;;  %757 = vmatprep.mubr.msk.bf16.mxu1 %vm972_vm0, %v971_v0 }
  0x95   :  { %740 = vmatpush3.bf16.msra.mxu0 %v793_v29  ;;  %752 = vmatpush3.bf16.msra.mxu1 %v794_v30 }
  0x96   :  { %741 = vmatprep.subr.bf16.mxu0 %v971_v0  ;;  %753 = vmatprep.subr.bf16.mxu1 %v971_v0 }
  0x99   :  { %742 = vmatpush3.bf16.msra.mxu0 %v795_v31  ;;  %754 = vmatpush3.bf16.msra.mxu1 %v796_v32 }
  0x9a   :  { %743 = vmatprep.subr.bf16.mxu0 %v971_v0  ;;  %755 = vmatprep.subr.bf16.mxu1 %v971_v0 }
  0x9d   :  { %744 = vmatpush3.bf16.msra.mxu0 %v797_v33  ;;  %756 = vmatpush3.bf16.msra.mxu1 %v798_v34 }
  0xa0   :  { %746 = vmatmul.mubr.msk.bf16.vlgmr.msra.gmra.mrb[8].mxu0 %vm159_vm3, %v434_v35  ;;  %758 = vmatmul.mubr.msk.bf16.vlgmr.msra.gmra.mrb[8].mxu1 %vm159_vm3, %v1099_v7 }
 0x153   :  { %v197_v36 = vpop.f32.mrb[0].mxu0  ;;  %v263_v37 = vpop.f32.mrb[0].mxu1 }
 0x154   :  { %v699_v38 = vpop.f32.mrb[1].mxu0  ;;  %v264_v39 = vadd.f32 %v263_v37, %v197_v36  ;;  %v711_v40 = vpop.f32.mrb[1].mxu1 }
 0x155   :  { %v200_v41 = vpop.f32.mrb[2].mxu0  ;;  %v266_v42 = vpop.f32.mrb[2].mxu1 }
 0x156   :  { %v700_v43 = vpop.f32.mrb[3].mxu0  ;;  %v712_v44 = vpop.f32.mrb[3].mxu1 }
 0x163   :  { %v340_v45 = vpop.f32.mrb[4].mxu0  ;;  %v418_v47 = vpop.f32.mrb[4].mxu1 }
 0x164   :  { %v346_v46 = vadd.f32 %v340_v45, %v264_v39  ;;  %v723_v48 = vpop.f32.mrb[5].mxu0  ;;  %v735_v49 = vpop.f32.mrb[5].mxu1 }
 0x165   :  { %v343_v50 = vpop.f32.mrb[6].mxu0  ;;  %v421_v52 = vpop.f32.mrb[6].mxu1 }
 0x166   :  { %v424_v51 = vadd.f32 %v418_v47, %v346_v46  ;;  %v724_v53 = vpop.f32.mrb[7].mxu0  ;;  %v736_v54 = vpop.f32.mrb[7].mxu1 }
 0x173   :  { %v496_v56 = vpop.f32.mrb[8].mxu0  ;;  %v587_v59 = vpop.f32.mrb[8].mxu1 }
 0x174   :  { %v502_v58 = vadd.f32 %v496_v56, %v424_v51  ;;  %v747_v60 = vpop.f32.mrb[9].mxu0  ;;  %v588_v61 = vadd.f32 %v653_v55, %v587_v59  ;;  %v759_v62 = vpop.f32.mrb[9].mxu1 }
 0x175   :  { %v499_v63 = vpop.f32.mrb[10].mxu0  ;;  %v590_v1 = vpop.f32.mrb[10].mxu1 }
 0x176   :  { %v510_v0 = vadd.f32 %v652_v57, %v502_v58  ;;  %v748_v2 = vpop.f32.mrb[11].mxu0  ;;  %v760_v3 = vpop.f32.mrb[11].mxu1  ;;  %vm596_vm4 = vcmp.ge.f32.partialorder %v588_v61, 0.0  ;;  %v597_v4 = vmul.f32 0.2, %v588_v61 }
 0x178   :  { %vm593_vm5 = vcmp.ge.f32.partialorder %v510_v0, 0.0  ;;  %v594_v5 = vmul.f32 0.2, %v510_v0  ;;  %v598_v6 = vsel %vm596_vm4, %v588_v61, %v597_v4 }
 0x179   :  { %602 = vrot.lane.b32.xlu0 %v598_v6, %s973_s5 }
 0x17a   :  { %v595_v7 = vsel %vm593_vm5, %v510_v0, %v594_v5 }
 0x17b   :  { %600 = vst.msk [vmem:[#allocation13] sm:$0xff] %vm599_vm6, %v595_v7 }
 0x1eb   :  { %v603_v8 = vpop.permute.xlu0 %602 }
 0x1ec   :  { %606 = vst.msk [vmem:[#allocation13] sm:$0xff] %vm605_vm7, %v603_v8 }
 0x1ed   :  { %942 = shalt.err (!%p939_p10)
}
 0x1ee   :  { %s943_s21 = scalar_lea.hbm %s1162_s6, 128 }
 0x1ef   :  { %p944_p11 = scmp.ne.s32.totalorder %s1162_s6, %s943_s21  ;;  %p947_p12 = scmp.lt.u32.totalorder %s943_s21, %s1162_s6 }
 0x1f1   :  { %p949_p13 = pnand %p947_p12, %p944_p11 }
 0x1f3   :  { %952 = shalt.err (!%p949_p13)
}
 0x1f4   :  { %616 = dma.vmem_to_hbm [thread:$0]  %s614_s18, 128, %s1162_s6, [#allocation4]  }
 0x1f5   :  { %961 = dma.done.wait [#allocation4], 128  }
 0x1f6   :  { %962 = vsyncadd [#allocation4], 4294967168 }
 0x1f7   :  { %620 = vsyncpa [#allocation3], 1 }
 0x1f8   :  { %621 = vsyncpa [#allocation6], 1 }
 0x1f9   :  { %622 = vsyncpa [#allocation9], 1 }
 0x1fa   :  { %623 = vsyncpa [#allocation12], 1 }
 0x1fb   :  { %624 = vsyncpa [#allocation4], 1 }

// kernel: audio2latent2_forward.24
= control target key start
LH: loop header
LB: loop body
LE: loop exit
PB: predicated region body
PF: predicated region fallthrough
CT: control target
= control target key end

     0   :  { %8 = vsyncpa [#allocation3], 0  ;;  %s279_s0 = inlined_call_operand.hbm [shape: f32[4,128], index: 0, kind: input, shape index: {}]   ;;  %s280_s1 = inlined_call_operand.hbm [shape: f32[1,2,128], index: 1, kind: input, shape index: {}]   ;;  %s281_s2 = inlined_call_operand.hbm [shape: f32[4,256], index: 2, kind: input, shape index: {}]   ;;  %s282_s3 = inlined_call_operand.hbm [shape: f32[4,256], index: 3, kind: output, shape index: {}]  }
   0x1   :  { %9 = vsyncpa [#allocation6], 0 }
   0x2   :  { %10 = vsyncpa [#allocation4], 0  ;;  %s207_s12 = smov [#allocation5]   ;;  %s208_s14 = smov [#allocation2]  }
   0x3   :  { %s27_s13 = sshll.u32 %s207_s12, 4  ;;  %s17_s15 = sshll.u32 %s208_s14, 4  ;;  %s28_s13 = int_to_ptr.vmem [resolvable:$true] %s27_s13  ;;  %s18_s15 = int_to_ptr.vmem [resolvable:$true] %s17_s15 }
   0x4   :  { %s113_s18 = scalar_lea.hbm %s280_s1, 32 }
   0x5   :  { %p114_p0 = scmp.ne.s32.totalorder %s280_s1, %s113_s18  ;;  %p117_p1 = scmp.lt.u32.totalorder %s113_s18, %s280_s1 }
   0x7   :  { %p119_p2 = pnand %p117_p1, %p114_p0 }
   0x9   :  { %122 = shalt.err (!%p119_p2)
}
   0xa   :  { %s123_s23 = scalar_lea.vmem %s28_s13, 32  ;;  %p128_p4 = scmp.lt.s32.totalorder %s28_s13, %s28_s13 }
   0xb   :  { %p124_p3 = scmp.ne.s32.totalorder %s28_s13, %s123_s23  ;;  %p129_p5 = scmp.lt.s32.totalorder %s123_s23, %s123_s23 }
   0xd   :  { %p130_p6 = por %p129_p5, %p128_p4 }
   0xf   :  { %p131_p7 = pnand %p130_p6, %p124_p3 }
  0x11   :  { %134 = shalt.err (!%p131_p7)
}
  0x12   :  { %30 = dma.hbm_to_vmem [thread:$0]  %s280_s1, 32, %s28_s13, [#allocation6]  }
  0x13   :  { %s135_s28 = scalar_lea.hbm %s279_s0, 64 }
  0x14   :  { %p136_p8 = scmp.ne.s32.totalorder %s279_s0, %s135_s28  ;;  %p139_p9 = scmp.lt.u32.totalorder %s135_s28, %s279_s0 }
  0x16   :  { %p141_p10 = pnand %p139_p9, %p136_p8 }
  0x18   :  { %144 = shalt.err (!%p141_p10)
}
  0x19   :  { %s145_s6 = scalar_lea.vmem %s18_s15, 64  ;;  %p150_p12 = scmp.lt.s32.totalorder %s18_s15, %s18_s15 }
  0x1a   :  { %p146_p11 = scmp.ne.s32.totalorder %s18_s15, %s145_s6  ;;  %p151_p13 = scmp.lt.s32.totalorder %s145_s6, %s145_s6 }
  0x1c   :  { %p152_p0 = por %p151_p13, %p150_p12 }
  0x1e   :  { %p153_p1 = pnand %p152_p0, %p146_p11 }
  0x20   :  { %156 = shalt.err (!%p153_p1)
}
  0x21   :  { %20 = dma.hbm_to_vmem [thread:$0]  %s279_s0, 64, %s18_s15, [#allocation3]  }
  0x22   :  { %s209_s8 = smov [#allocation7]   ;;  %s157_s12 = scalar_lea.hbm %s281_s2, 128 }
  0x23   :  { %s37_s9 = sshll.u32 %s209_s8, 4  ;;  %p158_p2 = scmp.ne.s32.totalorder %s281_s2, %s157_s12  ;;  %s38_s9 = int_to_ptr.vmem [resolvable:$true] %s37_s9 }
  0x24   :  { %p161_p3 = scmp.lt.u32.totalorder %s157_s12, %s281_s2 }
  0x26   :  { %p163_p4 = pnand %p161_p3, %p158_p2 }
  0x28   :  { %166 = shalt.err (!%p163_p4)
}
  0x29   :  { %s167_s18 = scalar_lea.vmem %s38_s9, 128  ;;  %p172_p6 = scmp.lt.s32.totalorder %s38_s9, %s38_s9 }
  0x2a   :  { %p168_p5 = scmp.ne.s32.totalorder %s38_s9, %s167_s18  ;;  %p173_p7 = scmp.lt.s32.totalorder %s167_s18, %s167_s18 }
  0x2c   :  { %p174_p8 = por %p173_p7, %p172_p6 }
  0x2e   :  { %p175_p9 = pnand %p174_p8, %p168_p5 }
  0x30   :  { %178 = shalt.err (!%p175_p9)
}
  0x31   :  { %40 = dma.hbm_to_vmem [thread:$0]  %s281_s2, 128, %s38_s9, [#allocation6]  }
  0x32   :  { %201 = dma.done.wait [#allocation3], 64  }
  0x33   :  { %202 = vsyncadd [#allocation3], 4294967232 }
  0x34   :  { %203 = dma.done.wait [#allocation6], 160  }
  0x35   :  { %204 = vsyncadd [#allocation6], 4294967136  ;;  %v67_v0 = vlaneseq  ;;  %v50_v6 = vld [vmem:[#allocation2] sm:$0xf]  ;;  %v51_v7 = vld [vmem:[#allocation5] sm:$0x1] }
  0x36   :  { %vm55_vm0 = vcmask 1040384   ;;  %v53_v8 = vrot.slane %v50_v6, 7  ;;  %v57_v10 = vld [vmem:[#allocation5 + $0x1] sm:$0x1]  ;;  %v58_v11 = vrot.slane %v50_v6, 1  ;;  %vm63_vm1 = vcmask 1042432  }
  0x37   :  { %v68_v1 = vshrl.u32 %v67_v0, 7  ;;  %v78_v12 = vld [vmem:[#allocation7] sm:$0xff]  ;;  %v61_v13 = vrot.slane %v57_v10, 5  ;;  %s210_s2 = smov [#allocation8]  }
  0x38   :  { %v56_v16 = vsel %vm55_vm0, %v51_v7, %v53_v8  ;;  %v88_v22 = vcombine.high %v78_v12, %v78_v12  ;;  %s98_s19 = sshll.u32 %s210_s2, 4  ;;  %s99_s19 = int_to_ptr.vmem [resolvable:$true] %s98_s19 }
  0x39   :  { %v69_v2 = vcvt.s32.f32 %v68_v1  ;;  %v64_v19 = vsel %vm63_vm1, %v58_v11, %v61_v13  ;;  %s179_s20 = scalar_lea.vmem %s99_s19, 128  ;;  %p184_p11 = scmp.lt.s32.totalorder %s99_s19, %s99_s19 }
  0x3a   :  { %p180_p10 = scmp.ne.s32.totalorder %s99_s19, %s179_s20  ;;  %p185_p12 = scmp.lt.s32.totalorder %s179_s20, %s179_s20 }
  0x3b   :  { %v72_v3 = vmul.f32 0.14285715, %v69_v2  ;;  %v74_v4 = vadd.f32 4.0, %v69_v2  ;;  %v76_v5 = vsub.f32 3.0, %v69_v2 }
  0x3c   :  { %p186_p13 = por %p185_p12, %p184_p11 }
  0x3d   :  { %v73_v9 = vsub.f32 1.0, %v72_v3  ;;  %v75_v14 = vmul.f32 0.14285715, %v74_v4  ;;  %v77_v15 = vmul.f32 0.14285715, %v76_v5  ;;  %v79_v18 = vmul.f32 %v72_v3, %v56_v16 }
  0x3e   :  { %p187_p0 = pnand %p186_p13, %p180_p10 }
  0x3f   :  { %v80_v17 = vmul.f32 %v73_v9, %v50_v6  ;;  %v84_v20 = vmul.f32 %v75_v14, %v50_v6  ;;  %v85_v21 = vmul.f32 %v77_v15, %v64_v19 }
  0x41   :  { %v81_v23 = vadd.f32 %v80_v17, %v79_v18  ;;  %v86_v24 = vadd.f32 %v85_v21, %v84_v20 }
  0x43   :  { %v82_v25 = vadd.f32 %v81_v23, %v78_v12  ;;  %v90_v26 = vadd.f32 %v88_v22, %v86_v24 }
  0x45   :  { %83 = vst [vmem:[#allocation8] sm:$0xf] %v82_v25  ;;  %91 = vst [vmem:[#allocation8 + $0x4] sm:$0xf] %v90_v26 }
  0x46   :  { %190 = shalt.err (!%p187_p0)
}
  0x47   :  { %s191_s23 = scalar_lea.hbm %s282_s3, 128 }
  0x48   :  { %p192_p1 = scmp.ne.s32.totalorder %s282_s3, %s191_s23  ;;  %p195_p2 = scmp.lt.u32.totalorder %s191_s23, %s282_s3 }
  0x4a   :  { %p197_p3 = pnand %p195_p2, %p192_p1 }
  0x4c   :  { %200 = shalt.err (!%p197_p3)
}
  0x4d   :  { %101 = dma.vmem_to_hbm [thread:$0]  %s99_s19, 128, %s282_s3, [#allocation4]  }
  0x4e   :  { %205 = dma.done.wait [#allocation4], 128  }
  0x4f   :  { %206 = vsyncadd [#allocation4], 4294967168 }
  0x50   :  { %105 = vsyncpa [#allocation3], 1 }
  0x51   :  { %106 = vsyncpa [#allocation6], 1 }
  0x52   :  { %107 = vsyncpa [#allocation4], 1 }

// kernel: audio2latent2_forward.27
= control target key start
LH: loop header
LB: loop body
LE: loop exit
PB: predicated region body
PF: predicated region fallthrough
CT: control target
= control target key end

     0   :  { %8 = vsyncpa [#allocation3], 0  ;;  %s289_s0 = inlined_call_operand.hbm [shape: f32[8,64], index: 0, kind: input, shape index: {}]   ;;  %s290_s1 = inlined_call_operand.hbm [shape: f32[1,2,64], index: 1, kind: input, shape index: {}]   ;;  %s291_s2 = inlined_call_operand.hbm [shape: f32[8,128], index: 2, kind: input, shape index: {}]   ;;  %s292_s3 = inlined_call_operand.hbm [shape: f32[8,128], index: 3, kind: output, shape index: {}]  }
   0x1   :  { %9 = vsyncpa [#allocation6], 0 }
   0x2   :  { %10 = vsyncpa [#allocation4], 0  ;;  %s214_s12 = smov [#allocation5]   ;;  %s215_s14 = smov [#allocation2]  }
   0x3   :  { %s27_s13 = sshll.u32 %s214_s12, 4  ;;  %s17_s15 = sshll.u32 %s215_s14, 4  ;;  %s28_s13 = int_to_ptr.vmem [resolvable:$true] %s27_s13  ;;  %s18_s15 = int_to_ptr.vmem [resolvable:$true] %s17_s15 }
   0x4   :  { %s120_s18 = scalar_lea.hbm %s290_s1, 32 }
   0x5   :  { %p121_p0 = scmp.ne.s32.totalorder %s290_s1, %s120_s18  ;;  %p124_p1 = scmp.lt.u32.totalorder %s120_s18, %s290_s1 }
   0x7   :  { %p126_p2 = pnand %p124_p1, %p121_p0 }
   0x9   :  { %129 = shalt.err (!%p126_p2)
}
   0xa   :  { %s130_s23 = scalar_lea.vmem %s28_s13, 32  ;;  %p135_p4 = scmp.lt.s32.totalorder %s28_s13, %s28_s13 }
   0xb   :  { %p131_p3 = scmp.ne.s32.totalorder %s28_s13, %s130_s23  ;;  %p136_p5 = scmp.lt.s32.totalorder %s130_s23, %s130_s23 }
   0xd   :  { %p137_p6 = por %p136_p5, %p135_p4 }
   0xf   :  { %p138_p7 = pnand %p137_p6, %p131_p3 }
  0x11   :  { %141 = shalt.err (!%p138_p7)
}
  0x12   :  { %30 = dma.hbm_to_vmem [thread:$0]  %s290_s1, 32, %s28_s13, [#allocation6]  }
  0x13   :  { %s142_s28 = scalar_lea.hbm %s289_s0, 128 }
  0x14   :  { %p143_p8 = scmp.ne.s32.totalorder %s289_s0, %s142_s28  ;;  %p146_p9 = scmp.lt.u32.totalorder %s142_s28, %s289_s0 }
  0x16   :  { %p148_p10 = pnand %p146_p9, %p143_p8 }
  0x18   :  { %151 = shalt.err (!%p148_p10)
}
  0x19   :  { %s152_s6 = scalar_lea.vmem %s18_s15, 128  ;;  %p157_p12 = scmp.lt.s32.totalorder %s18_s15, %s18_s15 }
  0x1a   :  { %p153_p11 = scmp.ne.s32.totalorder %s18_s15, %s152_s6  ;;  %p158_p13 = scmp.lt.s32.totalorder %s152_s6, %s152_s6 }
  0x1c   :  { %p159_p0 = por %p158_p13, %p157_p12 }
  0x1e   :  { %p160_p1 = pnand %p159_p0, %p153_p11 }
  0x20   :  { %163 = shalt.err (!%p160_p1)
}
  0x21   :  { %20 = dma.hbm_to_vmem [thread:$0]  %s289_s0, 128, %s18_s15, [#allocation3]  }
  0x22   :  { %s216_s8 = smov [#allocation7]   ;;  %s164_s12 = scalar_lea.hbm %s291_s2, 128 }
  0x23   :  { %s37_s9 = sshll.u32 %s216_s8, 4  ;;  %p165_p2 = scmp.ne.s32.totalorder %s291_s2, %s164_s12  ;;  %s38_s9 = int_to_ptr.vmem [resolvable:$true] %s37_s9 }
  0x24   :  { %p168_p3 = scmp.lt.u32.totalorder %s164_s12, %s291_s2 }
  0x26   :  { %p170_p4 = pnand %p168_p3, %p165_p2 }
  0x28   :  { %173 = shalt.err (!%p170_p4)
}
  0x29   :  { %s174_s18 = scalar_lea.vmem %s38_s9, 128  ;;  %p179_p6 = scmp.lt.s32.totalorder %s38_s9, %s38_s9 }
  0x2a   :  { %p175_p5 = scmp.ne.s32.totalorder %s38_s9, %s174_s18  ;;  %p180_p7 = scmp.lt.s32.totalorder %s174_s18, %s174_s18 }
  0x2c   :  { %p181_p8 = por %p180_p7, %p179_p6 }
  0x2e   :  { %p182_p9 = pnand %p181_p8, %p175_p5 }
  0x30   :  { %185 = shalt.err (!%p182_p9)
}
  0x31   :  { %40 = dma.hbm_to_vmem [thread:$0]  %s291_s2, 128, %s38_s9, [#allocation6]  }
  0x32   :  { %208 = dma.done.wait [#allocation3], 128  }
  0x33   :  { %209 = vsyncadd [#allocation3], 4294967168 }
  0x34   :  { %210 = dma.done.wait [#allocation6], 160  }
  0x35   :  { %211 = vsyncadd [#allocation6], 4294967136  ;;  %v78_v0 = vld [vmem:[#allocation7] sm:$0xff]  ;;  %s217_s19 = smov 64   ;;  %v67_v1 = vlaneseq  ;;  %v50_v5 = vld [vmem:[#allocation2] sm:$0xff]  ;;  %vm55_vm0 = vcmask 1040384  }
  0x36   :  { %89 = vrot.lane.b32.xlu0 %v78_v0, %s217_s19  ;;  %v53_v6 = vrot.slane %v50_v5, 7  ;;  %v51_v7 = vld [vmem:[#allocation5] sm:$0x1]  ;;  %v57_v13 = vld [vmem:[#allocation5 + $0x1] sm:$0x1]  ;;  %v58_v17 = vrot.slane %v50_v5, 1 }
  0x37   :  { %v68_v2 = vshrl.u32 %v67_v1, 7  ;;  %v61_v18 = vrot.slane %v57_v13, 1  ;;  %vm63_vm1 = vcmask 1046528   ;;  %vm83_vm2 = vcmask 523264   ;;  %s218_s2 = smov [#allocation8]  }
  0x38   :  { %v56_v9 = vsel %vm55_vm0, %v51_v7, %v53_v6  ;;  %s105_s20 = sshll.u32 %s218_s2, 4  ;;  %vm97_vm3 = vcmask 1048064   ;;  %s106_s20 = int_to_ptr.vmem [resolvable:$true] %s105_s20 }
  0x39   :  { %v69_v3 = vcvt.s32.f32 %v68_v2  ;;  %v64_v21 = vsel %vm63_vm1, %v58_v17, %v61_v18  ;;  %s186_s21 = scalar_lea.vmem %s106_s20, 128  ;;  %p191_p11 = scmp.lt.s32.totalorder %s106_s20, %s106_s20 }
  0x3a   :  { %p187_p10 = scmp.ne.s32.totalorder %s106_s20, %s186_s21  ;;  %p192_p12 = scmp.lt.s32.totalorder %s186_s21, %s186_s21 }
  0x3b   :  { %v72_v4 = vmul.f32 0.06666667, %v69_v3  ;;  %v74_v15 = vadd.f32 8.0, %v69_v3  ;;  %v76_v16 = vsub.f32 7.0, %v69_v3 }
  0x3c   :  { %p193_p13 = por %p192_p12, %p191_p11 }
  0x3d   :  { %v73_v8 = vsub.f32 1.0, %v72_v4  ;;  %v79_v10 = vmul.f32 %v72_v4, %v56_v9  ;;  %v75_v19 = vmul.f32 0.06666667, %v74_v15  ;;  %v77_v20 = vmul.f32 0.06666667, %v76_v16 }
  0x3e   :  { %p194_p0 = pnand %p193_p13, %p187_p10 }
  0x3f   :  { %v80_v11 = vmul.f32 %v73_v8, %v50_v5  ;;  %v85_v22 = vmul.f32 %v75_v19, %v50_v5  ;;  %v86_v23 = vmul.f32 %v77_v20, %v64_v21 }
  0x41   :  { %v81_v12 = vadd.f32 %v80_v11, %v79_v10  ;;  %v87_v24 = vadd.f32 %v86_v23, %v85_v22 }
  0x43   :  { %v82_v14 = vadd.f32 %v81_v12, %v78_v0 }
  0x45   :  { %84 = vst.msk [vmem:[#allocation8] sm:$0xff] %vm83_vm2, %v82_v14 }
  0xa8   :  { %v90_v25 = vpop.permute.xlu0 %89 }
  0xa9   :  { %v92_v26 = vadd.f32 %v90_v25, %v87_v24 }
  0xab   :  { %94 = vrot.lane.b32.xlu0 %v92_v26, %s217_s19 }
 0x11d   :  { %v95_v27 = vpop.permute.xlu0 %94 }
 0x11e   :  { %98 = vst.msk [vmem:[#allocation8] sm:$0xff] %vm97_vm3, %v95_v27 }
 0x11f   :  { %197 = shalt.err (!%p194_p0)
}
 0x120   :  { %s198_s24 = scalar_lea.hbm %s292_s3, 128 }
 0x121   :  { %p199_p1 = scmp.ne.s32.totalorder %s292_s3, %s198_s24  ;;  %p202_p2 = scmp.lt.u32.totalorder %s198_s24, %s292_s3 }
 0x123   :  { %p204_p3 = pnand %p202_p2, %p199_p1 }
 0x125   :  { %207 = shalt.err (!%p204_p3)
}
 0x126   :  { %108 = dma.vmem_to_hbm [thread:$0]  %s106_s20, 128, %s292_s3, [#allocation4]  }
 0x127   :  { %212 = dma.done.wait [#allocation4], 128  }
 0x128   :  { %213 = vsyncadd [#allocation4], 4294967168 }
 0x129   :  { %112 = vsyncpa [#allocation3], 1 }
 0x12a   :  { %113 = vsyncpa [#allocation6], 1 }
 0x12b   :  { %114 = vsyncpa [#allocation4], 1 }

// kernel: audio2latent2_forward.25
= control target key start
LH: loop header
LB: loop body
LE: loop exit
PB: predicated region body
PF: predicated region fallthrough
CT: control target
= control target key end

     0   :  { %11 = vsyncpa [#allocation3], 0  ;;  %s1202_s0 = inlined_call_operand.hbm [shape: bf16[16,64], index: 0, kind: input, shape index: {}]   ;;  %s1203_s1 = inlined_call_operand.hbm [shape: bf16[1,8,64], index: 1, kind: input, shape index: {}]   ;;  %s1204_s2 = inlined_call_operand.hbm [shape: bf16[5,64,16], index: 2, kind: input, shape index: {}]   ;;  %s1205_s3 = inlined_call_operand.hbm [shape: f32[1,16], index: 3, kind: input, shape index: {}]   ;;  %s1206_s4 = inlined_call_operand.hbm [shape: bf16[64,16], index: 4, kind: input, shape index: {}]   ;;  %s1207_s5 = inlined_call_operand.hbm [shape: f32[1,16], index: 5, kind: input, shape index: {}]   ;;  %s1208_s6 = inlined_call_operand.hbm [shape: f32[16,32], index: 6, kind: output, shape index: {}]  }
   0x1   :  { %12 = vsyncpa [#allocation6], 0 }
   0x2   :  { %13 = vsyncpa [#allocation9], 0 }
   0x3   :  { %14 = vsyncpa [#allocation12], 0 }
   0x4   :  { %15 = vsyncpa [#allocation4], 0  ;;  %s1001_s21 = smov [#allocation5]   ;;  %s1002_s23 = smov [#allocation8]  }
   0x5   :  { %s34_s22 = sshll.u32 %s1001_s21, 4  ;;  %s56_s24 = sshll.u32 %s1002_s23, 4  ;;  %s35_s22 = int_to_ptr.vmem [resolvable:$true] %s34_s22  ;;  %s57_s24 = int_to_ptr.vmem [resolvable:$true] %s56_s24 }
   0x6   :  { %s837_s27 = scalar_lea.hbm %s1203_s1, 64 }
   0x7   :  { %p838_p0 = scmp.ne.s32.totalorder %s1203_s1, %s837_s27  ;;  %p841_p1 = scmp.lt.u32.totalorder %s837_s27, %s1203_s1 }
   0x9   :  { %p843_p2 = pnand %p841_p1, %p838_p0 }
   0xb   :  { %846 = shalt.err (!%p843_p2)
}
   0xc   :  { %s847_s8 = scalar_lea.vmem %s35_s22, 64  ;;  %p852_p4 = scmp.lt.s32.totalorder %s35_s22, %s35_s22 }
   0xd   :  { %p848_p3 = scmp.ne.s32.totalorder %s35_s22, %s847_s8  ;;  %p853_p5 = scmp.lt.s32.totalorder %s847_s8, %s847_s8 }
   0xf   :  { %p854_p6 = por %p853_p5, %p852_p4 }
  0x11   :  { %p855_p7 = pnand %p854_p6, %p848_p3 }
  0x13   :  { %858 = shalt.err (!%p855_p7)
}
  0x14   :  { %37 = dma.hbm_to_vmem [thread:$0]  %s1203_s1, 64, %s35_s22, [#allocation6]  }
  0x15   :  { %s859_s13 = scalar_lea.hbm %s1205_s3, 16 }
  0x16   :  { %p860_p8 = scmp.ne.s32.totalorder %s1205_s3, %s859_s13  ;;  %p863_p9 = scmp.lt.u32.totalorder %s859_s13, %s1205_s3 }
  0x18   :  { %p865_p10 = pnand %p863_p9, %p860_p8 }
  0x1a   :  { %868 = shalt.err (!%p865_p10)
}
  0x1b   :  { %s869_s18 = scalar_lea.vmem %s57_s24, 16  ;;  %s873_s19 = scalar_lea.vmem %s57_s24, 32 }
  0x1c   :  { %p870_p11 = scmp.ne.s32.totalorder %s57_s24, %s869_s18  ;;  %p874_p12 = scmp.lt.s32.totalorder %s57_s24, %s57_s24 }
  0x1d   :  { %p875_p13 = scmp.lt.s32.totalorder %s873_s19, %s869_s18 }
  0x1f   :  { %p876_p0 = por %p875_p13, %p874_p12 }
  0x21   :  { %p877_p1 = pnand %p876_p0, %p870_p11 }
  0x23   :  { %880 = shalt.err (!%p877_p1)
}
  0x24   :  { %59 = dma.hbm_to_vmem [thread:$0]  %s1205_s3, 16, %s57_s24, [#allocation9]  }
  0x25   :  { %s1003_s21 = smov [#allocation2]   ;;  %s881_s26 = scalar_lea.hbm %s1202_s0, 128 }
  0x26   :  { %s21_s22 = sshll.u32 %s1003_s21, 4  ;;  %p882_p2 = scmp.ne.s32.totalorder %s1202_s0, %s881_s26  ;;  %s22_s22 = int_to_ptr.vmem [resolvable:$true] %s21_s22 }
  0x27   :  { %p885_p3 = scmp.lt.u32.totalorder %s881_s26, %s1202_s0 }
  0x29   :  { %p887_p4 = pnand %p885_p3, %p882_p2 }
  0x2b   :  { %890 = shalt.err (!%p887_p4)
}
  0x2c   :  { %s891_s7 = scalar_lea.vmem %s22_s22, 128  ;;  %p896_p6 = scmp.lt.s32.totalorder %s22_s22, %s22_s22 }
  0x2d   :  { %p892_p5 = scmp.ne.s32.totalorder %s22_s22, %s891_s7  ;;  %p897_p7 = scmp.lt.s32.totalorder %s891_s7, %s891_s7 }
  0x2f   :  { %p898_p8 = por %p897_p7, %p896_p6 }
  0x31   :  { %p899_p9 = pnand %p898_p8, %p892_p5 }
  0x33   :  { %902 = shalt.err (!%p899_p9)
}
  0x34   :  { %s1004_s3 = smov 64   ;;  %s1005_s24 = smov 4  }
  0x35   :  { %27 = dma.hbm_to_vmem [thread:$0]  %s1202_s0, 128, %s22_s22, [#allocation3], %s1004_s3, %s1004_s3, %s1005_s24  }
  0x36   :  { %s1006_s10 = smov [#allocation7]   ;;  %s1007_s12 = smov [#allocation10]  }
  0x37   :  { %s43_s11 = sshll.u32 %s1006_s10, 4  ;;  %s65_s13 = sshll.u32 %s1007_s12, 4  ;;  %s44_s11 = int_to_ptr.vmem [resolvable:$true] %s43_s11  ;;  %s66_s13 = int_to_ptr.vmem [resolvable:$true] %s65_s13 }
  0x38   :  { %s903_s16 = scalar_lea.hbm %s1204_s2, 2560 }
  0x39   :  { %p904_p10 = scmp.ne.s32.totalorder %s1204_s2, %s903_s16  ;;  %p907_p11 = scmp.lt.u32.totalorder %s903_s16, %s1204_s2 }
  0x3b   :  { %p909_p12 = pnand %p907_p11, %p904_p10 }
  0x3d   :  { %912 = shalt.err (!%p909_p12)
}
  0x3e   :  { %s913_s0 = scalar_lea.vmem %s44_s11, 2560  ;;  %p918_p0 = scmp.lt.s32.totalorder %s44_s11, %s44_s11 }
  0x3f   :  { %p914_p13 = scmp.ne.s32.totalorder %s44_s11, %s913_s0  ;;  %p919_p1 = scmp.lt.s32.totalorder %s913_s0, %s913_s0 }
  0x41   :  { %p920_p2 = por %p919_p1, %p918_p0 }
  0x43   :  { %p921_p3 = pnand %p920_p2, %p914_p13 }
  0x45   :  { %924 = shalt.err (!%p921_p3)
}
  0x46   :  { %49 = dma.hbm_to_vmem [thread:$0]  %s1204_s2, 2560, %s44_s11, [#allocation6], %s1004_s3, %s1004_s3, %s1005_s24  }
  0x47   :  { %s925_s25 = scalar_lea.hbm %s1206_s4, 512 }
  0x48   :  { %p926_p4 = scmp.ne.s32.totalorder %s1206_s4, %s925_s25  ;;  %p929_p5 = scmp.lt.u32.totalorder %s925_s25, %s1206_s4 }
  0x4a   :  { %p931_p6 = pnand %p929_p5, %p926_p4 }
  0x4c   :  { %934 = shalt.err (!%p931_p6)
}
  0x4d   :  { %s935_s30 = scalar_lea.vmem %s66_s13, 512  ;;  %p940_p8 = scmp.lt.s32.totalorder %s66_s13, %s66_s13 }
  0x4e   :  { %p936_p7 = scmp.ne.s32.totalorder %s66_s13, %s935_s30  ;;  %p941_p9 = scmp.lt.s32.totalorder %s935_s30, %s935_s30 }
  0x50   :  { %p942_p10 = por %p941_p9, %p940_p8 }
  0x52   :  { %p943_p11 = pnand %p942_p10, %p936_p7 }
  0x54   :  { %946 = shalt.err (!%p943_p11)
}
  0x55   :  { %71 = dma.hbm_to_vmem [thread:$0]  %s1206_s4, 512, %s66_s13, [#allocation9], %s1004_s3, %s1004_s3, %s1005_s24  }
  0x56   :  { %s1008_s8 = smov [#allocation11]   ;;  %s947_s12 = scalar_lea.hbm %s1207_s5, 16 }
  0x57   :  { %s78_s9 = sshll.u32 %s1008_s8, 4  ;;  %p948_p12 = scmp.ne.s32.totalorder %s1207_s5, %s947_s12  ;;  %s79_s9 = int_to_ptr.vmem [resolvable:$true] %s78_s9 }
  0x58   :  { %p951_p13 = scmp.lt.u32.totalorder %s947_s12, %s1207_s5 }
  0x5a   :  { %p953_p0 = pnand %p951_p13, %p948_p12 }
  0x5c   :  { %956 = shalt.err (!%p953_p0)
}
  0x5d   :  { %s957_s18 = scalar_lea.vmem %s79_s9, 16  ;;  %s961_s4 = scalar_lea.vmem %s79_s9, 32 }
  0x5e   :  { %p958_p1 = scmp.ne.s32.totalorder %s79_s9, %s957_s18  ;;  %p962_p2 = scmp.lt.s32.totalorder %s79_s9, %s79_s9 }
  0x5f   :  { %p963_p3 = scmp.lt.s32.totalorder %s961_s4, %s957_s18 }
  0x61   :  { %p964_p4 = por %p963_p3, %p962_p2 }
  0x63   :  { %p965_p5 = pnand %p964_p4, %p958_p1 }
  0x65   :  { %968 = shalt.err (!%p965_p5)
}
  0x66   :  { %81 = dma.hbm_to_vmem [thread:$0]  %s1207_s5, 16, %s79_s9, [#allocation12]  }
  0x67   :  { %991 = dma.done.wait [#allocation3], 128  }
  0x68   :  { %992 = vsyncadd [#allocation3], 4294967168 }
  0x69   :  { %993 = dma.done.wait [#allocation6], 2624  }
  0x6a   :  { %994 = vsyncadd [#allocation6], 4294964672 }
  0x6b   :  { %995 = dma.done.wait [#allocation9], 528  }
  0x6c   :  { %996 = vsyncadd [#allocation9], 4294966768 }
  0x6d   :  { %997 = dma.done.wait [#allocation12], 16  }
  0x6e   :  { %998 = vsyncadd [#allocation12], 4294967280  ;;  %v1009_v0 = vmov 0.0   ;;  %vm1010_vm0 = vmmov 0   ;;  %v812_v1 = vld [vmem:[#allocation7 + $0x20] sm:$0xff]   ;;  %v814_v3 = vld [vmem:[#allocation7 + $0x28] sm:$0xff]  }
  0x6f   :  { %726 = vmatprep.subr.bf16.mxu0 %v1009_v0  ;;  %738 = vmatprep.subr.bf16.mxu1 %v1009_v0  ;;  %v813_v2 = vld [vmem:[#allocation7] sm:$0xff]   ;;  %v815_v4 = vld [vmem:[#allocation7 + $0x8] sm:$0xff]   ;;  %v816_v5 = vld [vmem:[#allocation7 + $0x30] sm:$0xff]   ;;  %vm111_vm1 = vcmask 1041408   ;;  %vm136_vm2 = vcmask 1046528   ;;  %vm164_vm3 = vcmask 523264  }
  0x70   :  { %734 = vmatprep.mubr.msk.bf16.mxu0 %vm1010_vm0, %v1009_v0  ;;  %746 = vmatprep.mubr.msk.bf16.mxu1 %vm1010_vm0, %v1009_v0  ;;  %v817_v6 = vld [vmem:[#allocation7 + $0x10] sm:$0xff]   ;;  %v818_v7 = vld [vmem:[#allocation7 + $0x38] sm:$0xff]   ;;  %v821_v17 = vld [vmem:[#allocation7 + $0x40] sm:$0xff]   ;;  %vm285_vm4 = vcmask 1045504   ;;  %vm368_vm5 = vcmask 1044480   ;;  %vm451_vm6 = vcmask 1043456  }
  0x71   :  { %727 = vmatpush3.bf16.msra.mxu0 %v812_v1  ;;  %739 = vmatpush3.bf16.msra.mxu1 %v813_v2  ;;  %v103_v8 = vld [vmem:[#allocation5] sm:$0x3]  ;;  %v1141_v9 = vld [vmem:[#allocation2] sm:$0xff]   ;;  %v104_v10 = vld [vmem:[#allocation5] sm:$0xc]  ;;  %vm629_vm9 = vcmask 130048  }
  0x72   :  { %728 = vmatprep.subr.bf16.mxu0 %v1009_v0  ;;  %740 = vmatprep.subr.bf16.mxu1 %v1009_v0  ;;  %v819_v11 = vld [vmem:[#allocation7 + $0x18] sm:$0xff]   ;;  %v110_v12 = vrot.slane %v1141_v9, 6  ;;  %v822_v18 = vld [vmem:[#allocation7 + $0x60] sm:$0xff]   ;;  %v823_v20 = vld [vmem:[#allocation7 + $0x48] sm:$0xff]   ;;  %s1011_s5 = smov 16   ;;  %vm640_vm12 = vcmask 261248  }
  0x73   :  { %v824_v21 = vld [vmem:[#allocation7 + $0x68] sm:$0xff]   ;;  %v825_v22 = vld [vmem:[#allocation7 + $0x50] sm:$0xff]   ;;  %v827_v24 = vld [vmem:[#allocation7 + $0x58] sm:$0xff]   ;;  %s1012_s13 = smov [#allocation13]  }
  0x74   :  { %v1146_v13 = vsel %vm111_vm1, %v103_v8, %v110_v12  ;;  %v1148_v14 = vsel %vm111_vm1, %v110_v12, %v104_v10  ;;  %v826_v23 = vld [vmem:[#allocation7 + $0x70] sm:$0xff]   ;;  %v828_v27 = vld [vmem:[#allocation7 + $0x78] sm:$0xff]   ;;  %v829_v31 = vld [vmem:[#allocation7 + $0x80] sm:$0xff]   ;;  %s648_s19 = sshll.u32 %s1012_s13, 4  ;;  %s649_s19 = int_to_ptr.vmem [resolvable:$true] %s648_s19 }
  0x75   :  { %729 = vmatpush3.bf16.msra.mxu0 %v814_v3  ;;  %741 = vmatpush3.bf16.msra.mxu1 %v815_v4  ;;  %v137_v15 = vrot.slane %v1146_v13, 1  ;;  %v138_v16 = vrot.slane %v1148_v14, 1  ;;  %v286_v25 = vrot.slane %v1146_v13, 2  ;;  %v287_v26 = vrot.slane %v1148_v14, 2  ;;  %v830_v33 = vld [vmem:[#allocation10] sm:$0xff]   ;;  %v832_v35 = vld [vmem:[#allocation10 + $0x8] sm:$0xff]   ;;  %p974_p7 = scmp.lt.s32.totalorder %s649_s19, %s649_s19 }
  0x76   :  { %730 = vmatprep.subr.bf16.mxu0 %v1009_v0  ;;  %742 = vmatprep.subr.bf16.mxu1 %v1009_v0  ;;  %v369_v28 = vrot.slane %v1146_v13, 3  ;;  %v370_v29 = vrot.slane %v1148_v14, 3  ;;  %v831_v34 = vld [vmem:[#allocation7 + $0x88] sm:$0xff]   ;;  %v833_v36 = vld [vmem:[#allocation7 + $0x90] sm:$0xff]   ;;  %v835_v38 = vld [vmem:[#allocation7 + $0x98] sm:$0xff]   ;;  %v452_v39 = vrot.slane %v1146_v13, 4 }
  0x77   :  { %v139_v19 = vsel %vm136_vm2, %v137_v15, %v138_v16  ;;  %v288_v30 = vsel %vm285_vm4, %v286_v25, %v287_v26  ;;  %v834_v37 = vld [vmem:[#allocation10 + $0x10] sm:$0xff]   ;;  %v453_v40 = vrot.slane %v1148_v14, 4  ;;  %v836_v41 = vld [vmem:[#allocation10 + $0x18] sm:$0xff]   ;;  %v690_v1 = vld [vmem:[#allocation11] ss:$0 sm:$0xff]  ;;  %s969_s1 = scalar_lea.vmem %s649_s19, 256 }
  0x78   :  { %v371_v32 = vsel %vm368_vm5, %v369_v28, %v370_v29  ;;  %v689_v3 = vld [vmem:[#allocation8] ss:$0 sm:$0xff]  ;;  %p970_p6 = scmp.ne.s32.totalorder %s649_s19, %s969_s1  ;;  %p975_p8 = scmp.lt.s32.totalorder %s969_s1, %s969_s1 }
  0x79   :  { %731 = vmatpush3.bf16.msra.mxu0 %v816_v5  ;;  %743 = vmatpush3.bf16.msra.mxu1 %v817_v6  ;;  %v454_v42 = vsel %vm451_vm6, %v452_v39, %v453_v40 }
  0x7a   :  { %732 = vmatprep.subr.bf16.mxu0 %v1009_v0  ;;  %744 = vmatprep.subr.bf16.mxu1 %v1009_v0  ;;  %p976_p9 = por %p975_p8, %p974_p7 }
  0x7c   :  { %p977_p10 = pnand %p976_p9, %p970_p6 }
  0x7d   :  { %733 = vmatpush3.bf16.msra.mxu0 %v818_v7  ;;  %745 = vmatpush3.bf16.msra.mxu1 %v819_v11 }
  0x7e   :  { %750 = vmatprep.subr.bf16.mxu0 %v1009_v0  ;;  %762 = vmatprep.subr.bf16.mxu1 %v1009_v0 }
  0x80   :  { %735 = vmatmul.mubr.msk.bf16.vlgmr.msra.gmra.mrb[0].mxu0 %vm164_vm3, %v139_v19  ;;  %747 = vmatmul.mubr.msk.bf16.vlgmr.msra.gmra.mrb[0].mxu1 %vm164_vm3, %v1146_v13 }
  0x81   :  { %751 = vmatpush3.bf16.msra.mxu0 %v821_v17  ;;  %763 = vmatpush3.bf16.msra.mxu1 %v822_v18 }
  0x82   :  { %752 = vmatprep.subr.bf16.mxu0 %v1009_v0  ;;  %764 = vmatprep.subr.bf16.mxu1 %v1009_v0 }
  0x83   :  { %758 = vmatprep.mubr.msk.bf16.mxu0 %vm1010_vm0, %v1009_v0  ;;  %770 = vmatprep.mubr.msk.bf16.mxu1 %vm1010_vm0, %v1009_v0 }
  0x85   :  { %753 = vmatpush3.bf16.msra.mxu0 %v823_v20  ;;  %765 = vmatpush3.bf16.msra.mxu1 %v824_v21 }
  0x86   :  { %754 = vmatprep.subr.bf16.mxu0 %v1009_v0  ;;  %766 = vmatprep.subr.bf16.mxu1 %v1009_v0 }
  0x89   :  { %755 = vmatpush3.bf16.msra.mxu0 %v825_v22  ;;  %767 = vmatpush3.bf16.msra.mxu1 %v826_v23 }
  0x8a   :  { %756 = vmatprep.subr.bf16.mxu0 %v1009_v0  ;;  %768 = vmatprep.subr.bf16.mxu1 %v1009_v0 }
  0x8d   :  { %757 = vmatpush3.bf16.msra.mxu0 %v827_v24  ;;  %769 = vmatpush3.bf16.msra.mxu1 %v828_v27 }
  0x8e   :  { %774 = vmatprep.subr.bf16.mxu0 %v1009_v0  ;;  %786 = vmatprep.subr.bf16.mxu1 %v1009_v0 }
  0x90   :  { %759 = vmatmul.mubr.msk.bf16.vlgmr.msra.gmra.mrb[4].mxu0 %vm164_vm3, %v288_v30  ;;  %771 = vmatmul.mubr.msk.bf16.vlgmr.msra.gmra.mrb[4].mxu1 %vm164_vm3, %v371_v32 }
  0x91   :  { %775 = vmatpush3.bf16.msra.mxu0 %v829_v31  ;;  %787 = vmatpush3.bf16.msra.mxu1 %v830_v33 }
  0x92   :  { %776 = vmatprep.subr.bf16.mxu0 %v1009_v0  ;;  %788 = vmatprep.subr.bf16.mxu1 %v1009_v0 }
  0x93   :  { %782 = vmatprep.mubr.msk.bf16.mxu0 %vm1010_vm0, %v1009_v0  ;;  %794 = vmatprep.mubr.msk.bf16.mxu1 %vm1010_vm0, %v1009_v0 }
  0x95   :  { %777 = vmatpush3.bf16.msra.mxu0 %v831_v34  ;;  %789 = vmatpush3.bf16.msra.mxu1 %v832_v35 }
  0x96   :  { %778 = vmatprep.subr.bf16.mxu0 %v1009_v0  ;;  %790 = vmatprep.subr.bf16.mxu1 %v1009_v0 }
  0x99   :  { %779 = vmatpush3.bf16.msra.mxu0 %v833_v36  ;;  %791 = vmatpush3.bf16.msra.mxu1 %v834_v37 }
  0x9a   :  { %780 = vmatprep.subr.bf16.mxu0 %v1009_v0  ;;  %792 = vmatprep.subr.bf16.mxu1 %v1009_v0 }
  0x9d   :  { %781 = vmatpush3.bf16.msra.mxu0 %v835_v38  ;;  %793 = vmatpush3.bf16.msra.mxu1 %v836_v41 }
  0xa0   :  { %783 = vmatmul.mubr.msk.bf16.vlgmr.msra.gmra.mrb[8].mxu0 %vm164_vm3, %v454_v42  ;;  %795 = vmatmul.mubr.msk.bf16.vlgmr.msra.gmra.mrb[8].mxu1 %vm164_vm3, %v1141_v9 }
 0x153   :  { %v202_v43 = vpop.f32.mrb[0].mxu0  ;;  %v269_v44 = vpop.f32.mrb[0].mxu1 }
 0x154   :  { %v736_v45 = vpop.f32.mrb[1].mxu0  ;;  %v270_v46 = vadd.f32 %v269_v44, %v202_v43  ;;  %v748_v47 = vpop.f32.mrb[1].mxu1 }
 0x155   :  { %v205_v48 = vpop.f32.mrb[2].mxu0  ;;  %v272_v49 = vpop.f32.mrb[2].mxu1 }
 0x156   :  { %v737_v50 = vpop.f32.mrb[3].mxu0  ;;  %v273_v51 = vadd.f32 %v272_v49, %v205_v48  ;;  %v749_v52 = vpop.f32.mrb[3].mxu1 }
 0x163   :  { %v350_v53 = vpop.f32.mrb[4].mxu0  ;;  %v433_v55 = vpop.f32.mrb[4].mxu1 }
 0x164   :  { %v357_v54 = vadd.f32 %v350_v53, %v270_v46  ;;  %v760_v56 = vpop.f32.mrb[5].mxu0  ;;  %v772_v57 = vpop.f32.mrb[5].mxu1 }
 0x165   :  { %v353_v58 = vpop.f32.mrb[6].mxu0  ;;  %v436_v61 = vpop.f32.mrb[6].mxu1 }
 0x166   :  { %v440_v59 = vadd.f32 %v433_v55, %v357_v54  ;;  %v358_v60 = vadd.f32 %v353_v58, %v273_v51  ;;  %v761_v62 = vpop.f32.mrb[7].mxu0  ;;  %v773_v63 = vpop.f32.mrb[7].mxu1 }
 0x168   :  { %v441_v0 = vadd.f32 %v436_v61, %v358_v60 }
 0x173   :  { %v516_v2 = vpop.f32.mrb[8].mxu0  ;;  %v610_v5 = vpop.f32.mrb[8].mxu1 }
 0x174   :  { %v523_v4 = vadd.f32 %v516_v2, %v440_v59  ;;  %v784_v6 = vpop.f32.mrb[9].mxu0  ;;  %v611_v7 = vadd.f32 %v690_v1, %v610_v5  ;;  %v796_v8 = vpop.f32.mrb[9].mxu1 }
 0x175   :  { %v519_v9 = vpop.f32.mrb[10].mxu0  ;;  %v613_v12 = vpop.f32.mrb[10].mxu1 }
 0x176   :  { %v532_v10 = vadd.f32 %v689_v3, %v523_v4  ;;  %v524_v11 = vadd.f32 %v519_v9, %v441_v0  ;;  %v785_v13 = vpop.f32.mrb[11].mxu0  ;;  %v614_v14 = vadd.f32 %v690_v1, %v613_v12  ;;  %v797_v15 = vpop.f32.mrb[11].mxu1  ;;  %vm623_vm7 = vcmp.ge.f32.partialorder %v611_v7, 0.0 }
 0x177   :  { %v625_v16 = vmul.f32 0.2, %v611_v7 }
 0x178   :  { %vm617_vm8 = vcmp.ge.f32.partialorder %v532_v10, 0.0  ;;  %v619_v17 = vmul.f32 0.2, %v532_v10  ;;  %v533_v18 = vadd.f32 %v689_v3, %v524_v11  ;;  %v626_v19 = vmul.f32 0.2, %v614_v14 }
 0x179   :  { %v627_v20 = vsel %vm623_vm7, %v611_v7, %v625_v16  ;;  %vm624_vm11 = vcmp.ge.f32.partialorder %v614_v14, 0.0 }
 0x17a   :  { %v621_v21 = vsel %vm617_vm8, %v532_v10, %v619_v17  ;;  %vm618_vm10 = vcmp.ge.f32.partialorder %v533_v18, 0.0  ;;  %v620_v22 = vmul.f32 0.2, %v533_v18  ;;  %634 = vrot.lane.b32.xlu0 %v627_v20, %s1011_s5  ;;  %v628_v24 = vsel %vm624_vm11, %v614_v14, %v626_v19 }
 0x17b   :  { %630 = vst.msk [vmem:[#allocation13] sm:$0xff] %vm629_vm9, %v621_v21 }
 0x17c   :  { %v622_v23 = vsel %vm618_vm10, %v533_v18, %v620_v22 }
 0x17d   :  { %631 = vst.msk [vmem:[#allocation13 + $0x8] sm:$0xff] %vm629_vm9, %v622_v23 }
 0x17e   :  { %636 = vrot.lane.b32.xlu0 %v628_v24, %s1011_s5 }
 0x1ec   :  { %v635_v25 = vpop.permute.xlu0 %634 }
 0x1ed   :  { %641 = vst.msk [vmem:[#allocation13] sm:$0xff] %vm640_vm12, %v635_v25 }
 0x1f0   :  { %v637_v26 = vpop.permute.xlu0 %636 }
 0x1f1   :  { %642 = vst.msk [vmem:[#allocation13 + $0x8] sm:$0xff] %vm640_vm12, %v637_v26 }
 0x1f2   :  { %980 = shalt.err (!%p977_p10)
}
 0x1f3   :  { %s981_s21 = scalar_lea.hbm %s1208_s6, 256 }
 0x1f4   :  { %p982_p11 = scmp.ne.s32.totalorder %s1208_s6, %s981_s21  ;;  %p985_p12 = scmp.lt.u32.totalorder %s981_s21, %s1208_s6 }
 0x1f6   :  { %p987_p13 = pnand %p985_p12, %p982_p11 }
 0x1f8   :  { %990 = shalt.err (!%p987_p13)
}
 0x1f9   :  { %s1013_s27 = smov 128   ;;  %s1014_s28 = smov 8  }
 0x1fa   :  { %654 = dma.vmem_to_hbm [thread:$0]  %s649_s19, 256, %s1208_s6, [#allocation4], %s1013_s27, %s1013_s27, %s1014_s28  }
 0x1fb   :  { %999 = dma.done.wait [#allocation4], 256  }
 0x1fc   :  { %1000 = vsyncadd [#allocation4], 4294967040 }
 0x1fd   :  { %658 = vsyncpa [#allocation3], 1 }
 0x1fe   :  { %659 = vsyncpa [#allocation6], 1 }
 0x1ff   :  { %660 = vsyncpa [#allocation9], 1 }
 0x200   :  { %661 = vsyncpa [#allocation12], 1 }
 0x201   :  { %662 = vsyncpa [#allocation4], 1 }

// kernel: audio2latent2_forward.26
= control target key start
LH: loop header
LB: loop body
LE: loop exit
PB: predicated region body
PF: predicated region fallthrough
CT: control target
= control target key end

     0   :  { %11 = vsyncpa [#allocation3], 0  ;;  %s1017_s0 = inlined_call_operand.hbm [shape: bf16[16,32], index: 0, kind: input, shape index: {}]   ;;  %s1018_s1 = inlined_call_operand.hbm [shape: bf16[1,8,32], index: 1, kind: input, shape index: {}]   ;;  %s1019_s2 = inlined_call_operand.hbm [shape: bf16[5,32,16], index: 2, kind: input, shape index: {}]   ;;  %s1020_s3 = inlined_call_operand.hbm [shape: f32[1,16], index: 3, kind: input, shape index: {}]   ;;  %s1021_s4 = inlined_call_operand.hbm [shape: bf16[32,16], index: 4, kind: input, shape index: {}]   ;;  %s1022_s5 = inlined_call_operand.hbm [shape: f32[1,16], index: 5, kind: input, shape index: {}]   ;;  %s1023_s6 = inlined_call_operand.hbm [shape: f32[16,32], index: 6, kind: output, shape index: {}]  }
   0x1   :  { %12 = vsyncpa [#allocation6], 0 }
   0x2   :  { %13 = vsyncpa [#allocation9], 0 }
   0x3   :  { %14 = vsyncpa [#allocation12], 0 }
   0x4   :  { %15 = vsyncpa [#allocation4], 0  ;;  %s845_s21 = smov [#allocation5]   ;;  %s846_s23 = smov [#allocation8]  }
   0x5   :  { %s34_s22 = sshll.u32 %s845_s21, 4  ;;  %s56_s24 = sshll.u32 %s846_s23, 4  ;;  %s35_s22 = int_to_ptr.vmem [resolvable:$true] %s34_s22  ;;  %s57_s24 = int_to_ptr.vmem [resolvable:$true] %s56_s24 }
   0x6   :  { %s681_s27 = scalar_lea.hbm %s1018_s1, 64 }
   0x7   :  { %p682_p0 = scmp.ne.s32.totalorder %s1018_s1, %s681_s27  ;;  %p685_p1 = scmp.lt.u32.totalorder %s681_s27, %s1018_s1 }
   0x9   :  { %p687_p2 = pnand %p685_p1, %p682_p0 }
   0xb   :  { %690 = shalt.err (!%p687_p2)
}
   0xc   :  { %s691_s8 = scalar_lea.vmem %s35_s22, 64  ;;  %p696_p4 = scmp.lt.s32.totalorder %s35_s22, %s35_s22 }
   0xd   :  { %p692_p3 = scmp.ne.s32.totalorder %s35_s22, %s691_s8  ;;  %p697_p5 = scmp.lt.s32.totalorder %s691_s8, %s691_s8 }
   0xf   :  { %p698_p6 = por %p697_p5, %p696_p4 }
  0x11   :  { %p699_p7 = pnand %p698_p6, %p692_p3 }
  0x13   :  { %702 = shalt.err (!%p699_p7)
}
  0x14   :  { %37 = dma.hbm_to_vmem [thread:$0]  %s1018_s1, 64, %s35_s22, [#allocation6]  }
  0x15   :  { %s703_s13 = scalar_lea.hbm %s1020_s3, 16 }
  0x16   :  { %p704_p8 = scmp.ne.s32.totalorder %s1020_s3, %s703_s13  ;;  %p707_p9 = scmp.lt.u32.totalorder %s703_s13, %s1020_s3 }
  0x18   :  { %p709_p10 = pnand %p707_p9, %p704_p8 }
  0x1a   :  { %712 = shalt.err (!%p709_p10)
}
  0x1b   :  { %s713_s18 = scalar_lea.vmem %s57_s24, 16  ;;  %s717_s19 = scalar_lea.vmem %s57_s24, 32 }
  0x1c   :  { %p714_p11 = scmp.ne.s32.totalorder %s57_s24, %s713_s18  ;;  %p718_p12 = scmp.lt.s32.totalorder %s57_s24, %s57_s24 }
  0x1d   :  { %p719_p13 = scmp.lt.s32.totalorder %s717_s19, %s713_s18 }
  0x1f   :  { %p720_p0 = por %p719_p13, %p718_p12 }
  0x21   :  { %p721_p1 = pnand %p720_p0, %p714_p11 }
  0x23   :  { %724 = shalt.err (!%p721_p1)
}
  0x24   :  { %59 = dma.hbm_to_vmem [thread:$0]  %s1020_s3, 16, %s57_s24, [#allocation9]  }
  0x25   :  { %s847_s21 = smov [#allocation2]   ;;  %s725_s26 = scalar_lea.hbm %s1017_s0, 128 }
  0x26   :  { %s21_s22 = sshll.u32 %s847_s21, 4  ;;  %p726_p2 = scmp.ne.s32.totalorder %s1017_s0, %s725_s26  ;;  %s22_s22 = int_to_ptr.vmem [resolvable:$true] %s21_s22 }
  0x27   :  { %p729_p3 = scmp.lt.u32.totalorder %s725_s26, %s1017_s0 }
  0x29   :  { %p731_p4 = pnand %p729_p3, %p726_p2 }
  0x2b   :  { %734 = shalt.err (!%p731_p4)
}
  0x2c   :  { %s735_s7 = scalar_lea.vmem %s22_s22, 128  ;;  %p740_p6 = scmp.lt.s32.totalorder %s22_s22, %s22_s22 }
  0x2d   :  { %p736_p5 = scmp.ne.s32.totalorder %s22_s22, %s735_s7  ;;  %p741_p7 = scmp.lt.s32.totalorder %s735_s7, %s735_s7 }
  0x2f   :  { %p742_p8 = por %p741_p7, %p740_p6 }
  0x31   :  { %p743_p9 = pnand %p742_p8, %p736_p5 }
  0x33   :  { %746 = shalt.err (!%p743_p9)
}
  0x34   :  { %s848_s3 = smov 64   ;;  %s849_s24 = smov 4  }
  0x35   :  { %27 = dma.hbm_to_vmem [thread:$0]  %s1017_s0, 128, %s22_s22, [#allocation3], %s848_s3, %s848_s3, %s849_s24  }
  0x36   :  { %s850_s10 = smov [#allocation7]   ;;  %s851_s12 = smov [#allocation10]  }
  0x37   :  { %s43_s11 = sshll.u32 %s850_s10, 4  ;;  %s65_s13 = sshll.u32 %s851_s12, 4  ;;  %s44_s11 = int_to_ptr.vmem [resolvable:$true] %s43_s11  ;;  %s66_s13 = int_to_ptr.vmem [resolvable:$true] %s65_s13 }
  0x38   :  { %s747_s16 = scalar_lea.hbm %s1019_s2, 1280 }
  0x39   :  { %p748_p10 = scmp.ne.s32.totalorder %s1019_s2, %s747_s16  ;;  %p751_p11 = scmp.lt.u32.totalorder %s747_s16, %s1019_s2 }
  0x3b   :  { %p753_p12 = pnand %p751_p11, %p748_p10 }
  0x3d   :  { %756 = shalt.err (!%p753_p12)
}
  0x3e   :  { %s757_s0 = scalar_lea.vmem %s44_s11, 1280  ;;  %p762_p0 = scmp.lt.s32.totalorder %s44_s11, %s44_s11 }
  0x3f   :  { %p758_p13 = scmp.ne.s32.totalorder %s44_s11, %s757_s0  ;;  %p763_p1 = scmp.lt.s32.totalorder %s757_s0, %s757_s0 }
  0x41   :  { %p764_p2 = por %p763_p1, %p762_p0 }
  0x43   :  { %p765_p3 = pnand %p764_p2, %p758_p13 }
  0x45   :  { %768 = shalt.err (!%p765_p3)
}
  0x46   :  { %49 = dma.hbm_to_vmem [thread:$0]  %s1019_s2, 1280, %s44_s11, [#allocation6], %s848_s3, %s848_s3, %s849_s24  }
  0x47   :  { %s769_s25 = scalar_lea.hbm %s1021_s4, 256 }
  0x48   :  { %p770_p4 = scmp.ne.s32.totalorder %s1021_s4, %s769_s25  ;;  %p773_p5 = scmp.lt.u32.totalorder %s769_s25, %s1021_s4 }
  0x4a   :  { %p775_p6 = pnand %p773_p5, %p770_p4 }
  0x4c   :  { %778 = shalt.err (!%p775_p6)
}
  0x4d   :  { %s779_s30 = scalar_lea.vmem %s66_s13, 256  ;;  %p784_p8 = scmp.lt.s32.totalorder %s66_s13, %s66_s13 }
  0x4e   :  { %p780_p7 = scmp.ne.s32.totalorder %s66_s13, %s779_s30  ;;  %p785_p9 = scmp.lt.s32.totalorder %s779_s30, %s779_s30 }
  0x50   :  { %p786_p10 = por %p785_p9, %p784_p8 }
  0x52   :  { %p787_p11 = pnand %p786_p10, %p780_p7 }
  0x54   :  { %790 = shalt.err (!%p787_p11)
}
  0x55   :  { %71 = dma.hbm_to_vmem [thread:$0]  %s1021_s4, 256, %s66_s13, [#allocation9], %s848_s3, %s848_s3, %s849_s24  }
  0x56   :  { %s852_s8 = smov [#allocation11]   ;;  %s791_s12 = scalar_lea.hbm %s1022_s5, 16 }
  0x57   :  { %s78_s9 = sshll.u32 %s852_s8, 4  ;;  %p792_p12 = scmp.ne.s32.totalorder %s1022_s5, %s791_s12  ;;  %s79_s9 = int_to_ptr.vmem [resolvable:$true] %s78_s9 }
  0x58   :  { %p795_p13 = scmp.lt.u32.totalorder %s791_s12, %s1022_s5 }
  0x5a   :  { %p797_p0 = pnand %p795_p13, %p792_p12 }
  0x5c   :  { %800 = shalt.err (!%p797_p0)
}
  0x5d   :  { %s801_s18 = scalar_lea.vmem %s79_s9, 16  ;;  %s805_s4 = scalar_lea.vmem %s79_s9, 32 }
  0x5e   :  { %p802_p1 = scmp.ne.s32.totalorder %s79_s9, %s801_s18  ;;  %p806_p2 = scmp.lt.s32.totalorder %s79_s9, %s79_s9 }
  0x5f   :  { %p807_p3 = scmp.lt.s32.totalorder %s805_s4, %s801_s18 }
  0x61   :  { %p808_p4 = por %p807_p3, %p806_p2 }
  0x63   :  { %p809_p5 = pnand %p808_p4, %p802_p1 }
  0x65   :  { %812 = shalt.err (!%p809_p5)
}
  0x66   :  { %81 = dma.hbm_to_vmem [thread:$0]  %s1022_s5, 16, %s79_s9, [#allocation12]  }
  0x67   :  { %835 = dma.done.wait [#allocation3], 128  }
  0x68   :  { %836 = vsyncadd [#allocation3], 4294967168 }
  0x69   :  { %837 = dma.done.wait [#allocation6], 1344  }
  0x6a   :  { %838 = vsyncadd [#allocation6], 4294965952 }
  0x6b   :  { %839 = dma.done.wait [#allocation9], 272  }
  0x6c   :  { %840 = vsyncadd [#allocation9], 4294967024 }
  0x6d   :  { %841 = dma.done.wait [#allocation12], 16  }
  0x6e   :  { %842 = vsyncadd [#allocation12], 4294967280  ;;  %v853_v0 = vmov 0.0   ;;  %vm854_vm0 = vmmov 0   ;;  %v668_v1 = vld [vmem:[#allocation7 + $0x10] sm:$0xff]   ;;  %v669_v2 = vld [vmem:[#allocation7] sm:$0xff]  }
  0x6f   :  { %606 = vmatprep.subr.bf16.mxu0 %v853_v0  ;;  %614 = vmatprep.subr.bf16.mxu1 %v853_v0  ;;  %v670_v3 = vld [vmem:[#allocation7 + $0x18] sm:$0xff]   ;;  %v671_v4 = vld [vmem:[#allocation7 + $0x8] sm:$0xff]   ;;  %vm111_vm1 = vcmask 1041408   ;;  %vm144_vm2 = vcmask 261120   ;;  %v674_v9 = vld [vmem:[#allocation7 + $0x30] sm:$0xff]   ;;  %vm128_vm3 = vcmask 1046528  }
  0x70   :  { %610 = vmatprep.mubr.msk.bf16.mxu0 %vm854_vm0, %v853_v0  ;;  %618 = vmatprep.mubr.msk.bf16.mxu1 %vm854_vm0, %v853_v0  ;;  %v103_v5 = vld [vmem:[#allocation5] sm:$0x3]  ;;  %v672_v6 = vld [vmem:[#allocation2] sm:$0xff]   ;;  %v104_v7 = vld [vmem:[#allocation5] sm:$0xc]  ;;  %vm316_vm4 = vcmask 1044480  }
  0x71   :  { %607 = vmatpush3.bf16.msra.mxu0 %v668_v1  ;;  %615 = vmatpush3.bf16.msra.mxu1 %v669_v2  ;;  %v110_v8 = vrot.slane %v672_v6, 6  ;;  %v673_v14 = vld [vmem:[#allocation7 + $0x20] sm:$0xff]   ;;  %v676_v15 = vld [vmem:[#allocation7 + $0x38] sm:$0xff]   ;;  %v675_v19 = vld [vmem:[#allocation7 + $0x28] sm:$0xff]   ;;  %vm249_vm5 = vcmask 1045504   ;;  %vm383_vm6 = vcmask 1043456  }
  0x72   :  { %608 = vmatprep.subr.bf16.mxu0 %v853_v0  ;;  %616 = vmatprep.subr.bf16.mxu1 %v853_v0  ;;  %v678_v23 = vld [vmem:[#allocation10] sm:$0xff]   ;;  %v677_v25 = vld [vmem:[#allocation7 + $0x40] sm:$0xff]   ;;  %v679_v27 = vld [vmem:[#allocation7 + $0x48] sm:$0xff]   ;;  %s855_s5 = smov 16   ;;  %vm533_vm10 = vcmask 130048   ;;  %vm544_vm12 = vcmask 261248  }
  0x73   :  { %v114_v10 = vsel %vm111_vm1, %v103_v5, %v110_v8  ;;  %v116_v11 = vsel %vm111_vm1, %v110_v8, %v104_v7  ;;  %v680_v26 = vld [vmem:[#allocation10 + $0x8] sm:$0xff]   ;;  %v584_v52 = vld [vmem:[#allocation11] ss:$0 sm:$0xff]  ;;  %v583_v57 = vld [vmem:[#allocation8] ss:$0 sm:$0xff]  ;;  %s856_s13 = smov [#allocation13]  }
  0x74   :  { %v129_v12 = vrot.slane %v114_v10, 1  ;;  %v130_v13 = vrot.slane %v116_v11, 1  ;;  %v317_v16 = vrot.slane %v114_v10, 3  ;;  %v318_v17 = vrot.slane %v116_v11, 3  ;;  %s552_s19 = sshll.u32 %s856_s13, 4  ;;  %s553_s19 = int_to_ptr.vmem [resolvable:$true] %s552_s19 }
  0x75   :  { %609 = vmatpush3.bf16.msra.mxu0 %v670_v3  ;;  %617 = vmatpush3.bf16.msra.mxu1 %v671_v4  ;;  %v250_v20 = vrot.slane %v114_v10, 2  ;;  %v251_v21 = vrot.slane %v116_v11, 2  ;;  %v384_v28 = vrot.slane %v114_v10, 4  ;;  %v385_v29 = vrot.slane %v116_v11, 4  ;;  %s813_s1 = scalar_lea.vmem %s553_s19, 256  ;;  %p818_p7 = scmp.lt.s32.totalorder %s553_s19, %s553_s19 }
  0x76   :  { %622 = vmatprep.subr.bf16.mxu0 %v853_v0  ;;  %630 = vmatprep.subr.bf16.mxu1 %v853_v0  ;;  %v131_v18 = vsel %vm128_vm3, %v129_v12, %v130_v13  ;;  %v319_v22 = vsel %vm316_vm4, %v317_v16, %v318_v17  ;;  %p814_p6 = scmp.ne.s32.totalorder %s553_s19, %s813_s1  ;;  %p819_p8 = scmp.lt.s32.totalorder %s813_s1, %s813_s1 }
  0x77   :  { %v252_v24 = vsel %vm249_vm5, %v250_v20, %v251_v21  ;;  %v386_v30 = vsel %vm383_vm6, %v384_v28, %v385_v29 }
  0x78   :  { %619 = vmatmul.mubr.msk.bf16.vlgmr.msra.gmra.mrb[0].mxu1 %vm144_vm2, %v114_v10  ;;  %611 = vmatmul.mubr.msk.bf16.vlgmr.msra.gmra.mrb[0].mxu0 %vm144_vm2, %v131_v18  ;;  %p820_p9 = por %p819_p8, %p818_p7 }
  0x79   :  { %631 = vmatpush3.bf16.msra.mxu1 %v674_v9  ;;  %634 = vmatprep.mubr.msk.bf16.mxu1 %vm854_vm0, %v853_v0 }
  0x7a   :  { %632 = vmatprep.subr.bf16.mxu1 %v853_v0  ;;  %623 = vmatpush3.bf16.msra.mxu0 %v673_v14  ;;  %p821_p10 = pnand %p820_p9, %p814_p6 }
  0x7b   :  { %626 = vmatprep.mubr.msk.bf16.mxu0 %vm854_vm0, %v853_v0  ;;  %624 = vmatprep.subr.bf16.mxu0 %v853_v0 }
  0x7d   :  { %633 = vmatpush3.bf16.msra.mxu1 %v676_v15 }
  0x7e   :  { %646 = vmatprep.subr.bf16.mxu1 %v853_v0  ;;  %625 = vmatpush3.bf16.msra.mxu0 %v675_v19 }
  0x7f   :  { %638 = vmatprep.subr.bf16.mxu0 %v853_v0 }
  0x80   :  { %635 = vmatmul.mubr.msk.bf16.vlgmr.msra.gmra.mrb[4].mxu1 %vm144_vm2, %v319_v22 }
  0x81   :  { %647 = vmatpush3.bf16.msra.mxu1 %v678_v23  ;;  %650 = vmatprep.mubr.msk.bf16.mxu1 %vm854_vm0, %v853_v0 }
  0x82   :  { %648 = vmatprep.subr.bf16.mxu1 %v853_v0  ;;  %627 = vmatmul.mubr.msk.bf16.vlgmr.msra.gmra.mrb[4].mxu0 %vm144_vm2, %v252_v24 }
  0x83   :  { %639 = vmatpush3.bf16.msra.mxu0 %v677_v25  ;;  %642 = vmatprep.mubr.msk.bf16.mxu0 %vm854_vm0, %v853_v0 }
  0x84   :  { %640 = vmatprep.subr.bf16.mxu0 %v853_v0 }
  0x85   :  { %649 = vmatpush3.bf16.msra.mxu1 %v680_v26 }
  0x87   :  { %641 = vmatpush3.bf16.msra.mxu0 %v679_v27 }
  0x88   :  { %651 = vmatmul.mubr.msk.bf16.vlgmr.msra.gmra.mrb[8].mxu1 %vm144_vm2, %v672_v6 }
  0x8a   :  { %643 = vmatmul.mubr.msk.bf16.vlgmr.msra.gmra.mrb[8].mxu0 %vm144_vm2, %v386_v30 }
 0x14b   :  { %v237_v31 = vpop.f32.mrb[0].mxu1  ;;  %v182_v34 = vpop.f32.mrb[0].mxu0 }
 0x14c   :  { %v620_v32 = vpop.f32.mrb[1].mxu1  ;;  %v238_v36 = vadd.f32 %v237_v31, %v182_v34  ;;  %v612_v37 = vpop.f32.mrb[1].mxu0 }
 0x14d   :  { %v240_v33 = vpop.f32.mrb[2].mxu1  ;;  %v185_v38 = vpop.f32.mrb[2].mxu0 }
 0x14e   :  { %v621_v35 = vpop.f32.mrb[3].mxu1  ;;  %v241_v39 = vadd.f32 %v240_v33, %v185_v38  ;;  %v613_v40 = vpop.f32.mrb[3].mxu0 }
 0x153   :  { %v369_v41 = vpop.f32.mrb[4].mxu1 }
 0x154   :  { %v636_v42 = vpop.f32.mrb[5].mxu1 }
 0x155   :  { %v372_v43 = vpop.f32.mrb[6].mxu1  ;;  %v302_v44 = vpop.f32.mrb[4].mxu0 }
 0x156   :  { %v637_v45 = vpop.f32.mrb[7].mxu1  ;;  %v309_v46 = vadd.f32 %v302_v44, %v238_v36  ;;  %v628_v47 = vpop.f32.mrb[5].mxu0 }
 0x157   :  { %v305_v48 = vpop.f32.mrb[6].mxu0 }
 0x158   :  { %v376_v49 = vadd.f32 %v369_v41, %v309_v46  ;;  %v310_v50 = vadd.f32 %v305_v48, %v241_v39  ;;  %v629_v51 = vpop.f32.mrb[7].mxu0 }
 0x15a   :  { %v377_v53 = vadd.f32 %v372_v43, %v310_v50 }
 0x15b   :  { %v514_v54 = vpop.f32.mrb[8].mxu1 }
 0x15c   :  { %v515_v55 = vadd.f32 %v584_v52, %v514_v54  ;;  %v652_v56 = vpop.f32.mrb[9].mxu1 }
 0x15d   :  { %v517_v58 = vpop.f32.mrb[10].mxu1  ;;  %v436_v59 = vpop.f32.mrb[8].mxu0 }
 0x15e   :  { %v518_v60 = vadd.f32 %v584_v52, %v517_v58  ;;  %v653_v61 = vpop.f32.mrb[11].mxu1  ;;  %vm527_vm7 = vcmp.ge.f32.partialorder %v515_v55, 0.0  ;;  %v529_v62 = vmul.f32 0.2, %v515_v55  ;;  %v443_v63 = vadd.f32 %v436_v59, %v376_v49  ;;  %v644_v0 = vpop.f32.mrb[9].mxu0 }
 0x15f   :  { %v439_v1 = vpop.f32.mrb[10].mxu0 }
 0x160   :  { %v530_v2 = vmul.f32 0.2, %v518_v60  ;;  %v531_v3 = vsel %vm527_vm7, %v515_v55, %v529_v62  ;;  %v452_v4 = vadd.f32 %v583_v57, %v443_v63  ;;  %v444_v5 = vadd.f32 %v439_v1, %v377_v53  ;;  %v645_v6 = vpop.f32.mrb[11].mxu0 }
 0x161   :  { %538 = vrot.lane.b32.xlu0 %v531_v3, %s855_s5  ;;  %vm528_vm8 = vcmp.ge.f32.partialorder %v518_v60, 0.0 }
 0x162   :  { %vm521_vm9 = vcmp.ge.f32.partialorder %v452_v4, 0.0  ;;  %v523_v7 = vmul.f32 0.2, %v452_v4  ;;  %v453_v8 = vadd.f32 %v583_v57, %v444_v5  ;;  %v532_v9 = vsel %vm528_vm8, %v518_v60, %v530_v2 }
 0x164   :  { %v525_v10 = vsel %vm521_vm9, %v452_v4, %v523_v7  ;;  %vm522_vm11 = vcmp.ge.f32.partialorder %v453_v8, 0.0  ;;  %v524_v11 = vmul.f32 0.2, %v453_v8 }
 0x165   :  { %540 = vrot.lane.b32.xlu0 %v532_v9, %s855_s5  ;;  %534 = vst.msk [vmem:[#allocation13] sm:$0xff] %vm533_vm10, %v525_v10 }
 0x166   :  { %v526_v12 = vsel %vm522_vm11, %v453_v8, %v524_v11 }
 0x167   :  { %535 = vst.msk [vmem:[#allocation13 + $0x8] sm:$0xff] %vm533_vm10, %v526_v12 }
 0x1d3   :  { %v539_v13 = vpop.permute.xlu0 %538 }
 0x1d4   :  { %545 = vst.msk [vmem:[#allocation13] sm:$0xff] %vm544_vm12, %v539_v13 }
 0x1d7   :  { %v541_v14 = vpop.permute.xlu0 %540 }
 0x1d8   :  { %546 = vst.msk [vmem:[#allocation13 + $0x8] sm:$0xff] %vm544_vm12, %v541_v14 }
 0x1d9   :  { %824 = shalt.err (!%p821_p10)
}
 0x1da   :  { %s825_s21 = scalar_lea.hbm %s1023_s6, 256 }
 0x1db   :  { %p826_p11 = scmp.ne.s32.totalorder %s1023_s6, %s825_s21  ;;  %p829_p12 = scmp.lt.u32.totalorder %s825_s21, %s1023_s6 }
 0x1dd   :  { %p831_p13 = pnand %p829_p12, %p826_p11 }
 0x1df   :  { %834 = shalt.err (!%p831_p13)
}
 0x1e0   :  { %s857_s27 = smov 128   ;;  %s858_s28 = smov 8  }
 0x1e1   :  { %558 = dma.vmem_to_hbm [thread:$0]  %s553_s19, 256, %s1023_s6, [#allocation4], %s857_s27, %s857_s27, %s858_s28  }
 0x1e2   :  { %843 = dma.done.wait [#allocation4], 256  }
 0x1e3   :  { %844 = vsyncadd [#allocation4], 4294967040 }
 0x1e4   :  { %562 = vsyncpa [#allocation3], 1 }
 0x1e5   :  { %563 = vsyncpa [#allocation6], 1 }
 0x1e6   :  { %564 = vsyncpa [#allocation9], 1 }
 0x1e7   :  { %565 = vsyncpa [#allocation12], 1 }
 0x1e8   :  { %566 = vsyncpa [#allocation4], 1 }

// kernel: audio2latent2_forward.28
= control target key start
LH: loop header
LB: loop body
LE: loop exit
PB: predicated region body
PF: predicated region fallthrough
CT: control target
= control target key end

     0   :  { %11 = vsyncpa [#allocation3], 0  ;;  %s1144_s0 = inlined_call_operand.hbm [shape: bf16[32,32], index: 0, kind: input, shape index: {}]   ;;  %s1145_s1 = inlined_call_operand.hbm [shape: bf16[1,8,32], index: 1, kind: input, shape index: {}]   ;;  %s1146_s2 = inlined_call_operand.hbm [shape: bf16[5,32,64], index: 2, kind: input, shape index: {}]   ;;  %s1147_s3 = inlined_call_operand.hbm [shape: f32[1,64], index: 3, kind: input, shape index: {}]   ;;  %s1148_s4 = inlined_call_operand.hbm [shape: bf16[32,64], index: 4, kind: input, shape index: {}]   ;;  %s1149_s5 = inlined_call_operand.hbm [shape: f32[1,64], index: 5, kind: input, shape index: {}]   ;;  %s1150_s6 = inlined_call_operand.hbm [shape: f32[32,64], index: 6, kind: output, shape index: {}]  }
   0x1   :  { %12 = vsyncpa [#allocation6], 0 }
   0x2   :  { %13 = vsyncpa [#allocation9], 0 }
   0x3   :  { %14 = vsyncpa [#allocation12], 0 }
   0x4   :  { %15 = vsyncpa [#allocation4], 0  ;;  %s972_s21 = smov [#allocation5]   ;;  %s973_s23 = smov [#allocation8]  }
   0x5   :  { %s34_s22 = sshll.u32 %s972_s21, 4  ;;  %s56_s24 = sshll.u32 %s973_s23, 4  ;;  %s35_s22 = int_to_ptr.vmem [resolvable:$true] %s34_s22  ;;  %s57_s24 = int_to_ptr.vmem [resolvable:$true] %s56_s24 }
   0x6   :  { %s808_s27 = scalar_lea.hbm %s1145_s1, 64 }
   0x7   :  { %p809_p0 = scmp.ne.s32.totalorder %s1145_s1, %s808_s27  ;;  %p812_p1 = scmp.lt.u32.totalorder %s808_s27, %s1145_s1 }
   0x9   :  { %p814_p2 = pnand %p812_p1, %p809_p0 }
   0xb   :  { %817 = shalt.err (!%p814_p2)
}
   0xc   :  { %s818_s8 = scalar_lea.vmem %s35_s22, 64  ;;  %p823_p4 = scmp.lt.s32.totalorder %s35_s22, %s35_s22 }
   0xd   :  { %p819_p3 = scmp.ne.s32.totalorder %s35_s22, %s818_s8  ;;  %p824_p5 = scmp.lt.s32.totalorder %s818_s8, %s818_s8 }
   0xf   :  { %p825_p6 = por %p824_p5, %p823_p4 }
  0x11   :  { %p826_p7 = pnand %p825_p6, %p819_p3 }
  0x13   :  { %829 = shalt.err (!%p826_p7)
}
  0x14   :  { %37 = dma.hbm_to_vmem [thread:$0]  %s1145_s1, 64, %s35_s22, [#allocation6]  }
  0x15   :  { %s830_s13 = scalar_lea.hbm %s1147_s3, 16 }
  0x16   :  { %p831_p8 = scmp.ne.s32.totalorder %s1147_s3, %s830_s13  ;;  %p834_p9 = scmp.lt.u32.totalorder %s830_s13, %s1147_s3 }
  0x18   :  { %p836_p10 = pnand %p834_p9, %p831_p8 }
  0x1a   :  { %839 = shalt.err (!%p836_p10)
}
  0x1b   :  { %s840_s18 = scalar_lea.vmem %s57_s24, 16  ;;  %s844_s19 = scalar_lea.vmem %s57_s24, 32 }
  0x1c   :  { %p841_p11 = scmp.ne.s32.totalorder %s57_s24, %s840_s18  ;;  %p845_p12 = scmp.lt.s32.totalorder %s57_s24, %s57_s24 }
  0x1d   :  { %p846_p13 = scmp.lt.s32.totalorder %s844_s19, %s840_s18 }
  0x1f   :  { %p847_p0 = por %p846_p13, %p845_p12 }
  0x21   :  { %p848_p1 = pnand %p847_p0, %p841_p11 }
  0x23   :  { %851 = shalt.err (!%p848_p1)
}
  0x24   :  { %59 = dma.hbm_to_vmem [thread:$0]  %s1147_s3, 16, %s57_s24, [#allocation9]  }
  0x25   :  { %s974_s21 = smov [#allocation2]   ;;  %s852_s26 = scalar_lea.hbm %s1144_s0, 256 }
  0x26   :  { %s21_s22 = sshll.u32 %s974_s21, 4  ;;  %p853_p2 = scmp.ne.s32.totalorder %s1144_s0, %s852_s26  ;;  %s22_s22 = int_to_ptr.vmem [resolvable:$true] %s21_s22 }
  0x27   :  { %p856_p3 = scmp.lt.u32.totalorder %s852_s26, %s1144_s0 }
  0x29   :  { %p858_p4 = pnand %p856_p3, %p853_p2 }
  0x2b   :  { %861 = shalt.err (!%p858_p4)
}
  0x2c   :  { %s862_s7 = scalar_lea.vmem %s22_s22, 256  ;;  %p867_p6 = scmp.lt.s32.totalorder %s22_s22, %s22_s22 }
  0x2d   :  { %p863_p5 = scmp.ne.s32.totalorder %s22_s22, %s862_s7  ;;  %p868_p7 = scmp.lt.s32.totalorder %s862_s7, %s862_s7 }
  0x2f   :  { %p869_p8 = por %p868_p7, %p867_p6 }
  0x31   :  { %p870_p9 = pnand %p869_p8, %p863_p5 }
  0x33   :  { %873 = shalt.err (!%p870_p9)
}
  0x34   :  { %s975_s3 = smov 64   ;;  %s976_s24 = smov 4  }
  0x35   :  { %27 = dma.hbm_to_vmem [thread:$0]  %s1144_s0, 256, %s22_s22, [#allocation3], %s975_s3, %s975_s3, %s976_s24  }
  0x36   :  { %s977_s10 = smov [#allocation7]   ;;  %s978_s12 = smov [#allocation10]  }
  0x37   :  { %s43_s11 = sshll.u32 %s977_s10, 4  ;;  %s65_s13 = sshll.u32 %s978_s12, 4  ;;  %s44_s11 = int_to_ptr.vmem [resolvable:$true] %s43_s11  ;;  %s66_s13 = int_to_ptr.vmem [resolvable:$true] %s65_s13 }
  0x38   :  { %s874_s16 = scalar_lea.hbm %s1146_s2, 1280 }
  0x39   :  { %p875_p10 = scmp.ne.s32.totalorder %s1146_s2, %s874_s16  ;;  %p878_p11 = scmp.lt.u32.totalorder %s874_s16, %s1146_s2 }
  0x3b   :  { %p880_p12 = pnand %p878_p11, %p875_p10 }
  0x3d   :  { %883 = shalt.err (!%p880_p12)
}
  0x3e   :  { %s884_s0 = scalar_lea.vmem %s44_s11, 1280  ;;  %p889_p0 = scmp.lt.s32.totalorder %s44_s11, %s44_s11 }
  0x3f   :  { %p885_p13 = scmp.ne.s32.totalorder %s44_s11, %s884_s0  ;;  %p890_p1 = scmp.lt.s32.totalorder %s884_s0, %s884_s0 }
  0x41   :  { %p891_p2 = por %p890_p1, %p889_p0 }
  0x43   :  { %p892_p3 = pnand %p891_p2, %p885_p13 }
  0x45   :  { %895 = shalt.err (!%p892_p3)
}
  0x46   :  { %49 = dma.hbm_to_vmem [thread:$0]  %s1146_s2, 1280, %s44_s11, [#allocation6], %s975_s3, %s975_s3, %s976_s24  }
  0x47   :  { %s896_s25 = scalar_lea.hbm %s1148_s4, 256 }
  0x48   :  { %p897_p4 = scmp.ne.s32.totalorder %s1148_s4, %s896_s25  ;;  %p900_p5 = scmp.lt.u32.totalorder %s896_s25, %s1148_s4 }
  0x4a   :  { %p902_p6 = pnand %p900_p5, %p897_p4 }
  0x4c   :  { %905 = shalt.err (!%p902_p6)
}
  0x4d   :  { %s906_s30 = scalar_lea.vmem %s66_s13, 256  ;;  %p911_p8 = scmp.lt.s32.totalorder %s66_s13, %s66_s13 }
  0x4e   :  { %p907_p7 = scmp.ne.s32.totalorder %s66_s13, %s906_s30  ;;  %p912_p9 = scmp.lt.s32.totalorder %s906_s30, %s906_s30 }
  0x50   :  { %p913_p10 = por %p912_p9, %p911_p8 }
  0x52   :  { %p914_p11 = pnand %p913_p10, %p907_p7 }
  0x54   :  { %917 = shalt.err (!%p914_p11)
}
  0x55   :  { %71 = dma.hbm_to_vmem [thread:$0]  %s1148_s4, 256, %s66_s13, [#allocation9], %s975_s3, %s975_s3, %s976_s24  }
  0x56   :  { %s979_s8 = smov [#allocation11]   ;;  %s918_s12 = scalar_lea.hbm %s1149_s5, 16 }
  0x57   :  { %s78_s9 = sshll.u32 %s979_s8, 4  ;;  %p919_p12 = scmp.ne.s32.totalorder %s1149_s5, %s918_s12  ;;  %s79_s9 = int_to_ptr.vmem [resolvable:$true] %s78_s9 }
  0x58   :  { %p922_p13 = scmp.lt.u32.totalorder %s918_s12, %s1149_s5 }
  0x5a   :  { %p924_p0 = pnand %p922_p13, %p919_p12 }
  0x5c   :  { %927 = shalt.err (!%p924_p0)
}
  0x5d   :  { %s928_s18 = scalar_lea.vmem %s79_s9, 16  ;;  %s932_s4 = scalar_lea.vmem %s79_s9, 32 }
  0x5e   :  { %p929_p1 = scmp.ne.s32.totalorder %s79_s9, %s928_s18  ;;  %p933_p2 = scmp.lt.s32.totalorder %s79_s9, %s79_s9 }
  0x5f   :  { %p934_p3 = scmp.lt.s32.totalorder %s932_s4, %s928_s18 }
  0x61   :  { %p935_p4 = por %p934_p3, %p933_p2 }
  0x63   :  { %p936_p5 = pnand %p935_p4, %p929_p1 }
  0x65   :  { %939 = shalt.err (!%p936_p5)
}
  0x66   :  { %81 = dma.hbm_to_vmem [thread:$0]  %s1149_s5, 16, %s79_s9, [#allocation12]  }
  0x67   :  { %962 = dma.done.wait [#allocation3], 256  }
  0x68   :  { %963 = vsyncadd [#allocation3], 4294967040 }
  0x69   :  { %964 = dma.done.wait [#allocation6], 1344  }
  0x6a   :  { %965 = vsyncadd [#allocation6], 4294965952 }
  0x6b   :  { %966 = dma.done.wait [#allocation9], 272  }
  0x6c   :  { %967 = vsyncadd [#allocation9], 4294967024 }
  0x6d   :  { %968 = dma.done.wait [#allocation12], 16  }
  0x6e   :  { %969 = vsyncadd [#allocation12], 4294967280  ;;  %v794_v0 = vld [vmem:[#allocation7 + $0x10] sm:$0xff]   ;;  %v796_v2 = vld [vmem:[#allocation7 + $0x18] sm:$0xff]   ;;  %vm117_vm0 = vcmask 1041408   ;;  %vm139_vm1 = vcmask 1046528  }
  0x6f   :  { %v795_v1 = vld [vmem:[#allocation7 + $0x30] sm:$0xff]   ;;  %707 = vmatprep.subr.bf16.mxu1 %v794_v0  ;;  %v797_v3 = vld [vmem:[#allocation7 + $0x38] sm:$0xff]   ;;  %vm157_vm2 = vcmask 261120   ;;  %v800_v9 = vld [vmem:[#allocation7] sm:$0xff]   ;;  %vm366_vm3 = vcmask 1044480   ;;  %vm448_vm4 = vcmask 1043456  }
  0x70   :  { %731 = vmatprep.subr.bf16.mxu0 %v795_v1  ;;  %708 = vmatpush3.bf16.msra.mxu1 %v794_v0  ;;  %v105_v4 = vld [vmem:[#allocation5] sm:$0x3]  ;;  %v1099_v5 = vld [vmem:[#allocation2] sm:$0xff]   ;;  %v1101_v6 = vld [vmem:[#allocation2 + $0x8] sm:$0xff]   ;;  %vm284_vm5 = vcmask 1045504   ;;  %vm630_vm7 = vcmask 523264  }
  0x71   :  { %732 = vmatpush3.bf16.msra.mxu0 %v795_v1  ;;  %709 = vmatprep.subr.bf16.mxu1 %v796_v2  ;;  %v106_v7 = vld [vmem:[#allocation5] sm:$0xc]  ;;  %v118_v8 = vrot.slane %v1099_v5, 6  ;;  %v119_v10 = vrot.slane %v1101_v6, 6  ;;  %v801_v11 = vld [vmem:[#allocation7 + $0x40] sm:$0xff]   ;;  %v802_v21 = vld [vmem:[#allocation7 + $0x8] sm:$0xff]  }
  0x72   :  { %733 = vmatprep.subr.bf16.mxu0 %v797_v3  ;;  %v803_v22 = vld [vmem:[#allocation7 + $0x48] sm:$0xff]   ;;  %v804_v30 = vld [vmem:[#allocation7 + $0x20] sm:$0xff]   ;;  %v805_v31 = vld [vmem:[#allocation10] sm:$0xff]   ;;  %s980_s5 = smov [#allocation13]  }
  0x73   :  { %v124_v12 = vsel %vm117_vm0, %v105_v4, %v118_v8  ;;  %v120_v13 = vsel %vm117_vm0, %v118_v8, %v119_v10  ;;  %v127_v16 = vsel %vm117_vm0, %v119_v10, %v106_v7  ;;  %v806_v36 = vld [vmem:[#allocation7 + $0x28] sm:$0xff]   ;;  %v807_v37 = vld [vmem:[#allocation10 + $0x8] sm:$0xff]   ;;  %v677_v41 = vld [vmem:[#allocation8] ss:$0 sm:$0xff]  ;;  %s640_s13 = sshll.u32 %s980_s5, 4  ;;  %s641_s13 = int_to_ptr.vmem [resolvable:$true] %s640_s13 }
  0x74   :  { %710 = vmatpush3.bf16.msra.mxu1 %v796_v2  ;;  %v140_v14 = vrot.slane %v124_v12, 1  ;;  %v367_v15 = vrot.slane %v124_v12, 3  ;;  %v141_v17 = vrot.slane %v120_v13, 1  ;;  %v368_v18 = vrot.slane %v120_v13, 3  ;;  %v678_v47 = vld [vmem:[#allocation11] ss:$0 sm:$0xff]  ;;  %p945_p7 = scmp.lt.s32.totalorder %s641_s13, %s641_s13 }
  0x75   :  { %734 = vmatpush3.bf16.msra.mxu0 %v797_v3  ;;  %715 = vmatprep.subr.bf16.mxu1 %v800_v9  ;;  %v143_v19 = vrot.slane %v127_v16, 1  ;;  %v370_v20 = vrot.slane %v127_v16, 3  ;;  %v449_v23 = vrot.slane %v124_v12, 4  ;;  %v450_v24 = vrot.slane %v120_v13, 4  ;;  %s940_s19 = scalar_lea.vmem %s641_s13, 512 }
  0x76   :  { %739 = vmatprep.subr.bf16.mxu0 %v801_v11  ;;  %v142_v25 = vsel %vm139_vm1, %v140_v14, %v141_v17  ;;  %v369_v26 = vsel %vm366_vm3, %v367_v15, %v368_v18  ;;  %v452_v32 = vrot.slane %v127_v16, 4  ;;  %v285_v33 = vrot.slane %v124_v12, 2  ;;  %p941_p6 = scmp.ne.s32.totalorder %s641_s13, %s940_s19  ;;  %p946_p8 = scmp.lt.s32.totalorder %s940_s19, %s940_s19 }
  0x77   :  { %v144_v27 = vsel %vm139_vm1, %v141_v17, %v143_v19  ;;  %v371_v28 = vsel %vm366_vm3, %v368_v18, %v370_v20  ;;  %711 = vmatprep.mubr.msk.bf16.mxu1 %vm157_vm2, %v142_v25  ;;  %735 = vmatprep.mubr.msk.bf16.mxu0 %vm157_vm2, %v369_v26  ;;  %v451_v29 = vsel %vm448_vm4, %v449_v23, %v450_v24  ;;  %v286_v34 = vrot.slane %v120_v13, 2 }
  0x78   :  { %712 = vmatmul.mubr.msk.bf16.vlgmr.msra.gmra.mrb[0].mxu1 %vm157_vm2, %v144_v27  ;;  %736 = vmatmul.mubr.msk.bf16.vlgmr.msra.gmra.mrb[0].mxu0 %vm157_vm2, %v371_v28  ;;  %v453_v35 = vsel %vm448_vm4, %v450_v24, %v452_v32  ;;  %v288_v39 = vrot.slane %v127_v16, 2  ;;  %p947_p9 = por %p946_p8, %p945_p7 }
  0x79   :  { %716 = vmatpush3.bf16.msra.mxu1 %v800_v9  ;;  %740 = vmatpush3.bf16.msra.mxu0 %v801_v11  ;;  %v287_v38 = vsel %vm284_vm5, %v285_v33, %v286_v34 }
  0x7a   :  { %717 = vmatprep.subr.bf16.mxu1 %v802_v21  ;;  %741 = vmatprep.subr.bf16.mxu0 %v803_v22  ;;  %v289_v40 = vsel %vm284_vm5, %v286_v34, %v288_v39  ;;  %p948_p10 = pnand %p947_p9, %p941_p6 }
  0x7b   :  { %719 = vmatprep.mubr.msk.bf16.mxu1 %vm157_vm2, %v124_v12  ;;  %743 = vmatprep.mubr.msk.bf16.mxu0 %vm157_vm2, %v451_v29 }
  0x7d   :  { %718 = vmatpush3.bf16.msra.mxu1 %v802_v21  ;;  %742 = vmatpush3.bf16.msra.mxu0 %v803_v22 }
  0x7e   :  { %723 = vmatprep.subr.bf16.mxu1 %v804_v30  ;;  %747 = vmatprep.subr.bf16.mxu0 %v805_v31 }
  0x84   :  { %720 = vmatmul.mubr.msk.bf16.vlgmr.msra.gmra.mrb[0].mxu1 %vm157_vm2, %v120_v13  ;;  %744 = vmatmul.mubr.msk.bf16.vlgmr.msra.gmra.mrb[0].mxu0 %vm157_vm2, %v453_v35 }
  0x85   :  { %724 = vmatpush3.bf16.msra.mxu1 %v804_v30  ;;  %748 = vmatpush3.bf16.msra.mxu0 %v805_v31 }
  0x86   :  { %725 = vmatprep.subr.bf16.mxu1 %v806_v36  ;;  %749 = vmatprep.subr.bf16.mxu0 %v807_v37 }
  0x87   :  { %727 = vmatprep.mubr.msk.bf16.mxu1 %vm157_vm2, %v287_v38  ;;  %751 = vmatprep.mubr.msk.bf16.mxu0 %vm157_vm2, %v1099_v5 }
  0x89   :  { %726 = vmatpush3.bf16.msra.mxu1 %v806_v36  ;;  %750 = vmatpush3.bf16.msra.mxu0 %v807_v37 }
  0x90   :  { %728 = vmatmul.mubr.msk.bf16.vlgmr.msra.gmra.mrb[0].mxu1 %vm157_vm2, %v289_v40  ;;  %752 = vmatmul.mubr.msk.bf16.vlgmr.msra.gmra.mrb[0].mxu0 %vm157_vm2, %v1101_v6 }
 0x163   :  { %v729_v42 = vpop.f32.mrb[0].mxu1  ;;  %v753_v43 = vpop.f32.mrb[0].mxu0 }
 0x164   :  { %v755_v44 = vadd.f32 %v729_v42, %v677_v41  ;;  %v342_v45 = vpop.f32.mrb[1].mxu1  ;;  %v599_v46 = vpop.f32.mrb[1].mxu0 }
 0x165   :  { %v758_v48 = vadd.f32 %v677_v41, %v342_v45  ;;  %v730_v49 = vpop.f32.mrb[2].mxu1  ;;  %v754_v50 = vpop.f32.mrb[2].mxu0 }
 0x166   :  { %v756_v51 = vadd.f32 %v755_v44, %v753_v43  ;;  %v761_v52 = vadd.f32 %v730_v49, %v677_v41  ;;  %v345_v53 = vpop.f32.mrb[3].mxu1  ;;  %v602_v54 = vpop.f32.mrb[3].mxu0 }
 0x167   :  { %v759_v55 = vadd.f32 %v758_v48, %v599_v46  ;;  %v764_v56 = vadd.f32 %v677_v41, %v345_v53 }
 0x168   :  { %v757_v57 = vadd.f32 %v756_v51, %v678_v47  ;;  %v762_v58 = vadd.f32 %v761_v52, %v678_v47 }
 0x169   :  { %v760_v59 = vadd.f32 %v759_v55, %v678_v47  ;;  %v765_v60 = vadd.f32 %v764_v56, %v678_v47 }
 0x16a   :  { %vm620_vm6 = vcmp.ge.f32.partialorder %v757_v57, 0.0  ;;  %v624_v61 = vmul.f32 0.2, %v757_v57  ;;  %v763_v62 = vadd.f32 %v762_v58, %v754_v50 }
 0x16b   :  { %vm618_vm8 = vcmp.ge.f32.partialorder %v760_v59, 0.0  ;;  %v622_v63 = vmul.f32 0.2, %v760_v59  ;;  %v766_v0 = vadd.f32 %v765_v60, %v602_v54 }
 0x16c   :  { %v628_v1 = vsel %vm620_vm6, %v757_v57, %v624_v61  ;;  %vm621_vm9 = vcmp.ge.f32.partialorder %v763_v62, 0.0  ;;  %v625_v2 = vmul.f32 0.2, %v763_v62 }
 0x16d   :  { %633 = vst.msk [vmem:[#allocation13 + $0x10] sm:$0xff] %vm630_vm7, %v628_v1  ;;  %v626_v3 = vsel %vm618_vm8, %v760_v59, %v622_v63  ;;  %vm619_vm10 = vcmp.ge.f32.partialorder %v766_v0, 0.0  ;;  %v623_v4 = vmul.f32 0.2, %v766_v0 }
 0x16e   :  { %631 = vst.msk [vmem:[#allocation13] sm:$0xff] %vm630_vm7, %v626_v3  ;;  %v629_v5 = vsel %vm621_vm9, %v763_v62, %v625_v2 }
 0x16f   :  { %634 = vst.msk [vmem:[#allocation13 + $0x18] sm:$0xff] %vm630_vm7, %v629_v5  ;;  %v627_v6 = vsel %vm619_vm10, %v766_v0, %v623_v4 }
 0x170   :  { %632 = vst.msk [vmem:[#allocation13 + $0x8] sm:$0xff] %vm630_vm7, %v627_v6 }
 0x171   :  { %951 = shalt.err (!%p948_p10)
}
 0x172   :  { %s952_s20 = scalar_lea.hbm %s1150_s6, 512 }
 0x173   :  { %p953_p11 = scmp.ne.s32.totalorder %s1150_s6, %s952_s20  ;;  %p956_p12 = scmp.lt.u32.totalorder %s952_s20, %s1150_s6 }
 0x175   :  { %p958_p13 = pnand %p956_p12, %p953_p11 }
 0x177   :  { %961 = shalt.err (!%p958_p13)
}
 0x178   :  { %s981_s26 = smov 128   ;;  %s982_s27 = smov 8  }
 0x179   :  { %646 = dma.vmem_to_hbm [thread:$0]  %s641_s13, 512, %s1150_s6, [#allocation4], %s981_s26, %s981_s26, %s982_s27  }
 0x17a   :  { %970 = dma.done.wait [#allocation4], 512  }
 0x17b   :  { %971 = vsyncadd [#allocation4], 4294966784 }
 0x17c   :  { %650 = vsyncpa [#allocation3], 1 }
 0x17d   :  { %651 = vsyncpa [#allocation6], 1 }
 0x17e   :  { %652 = vsyncpa [#allocation9], 1 }
 0x17f   :  { %653 = vsyncpa [#allocation12], 1 }
 0x180   :  { %654 = vsyncpa [#allocation4], 1 }

// kernel: audio2latent2_forward.29
= control target key start
LH: loop header
LB: loop body
LE: loop exit
PB: predicated region body
PF: predicated region fallthrough
CT: control target
= control target key end

     0   :  { %11 = vsyncpa [#allocation3], 0  ;;  %s1306_s0 = inlined_call_operand.hbm [shape: bf16[32,64], index: 0, kind: input, shape index: {}]   ;;  %s1307_s1 = inlined_call_operand.hbm [shape: bf16[1,8,64], index: 1, kind: input, shape index: {}]   ;;  %s1308_s2 = inlined_call_operand.hbm [shape: bf16[5,64,16], index: 2, kind: input, shape index: {}]   ;;  %s1309_s3 = inlined_call_operand.hbm [shape: f32[1,16], index: 3, kind: input, shape index: {}]   ;;  %s1310_s4 = inlined_call_operand.hbm [shape: bf16[64,16], index: 4, kind: input, shape index: {}]   ;;  %s1311_s5 = inlined_call_operand.hbm [shape: f32[1,16], index: 5, kind: input, shape index: {}]   ;;  %s1312_s6 = inlined_call_operand.hbm [shape: f32[32,16], index: 6, kind: output, shape index: {}]  }
   0x1   :  { %12 = vsyncpa [#allocation6], 0 }
   0x2   :  { %13 = vsyncpa [#allocation9], 0 }
   0x3   :  { %14 = vsyncpa [#allocation12], 0 }
   0x4   :  { %15 = vsyncpa [#allocation4], 0  ;;  %s1116_s21 = smov [#allocation5]   ;;  %s1117_s23 = smov [#allocation8]  }
   0x5   :  { %s34_s22 = sshll.u32 %s1116_s21, 4  ;;  %s56_s24 = sshll.u32 %s1117_s23, 4  ;;  %s35_s22 = int_to_ptr.vmem [resolvable:$true] %s34_s22  ;;  %s57_s24 = int_to_ptr.vmem [resolvable:$true] %s56_s24 }
   0x6   :  { %s952_s27 = scalar_lea.hbm %s1307_s1, 64 }
   0x7   :  { %p953_p0 = scmp.ne.s32.totalorder %s1307_s1, %s952_s27  ;;  %p956_p1 = scmp.lt.u32.totalorder %s952_s27, %s1307_s1 }
   0x9   :  { %p958_p2 = pnand %p956_p1, %p953_p0 }
   0xb   :  { %961 = shalt.err (!%p958_p2)
}
   0xc   :  { %s962_s8 = scalar_lea.vmem %s35_s22, 64  ;;  %p967_p4 = scmp.lt.s32.totalorder %s35_s22, %s35_s22 }
   0xd   :  { %p963_p3 = scmp.ne.s32.totalorder %s35_s22, %s962_s8  ;;  %p968_p5 = scmp.lt.s32.totalorder %s962_s8, %s962_s8 }
   0xf   :  { %p969_p6 = por %p968_p5, %p967_p4 }
  0x11   :  { %p970_p7 = pnand %p969_p6, %p963_p3 }
  0x13   :  { %973 = shalt.err (!%p970_p7)
}
  0x14   :  { %37 = dma.hbm_to_vmem [thread:$0]  %s1307_s1, 64, %s35_s22, [#allocation6]  }
  0x15   :  { %s974_s13 = scalar_lea.hbm %s1309_s3, 16 }
  0x16   :  { %p975_p8 = scmp.ne.s32.totalorder %s1309_s3, %s974_s13  ;;  %p978_p9 = scmp.lt.u32.totalorder %s974_s13, %s1309_s3 }
  0x18   :  { %p980_p10 = pnand %p978_p9, %p975_p8 }
  0x1a   :  { %983 = shalt.err (!%p980_p10)
}
  0x1b   :  { %s984_s18 = scalar_lea.vmem %s57_s24, 16  ;;  %s988_s19 = scalar_lea.vmem %s57_s24, 32 }
  0x1c   :  { %p985_p11 = scmp.ne.s32.totalorder %s57_s24, %s984_s18  ;;  %p989_p12 = scmp.lt.s32.totalorder %s57_s24, %s57_s24 }
  0x1d   :  { %p990_p13 = scmp.lt.s32.totalorder %s988_s19, %s984_s18 }
  0x1f   :  { %p991_p0 = por %p990_p13, %p989_p12 }
  0x21   :  { %p992_p1 = pnand %p991_p0, %p985_p11 }
  0x23   :  { %995 = shalt.err (!%p992_p1)
}
  0x24   :  { %59 = dma.hbm_to_vmem [thread:$0]  %s1309_s3, 16, %s57_s24, [#allocation9]  }
  0x25   :  { %s1118_s21 = smov [#allocation2]   ;;  %s996_s26 = scalar_lea.hbm %s1306_s0, 256 }
  0x26   :  { %s21_s22 = sshll.u32 %s1118_s21, 4  ;;  %p997_p2 = scmp.ne.s32.totalorder %s1306_s0, %s996_s26  ;;  %s22_s22 = int_to_ptr.vmem [resolvable:$true] %s21_s22 }
  0x27   :  { %p1000_p3 = scmp.lt.u32.totalorder %s996_s26, %s1306_s0 }
  0x29   :  { %p1002_p4 = pnand %p1000_p3, %p997_p2 }
  0x2b   :  { %1005 = shalt.err (!%p1002_p4)
}
  0x2c   :  { %s1006_s7 = scalar_lea.vmem %s22_s22, 256  ;;  %p1011_p6 = scmp.lt.s32.totalorder %s22_s22, %s22_s22 }
  0x2d   :  { %p1007_p5 = scmp.ne.s32.totalorder %s22_s22, %s1006_s7  ;;  %p1012_p7 = scmp.lt.s32.totalorder %s1006_s7, %s1006_s7 }
  0x2f   :  { %p1013_p8 = por %p1012_p7, %p1011_p6 }
  0x31   :  { %p1014_p9 = pnand %p1013_p8, %p1007_p5 }
  0x33   :  { %1017 = shalt.err (!%p1014_p9)
}
  0x34   :  { %s1119_s3 = smov 64   ;;  %s1120_s24 = smov 4  }
  0x35   :  { %27 = dma.hbm_to_vmem [thread:$0]  %s1306_s0, 256, %s22_s22, [#allocation3], %s1119_s3, %s1119_s3, %s1120_s24  }
  0x36   :  { %s1121_s10 = smov [#allocation7]   ;;  %s1122_s12 = smov [#allocation10]  }
  0x37   :  { %s43_s11 = sshll.u32 %s1121_s10, 4  ;;  %s65_s13 = sshll.u32 %s1122_s12, 4  ;;  %s44_s11 = int_to_ptr.vmem [resolvable:$true] %s43_s11  ;;  %s66_s13 = int_to_ptr.vmem [resolvable:$true] %s65_s13 }
  0x38   :  { %s1018_s16 = scalar_lea.hbm %s1308_s2, 2560 }
  0x39   :  { %p1019_p10 = scmp.ne.s32.totalorder %s1308_s2, %s1018_s16  ;;  %p1022_p11 = scmp.lt.u32.totalorder %s1018_s16, %s1308_s2 }
  0x3b   :  { %p1024_p12 = pnand %p1022_p11, %p1019_p10 }
  0x3d   :  { %1027 = shalt.err (!%p1024_p12)
}
  0x3e   :  { %s1028_s0 = scalar_lea.vmem %s44_s11, 2560  ;;  %p1033_p0 = scmp.lt.s32.totalorder %s44_s11, %s44_s11 }
  0x3f   :  { %p1029_p13 = scmp.ne.s32.totalorder %s44_s11, %s1028_s0  ;;  %p1034_p1 = scmp.lt.s32.totalorder %s1028_s0, %s1028_s0 }
  0x41   :  { %p1035_p2 = por %p1034_p1, %p1033_p0 }
  0x43   :  { %p1036_p3 = pnand %p1035_p2, %p1029_p13 }
  0x45   :  { %1039 = shalt.err (!%p1036_p3)
}
  0x46   :  { %49 = dma.hbm_to_vmem [thread:$0]  %s1308_s2, 2560, %s44_s11, [#allocation6], %s1119_s3, %s1119_s3, %s1120_s24  }
  0x47   :  { %s1040_s25 = scalar_lea.hbm %s1310_s4, 512 }
  0x48   :  { %p1041_p4 = scmp.ne.s32.totalorder %s1310_s4, %s1040_s25  ;;  %p1044_p5 = scmp.lt.u32.totalorder %s1040_s25, %s1310_s4 }
  0x4a   :  { %p1046_p6 = pnand %p1044_p5, %p1041_p4 }
  0x4c   :  { %1049 = shalt.err (!%p1046_p6)
}
  0x4d   :  { %s1050_s30 = scalar_lea.vmem %s66_s13, 512  ;;  %p1055_p8 = scmp.lt.s32.totalorder %s66_s13, %s66_s13 }
  0x4e   :  { %p1051_p7 = scmp.ne.s32.totalorder %s66_s13, %s1050_s30  ;;  %p1056_p9 = scmp.lt.s32.totalorder %s1050_s30, %s1050_s30 }
  0x50   :  { %p1057_p10 = por %p1056_p9, %p1055_p8 }
  0x52   :  { %p1058_p11 = pnand %p1057_p10, %p1051_p7 }
  0x54   :  { %1061 = shalt.err (!%p1058_p11)
}
  0x55   :  { %71 = dma.hbm_to_vmem [thread:$0]  %s1310_s4, 512, %s66_s13, [#allocation9], %s1119_s3, %s1119_s3, %s1120_s24  }
  0x56   :  { %s1123_s8 = smov [#allocation11]   ;;  %s1062_s12 = scalar_lea.hbm %s1311_s5, 16 }
  0x57   :  { %s78_s9 = sshll.u32 %s1123_s8, 4  ;;  %p1063_p12 = scmp.ne.s32.totalorder %s1311_s5, %s1062_s12  ;;  %s79_s9 = int_to_ptr.vmem [resolvable:$true] %s78_s9 }
  0x58   :  { %p1066_p13 = scmp.lt.u32.totalorder %s1062_s12, %s1311_s5 }
  0x5a   :  { %p1068_p0 = pnand %p1066_p13, %p1063_p12 }
  0x5c   :  { %1071 = shalt.err (!%p1068_p0)
}
  0x5d   :  { %s1072_s18 = scalar_lea.vmem %s79_s9, 16  ;;  %s1076_s4 = scalar_lea.vmem %s79_s9, 32 }
  0x5e   :  { %p1073_p1 = scmp.ne.s32.totalorder %s79_s9, %s1072_s18  ;;  %p1077_p2 = scmp.lt.s32.totalorder %s79_s9, %s79_s9 }
  0x5f   :  { %p1078_p3 = scmp.lt.s32.totalorder %s1076_s4, %s1072_s18 }
  0x61   :  { %p1079_p4 = por %p1078_p3, %p1077_p2 }
  0x63   :  { %p1080_p5 = pnand %p1079_p4, %p1073_p1 }
  0x65   :  { %1083 = shalt.err (!%p1080_p5)
}
  0x66   :  { %81 = dma.hbm_to_vmem [thread:$0]  %s1311_s5, 16, %s79_s9, [#allocation12]  }
  0x67   :  { %1106 = dma.done.wait [#allocation3], 256  }
  0x68   :  { %1107 = vsyncadd [#allocation3], 4294967040 }
  0x69   :  { %1108 = dma.done.wait [#allocation6], 2624  }
  0x6a   :  { %1109 = vsyncadd [#allocation6], 4294964672 }
  0x6b   :  { %1110 = dma.done.wait [#allocation9], 528  }
  0x6c   :  { %1111 = vsyncadd [#allocation9], 4294966768 }
  0x6d   :  { %1112 = dma.done.wait [#allocation12], 16  }
  0x6e   :  { %1113 = vsyncadd [#allocation12], 4294967280  ;;  %v926_v0 = vld [vmem:[#allocation7 + $0x20] sm:$0xff]   ;;  %v928_v2 = vld [vmem:[#allocation7 + $0x28] sm:$0xff]   ;;  %vm117_vm0 = vcmask 1041408   ;;  %vm147_vm1 = vcmask 1046528  }
  0x6f   :  { %v927_v1 = vld [vmem:[#allocation7 + $0x60] sm:$0xff]   ;;  %815 = vmatprep.subr.bf16.mxu1 %v926_v0  ;;  %v929_v3 = vld [vmem:[#allocation7 + $0x68] sm:$0xff]   ;;  %v930_v4 = vld [vmem:[#allocation7 + $0x30] sm:$0xff]   ;;  %vm177_vm2 = vcmask 523264   ;;  %vm418_vm3 = vcmask 1044480   ;;  %vm516_vm4 = vcmask 1043456  }
  0x70   :  { %851 = vmatprep.subr.bf16.mxu0 %v927_v1  ;;  %816 = vmatpush3.bf16.msra.mxu1 %v926_v0  ;;  %v931_v5 = vld [vmem:[#allocation7 + $0x70] sm:$0xff]   ;;  %v932_v6 = vld [vmem:[#allocation7 + $0x38] sm:$0xff]   ;;  %v936_v13 = vld [vmem:[#allocation7] sm:$0xff]   ;;  %vm320_vm5 = vcmask 1045504   ;;  %vm714_vm6 = vcmask 130048   ;;  %s1124_s5 = smov [#allocation13]  }
  0x71   :  { %852 = vmatpush3.bf16.msra.mxu0 %v927_v1  ;;  %817 = vmatprep.subr.bf16.mxu1 %v928_v2  ;;  %v933_v7 = vld [vmem:[#allocation7 + $0x78] sm:$0xff]   ;;  %v1243_v9 = vld [vmem:[#allocation2] sm:$0xff]   ;;  %v937_v16 = vld [vmem:[#allocation7 + $0x80] sm:$0xff]   ;;  %s724_s13 = sshll.u32 %s1124_s5, 4  ;;  %s725_s13 = int_to_ptr.vmem [resolvable:$true] %s724_s13 }
  0x72   :  { %853 = vmatprep.subr.bf16.mxu0 %v929_v3  ;;  %v105_v8 = vld [vmem:[#allocation5] sm:$0x3]  ;;  %v1245_v10 = vld [vmem:[#allocation2 + $0x8] sm:$0xff]   ;;  %v118_v11 = vrot.slane %v1243_v9, 6  ;;  %v106_v14 = vld [vmem:[#allocation5] sm:$0xc]  ;;  %p1089_p7 = scmp.lt.s32.totalorder %s725_s13, %s725_s13 }
  0x73   :  { %v119_v12 = vrot.slane %v1245_v10, 6  ;;  %v938_v25 = vld [vmem:[#allocation7 + $0x8] sm:$0xff]   ;;  %v940_v33 = vld [vmem:[#allocation7 + $0x10] sm:$0xff]   ;;  %v942_v36 = vld [vmem:[#allocation7 + $0x18] sm:$0xff]   ;;  %s1084_s19 = scalar_lea.vmem %s725_s13, 512 }
  0x74   :  { %818 = vmatpush3.bf16.msra.mxu1 %v928_v2  ;;  %v1250_v15 = vsel %vm117_vm0, %v105_v8, %v118_v11  ;;  %v939_v30 = vld [vmem:[#allocation7 + $0x88] sm:$0xff]   ;;  %v941_v34 = vld [vmem:[#allocation7 + $0x90] sm:$0xff]   ;;  %v943_v37 = vld [vmem:[#allocation7 + $0x98] sm:$0xff]   ;;  %p1085_p6 = scmp.ne.s32.totalorder %s725_s13, %s1084_s19  ;;  %p1090_p8 = scmp.lt.s32.totalorder %s1084_s19, %s1084_s19 }
  0x75   :  { %854 = vmatpush3.bf16.msra.mxu0 %v929_v3  ;;  %819 = vmatprep.subr.bf16.mxu1 %v930_v4  ;;  %v1253_v17 = vsel %vm117_vm0, %v118_v11, %v119_v12  ;;  %v148_v18 = vrot.slane %v1250_v15, 1  ;;  %v419_v19 = vrot.slane %v1250_v15, 3  ;;  %v1258_v20 = vsel %vm117_vm0, %v119_v12, %v106_v14  ;;  %v944_v39 = vld [vmem:[#allocation7 + $0x40] sm:$0xff]   ;;  %v946_v44 = vld [vmem:[#allocation7 + $0x48] sm:$0xff]   ;;  %v948_v47 = vld [vmem:[#allocation7 + $0x50] sm:$0xff]  }
  0x76   :  { %855 = vmatprep.subr.bf16.mxu0 %v931_v5  ;;  %v149_v21 = vrot.slane %v1253_v17, 1  ;;  %v420_v22 = vrot.slane %v1253_v17, 3  ;;  %v151_v23 = vrot.slane %v1258_v20, 1  ;;  %v422_v24 = vrot.slane %v1258_v20, 3  ;;  %v945_v40 = vld [vmem:[#allocation10] sm:$0xff]   ;;  %v947_v45 = vld [vmem:[#allocation10 + $0x8] sm:$0xff]   ;;  %p1091_p9 = por %p1090_p8, %p1089_p7 }
  0x77   :  { %v517_v31 = vrot.slane %v1250_v15, 4  ;;  %v518_v32 = vrot.slane %v1253_v17, 4  ;;  %v520_v38 = vrot.slane %v1258_v20, 4  ;;  %v321_v41 = vrot.slane %v1250_v15, 2  ;;  %v949_v48 = vld [vmem:[#allocation10 + $0x10] sm:$0xff]   ;;  %v951_v50 = vld [vmem:[#allocation10 + $0x18] sm:$0xff]  }
  0x78   :  { %820 = vmatpush3.bf16.msra.mxu1 %v930_v4  ;;  %v150_v26 = vsel %vm147_vm1, %v148_v18, %v149_v21  ;;  %v421_v27 = vsel %vm418_vm3, %v419_v19, %v420_v22  ;;  %v152_v28 = vsel %vm147_vm1, %v149_v21, %v151_v23  ;;  %v423_v29 = vsel %vm418_vm3, %v420_v22, %v422_v24  ;;  %v950_v49 = vld [vmem:[#allocation7 + $0x58] sm:$0xff]   ;;  %v771_v53 = vld [vmem:[#allocation8] ss:$0 sm:$0xff]  ;;  %v772_v59 = vld [vmem:[#allocation11] ss:$0 sm:$0xff]  ;;  %p1092_p10 = pnand %p1091_p9, %p1085_p6 }
  0x79   :  { %856 = vmatpush3.bf16.msra.mxu0 %v931_v5  ;;  %821 = vmatprep.subr.bf16.mxu1 %v932_v6  ;;  %v519_v35 = vsel %vm516_vm4, %v517_v31, %v518_v32  ;;  %v322_v42 = vrot.slane %v1253_v17, 2  ;;  %v521_v43 = vsel %vm516_vm4, %v518_v32, %v520_v38  ;;  %v324_v51 = vrot.slane %v1258_v20, 2 }
  0x7a   :  { %857 = vmatprep.subr.bf16.mxu0 %v933_v7  ;;  %823 = vmatprep.mubr.msk.bf16.mxu1 %vm177_vm2, %v150_v26 }
  0x7b   :  { %859 = vmatprep.mubr.msk.bf16.mxu0 %vm177_vm2, %v421_v27  ;;  %v323_v46 = vsel %vm320_vm5, %v321_v41, %v322_v42  ;;  %v325_v52 = vsel %vm320_vm5, %v322_v42, %v324_v51 }
  0x7c   :  { %822 = vmatpush3.bf16.msra.mxu1 %v932_v6 }
  0x7d   :  { %858 = vmatpush3.bf16.msra.mxu0 %v933_v7  ;;  %827 = vmatprep.subr.bf16.mxu1 %v936_v13 }
  0x7e   :  { %863 = vmatprep.subr.bf16.mxu0 %v937_v16 }
  0x7f   :  { %824 = vmatmul.mubr.msk.bf16.vlgmr.msra.gmra.mrb[0].mxu1 %vm177_vm2, %v152_v28 }
  0x80   :  { %860 = vmatmul.mubr.msk.bf16.vlgmr.msra.gmra.mrb[0].mxu0 %vm177_vm2, %v423_v29  ;;  %828 = vmatpush3.bf16.msra.mxu1 %v936_v13 }
  0x81   :  { %864 = vmatpush3.bf16.msra.mxu0 %v937_v16  ;;  %829 = vmatprep.subr.bf16.mxu1 %v938_v25 }
  0x82   :  { %865 = vmatprep.subr.bf16.mxu0 %v939_v30  ;;  %835 = vmatprep.mubr.msk.bf16.mxu1 %vm177_vm2, %v1250_v15 }
  0x83   :  { %871 = vmatprep.mubr.msk.bf16.mxu0 %vm177_vm2, %v519_v35 }
  0x84   :  { %830 = vmatpush3.bf16.msra.mxu1 %v938_v25 }
  0x85   :  { %866 = vmatpush3.bf16.msra.mxu0 %v939_v30  ;;  %831 = vmatprep.subr.bf16.mxu1 %v940_v33 }
  0x86   :  { %867 = vmatprep.subr.bf16.mxu0 %v941_v34 }
  0x88   :  { %832 = vmatpush3.bf16.msra.mxu1 %v940_v33 }
  0x89   :  { %868 = vmatpush3.bf16.msra.mxu0 %v941_v34  ;;  %833 = vmatprep.subr.bf16.mxu1 %v942_v36 }
  0x8a   :  { %869 = vmatprep.subr.bf16.mxu0 %v943_v37 }
  0x8c   :  { %834 = vmatpush3.bf16.msra.mxu1 %v942_v36 }
  0x8d   :  { %870 = vmatpush3.bf16.msra.mxu0 %v943_v37  ;;  %839 = vmatprep.subr.bf16.mxu1 %v944_v39 }
  0x8e   :  { %875 = vmatprep.subr.bf16.mxu0 %v945_v40 }
  0x8f   :  { %836 = vmatmul.mubr.msk.bf16.vlgmr.msra.gmra.mrb[0].mxu1 %vm177_vm2, %v1253_v17 }
  0x90   :  { %872 = vmatmul.mubr.msk.bf16.vlgmr.msra.gmra.mrb[0].mxu0 %vm177_vm2, %v521_v43  ;;  %840 = vmatpush3.bf16.msra.mxu1 %v944_v39 }
  0x91   :  { %876 = vmatpush3.bf16.msra.mxu0 %v945_v40  ;;  %841 = vmatprep.subr.bf16.mxu1 %v946_v44 }
  0x92   :  { %877 = vmatprep.subr.bf16.mxu0 %v947_v45  ;;  %847 = vmatprep.mubr.msk.bf16.mxu1 %vm177_vm2, %v323_v46 }
  0x93   :  { %883 = vmatprep.mubr.msk.bf16.mxu0 %vm177_vm2, %v1243_v9 }
  0x94   :  { %842 = vmatpush3.bf16.msra.mxu1 %v946_v44 }
  0x95   :  { %878 = vmatpush3.bf16.msra.mxu0 %v947_v45  ;;  %843 = vmatprep.subr.bf16.mxu1 %v948_v47 }
  0x96   :  { %879 = vmatprep.subr.bf16.mxu0 %v949_v48 }
  0x98   :  { %844 = vmatpush3.bf16.msra.mxu1 %v948_v47 }
  0x99   :  { %880 = vmatpush3.bf16.msra.mxu0 %v949_v48  ;;  %845 = vmatprep.subr.bf16.mxu1 %v950_v49 }
  0x9a   :  { %881 = vmatprep.subr.bf16.mxu0 %v951_v50 }
  0x9c   :  { %846 = vmatpush3.bf16.msra.mxu1 %v950_v49 }
  0x9d   :  { %882 = vmatpush3.bf16.msra.mxu0 %v951_v50 }
  0x9f   :  { %848 = vmatmul.mubr.msk.bf16.vlgmr.msra.gmra.mrb[0].mxu1 %vm177_vm2, %v325_v52 }
  0xa0   :  { %884 = vmatmul.mubr.msk.bf16.vlgmr.msra.gmra.mrb[0].mxu0 %vm177_vm2, %v1245_v10 }
 0x172   :  { %v849_v54 = vpop.f32.mrb[0].mxu1 }
 0x173   :  { %v885_v55 = vpop.f32.mrb[0].mxu0  ;;  %v887_v56 = vadd.f32 %v849_v54, %v771_v53  ;;  %v390_v57 = vpop.f32.mrb[1].mxu1 }
 0x174   :  { %v695_v58 = vpop.f32.mrb[1].mxu0  ;;  %v890_v60 = vadd.f32 %v771_v53, %v390_v57  ;;  %v850_v61 = vpop.f32.mrb[2].mxu1 }
 0x175   :  { %v886_v62 = vpop.f32.mrb[2].mxu0  ;;  %v888_v63 = vadd.f32 %v887_v56, %v885_v55  ;;  %v893_v0 = vadd.f32 %v850_v61, %v771_v53  ;;  %v393_v1 = vpop.f32.mrb[3].mxu1 }
 0x176   :  { %v698_v2 = vpop.f32.mrb[3].mxu0  ;;  %v891_v3 = vadd.f32 %v890_v60, %v695_v58  ;;  %v896_v4 = vadd.f32 %v771_v53, %v393_v1 }
 0x177   :  { %v889_v5 = vadd.f32 %v888_v63, %v772_v59  ;;  %v894_v6 = vadd.f32 %v893_v0, %v772_v59 }
 0x178   :  { %v892_v7 = vadd.f32 %v891_v3, %v772_v59  ;;  %v897_v8 = vadd.f32 %v896_v4, %v772_v59 }
 0x179   :  { %717 = vst.msk [vmem:[#allocation13 + $0x10] sm:$0xff] %vm714_vm6, %v889_v5  ;;  %v895_v9 = vadd.f32 %v894_v6, %v886_v62 }
 0x17a   :  { %715 = vst.msk [vmem:[#allocation13] sm:$0xff] %vm714_vm6, %v892_v7  ;;  %v898_v10 = vadd.f32 %v897_v8, %v698_v2 }
 0x17b   :  { %718 = vst.msk [vmem:[#allocation13 + $0x18] sm:$0xff] %vm714_vm6, %v895_v9 }
 0x17c   :  { %716 = vst.msk [vmem:[#allocation13 + $0x8] sm:$0xff] %vm714_vm6, %v898_v10 }
 0x17d   :  { %1095 = shalt.err (!%p1092_p10)
}
 0x17e   :  { %s1096_s20 = scalar_lea.hbm %s1312_s6, 512 }
 0x17f   :  { %p1097_p11 = scmp.ne.s32.totalorder %s1312_s6, %s1096_s20  ;;  %p1100_p12 = scmp.lt.u32.totalorder %s1096_s20, %s1312_s6 }
 0x181   :  { %p1102_p13 = pnand %p1100_p12, %p1097_p11 }
 0x183   :  { %1105 = shalt.err (!%p1102_p13)
}
 0x184   :  { %s1125_s26 = smov 128   ;;  %s1126_s27 = smov 8  }
 0x185   :  { %730 = dma.vmem_to_hbm [thread:$0]  %s725_s13, 512, %s1312_s6, [#allocation4], %s1125_s26, %s1125_s26, %s1126_s27  }
 0x186   :  { %1114 = dma.done.wait [#allocation4], 512  }
 0x187   :  { %1115 = vsyncadd [#allocation4], 4294966784 }
 0x188   :  { %734 = vsyncpa [#allocation3], 1 }
 0x189   :  { %735 = vsyncpa [#allocation6], 1 }
 0x18a   :  { %736 = vsyncpa [#allocation9], 1 }
 0x18b   :  { %737 = vsyncpa [#allocation12], 1 }
 0x18c   :  { %738 = vsyncpa [#allocation4], 1 }

</bundles_post_ra>
